<compile_context>
chip_gen: v7x
topology: tpu7x:2x2x1
jax: 0.10.0
libtpu: 0.0.40
codegen_flags: <defaults>
</compile_context>

<pallas_src>
import math
import functools

import jax
import jax.numpy as jnp
from jax.experimental import pallas as pl
from jax.experimental.pallas import tpu as pltpu

BN_EPS = 1e-5
LRELU_SLOPE = 0.2
KSIZE = 4
PAD = 1

# ------------------------- model configuration (small) ----------------------
IN_CHANNELS = 4
HIDDEN_CHANNELS = 32
N_LAYERS = 3
# 32x32 is the smallest spatial size that keeps every layer's output non-empty
# (three stride-2 4x4 convs + two stride-1 4x4 convs, all with padding 1).
INPUT_SHAPE = (2, IN_CHANNELS, 32, 32)          # NCHW, as in PyTorch


def _round_up(x, m):
    return (x + m - 1) // m * m


def _layer_configs(in_channels, hidden, n_layers):
    cfgs = [dict(cin=in_channels, cout=hidden, stride=2,
                 conv_bias=True, bn=False, slope=LRELU_SLOPE)]
    r = 1
    for i in range(1, n_layers + 1):
        prev_r, r = r, min(2 ** i, 8)
        cfgs.append(dict(cin=prev_r * hidden, cout=r * hidden,
                         stride=2 if i != n_layers else 1,
                         conv_bias=False, bn=True, slope=LRELU_SLOPE))
    cfgs.append(dict(cin=r * hidden, cout=1, stride=1,
                     conv_bias=True, bn=False, slope=None))
    return tuple(cfgs)


CFGS = _layer_configs(IN_CHANNELS, HIDDEN_CHANNELS, N_LAYERS)


# ------------------------------ Pallas kernel --------------------------------
def _conv_bias_lrelu_kernel(ph_ref, w_ref, b_ref, o_ref, *,
                            taps, hout, wout, w_ext, slope):
    """Fused 4x4 conv + (folded-BN) bias + optional LeakyReLU, one image.

    ph_ref : (1, P, Hs, Ws, Cin)  padded / phase-split input, f32
    w_ref  : (16, Cin, Cout)      bf16, tap-major, BN scale pre-folded
    b_ref  : (1, Cout)            f32
    o_ref  : (1, hout, wout, Cout) f32
    """
    cin = ph_ref.shape[-1]
    cout = w_ref.shape[-1]
    m = hout * w_ext
    acc = jnp.zeros((m, cout), jnp.float32)
    # 16 shifted sub-window matmuls accumulated in f32 (MXU, bf16 operands).
    for t, (p, i0, j0) in enumerate(taps):
        patch = ph_ref[0, p, i0:i0 + hout, j0:j0 + w_ext, :]    # (hout,w_ext,cin)
        rows = patch.reshape(m, cin).astype(jnp.bfloat16)       # aligned collapse
        acc = acc + jnp.dot(rows, w_ref[t],
                            preferred_element_type=jnp.float32)
    y = acc + b_ref[...]                                        # f32 epilogue
    if slope is not None:
        y = jnp.maximum(y, slope * y)                           # LeakyReLU(0.2)
    y = y.reshape(hout, w_ext, cout)[:, :wout, :]               # drop pad cols
    o_ref[0] = y.astype(o_ref.dtype)


# ------------------------------ kernel wrapper --------------------------------
def conv_block(x, w16, b, *, stride, slope):
    """x: (N, H, W, Cin) f32 NHWC -> (N, Hout, Wout, Cout) f32."""
    N, H, W, cin = x.shape
    cout = w16.shape[-1]
    hout = (H + 2 * PAD - KSIZE) // stride + 1
    wout = (W + 2 * PAD - KSIZE) // stride + 1
    assert hout > 0 and wout > 0, "input too small for this conv stack"

    xp = jnp.pad(x, ((0, 0), (PAD, PAD), (PAD, PAD), (0, 0)))
    if stride == 2:
        assert (H + 2 * PAD) % 2 == 0 and (W + 2 * PAD) % 2 == 0
        hs, ws = (H + 2 * PAD) // 2, (W + 2 * PAD) // 2
        # space-to-depth phase split: ph[n, 2a+b, r, c] == xp[n, 2r+a, 2c+b]
        ph = xp.reshape(N, hs, 2, ws, 2, cin)
        ph = ph.transpose(0, 2, 4, 1, 3, 5).reshape(N, 4, hs, ws, cin)
        taps = tuple(((kh % 2) * 2 + (kw % 2), kh // 2, kw // 2)
                     for kh in range(KSIZE) for kw in range(KSIZE))
        nphase, j0_max = 4, (KSIZE - 1) // 2
    else:
        hs, ws = H + 2 * PAD, W + 2 * PAD
        ph = xp.reshape(N, 1, hs, ws, cin)
        taps = tuple((0, kh, kw) for kh in range(KSIZE) for kw in range(KSIZE))
        nphase, j0_max = 1, KSIZE - 1

    # pad the window axis so the per-tap extraction width is a multiple of 8
    # (keeps all in-kernel reshapes sublane-aligned); extra columns are sliced
    # off again inside the kernel before the store.
    w_ext = _round_up(wout, 8)
    ws_pad = max(ws, j0_max + w_ext)
    if ws_pad > ws:
        ph = jnp.pad(ph, ((0, 0), (0, 0), (0, 0), (0, ws_pad - ws), (0, 0)))

    kernel = functools.partial(_conv_bias_lrelu_kernel, taps=taps,
                               hout=hout, wout=wout, w_ext=w_ext, slope=slope)
    return pl.pallas_call(
        kernel,
        out_shape=jax.ShapeDtypeStruct((N, hout, wout, cout), jnp.float32),
        grid=(N,),
        in_specs=[
            pl.BlockSpec((1, nphase, hs, ws_pad, cin),
                         lambda n: (n, 0, 0, 0, 0)),
            pl.BlockSpec((KSIZE * KSIZE, cin, cout), lambda n: (0, 0, 0)),
            pl.BlockSpec((1, cout), lambda n: (0, 0)),
        ],
        out_specs=pl.BlockSpec((1, hout, wout, cout), lambda n: (n, 0, 0, 0)),
        compiler_params=pltpu.CompilerParams(
            dimension_semantics=("parallel",)),
    )(ph, w16, b)


# ------------------------------ parameter init --------------------------------
def build_params(key, cfgs):
    params = []
    for cfg in cfgs:
        cin, cout = cfg['cin'], cfg['cout']
        fan_in = cin * KSIZE * KSIZE
        bound = 1.0 / math.sqrt(fan_in)          # PyTorch kaiming_uniform(a=sqrt(5))
        key, kw, kb = jax.random.split(key, 3)
        w = jax.random.uniform(kw, (KSIZE, KSIZE, cin, cout), jnp.float32,
                               -bound, bound)
        if cfg['conv_bias']:
            cb = jax.random.uniform(kb, (cout,), jnp.float32, -bound, bound)
        else:
            cb = jnp.zeros((cout,), jnp.float32)
        if cfg['bn']:
            # eval-mode fold with init values gamma=1, beta=0, mean=0, var=1
            gamma = jnp.ones((cout,), jnp.float32)
            beta = jnp.zeros((cout,), jnp.float32)
            mean = jnp.zeros((cout,), jnp.float32)
            var = jnp.ones((cout,), jnp.float32)
            scale = gamma * jax.lax.rsqrt(var + BN_EPS)
            w = w * scale                        # fold BN scale into the weights
            b = beta + (cb - mean) * scale
        else:
            b = cb
        params.append(dict(
            w=w.reshape(KSIZE * KSIZE, cin, cout).astype(jnp.bfloat16),
            w_f32=w,                             # f32 copy for the reference check
            b=b.reshape(1, cout).astype(jnp.float32)))
    return params


# -------------------------------- forward pass --------------------------------
def discriminator_forward(params, x_nchw):
    x = jnp.transpose(x_nchw, (0, 2, 3, 1)).astype(jnp.float32)   # NCHW -> NHWC
    for cfg, p in zip(CFGS, params):
        x = conv_block(x, p['w'], p['b'], stride=cfg['stride'], slope=cfg['slope'])
    return jnp.transpose(x, (0, 3, 1, 2))                          # back to NCHW


def reference_forward(params, x_nchw):
    """Pure-XLA f32 reference (same folded parameters)."""
    x = jnp.transpose(x_nchw, (0, 2, 3, 1)).astype(jnp.float32)
    for cfg, p in zip(CFGS, params):
        y = jax.lax.conv_general_dilated(
            x, p['w_f32'], window_strides=(cfg['stride'], cfg['stride']),
            padding=((PAD, PAD), (PAD, PAD)),
            dimension_numbers=('NHWC', 'HWIO', 'NHWC'))
        y = y + p['b'].reshape(1, 1, 1, -1)
        if cfg['slope'] is not None:
            y = jnp.where(y >= 0, y, cfg['slope'] * y)
        x = y
    return jnp.transpose(x, (0, 3, 1, 2))


# ------------------------------------ main -------------------------------------
if __name__ == "__main__":
    root = jax.random.PRNGKey(0)
    kparam, kx = jax.random.split(root)
    params = build_params(kparam, CFGS)
    x = jax.random.normal(kx, INPUT_SHAPE, jnp.float32)            # NCHW input

    fwd = jax.jit(discriminator_forward)
    out = jax.block_until_ready(fwd(params, x))

    # expected output spatial size
    exp_hw = INPUT_SHAPE[2]
    for cfg in CFGS:
        exp_hw = (exp_hw + 2 * PAD - KSIZE) // cfg['stride'] + 1
    assert out.shape == (INPUT_SHAPE[0], 1, exp_hw, exp_hw), out.shape
    assert bool(jnp.all(jnp.isfinite(out)))

    # correctness check vs. XLA reference (bf16 matmul => loose tolerance)
    ref = jax.block_until_ready(reference_forward(params, x))
    err = float(jnp.max(jnp.abs(out - ref)))
    tol = 5e-2 * max(1.0, float(jnp.max(jnp.abs(ref))))
    assert err <= tol, (err, tol)

    print("KERNEL_OK")
</pallas_src>

<mosaic_0001>
module attributes {stable_mosaic.version = 11 : i64} {
  func.func @_conv_bias_lrelu_kernel(%arg0: i32, %arg1: memref<1x4x17x17x4xf32, #tpu.memory_space<vmem>>, %arg2: memref<16x4x32xbf16, #tpu.memory_space<vmem>>, %arg3: memref<1x32xf32, #tpu.memory_space<vmem>>, %arg4: memref<1x16x16x32xf32, #tpu.memory_space<vmem>>) attributes {dimension_semantics = [#tpu.dimension_semantics<parallel>], iteration_bounds = array<i64: 2>, scalar_prefetch = 0 : i64, scratch_operands = 0 : i64, tpu.core_type = #tpu.core_type<tc>, window_params = [{transform_indices = @transform_0, window_bounds = array<i64: 1, 4, 17, 17, 4>}, {pipeline_mode = #tpu.pipeline_mode<synchronous>, transform_indices = @transform_1, window_bounds = array<i64: 16, 4, 32>}, {pipeline_mode = #tpu.pipeline_mode<synchronous>, transform_indices = @transform_2, window_bounds = array<i64: 1, 32>}, {transform_indices = @transform_3, window_bounds = array<i64: 1, 16, 16, 32>}]} {
    %cst = arith.constant 0.000000e+00 : f32
    %0 = vector.broadcast %cst : f32 to vector<256x32xf32>
    %c0 = arith.constant 0 : index
    %c0_0 = arith.constant 0 : index
    %c0_1 = arith.constant 0 : index
    %c0_2 = arith.constant 0 : index
    %c0_3 = arith.constant 0 : index
    %1 = vector.load %arg1[%c0, %c0_0, %c0_1, %c0_2, %c0_3] : memref<1x4x17x17x4xf32, #tpu.memory_space<vmem>>, vector<1x1x16x16x4xf32>
    %2 = vector.shape_cast %1 : vector<1x1x16x16x4xf32> to vector<16x16x4xf32>
    %3 = vector.shape_cast %2 : vector<16x16x4xf32> to vector<256x4xf32>
    %4 = arith.truncf %3 : vector<256x4xf32> to vector<256x4xbf16>
    %c0_4 = arith.constant 0 : index
    %c0_5 = arith.constant 0 : index
    %c0_6 = arith.constant 0 : index
    %5 = vector.load %arg2[%c0_4, %c0_5, %c0_6] : memref<16x4x32xbf16, #tpu.memory_space<vmem>>, vector<1x4x32xbf16>
    %6 = vector.shape_cast %5 : vector<1x4x32xbf16> to vector<4x32xbf16>
    %cst_7 = arith.constant dense<0.000000e+00> : vector<256x32xf32>
    %7 = tpu.matmul %4, %6, %cst_7 {dimension_numbers = #tpu.dot_dimension_numbers<[1], [0], [0], [1], [0, 0, 1, 1], [], []>} : vector<256x4xbf16>, vector<4x32xbf16>, vector<256x32xf32> -> vector<256x32xf32>
    %8 = arith.addf %0, %7 : vector<256x32xf32>
    %c0_8 = arith.constant 0 : index
    %c1 = arith.constant 1 : index
    %c0_9 = arith.constant 0 : index
    %c0_10 = arith.constant 0 : index
    %c0_11 = arith.constant 0 : index
    %9 = vector.load %arg1[%c0_8, %c1, %c0_9, %c0_10, %c0_11] : memref<1x4x17x17x4xf32, #tpu.memory_space<vmem>>, vector<1x1x16x16x4xf32>
    %10 = vector.shape_cast %9 : vector<1x1x16x16x4xf32> to vector<16x16x4xf32>
    %11 = vector.shape_cast %10 : vector<16x16x4xf32> to vector<256x4xf32>
    %12 = arith.truncf %11 : vector<256x4xf32> to vector<256x4xbf16>
    %c1_12 = arith.constant 1 : index
    %c0_13 = arith.constant 0 : index
    %c0_14 = arith.constant 0 : index
    %13 = vector.load %arg2[%c1_12, %c0_13, %c0_14] : memref<16x4x32xbf16, #tpu.memory_space<vmem>>, vector<1x4x32xbf16>
    %14 = vector.shape_cast %13 : vector<1x4x32xbf16> to vector<4x32xbf16>
    %cst_15 = arith.constant dense<0.000000e+00> : vector<256x32xf32>
    %15 = tpu.matmul %12, %14, %cst_15 {dimension_numbers = #tpu.dot_dimension_numbers<[1], [0], [0], [1], [0, 0, 1, 1], [], []>} : vector<256x4xbf16>, vector<4x32xbf16>, vector<256x32xf32> -> vector<256x32xf32>
    %16 = arith.addf %8, %15 : vector<256x32xf32>
    %c0_16 = arith.constant 0 : index
    %c0_17 = arith.constant 0 : index
    %c0_18 = arith.constant 0 : index
    %c1_19 = arith.constant 1 : index
    %c0_20 = arith.constant 0 : index
    %17 = vector.load %arg1[%c0_16, %c0_17, %c0_18, %c1_19, %c0_20] : memref<1x4x17x17x4xf32, #tpu.memory_space<vmem>>, vector<1x1x16x16x4xf32>
    %18 = vector.shape_cast %17 : vector<1x1x16x16x4xf32> to vector<16x16x4xf32>
    %19 = vector.shape_cast %18 : vector<16x16x4xf32> to vector<256x4xf32>
    %20 = arith.truncf %19 : vector<256x4xf32> to vector<256x4xbf16>
    %c2 = arith.constant 2 : index
    %c0_21 = arith.constant 0 : index
    %c0_22 = arith.constant 0 : index
    %21 = vector.load %arg2[%c2, %c0_21, %c0_22] : memref<16x4x32xbf16, #tpu.memory_space<vmem>>, vector<1x4x32xbf16>
    %22 = vector.shape_cast %21 : vector<1x4x32xbf16> to vector<4x32xbf16>
    %cst_23 = arith.constant dense<0.000000e+00> : vector<256x32xf32>
    %23 = tpu.matmul %20, %22, %cst_23 {dimension_numbers = #tpu.dot_dimension_numbers<[1], [0], [0], [1], [0, 0, 1, 1], [], []>} : vector<256x4xbf16>, vector<4x32xbf16>, vector<256x32xf32> -> vector<256x32xf32>
    %24 = arith.addf %16, %23 : vector<256x32xf32>
    %c0_24 = arith.constant 0 : index
    %c1_25 = arith.constant 1 : index
    %c0_26 = arith.constant 0 : index
    %c1_27 = arith.constant 1 : index
    %c0_28 = arith.constant 0 : index
    %25 = vector.load %arg1[%c0_24, %c1_25, %c0_26, %c1_27, %c0_28] : memref<1x4x17x17x4xf32, #tpu.memory_space<vmem>>, vector<1x1x16x16x4xf32>
    %26 = vector.shape_cast %25 : vector<1x1x16x16x4xf32> to vector<16x16x4xf32>
    %27 = vector.shape_cast %26 : vector<16x16x4xf32> to vector<256x4xf32>
    %28 = arith.truncf %27 : vector<256x4xf32> to vector<256x4xbf16>
    %c3 = arith.constant 3 : index
    %c0_29 = arith.constant 0 : index
    %c0_30 = arith.constant 0 : index
    %29 = vector.load %arg2[%c3, %c0_29, %c0_30] : memref<16x4x32xbf16, #tpu.memory_space<vmem>>, vector<1x4x32xbf16>
    %30 = vector.shape_cast %29 : vector<1x4x32xbf16> to vector<4x32xbf16>
    %cst_31 = arith.constant dense<0.000000e+00> : vector<256x32xf32>
    %31 = tpu.matmul %28, %30, %cst_31 {dimension_numbers = #tpu.dot_dimension_numbers<[1], [0], [0], [1], [0, 0, 1, 1], [], []>} : vector<256x4xbf16>, vector<4x32xbf16>, vector<256x32xf32> -> vector<256x32xf32>
    %32 = arith.addf %24, %31 : vector<256x32xf32>
    %c0_32 = arith.constant 0 : index
    %c2_33 = arith.constant 2 : index
    %c0_34 = arith.constant 0 : index
    %c0_35 = arith.constant 0 : index
    %c0_36 = arith.constant 0 : index
    %33 = vector.load %arg1[%c0_32, %c2_33, %c0_34, %c0_35, %c0_36] : memref<1x4x17x17x4xf32, #tpu.memory_space<vmem>>, vector<1x1x16x16x4xf32>
    %34 = vector.shape_cast %33 : vector<1x1x16x16x4xf32> to vector<16x16x4xf32>
    %35 = vector.shape_cast %34 : vector<16x16x4xf32> to vector<256x4xf32>
    %36 = arith.truncf %35 : vector<256x4xf32> to vector<256x4xbf16>
    %c4 = arith.constant 4 : index
    %c0_37 = arith.constant 0 : index
    %c0_38 = arith.constant 0 : index
    %37 = vector.load %arg2[%c4, %c0_37, %c0_38] : memref<16x4x32xbf16, #tpu.memory_space<vmem>>, vector<1x4x32xbf16>
    %38 = vector.shape_cast %37 : vector<1x4x32xbf16> to vector<4x32xbf16>
    %cst_39 = arith.constant dense<0.000000e+00> : vector<256x32xf32>
    %39 = tpu.matmul %36, %38, %cst_39 {dimension_numbers = #tpu.dot_dimension_numbers<[1], [0], [0], [1], [0, 0, 1, 1], [], []>} : vector<256x4xbf16>, vector<4x32xbf16>, vector<256x32xf32> -> vector<256x32xf32>
    %40 = arith.addf %32, %39 : vector<256x32xf32>
    %c0_40 = arith.constant 0 : index
    %c3_41 = arith.constant 3 : index
    %c0_42 = arith.constant 0 : index
    %c0_43 = arith.constant 0 : index
    %c0_44 = arith.constant 0 : index
    %41 = vector.load %arg1[%c0_40, %c3_41, %c0_42, %c0_43, %c0_44] : memref<1x4x17x17x4xf32, #tpu.memory_space<vmem>>, vector<1x1x16x16x4xf32>
    %42 = vector.shape_cast %41 : vector<1x1x16x16x4xf32> to vector<16x16x4xf32>
    %43 = vector.shape_cast %42 : vector<16x16x4xf32> to vector<256x4xf32>
    %44 = arith.truncf %43 : vector<256x4xf32> to vector<256x4xbf16>
    %c5 = arith.constant 5 : index
    %c0_45 = arith.constant 0 : index
    %c0_46 = arith.constant 0 : index
    %45 = vector.load %arg2[%c5, %c0_45, %c0_46] : memref<16x4x32xbf16, #tpu.memory_space<vmem>>, vector<1x4x32xbf16>
    %46 = vector.shape_cast %45 : vector<1x4x32xbf16> to vector<4x32xbf16>
    %cst_47 = arith.constant dense<0.000000e+00> : vector<256x32xf32>
    %47 = tpu.matmul %44, %46, %cst_47 {dimension_numbers = #tpu.dot_dimension_numbers<[1], [0], [0], [1], [0, 0, 1, 1], [], []>} : vector<256x4xbf16>, vector<4x32xbf16>, vector<256x32xf32> -> vector<256x32xf32>
    %48 = arith.addf %40, %47 : vector<256x32xf32>
    %c0_48 = arith.constant 0 : index
    %c2_49 = arith.constant 2 : index
    %c0_50 = arith.constant 0 : index
    %c1_51 = arith.constant 1 : index
    %c0_52 = arith.constant 0 : index
    %49 = vector.load %arg1[%c0_48, %c2_49, %c0_50, %c1_51, %c0_52] : memref<1x4x17x17x4xf32, #tpu.memory_space<vmem>>, vector<1x1x16x16x4xf32>
    %50 = vector.shape_cast %49 : vector<1x1x16x16x4xf32> to vector<16x16x4xf32>
    %51 = vector.shape_cast %50 : vector<16x16x4xf32> to vector<256x4xf32>
    %52 = arith.truncf %51 : vector<256x4xf32> to vector<256x4xbf16>
    %c6 = arith.constant 6 : index
    %c0_53 = arith.constant 0 : index
    %c0_54 = arith.constant 0 : index
    %53 = vector.load %arg2[%c6, %c0_53, %c0_54] : memref<16x4x32xbf16, #tpu.memory_space<vmem>>, vector<1x4x32xbf16>
    %54 = vector.shape_cast %53 : vector<1x4x32xbf16> to vector<4x32xbf16>
    %cst_55 = arith.constant dense<0.000000e+00> : vector<256x32xf32>
    %55 = tpu.matmul %52, %54, %cst_55 {dimension_numbers = #tpu.dot_dimension_numbers<[1], [0], [0], [1], [0, 0, 1, 1], [], []>} : vector<256x4xbf16>, vector<4x32xbf16>, vector<256x32xf32> -> vector<256x32xf32>
    %56 = arith.addf %48, %55 : vector<256x32xf32>
    %c0_56 = arith.constant 0 : index
    %c3_57 = arith.constant 3 : index
    %c0_58 = arith.constant 0 : index
    %c1_59 = arith.constant 1 : index
    %c0_60 = arith.constant 0 : index
    %57 = vector.load %arg1[%c0_56, %c3_57, %c0_58, %c1_59, %c0_60] : memref<1x4x17x17x4xf32, #tpu.memory_space<vmem>>, vector<1x1x16x16x4xf32>
    %58 = vector.shape_cast %57 : vector<1x1x16x16x4xf32> to vector<16x16x4xf32>
    %59 = vector.shape_cast %58 : vector<16x16x4xf32> to vector<256x4xf32>
    %60 = arith.truncf %59 : vector<256x4xf32> to vector<256x4xbf16>
    %c7 = arith.constant 7 : index
    %c0_61 = arith.constant 0 : index
    %c0_62 = arith.constant 0 : index
    %61 = vector.load %arg2[%c7, %c0_61, %c0_62] : memref<16x4x32xbf16, #tpu.memory_space<vmem>>, vector<1x4x32xbf16>
    %62 = vector.shape_cast %61 : vector<1x4x32xbf16> to vector<4x32xbf16>
    %cst_63 = arith.constant dense<0.000000e+00> : vector<256x32xf32>
    %63 = tpu.matmul %60, %62, %cst_63 {dimension_numbers = #tpu.dot_dimension_numbers<[1], [0], [0], [1], [0, 0, 1, 1], [], []>} : vector<256x4xbf16>, vector<4x32xbf16>, vector<256x32xf32> -> vector<256x32xf32>
    %64 = arith.addf %56, %63 : vector<256x32xf32>
    %c0_64 = arith.constant 0 : index
    %c0_65 = arith.constant 0 : index
    %c1_66 = arith.constant 1 : index
    %c0_67 = arith.constant 0 : index
    %c0_68 = arith.constant 0 : index
    %65 = vector.load %arg1[%c0_64, %c0_65, %c1_66, %c0_67, %c0_68] : memref<1x4x17x17x4xf32, #tpu.memory_space<vmem>>, vector<1x1x16x16x4xf32>
    %66 = vector.shape_cast %65 : vector<1x1x16x16x4xf32> to vector<16x16x4xf32>
    %67 = vector.shape_cast %66 : vector<16x16x4xf32> to vector<256x4xf32>
    %68 = arith.truncf %67 : vector<256x4xf32> to vector<256x4xbf16>
    %c8 = arith.constant 8 : index
    %c0_69 = arith.constant 0 : index
    %c0_70 = arith.constant 0 : index
    %69 = vector.load %arg2[%c8, %c0_69, %c0_70] : memref<16x4x32xbf16, #tpu.memory_space<vmem>>, vector<1x4x32xbf16>
    %70 = vector.shape_cast %69 : vector<1x4x32xbf16> to vector<4x32xbf16>
    %cst_71 = arith.constant dense<0.000000e+00> : vector<256x32xf32>
    %71 = tpu.matmul %68, %70, %cst_71 {dimension_numbers = #tpu.dot_dimension_numbers<[1], [0], [0], [1], [0, 0, 1, 1], [], []>} : vector<256x4xbf16>, vector<4x32xbf16>, vector<256x32xf32> -> vector<256x32xf32>
    %72 = arith.addf %64, %71 : vector<256x32xf32>
    %c0_72 = arith.constant 0 : index
    %c1_73 = arith.constant 1 : index
    %c1_74 = arith.constant 1 : index
    %c0_75 = arith.constant 0 : index
    %c0_76 = arith.constant 0 : index
    %73 = vector.load %arg1[%c0_72, %c1_73, %c1_74, %c0_75, %c0_76] : memref<1x4x17x17x4xf32, #tpu.memory_space<vmem>>, vector<1x1x16x16x4xf32>
    %74 = vector.shape_cast %73 : vector<1x1x16x16x4xf32> to vector<16x16x4xf32>
    %75 = vector.shape_cast %74 : vector<16x16x4xf32> to vector<256x4xf32>
    %76 = arith.truncf %75 : vector<256x4xf32> to vector<256x4xbf16>
    %c9 = arith.constant 9 : index
    %c0_77 = arith.constant 0 : index
    %c0_78 = arith.constant 0 : index
    %77 = vector.load %arg2[%c9, %c0_77, %c0_78] : memref<16x4x32xbf16, #tpu.memory_space<vmem>>, vector<1x4x32xbf16>
    %78 = vector.shape_cast %77 : vector<1x4x32xbf16> to vector<4x32xbf16>
    %cst_79 = arith.constant dense<0.000000e+00> : vector<256x32xf32>
    %79 = tpu.matmul %76, %78, %cst_79 {dimension_numbers = #tpu.dot_dimension_numbers<[1], [0], [0], [1], [0, 0, 1, 1], [], []>} : vector<256x4xbf16>, vector<4x32xbf16>, vector<256x32xf32> -> vector<256x32xf32>
    %80 = arith.addf %72, %79 : vector<256x32xf32>
    %c0_80 = arith.constant 0 : index
    %c0_81 = arith.constant 0 : index
    %c1_82 = arith.constant 1 : index
    %c1_83 = arith.constant 1 : index
    %c0_84 = arith.constant 0 : index
    %81 = vector.load %arg1[%c0_80, %c0_81, %c1_82, %c1_83, %c0_84] : memref<1x4x17x17x4xf32, #tpu.memory_space<vmem>>, vector<1x1x16x16x4xf32>
    %82 = vector.shape_cast %81 : vector<1x1x16x16x4xf32> to vector<16x16x4xf32>
    %83 = vector.shape_cast %82 : vector<16x16x4xf32> to vector<256x4xf32>
    %84 = arith.truncf %83 : vector<256x4xf32> to vector<256x4xbf16>
    %c10 = arith.constant 10 : index
    %c0_85 = arith.constant 0 : index
    %c0_86 = arith.constant 0 : index
    %85 = vector.load %arg2[%c10, %c0_85, %c0_86] : memref<16x4x32xbf16, #tpu.memory_space<vmem>>, vector<1x4x32xbf16>
    %86 = vector.shape_cast %85 : vector<1x4x32xbf16> to vector<4x32xbf16>
    %cst_87 = arith.constant dense<0.000000e+00> : vector<256x32xf32>
    %87 = tpu.matmul %84, %86, %cst_87 {dimension_numbers = #tpu.dot_dimension_numbers<[1], [0], [0], [1], [0, 0, 1, 1], [], []>} : vector<256x4xbf16>, vector<4x32xbf16>, vector<256x32xf32> -> vector<256x32xf32>
    %88 = arith.addf %80, %87 : vector<256x32xf32>
    %c0_88 = arith.constant 0 : index
    %c1_89 = arith.constant 1 : index
    %c1_90 = arith.constant 1 : index
    %c1_91 = arith.constant 1 : index
    %c0_92 = arith.constant 0 : index
    %89 = vector.load %arg1[%c0_88, %c1_89, %c1_90, %c1_91, %c0_92] : memref<1x4x17x17x4xf32, #tpu.memory_space<vmem>>, vector<1x1x16x16x4xf32>
    %90 = vector.shape_cast %89 : vector<1x1x16x16x4xf32> to vector<16x16x4xf32>
    %91 = vector.shape_cast %90 : vector<16x16x4xf32> to vector<256x4xf32>
    %92 = arith.truncf %91 : vector<256x4xf32> to vector<256x4xbf16>
    %c11 = arith.constant 11 : index
    %c0_93 = arith.constant 0 : index
    %c0_94 = arith.constant 0 : index
    %93 = vector.load %arg2[%c11, %c0_93, %c0_94] : memref<16x4x32xbf16, #tpu.memory_space<vmem>>, vector<1x4x32xbf16>
    %94 = vector.shape_cast %93 : vector<1x4x32xbf16> to vector<4x32xbf16>
    %cst_95 = arith.constant dense<0.000000e+00> : vector<256x32xf32>
    %95 = tpu.matmul %92, %94, %cst_95 {dimension_numbers = #tpu.dot_dimension_numbers<[1], [0], [0], [1], [0, 0, 1, 1], [], []>} : vector<256x4xbf16>, vector<4x32xbf16>, vector<256x32xf32> -> vector<256x32xf32>
    %96 = arith.addf %88, %95 : vector<256x32xf32>
    %c0_96 = arith.constant 0 : index
    %c2_97 = arith.constant 2 : index
    %c1_98 = arith.constant 1 : index
    %c0_99 = arith.constant 0 : index
    %c0_100 = arith.constant 0 : index
    %97 = vector.load %arg1[%c0_96, %c2_97, %c1_98, %c0_99, %c0_100] : memref<1x4x17x17x4xf32, #tpu.memory_space<vmem>>, vector<1x1x16x16x4xf32>
    %98 = vector.shape_cast %97 : vector<1x1x16x16x4xf32> to vector<16x16x4xf32>
    %99 = vector.shape_cast %98 : vector<16x16x4xf32> to vector<256x4xf32>
    %100 = arith.truncf %99 : vector<256x4xf32> to vector<256x4xbf16>
    %c12 = arith.constant 12 : index
    %c0_101 = arith.constant 0 : index
    %c0_102 = arith.constant 0 : index
    %101 = vector.load %arg2[%c12, %c0_101, %c0_102] : memref<16x4x32xbf16, #tpu.memory_space<vmem>>, vector<1x4x32xbf16>
    %102 = vector.shape_cast %101 : vector<1x4x32xbf16> to vector<4x32xbf16>
    %cst_103 = arith.constant dense<0.000000e+00> : vector<256x32xf32>
    %103 = tpu.matmul %100, %102, %cst_103 {dimension_numbers = #tpu.dot_dimension_numbers<[1], [0], [0], [1], [0, 0, 1, 1], [], []>} : vector<256x4xbf16>, vector<4x32xbf16>, vector<256x32xf32> -> vector<256x32xf32>
    %104 = arith.addf %96, %103 : vector<256x32xf32>
    %c0_104 = arith.constant 0 : index
    %c3_105 = arith.constant 3 : index
    %c1_106 = arith.constant 1 : index
    %c0_107 = arith.constant 0 : index
    %c0_108 = arith.constant 0 : index
    %105 = vector.load %arg1[%c0_104, %c3_105, %c1_106, %c0_107, %c0_108] : memref<1x4x17x17x4xf32, #tpu.memory_space<vmem>>, vector<1x1x16x16x4xf32>
    %106 = vector.shape_cast %105 : vector<1x1x16x16x4xf32> to vector<16x16x4xf32>
    %107 = vector.shape_cast %106 : vector<16x16x4xf32> to vector<256x4xf32>
    %108 = arith.truncf %107 : vector<256x4xf32> to vector<256x4xbf16>
    %c13 = arith.constant 13 : index
    %c0_109 = arith.constant 0 : index
    %c0_110 = arith.constant 0 : index
    %109 = vector.load %arg2[%c13, %c0_109, %c0_110] : memref<16x4x32xbf16, #tpu.memory_space<vmem>>, vector<1x4x32xbf16>
    %110 = vector.shape_cast %109 : vector<1x4x32xbf16> to vector<4x32xbf16>
    %cst_111 = arith.constant dense<0.000000e+00> : vector<256x32xf32>
    %111 = tpu.matmul %108, %110, %cst_111 {dimension_numbers = #tpu.dot_dimension_numbers<[1], [0], [0], [1], [0, 0, 1, 1], [], []>} : vector<256x4xbf16>, vector<4x32xbf16>, vector<256x32xf32> -> vector<256x32xf32>
    %112 = arith.addf %104, %111 : vector<256x32xf32>
    %c0_112 = arith.constant 0 : index
    %c2_113 = arith.constant 2 : index
    %c1_114 = arith.constant 1 : index
    %c1_115 = arith.constant 1 : index
    %c0_116 = arith.constant 0 : index
    %113 = vector.load %arg1[%c0_112, %c2_113, %c1_114, %c1_115, %c0_116] : memref<1x4x17x17x4xf32, #tpu.memory_space<vmem>>, vector<1x1x16x16x4xf32>
    %114 = vector.shape_cast %113 : vector<1x1x16x16x4xf32> to vector<16x16x4xf32>
    %115 = vector.shape_cast %114 : vector<16x16x4xf32> to vector<256x4xf32>
    %116 = arith.truncf %115 : vector<256x4xf32> to vector<256x4xbf16>
    %c14 = arith.constant 14 : index
    %c0_117 = arith.constant 0 : index
    %c0_118 = arith.constant 0 : index
    %117 = vector.load %arg2[%c14, %c0_117, %c0_118] : memref<16x4x32xbf16, #tpu.memory_space<vmem>>, vector<1x4x32xbf16>
    %118 = vector.shape_cast %117 : vector<1x4x32xbf16> to vector<4x32xbf16>
    %cst_119 = arith.constant dense<0.000000e+00> : vector<256x32xf32>
    %119 = tpu.matmul %116, %118, %cst_119 {dimension_numbers = #tpu.dot_dimension_numbers<[1], [0], [0], [1], [0, 0, 1, 1], [], []>} : vector<256x4xbf16>, vector<4x32xbf16>, vector<256x32xf32> -> vector<256x32xf32>
    %120 = arith.addf %112, %119 : vector<256x32xf32>
    %c0_120 = arith.constant 0 : index
    %c3_121 = arith.constant 3 : index
    %c1_122 = arith.constant 1 : index
    %c1_123 = arith.constant 1 : index
    %c0_124 = arith.constant 0 : index
    %121 = vector.load %arg1[%c0_120, %c3_121, %c1_122, %c1_123, %c0_124] : memref<1x4x17x17x4xf32, #tpu.memory_space<vmem>>, vector<1x1x16x16x4xf32>
    %122 = vector.shape_cast %121 : vector<1x1x16x16x4xf32> to vector<16x16x4xf32>
    %123 = vector.shape_cast %122 : vector<16x16x4xf32> to vector<256x4xf32>
    %124 = arith.truncf %123 : vector<256x4xf32> to vector<256x4xbf16>
    %c15 = arith.constant 15 : index
    %c0_125 = arith.constant 0 : index
    %c0_126 = arith.constant 0 : index
    %125 = vector.load %arg2[%c15, %c0_125, %c0_126] : memref<16x4x32xbf16, #tpu.memory_space<vmem>>, vector<1x4x32xbf16>
    %126 = vector.shape_cast %125 : vector<1x4x32xbf16> to vector<4x32xbf16>
    %cst_127 = arith.constant dense<0.000000e+00> : vector<256x32xf32>
    %127 = tpu.matmul %124, %126, %cst_127 {dimension_numbers = #tpu.dot_dimension_numbers<[1], [0], [0], [1], [0, 0, 1, 1], [], []>} : vector<256x4xbf16>, vector<4x32xbf16>, vector<256x32xf32> -> vector<256x32xf32>
    %128 = arith.addf %120, %127 : vector<256x32xf32>
    %c0_128 = arith.constant 0 : index
    %c0_129 = arith.constant 0 : index
    %129 = vector.load %arg3[%c0_128, %c0_129] : memref<1x32xf32, #tpu.memory_space<vmem>>, vector<1x32xf32>
    %130 = vector.broadcast %129 : vector<1x32xf32> to vector<256x32xf32>
    %131 = arith.addf %128, %130 : vector<256x32xf32>
    %cst_130 = arith.constant 2.000000e-01 : f32
    %132 = vector.broadcast %cst_130 : f32 to vector<256x32xf32>
    %133 = arith.mulf %132, %131 : vector<256x32xf32>
    %134 = arith.maximumf %131, %133 : vector<256x32xf32>
    %135 = vector.shape_cast %134 : vector<256x32xf32> to vector<16x16x32xf32>
    %c0_131 = arith.constant 0 : index
    %c0_132 = arith.constant 0 : index
    %c0_133 = arith.constant 0 : index
    %c0_134 = arith.constant 0 : index
    %136 = vector.load %arg4[%c0_131, %c0_132, %c0_133, %c0_134] : memref<1x16x16x32xf32, #tpu.memory_space<vmem>>, vector<1x16x16x32xf32>
    %137 = vector.shape_cast %136 : vector<1x16x16x32xf32> to vector<16x16x32xf32>
    %138 = vector.shape_cast %135 : vector<16x16x32xf32> to vector<1x16x16x32xf32>
    tpu.vector_store %arg4[%c0_131, %c0_132, %c0_133, %c0_134], %138 {strides = array<i32>} : memref<1x16x16x32xf32, #tpu.memory_space<vmem>>, vector<1x16x16x32xf32>,
    return
  }
  func.func @transform_0(%arg0: i32) -> (i32, i32, i32, i32, i32) {
    %c0_i32 = arith.constant 0 : i32
    %c0_i32_0 = arith.constant 0 : i32
    %c0_i32_1 = arith.constant 0 : i32
    %c0_i32_2 = arith.constant 0 : i32
    %c0_i32_3 = arith.constant 0 : i32
    return %arg0, %c0_i32, %c0_i32_0, %c0_i32_1, %c0_i32_2 : i32, i32, i32, i32, i32
  }
  func.func @transform_1(%arg0: i32) -> (i32, i32, i32) {
    %c0_i32 = arith.constant 0 : i32
    %c0_i32_0 = arith.constant 0 : i32
    %c0_i32_1 = arith.constant 0 : i32
    %c0_i32_2 = arith.constant 0 : i32
    return %c0_i32, %c0_i32_0, %c0_i32_1 : i32, i32, i32
  }
  func.func @transform_2(%arg0: i32) -> (i32, i32) {
    %c0_i32 = arith.constant 0 : i32
    %c0_i32_0 = arith.constant 0 : i32
    %c0_i32_1 = arith.constant 0 : i32
    return %c0_i32, %c0_i32_0 : i32, i32
  }
  func.func @transform_3(%arg0: i32) -> (i32, i32, i32, i32) {
    %c0_i32 = arith.constant 0 : i32
    %c0_i32_0 = arith.constant 0 : i32
    %c0_i32_1 = arith.constant 0 : i32
    %c0_i32_2 = arith.constant 0 : i32
    return %arg0, %c0_i32, %c0_i32_0, %c0_i32_1 : i32, i32, i32, i32
  }
}

module attributes {stable_mosaic.version = 11 : i64} {
  func.func @_conv_bias_lrelu_kernel(%arg0: i32, %arg1: memref<1x4x9x9x32xf32, #tpu.memory_space<vmem>>, %arg2: memref<16x32x64xbf16, #tpu.memory_space<vmem>>, %arg3: memref<1x64xf32, #tpu.memory_space<vmem>>, %arg4: memref<1x8x8x64xf32, #tpu.memory_space<vmem>>) attributes {dimension_semantics = [#tpu.dimension_semantics<parallel>], iteration_bounds = array<i64: 2>, scalar_prefetch = 0 : i64, scratch_operands = 0 : i64, tpu.core_type = #tpu.core_type<tc>, window_params = [{transform_indices = @transform_0, window_bounds = array<i64: 1, 4, 9, 9, 32>}, {pipeline_mode = #tpu.pipeline_mode<synchronous>, transform_indices = @transform_1, window_bounds = array<i64: 16, 32, 64>}, {pipeline_mode = #tpu.pipeline_mode<synchronous>, transform_indices = @transform_2, window_bounds = array<i64: 1, 64>}, {transform_indices = @transform_3, window_bounds = array<i64: 1, 8, 8, 64>}]} {
    %cst = arith.constant 0.000000e+00 : f32
    %0 = vector.broadcast %cst : f32 to vector<64x64xf32>
    %c0 = arith.constant 0 : index
    %c0_0 = arith.constant 0 : index
    %c0_1 = arith.constant 0 : index
    %c0_2 = arith.constant 0 : index
    %c0_3 = arith.constant 0 : index
    %1 = vector.load %arg1[%c0, %c0_0, %c0_1, %c0_2, %c0_3] : memref<1x4x9x9x32xf32, #tpu.memory_space<vmem>>, vector<1x1x8x8x32xf32>
    %2 = vector.shape_cast %1 : vector<1x1x8x8x32xf32> to vector<8x8x32xf32>
    %3 = vector.shape_cast %2 : vector<8x8x32xf32> to vector<64x32xf32>
    %4 = arith.truncf %3 : vector<64x32xf32> to vector<64x32xbf16>
    %c0_4 = arith.constant 0 : index
    %c0_5 = arith.constant 0 : index
    %c0_6 = arith.constant 0 : index
    %5 = vector.load %arg2[%c0_4, %c0_5, %c0_6] : memref<16x32x64xbf16, #tpu.memory_space<vmem>>, vector<1x32x64xbf16>
    %6 = vector.shape_cast %5 : vector<1x32x64xbf16> to vector<32x64xbf16>
    %cst_7 = arith.constant dense<0.000000e+00> : vector<64x64xf32>
    %7 = tpu.matmul %4, %6, %cst_7 {dimension_numbers = #tpu.dot_dimension_numbers<[1], [0], [0], [1], [0, 0, 1, 1], [], []>} : vector<64x32xbf16>, vector<32x64xbf16>, vector<64x64xf32> -> vector<64x64xf32>
    %8 = arith.addf %0, %7 : vector<64x64xf32>
    %c0_8 = arith.constant 0 : index
    %c1 = arith.constant 1 : index
    %c0_9 = arith.constant 0 : index
    %c0_10 = arith.constant 0 : index
    %c0_11 = arith.constant 0 : index
    %9 = vector.load %arg1[%c0_8, %c1, %c0_9, %c0_10, %c0_11] : memref<1x4x9x9x32xf32, #tpu.memory_space<vmem>>, vector<1x1x8x8x32xf32>
    %10 = vector.shape_cast %9 : vector<1x1x8x8x32xf32> to vector<8x8x32xf32>
    %11 = vector.shape_cast %10 : vector<8x8x32xf32> to vector<64x32xf32>
    %12 = arith.truncf %11 : vector<64x32xf32> to vector<64x32xbf16>
    %c1_12 = arith.constant 1 : index
    %c0_13 = arith.constant 0 : index
    %c0_14 = arith.constant 0 : index
    %13 = vector.load %arg2[%c1_12, %c0_13, %c0_14] : memref<16x32x64xbf16, #tpu.memory_space<vmem>>, vector<1x32x64xbf16>
    %14 = vector.shape_cast %13 : vector<1x32x64xbf16> to vector<32x64xbf16>
    %cst_15 = arith.constant dense<0.000000e+00> : vector<64x64xf32>
    %15 = tpu.matmul %12, %14, %cst_15 {dimension_numbers = #tpu.dot_dimension_numbers<[1], [0], [0], [1], [0, 0, 1, 1], [], []>} : vector<64x32xbf16>, vector<32x64xbf16>, vector<64x64xf32> -> vector<64x64xf32>
    %16 = arith.addf %8, %15 : vector<64x64xf32>
    %c0_16 = arith.constant 0 : index
    %c0_17 = arith.constant 0 : index
    %c0_18 = arith.constant 0 : index
    %c1_19 = arith.constant 1 : index
    %c0_20 = arith.constant 0 : index
    %17 = vector.load %arg1[%c0_16, %c0_17, %c0_18, %c1_19, %c0_20] : memref<1x4x9x9x32xf32, #tpu.memory_space<vmem>>, vector<1x1x8x8x32xf32>
    %18 = vector.shape_cast %17 : vector<1x1x8x8x32xf32> to vector<8x8x32xf32>
    %19 = vector.shape_cast %18 : vector<8x8x32xf32> to vector<64x32xf32>
    %20 = arith.truncf %19 : vector<64x32xf32> to vector<64x32xbf16>
    %c2 = arith.constant 2 : index
    %c0_21 = arith.constant 0 : index
    %c0_22 = arith.constant 0 : index
    %21 = vector.load %arg2[%c2, %c0_21, %c0_22] : memref<16x32x64xbf16, #tpu.memory_space<vmem>>, vector<1x32x64xbf16>
    %22 = vector.shape_cast %21 : vector<1x32x64xbf16> to vector<32x64xbf16>
    %cst_23 = arith.constant dense<0.000000e+00> : vector<64x64xf32>
    %23 = tpu.matmul %20, %22, %cst_23 {dimension_numbers = #tpu.dot_dimension_numbers<[1], [0], [0], [1], [0, 0, 1, 1], [], []>} : vector<64x32xbf16>, vector<32x64xbf16>, vector<64x64xf32> -> vector<64x64xf32>
    %24 = arith.addf %16, %23 : vector<64x64xf32>
    %c0_24 = arith.constant 0 : index
    %c1_25 = arith.constant 1 : index
    %c0_26 = arith.constant 0 : index
    %c1_27 = arith.constant 1 : index
    %c0_28 = arith.constant 0 : index
    %25 = vector.load %arg1[%c0_24, %c1_25, %c0_26, %c1_27, %c0_28] : memref<1x4x9x9x32xf32, #tpu.memory_space<vmem>>, vector<1x1x8x8x32xf32>
    %26 = vector.shape_cast %25 : vector<1x1x8x8x32xf32> to vector<8x8x32xf32>
    %27 = vector.shape_cast %26 : vector<8x8x32xf32> to vector<64x32xf32>
    %28 = arith.truncf %27 : vector<64x32xf32> to vector<64x32xbf16>
    %c3 = arith.constant 3 : index
    %c0_29 = arith.constant 0 : index
    %c0_30 = arith.constant 0 : index
    %29 = vector.load %arg2[%c3, %c0_29, %c0_30] : memref<16x32x64xbf16, #tpu.memory_space<vmem>>, vector<1x32x64xbf16>
    %30 = vector.shape_cast %29 : vector<1x32x64xbf16> to vector<32x64xbf16>
    %cst_31 = arith.constant dense<0.000000e+00> : vector<64x64xf32>
    %31 = tpu.matmul %28, %30, %cst_31 {dimension_numbers = #tpu.dot_dimension_numbers<[1], [0], [0], [1], [0, 0, 1, 1], [], []>} : vector<64x32xbf16>, vector<32x64xbf16>, vector<64x64xf32> -> vector<64x64xf32>
    %32 = arith.addf %24, %31 : vector<64x64xf32>
    %c0_32 = arith.constant 0 : index
    %c2_33 = arith.constant 2 : index
    %c0_34 = arith.constant 0 : index
    %c0_35 = arith.constant 0 : index
    %c0_36 = arith.constant 0 : index
    %33 = vector.load %arg1[%c0_32, %c2_33, %c0_34, %c0_35, %c0_36] : memref<1x4x9x9x32xf32, #tpu.memory_space<vmem>>, vector<1x1x8x8x32xf32>
    %34 = vector.shape_cast %33 : vector<1x1x8x8x32xf32> to vector<8x8x32xf32>
    %35 = vector.shape_cast %34 : vector<8x8x32xf32> to vector<64x32xf32>
    %36 = arith.truncf %35 : vector<64x32xf32> to vector<64x32xbf16>
    %c4 = arith.constant 4 : index
    %c0_37 = arith.constant 0 : index
    %c0_38 = arith.constant 0 : index
    %37 = vector.load %arg2[%c4, %c0_37, %c0_38] : memref<16x32x64xbf16, #tpu.memory_space<vmem>>, vector<1x32x64xbf16>
    %38 = vector.shape_cast %37 : vector<1x32x64xbf16> to vector<32x64xbf16>
    %cst_39 = arith.constant dense<0.000000e+00> : vector<64x64xf32>
    %39 = tpu.matmul %36, %38, %cst_39 {dimension_numbers = #tpu.dot_dimension_numbers<[1], [0], [0], [1], [0, 0, 1, 1], [], []>} : vector<64x32xbf16>, vector<32x64xbf16>, vector<64x64xf32> -> vector<64x64xf32>
    %40 = arith.addf %32, %39 : vector<64x64xf32>
    %c0_40 = arith.constant 0 : index
    %c3_41 = arith.constant 3 : index
    %c0_42 = arith.constant 0 : index
    %c0_43 = arith.constant 0 : index
    %c0_44 = arith.constant 0 : index
    %41 = vector.load %arg1[%c0_40, %c3_41, %c0_42, %c0_43, %c0_44] : memref<1x4x9x9x32xf32, #tpu.memory_space<vmem>>, vector<1x1x8x8x32xf32>
    %42 = vector.shape_cast %41 : vector<1x1x8x8x32xf32> to vector<8x8x32xf32>
    %43 = vector.shape_cast %42 : vector<8x8x32xf32> to vector<64x32xf32>
    %44 = arith.truncf %43 : vector<64x32xf32> to vector<64x32xbf16>
    %c5 = arith.constant 5 : index
    %c0_45 = arith.constant 0 : index
    %c0_46 = arith.constant 0 : index
    %45 = vector.load %arg2[%c5, %c0_45, %c0_46] : memref<16x32x64xbf16, #tpu.memory_space<vmem>>, vector<1x32x64xbf16>
    %46 = vector.shape_cast %45 : vector<1x32x64xbf16> to vector<32x64xbf16>
    %cst_47 = arith.constant dense<0.000000e+00> : vector<64x64xf32>
    %47 = tpu.matmul %44, %46, %cst_47 {dimension_numbers = #tpu.dot_dimension_numbers<[1], [0], [0], [1], [0, 0, 1, 1], [], []>} : vector<64x32xbf16>, vector<32x64xbf16>, vector<64x64xf32> -> vector<64x64xf32>
    %48 = arith.addf %40, %47 : vector<64x64xf32>
    %c0_48 = arith.constant 0 : index
    %c2_49 = arith.constant 2 : index
    %c0_50 = arith.constant 0 : index
    %c1_51 = arith.constant 1 : index
    %c0_52 = arith.constant 0 : index
    %49 = vector.load %arg1[%c0_48, %c2_49, %c0_50, %c1_51, %c0_52] : memref<1x4x9x9x32xf32, #tpu.memory_space<vmem>>, vector<1x1x8x8x32xf32>
    %50 = vector.shape_cast %49 : vector<1x1x8x8x32xf32> to vector<8x8x32xf32>
    %51 = vector.shape_cast %50 : vector<8x8x32xf32> to vector<64x32xf32>
    %52 = arith.truncf %51 : vector<64x32xf32> to vector<64x32xbf16>
    %c6 = arith.constant 6 : index
    %c0_53 = arith.constant 0 : index
    %c0_54 = arith.constant 0 : index
    %53 = vector.load %arg2[%c6, %c0_53, %c0_54] : memref<16x32x64xbf16, #tpu.memory_space<vmem>>, vector<1x32x64xbf16>
    %54 = vector.shape_cast %53 : vector<1x32x64xbf16> to vector<32x64xbf16>
    %cst_55 = arith.constant dense<0.000000e+00> : vector<64x64xf32>
    %55 = tpu.matmul %52, %54, %cst_55 {dimension_numbers = #tpu.dot_dimension_numbers<[1], [0], [0], [1], [0, 0, 1, 1], [], []>} : vector<64x32xbf16>, vector<32x64xbf16>, vector<64x64xf32> -> vector<64x64xf32>
    %56 = arith.addf %48, %55 : vector<64x64xf32>
    %c0_56 = arith.constant 0 : index
    %c3_57 = arith.constant 3 : index
    %c0_58 = arith.constant 0 : index
    %c1_59 = arith.constant 1 : index
    %c0_60 = arith.constant 0 : index
    %57 = vector.load %arg1[%c0_56, %c3_57, %c0_58, %c1_59, %c0_60] : memref<1x4x9x9x32xf32, #tpu.memory_space<vmem>>, vector<1x1x8x8x32xf32>
    %58 = vector.shape_cast %57 : vector<1x1x8x8x32xf32> to vector<8x8x32xf32>
    %59 = vector.shape_cast %58 : vector<8x8x32xf32> to vector<64x32xf32>
    %60 = arith.truncf %59 : vector<64x32xf32> to vector<64x32xbf16>
    %c7 = arith.constant 7 : index
    %c0_61 = arith.constant 0 : index
    %c0_62 = arith.constant 0 : index
    %61 = vector.load %arg2[%c7, %c0_61, %c0_62] : memref<16x32x64xbf16, #tpu.memory_space<vmem>>, vector<1x32x64xbf16>
    %62 = vector.shape_cast %61 : vector<1x32x64xbf16> to vector<32x64xbf16>
    %cst_63 = arith.constant dense<0.000000e+00> : vector<64x64xf32>
    %63 = tpu.matmul %60, %62, %cst_63 {dimension_numbers = #tpu.dot_dimension_numbers<[1], [0], [0], [1], [0, 0, 1, 1], [], []>} : vector<64x32xbf16>, vector<32x64xbf16>, vector<64x64xf32> -> vector<64x64xf32>
    %64 = arith.addf %56, %63 : vector<64x64xf32>
    %c0_64 = arith.constant 0 : index
    %c0_65 = arith.constant 0 : index
    %c1_66 = arith.constant 1 : index
    %c0_67 = arith.constant 0 : index
    %c0_68 = arith.constant 0 : index
    %65 = vector.load %arg1[%c0_64, %c0_65, %c1_66, %c0_67, %c0_68] : memref<1x4x9x9x32xf32, #tpu.memory_space<vmem>>, vector<1x1x8x8x32xf32>
    %66 = vector.shape_cast %65 : vector<1x1x8x8x32xf32> to vector<8x8x32xf32>
    %67 = vector.shape_cast %66 : vector<8x8x32xf32> to vector<64x32xf32>
    %68 = arith.truncf %67 : vector<64x32xf32> to vector<64x32xbf16>
    %c8 = arith.constant 8 : index
    %c0_69 = arith.constant 0 : index
    %c0_70 = arith.constant 0 : index
    %69 = vector.load %arg2[%c8, %c0_69, %c0_70] : memref<16x32x64xbf16, #tpu.memory_space<vmem>>, vector<1x32x64xbf16>
    %70 = vector.shape_cast %69 : vector<1x32x64xbf16> to vector<32x64xbf16>
    %cst_71 = arith.constant dense<0.000000e+00> : vector<64x64xf32>
    %71 = tpu.matmul %68, %70, %cst_71 {dimension_numbers = #tpu.dot_dimension_numbers<[1], [0], [0], [1], [0, 0, 1, 1], [], []>} : vector<64x32xbf16>, vector<32x64xbf16>, vector<64x64xf32> -> vector<64x64xf32>
    %72 = arith.addf %64, %71 : vector<64x64xf32>
    %c0_72 = arith.constant 0 : index
    %c1_73 = arith.constant 1 : index
    %c1_74 = arith.constant 1 : index
    %c0_75 = arith.constant 0 : index
    %c0_76 = arith.constant 0 : index
    %73 = vector.load %arg1[%c0_72, %c1_73, %c1_74, %c0_75, %c0_76] : memref<1x4x9x9x32xf32, #tpu.memory_space<vmem>>, vector<1x1x8x8x32xf32>
    %74 = vector.shape_cast %73 : vector<1x1x8x8x32xf32> to vector<8x8x32xf32>
    %75 = vector.shape_cast %74 : vector<8x8x32xf32> to vector<64x32xf32>
    %76 = arith.truncf %75 : vector<64x32xf32> to vector<64x32xbf16>
    %c9 = arith.constant 9 : index
    %c0_77 = arith.constant 0 : index
    %c0_78 = arith.constant 0 : index
    %77 = vector.load %arg2[%c9, %c0_77, %c0_78] : memref<16x32x64xbf16, #tpu.memory_space<vmem>>, vector<1x32x64xbf16>
    %78 = vector.shape_cast %77 : vector<1x32x64xbf16> to vector<32x64xbf16>
    %cst_79 = arith.constant dense<0.000000e+00> : vector<64x64xf32>
    %79 = tpu.matmul %76, %78, %cst_79 {dimension_numbers = #tpu.dot_dimension_numbers<[1], [0], [0], [1], [0, 0, 1, 1], [], []>} : vector<64x32xbf16>, vector<32x64xbf16>, vector<64x64xf32> -> vector<64x64xf32>
    %80 = arith.addf %72, %79 : vector<64x64xf32>
    %c0_80 = arith.constant 0 : index
    %c0_81 = arith.constant 0 : index
    %c1_82 = arith.constant 1 : index
    %c1_83 = arith.constant 1 : index
    %c0_84 = arith.constant 0 : index
    %81 = vector.load %arg1[%c0_80, %c0_81, %c1_82, %c1_83, %c0_84] : memref<1x4x9x9x32xf32, #tpu.memory_space<vmem>>, vector<1x1x8x8x32xf32>
    %82 = vector.shape_cast %81 : vector<1x1x8x8x32xf32> to vector<8x8x32xf32>
    %83 = vector.shape_cast %82 : vector<8x8x32xf32> to vector<64x32xf32>
    %84 = arith.truncf %83 : vector<64x32xf32> to vector<64x32xbf16>
    %c10 = arith.constant 10 : index
    %c0_85 = arith.constant 0 : index
    %c0_86 = arith.constant 0 : index
    %85 = vector.load %arg2[%c10, %c0_85, %c0_86] : memref<16x32x64xbf16, #tpu.memory_space<vmem>>, vector<1x32x64xbf16>
    %86 = vector.shape_cast %85 : vector<1x32x64xbf16> to vector<32x64xbf16>
    %cst_87 = arith.constant dense<0.000000e+00> : vector<64x64xf32>
    %87 = tpu.matmul %84, %86, %cst_87 {dimension_numbers = #tpu.dot_dimension_numbers<[1], [0], [0], [1], [0, 0, 1, 1], [], []>} : vector<64x32xbf16>, vector<32x64xbf16>, vector<64x64xf32> -> vector<64x64xf32>
    %88 = arith.addf %80, %87 : vector<64x64xf32>
    %c0_88 = arith.constant 0 : index
    %c1_89 = arith.constant 1 : index
    %c1_90 = arith.constant 1 : index
    %c1_91 = arith.constant 1 : index
    %c0_92 = arith.constant 0 : index
    %89 = vector.load %arg1[%c0_88, %c1_89, %c1_90, %c1_91, %c0_92] : memref<1x4x9x9x32xf32, #tpu.memory_space<vmem>>, vector<1x1x8x8x32xf32>
    %90 = vector.shape_cast %89 : vector<1x1x8x8x32xf32> to vector<8x8x32xf32>
    %91 = vector.shape_cast %90 : vector<8x8x32xf32> to vector<64x32xf32>
    %92 = arith.truncf %91 : vector<64x32xf32> to vector<64x32xbf16>
    %c11 = arith.constant 11 : index
    %c0_93 = arith.constant 0 : index
    %c0_94 = arith.constant 0 : index
    %93 = vector.load %arg2[%c11, %c0_93, %c0_94] : memref<16x32x64xbf16, #tpu.memory_space<vmem>>, vector<1x32x64xbf16>
    %94 = vector.shape_cast %93 : vector<1x32x64xbf16> to vector<32x64xbf16>
    %cst_95 = arith.constant dense<0.000000e+00> : vector<64x64xf32>
    %95 = tpu.matmul %92, %94, %cst_95 {dimension_numbers = #tpu.dot_dimension_numbers<[1], [0], [0], [1], [0, 0, 1, 1], [], []>} : vector<64x32xbf16>, vector<32x64xbf16>, vector<64x64xf32> -> vector<64x64xf32>
    %96 = arith.addf %88, %95 : vector<64x64xf32>
    %c0_96 = arith.constant 0 : index
    %c2_97 = arith.constant 2 : index
    %c1_98 = arith.constant 1 : index
    %c0_99 = arith.constant 0 : index
    %c0_100 = arith.constant 0 : index
    %97 = vector.load %arg1[%c0_96, %c2_97, %c1_98, %c0_99, %c0_100] : memref<1x4x9x9x32xf32, #tpu.memory_space<vmem>>, vector<1x1x8x8x32xf32>
    %98 = vector.shape_cast %97 : vector<1x1x8x8x32xf32> to vector<8x8x32xf32>
    %99 = vector.shape_cast %98 : vector<8x8x32xf32> to vector<64x32xf32>
    %100 = arith.truncf %99 : vector<64x32xf32> to vector<64x32xbf16>
    %c12 = arith.constant 12 : index
    %c0_101 = arith.constant 0 : index
    %c0_102 = arith.constant 0 : index
    %101 = vector.load %arg2[%c12, %c0_101, %c0_102] : memref<16x32x64xbf16, #tpu.memory_space<vmem>>, vector<1x32x64xbf16>
    %102 = vector.shape_cast %101 : vector<1x32x64xbf16> to vector<32x64xbf16>
    %cst_103 = arith.constant dense<0.000000e+00> : vector<64x64xf32>
    %103 = tpu.matmul %100, %102, %cst_103 {dimension_numbers = #tpu.dot_dimension_numbers<[1], [0], [0], [1], [0, 0, 1, 1], [], []>} : vector<64x32xbf16>, vector<32x64xbf16>, vector<64x64xf32> -> vector<64x64xf32>
    %104 = arith.addf %96, %103 : vector<64x64xf32>
    %c0_104 = arith.constant 0 : index
    %c3_105 = arith.constant 3 : index
    %c1_106 = arith.constant 1 : index
    %c0_107 = arith.constant 0 : index
    %c0_108 = arith.constant 0 : index
    %105 = vector.load %arg1[%c0_104, %c3_105, %c1_106, %c0_107, %c0_108] : memref<1x4x9x9x32xf32, #tpu.memory_space<vmem>>, vector<1x1x8x8x32xf32>
    %106 = vector.shape_cast %105 : vector<1x1x8x8x32xf32> to vector<8x8x32xf32>
    %107 = vector.shape_cast %106 : vector<8x8x32xf32> to vector<64x32xf32>
    %108 = arith.truncf %107 : vector<64x32xf32> to vector<64x32xbf16>
    %c13 = arith.constant 13 : index
    %c0_109 = arith.constant 0 : index
    %c0_110 = arith.constant 0 : index
    %109 = vector.load %arg2[%c13, %c0_109, %c0_110] : memref<16x32x64xbf16, #tpu.memory_space<vmem>>, vector<1x32x64xbf16>
    %110 = vector.shape_cast %109 : vector<1x32x64xbf16> to vector<32x64xbf16>
    %cst_111 = arith.constant dense<0.000000e+00> : vector<64x64xf32>
    %111 = tpu.matmul %108, %110, %cst_111 {dimension_numbers = #tpu.dot_dimension_numbers<[1], [0], [0], [1], [0, 0, 1, 1], [], []>} : vector<64x32xbf16>, vector<32x64xbf16>, vector<64x64xf32> -> vector<64x64xf32>
    %112 = arith.addf %104, %111 : vector<64x64xf32>
    %c0_112 = arith.constant 0 : index
    %c2_113 = arith.constant 2 : index
    %c1_114 = arith.constant 1 : index
    %c1_115 = arith.constant 1 : index
    %c0_116 = arith.constant 0 : index
    %113 = vector.load %arg1[%c0_112, %c2_113, %c1_114, %c1_115, %c0_116] : memref<1x4x9x9x32xf32, #tpu.memory_space<vmem>>, vector<1x1x8x8x32xf32>
    %114 = vector.shape_cast %113 : vector<1x1x8x8x32xf32> to vector<8x8x32xf32>
    %115 = vector.shape_cast %114 : vector<8x8x32xf32> to vector<64x32xf32>
    %116 = arith.truncf %115 : vector<64x32xf32> to vector<64x32xbf16>
    %c14 = arith.constant 14 : index
    %c0_117 = arith.constant 0 : index
    %c0_118 = arith.constant 0 : index
    %117 = vector.load %arg2[%c14, %c0_117, %c0_118] : memref<16x32x64xbf16, #tpu.memory_space<vmem>>, vector<1x32x64xbf16>
    %118 = vector.shape_cast %117 : vector<1x32x64xbf16> to vector<32x64xbf16>
    %cst_119 = arith.constant dense<0.000000e+00> : vector<64x64xf32>
    %119 = tpu.matmul %116, %118, %cst_119 {dimension_numbers = #tpu.dot_dimension_numbers<[1], [0], [0], [1], [0, 0, 1, 1], [], []>} : vector<64x32xbf16>, vector<32x64xbf16>, vector<64x64xf32> -> vector<64x64xf32>
    %120 = arith.addf %112, %119 : vector<64x64xf32>
    %c0_120 = arith.constant 0 : index
    %c3_121 = arith.constant 3 : index
    %c1_122 = arith.constant 1 : index
    %c1_123 = arith.constant 1 : index
    %c0_124 = arith.constant 0 : index
    %121 = vector.load %arg1[%c0_120, %c3_121, %c1_122, %c1_123, %c0_124] : memref<1x4x9x9x32xf32, #tpu.memory_space<vmem>>, vector<1x1x8x8x32xf32>
    %122 = vector.shape_cast %121 : vector<1x1x8x8x32xf32> to vector<8x8x32xf32>
    %123 = vector.shape_cast %122 : vector<8x8x32xf32> to vector<64x32xf32>
    %124 = arith.truncf %123 : vector<64x32xf32> to vector<64x32xbf16>
    %c15 = arith.constant 15 : index
    %c0_125 = arith.constant 0 : index
    %c0_126 = arith.constant 0 : index
    %125 = vector.load %arg2[%c15, %c0_125, %c0_126] : memref<16x32x64xbf16, #tpu.memory_space<vmem>>, vector<1x32x64xbf16>
    %126 = vector.shape_cast %125 : vector<1x32x64xbf16> to vector<32x64xbf16>
    %cst_127 = arith.constant dense<0.000000e+00> : vector<64x64xf32>
    %127 = tpu.matmul %124, %126, %cst_127 {dimension_numbers = #tpu.dot_dimension_numbers<[1], [0], [0], [1], [0, 0, 1, 1], [], []>} : vector<64x32xbf16>, vector<32x64xbf16>, vector<64x64xf32> -> vector<64x64xf32>
    %128 = arith.addf %120, %127 : vector<64x64xf32>
    %c0_128 = arith.constant 0 : index
    %c0_129 = arith.constant 0 : index
    %129 = vector.load %arg3[%c0_128, %c0_129] : memref<1x64xf32, #tpu.memory_space<vmem>>, vector<1x64xf32>
    %130 = vector.broadcast %129 : vector<1x64xf32> to vector<64x64xf32>
    %131 = arith.addf %128, %130 : vector<64x64xf32>
    %cst_130 = arith.constant 2.000000e-01 : f32
    %132 = vector.broadcast %cst_130 : f32 to vector<64x64xf32>
    %133 = arith.mulf %132, %131 : vector<64x64xf32>
    %134 = arith.maximumf %131, %133 : vector<64x64xf32>
    %135 = vector.shape_cast %134 : vector<64x64xf32> to vector<8x8x64xf32>
    %c0_131 = arith.constant 0 : index
    %c0_132 = arith.constant 0 : index
    %c0_133 = arith.constant 0 : index
    %c0_134 = arith.constant 0 : index
    %136 = vector.load %arg4[%c0_131, %c0_132, %c0_133, %c0_134] : memref<1x8x8x64xf32, #tpu.memory_space<vmem>>, vector<1x8x8x64xf32>
    %137 = vector.shape_cast %136 : vector<1x8x8x64xf32> to vector<8x8x64xf32>
    %138 = vector.shape_cast %135 : vector<8x8x64xf32> to vector<1x8x8x64xf32>
    tpu.vector_store %arg4[%c0_131, %c0_132, %c0_133, %c0_134], %138 {strides = array<i32>} : memref<1x8x8x64xf32, #tpu.memory_space<vmem>>, vector<1x8x8x64xf32>,
    return
  }
  func.func @transform_0(%arg0: i32) -> (i32, i32, i32, i32, i32) {
    %c0_i32 = arith.constant 0 : i32
    %c0_i32_0 = arith.constant 0 : i32
    %c0_i32_1 = arith.constant 0 : i32
    %c0_i32_2 = arith.constant 0 : i32
    %c0_i32_3 = arith.constant 0 : i32
    return %arg0, %c0_i32, %c0_i32_0, %c0_i32_1, %c0_i32_2 : i32, i32, i32, i32, i32
  }
  func.func @transform_1(%arg0: i32) -> (i32, i32, i32) {
    %c0_i32 = arith.constant 0 : i32
    %c0_i32_0 = arith.constant 0 : i32
    %c0_i32_1 = arith.constant 0 : i32
    %c0_i32_2 = arith.constant 0 : i32
    return %c0_i32, %c0_i32_0, %c0_i32_1 : i32, i32, i32
  }
  func.func @transform_2(%arg0: i32) -> (i32, i32) {
    %c0_i32 = arith.constant 0 : i32
    %c0_i32_0 = arith.constant 0 : i32
    %c0_i32_1 = arith.constant 0 : i32
    return %c0_i32, %c0_i32_0 : i32, i32
  }
  func.func @transform_3(%arg0: i32) -> (i32, i32, i32, i32) {
    %c0_i32 = arith.constant 0 : i32
    %c0_i32_0 = arith.constant 0 : i32
    %c0_i32_1 = arith.constant 0 : i32
    %c0_i32_2 = arith.constant 0 : i32
    return %arg0, %c0_i32, %c0_i32_0, %c0_i32_1 : i32, i32, i32, i32
  }
}

module attributes {stable_mosaic.version = 11 : i64} {
  func.func @_conv_bias_lrelu_kernel(%arg0: i32, %arg1: memref<1x4x5x9x64xf32, #tpu.memory_space<vmem>>, %arg2: memref<16x64x128xbf16, #tpu.memory_space<vmem>>, %arg3: memref<1x128xf32, #tpu.memory_space<vmem>>, %arg4: memref<1x4x4x128xf32, #tpu.memory_space<vmem>>) attributes {dimension_semantics = [#tpu.dimension_semantics<parallel>], iteration_bounds = array<i64: 2>, scalar_prefetch = 0 : i64, scratch_operands = 0 : i64, tpu.core_type = #tpu.core_type<tc>, window_params = [{transform_indices = @transform_0, window_bounds = array<i64: 1, 4, 5, 9, 64>}, {pipeline_mode = #tpu.pipeline_mode<synchronous>, transform_indices = @transform_1, window_bounds = array<i64: 16, 64, 128>}, {pipeline_mode = #tpu.pipeline_mode<synchronous>, transform_indices = @transform_2, window_bounds = array<i64: 1, 128>}, {transform_indices = @transform_3, window_bounds = array<i64: 1, 4, 4, 128>}]} {
    %cst = arith.constant 0.000000e+00 : f32
    %0 = vector.broadcast %cst : f32 to vector<32x128xf32>
    %c0 = arith.constant 0 : index
    %c0_0 = arith.constant 0 : index
    %c0_1 = arith.constant 0 : index
    %c0_2 = arith.constant 0 : index
    %c0_3 = arith.constant 0 : index
    %1 = vector.load %arg1[%c0, %c0_0, %c0_1, %c0_2, %c0_3] : memref<1x4x5x9x64xf32, #tpu.memory_space<vmem>>, vector<1x1x4x8x64xf32>
    %2 = vector.shape_cast %1 : vector<1x1x4x8x64xf32> to vector<4x8x64xf32>
    %3 = vector.shape_cast %2 : vector<4x8x64xf32> to vector<32x64xf32>
    %4 = arith.truncf %3 : vector<32x64xf32> to vector<32x64xbf16>
    %c0_4 = arith.constant 0 : index
    %c0_5 = arith.constant 0 : index
    %c0_6 = arith.constant 0 : index
    %5 = vector.load %arg2[%c0_4, %c0_5, %c0_6] : memref<16x64x128xbf16, #tpu.memory_space<vmem>>, vector<1x64x128xbf16>
    %6 = vector.shape_cast %5 : vector<1x64x128xbf16> to vector<64x128xbf16>
    %cst_7 = arith.constant dense<0.000000e+00> : vector<32x128xf32>
    %7 = tpu.matmul %4, %6, %cst_7 {dimension_numbers = #tpu.dot_dimension_numbers<[1], [0], [0], [1], [0, 0, 1, 1], [], []>} : vector<32x64xbf16>, vector<64x128xbf16>, vector<32x128xf32> -> vector<32x128xf32>
    %8 = arith.addf %0, %7 : vector<32x128xf32>
    %c0_8 = arith.constant 0 : index
    %c1 = arith.constant 1 : index
    %c0_9 = arith.constant 0 : index
    %c0_10 = arith.constant 0 : index
    %c0_11 = arith.constant 0 : index
    %9 = vector.load %arg1[%c0_8, %c1, %c0_9, %c0_10, %c0_11] : memref<1x4x5x9x64xf32, #tpu.memory_space<vmem>>, vector<1x1x4x8x64xf32>
    %10 = vector.shape_cast %9 : vector<1x1x4x8x64xf32> to vector<4x8x64xf32>
    %11 = vector.shape_cast %10 : vector<4x8x64xf32> to vector<32x64xf32>
    %12 = arith.truncf %11 : vector<32x64xf32> to vector<32x64xbf16>
    %c1_12 = arith.constant 1 : index
    %c0_13 = arith.constant 0 : index
    %c0_14 = arith.constant 0 : index
    %13 = vector.load %arg2[%c1_12, %c0_13, %c0_14] : memref<16x64x128xbf16, #tpu.memory_space<vmem>>, vector<1x64x128xbf16>
    %14 = vector.shape_cast %13 : vector<1x64x128xbf16> to vector<64x128xbf16>
    %cst_15 = arith.constant dense<0.000000e+00> : vector<32x128xf32>
    %15 = tpu.matmul %12, %14, %cst_15 {dimension_numbers = #tpu.dot_dimension_numbers<[1], [0], [0], [1], [0, 0, 1, 1], [], []>} : vector<32x64xbf16>, vector<64x128xbf16>, vector<32x128xf32> -> vector<32x128xf32>
    %16 = arith.addf %8, %15 : vector<32x128xf32>
    %c0_16 = arith.constant 0 : index
    %c0_17 = arith.constant 0 : index
    %c0_18 = arith.constant 0 : index
    %c1_19 = arith.constant 1 : index
    %c0_20 = arith.constant 0 : index
    %17 = vector.load %arg1[%c0_16, %c0_17, %c0_18, %c1_19, %c0_20] : memref<1x4x5x9x64xf32, #tpu.memory_space<vmem>>, vector<1x1x4x8x64xf32>
    %18 = vector.shape_cast %17 : vector<1x1x4x8x64xf32> to vector<4x8x64xf32>
    %19 = vector.shape_cast %18 : vector<4x8x64xf32> to vector<32x64xf32>
    %20 = arith.truncf %19 : vector<32x64xf32> to vector<32x64xbf16>
    %c2 = arith.constant 2 : index
    %c0_21 = arith.constant 0 : index
    %c0_22 = arith.constant 0 : index
    %21 = vector.load %arg2[%c2, %c0_21, %c0_22] : memref<16x64x128xbf16, #tpu.memory_space<vmem>>, vector<1x64x128xbf16>
    %22 = vector.shape_cast %21 : vector<1x64x128xbf16> to vector<64x128xbf16>
    %cst_23 = arith.constant dense<0.000000e+00> : vector<32x128xf32>
    %23 = tpu.matmul %20, %22, %cst_23 {dimension_numbers = #tpu.dot_dimension_numbers<[1], [0], [0], [1], [0, 0, 1, 1], [], []>} : vector<32x64xbf16>, vector<64x128xbf16>, vector<32x128xf32> -> vector<32x128xf32>
    %24 = arith.addf %16, %23 : vector<32x128xf32>
    %c0_24 = arith.constant 0 : index
    %c1_25 = arith.constant 1 : index
    %c0_26 = arith.constant 0 : index
    %c1_27 = arith.constant 1 : index
    %c0_28 = arith.constant 0 : index
    %25 = vector.load %arg1[%c0_24, %c1_25, %c0_26, %c1_27, %c0_28] : memref<1x4x5x9x64xf32, #tpu.memory_space<vmem>>, vector<1x1x4x8x64xf32>
    %26 = vector.shape_cast %25 : vector<1x1x4x8x64xf32> to vector<4x8x64xf32>
    %27 = vector.shape_cast %26 : vector<4x8x64xf32> to vector<32x64xf32>
    %28 = arith.truncf %27 : vector<32x64xf32> to vector<32x64xbf16>
    %c3 = arith.constant 3 : index
    %c0_29 = arith.constant 0 : index
    %c0_30 = arith.constant 0 : index
    %29 = vector.load %arg2[%c3, %c0_29, %c0_30] : memref<16x64x128xbf16, #tpu.memory_space<vmem>>, vector<1x64x128xbf16>
    %30 = vector.shape_cast %29 : vector<1x64x128xbf16> to vector<64x128xbf16>
    %cst_31 = arith.constant dense<0.000000e+00> : vector<32x128xf32>
    %31 = tpu.matmul %28, %30, %cst_31 {dimension_numbers = #tpu.dot_dimension_numbers<[1], [0], [0], [1], [0, 0, 1, 1], [], []>} : vector<32x64xbf16>, vector<64x128xbf16>, vector<32x128xf32> -> vector<32x128xf32>
    %32 = arith.addf %24, %31 : vector<32x128xf32>
    %c0_32 = arith.constant 0 : index
    %c2_33 = arith.constant 2 : index
    %c0_34 = arith.constant 0 : index
    %c0_35 = arith.constant 0 : index
    %c0_36 = arith.constant 0 : index
    %33 = vector.load %arg1[%c0_32, %c2_33, %c0_34, %c0_35, %c0_36] : memref<1x4x5x9x64xf32, #tpu.memory_space<vmem>>, vector<1x1x4x8x64xf32>
    %34 = vector.shape_cast %33 : vector<1x1x4x8x64xf32> to vector<4x8x64xf32>
    %35 = vector.shape_cast %34 : vector<4x8x64xf32> to vector<32x64xf32>
    %36 = arith.truncf %35 : vector<32x64xf32> to vector<32x64xbf16>
    %c4 = arith.constant 4 : index
    %c0_37 = arith.constant 0 : index
    %c0_38 = arith.constant 0 : index
    %37 = vector.load %arg2[%c4, %c0_37, %c0_38] : memref<16x64x128xbf16, #tpu.memory_space<vmem>>, vector<1x64x128xbf16>
    %38 = vector.shape_cast %37 : vector<1x64x128xbf16> to vector<64x128xbf16>
    %cst_39 = arith.constant dense<0.000000e+00> : vector<32x128xf32>
    %39 = tpu.matmul %36, %38, %cst_39 {dimension_numbers = #tpu.dot_dimension_numbers<[1], [0], [0], [1], [0, 0, 1, 1], [], []>} : vector<32x64xbf16>, vector<64x128xbf16>, vector<32x128xf32> -> vector<32x128xf32>
    %40 = arith.addf %32, %39 : vector<32x128xf32>
    %c0_40 = arith.constant 0 : index
    %c3_41 = arith.constant 3 : index
    %c0_42 = arith.constant 0 : index
    %c0_43 = arith.constant 0 : index
    %c0_44 = arith.constant 0 : index
    %41 = vector.load %arg1[%c0_40, %c3_41, %c0_42, %c0_43, %c0_44] : memref<1x4x5x9x64xf32, #tpu.memory_space<vmem>>, vector<1x1x4x8x64xf32>
    %42 = vector.shape_cast %41 : vector<1x1x4x8x64xf32> to vector<4x8x64xf32>
    %43 = vector.shape_cast %42 : vector<4x8x64xf32> to vector<32x64xf32>
    %44 = arith.truncf %43 : vector<32x64xf32> to vector<32x64xbf16>
    %c5 = arith.constant 5 : index
    %c0_45 = arith.constant 0 : index
    %c0_46 = arith.constant 0 : index
    %45 = vector.load %arg2[%c5, %c0_45, %c0_46] : memref<16x64x128xbf16, #tpu.memory_space<vmem>>, vector<1x64x128xbf16>
    %46 = vector.shape_cast %45 : vector<1x64x128xbf16> to vector<64x128xbf16>
    %cst_47 = arith.constant dense<0.000000e+00> : vector<32x128xf32>
    %47 = tpu.matmul %44, %46, %cst_47 {dimension_numbers = #tpu.dot_dimension_numbers<[1], [0], [0], [1], [0, 0, 1, 1], [], []>} : vector<32x64xbf16>, vector<64x128xbf16>, vector<32x128xf32> -> vector<32x128xf32>
    %48 = arith.addf %40, %47 : vector<32x128xf32>
    %c0_48 = arith.constant 0 : index
    %c2_49 = arith.constant 2 : index
    %c0_50 = arith.constant 0 : index
    %c1_51 = arith.constant 1 : index
    %c0_52 = arith.constant 0 : index
    %49 = vector.load %arg1[%c0_48, %c2_49, %c0_50, %c1_51, %c0_52] : memref<1x4x5x9x64xf32, #tpu.memory_space<vmem>>, vector<1x1x4x8x64xf32>
    %50 = vector.shape_cast %49 : vector<1x1x4x8x64xf32> to vector<4x8x64xf32>
    %51 = vector.shape_cast %50 : vector<4x8x64xf32> to vector<32x64xf32>
    %52 = arith.truncf %51 : vector<32x64xf32> to vector<32x64xbf16>
    %c6 = arith.constant 6 : index
    %c0_53 = arith.constant 0 : index
    %c0_54 = arith.constant 0 : index
    %53 = vector.load %arg2[%c6, %c0_53, %c0_54] : memref<16x64x128xbf16, #tpu.memory_space<vmem>>, vector<1x64x128xbf16>
    %54 = vector.shape_cast %53 : vector<1x64x128xbf16> to vector<64x128xbf16>
    %cst_55 = arith.constant dense<0.000000e+00> : vector<32x128xf32>
    %55 = tpu.matmul %52, %54, %cst_55 {dimension_numbers = #tpu.dot_dimension_numbers<[1], [0], [0], [1], [0, 0, 1, 1], [], []>} : vector<32x64xbf16>, vector<64x128xbf16>, vector<32x128xf32> -> vector<32x128xf32>
    %56 = arith.addf %48, %55 : vector<32x128xf32>
    %c0_56 = arith.constant 0 : index
    %c3_57 = arith.constant 3 : index
    %c0_58 = arith.constant 0 : index
    %c1_59 = arith.constant 1 : index
    %c0_60 = arith.constant 0 : index
    %57 = vector.load %arg1[%c0_56, %c3_57, %c0_58, %c1_59, %c0_60] : memref<1x4x5x9x64xf32, #tpu.memory_space<vmem>>, vector<1x1x4x8x64xf32>
    %58 = vector.shape_cast %57 : vector<1x1x4x8x64xf32> to vector<4x8x64xf32>
    %59 = vector.shape_cast %58 : vector<4x8x64xf32> to vector<32x64xf32>
    %60 = arith.truncf %59 : vector<32x64xf32> to vector<32x64xbf16>
    %c7 = arith.constant 7 : index
    %c0_61 = arith.constant 0 : index
    %c0_62 = arith.constant 0 : index
    %61 = vector.load %arg2[%c7, %c0_61, %c0_62] : memref<16x64x128xbf16, #tpu.memory_space<vmem>>, vector<1x64x128xbf16>
    %62 = vector.shape_cast %61 : vector<1x64x128xbf16> to vector<64x128xbf16>
    %cst_63 = arith.constant dense<0.000000e+00> : vector<32x128xf32>
    %63 = tpu.matmul %60, %62, %cst_63 {dimension_numbers = #tpu.dot_dimension_numbers<[1], [0], [0], [1], [0, 0, 1, 1], [], []>} : vector<32x64xbf16>, vector<64x128xbf16>, vector<32x128xf32> -> vector<32x128xf32>
    %64 = arith.addf %56, %63 : vector<32x128xf32>
    %c0_64 = arith.constant 0 : index
    %c0_65 = arith.constant 0 : index
    %c1_66 = arith.constant 1 : index
    %c0_67 = arith.constant 0 : index
    %c0_68 = arith.constant 0 : index
    %65 = vector.load %arg1[%c0_64, %c0_65, %c1_66, %c0_67, %c0_68] : memref<1x4x5x9x64xf32, #tpu.memory_space<vmem>>, vector<1x1x4x8x64xf32>
    %66 = vector.shape_cast %65 : vector<1x1x4x8x64xf32> to vector<4x8x64xf32>
    %67 = vector.shape_cast %66 : vector<4x8x64xf32> to vector<32x64xf32>
    %68 = arith.truncf %67 : vector<32x64xf32> to vector<32x64xbf16>
    %c8 = arith.constant 8 : index
    %c0_69 = arith.constant 0 : index
    %c0_70 = arith.constant 0 : index
    %69 = vector.load %arg2[%c8, %c0_69, %c0_70] : memref<16x64x128xbf16, #tpu.memory_space<vmem>>, vector<1x64x128xbf16>
    %70 = vector.shape_cast %69 : vector<1x64x128xbf16> to vector<64x128xbf16>
    %cst_71 = arith.constant dense<0.000000e+00> : vector<32x128xf32>
    %71 = tpu.matmul %68, %70, %cst_71 {dimension_numbers = #tpu.dot_dimension_numbers<[1], [0], [0], [1], [0, 0, 1, 1], [], []>} : vector<32x64xbf16>, vector<64x128xbf16>, vector<32x128xf32> -> vector<32x128xf32>
    %72 = arith.addf %64, %71 : vector<32x128xf32>
    %c0_72 = arith.constant 0 : index
    %c1_73 = arith.constant 1 : index
    %c1_74 = arith.constant 1 : index
    %c0_75 = arith.constant 0 : index
    %c0_76 = arith.constant 0 : index
    %73 = vector.load %arg1[%c0_72, %c1_73, %c1_74, %c0_75, %c0_76] : memref<1x4x5x9x64xf32, #tpu.memory_space<vmem>>, vector<1x1x4x8x64xf32>
    %74 = vector.shape_cast %73 : vector<1x1x4x8x64xf32> to vector<4x8x64xf32>
    %75 = vector.shape_cast %74 : vector<4x8x64xf32> to vector<32x64xf32>
    %76 = arith.truncf %75 : vector<32x64xf32> to vector<32x64xbf16>
    %c9 = arith.constant 9 : index
    %c0_77 = arith.constant 0 : index
    %c0_78 = arith.constant 0 : index
    %77 = vector.load %arg2[%c9, %c0_77, %c0_78] : memref<16x64x128xbf16, #tpu.memory_space<vmem>>, vector<1x64x128xbf16>
    %78 = vector.shape_cast %77 : vector<1x64x128xbf16> to vector<64x128xbf16>
    %cst_79 = arith.constant dense<0.000000e+00> : vector<32x128xf32>
    %79 = tpu.matmul %76, %78, %cst_79 {dimension_numbers = #tpu.dot_dimension_numbers<[1], [0], [0], [1], [0, 0, 1, 1], [], []>} : vector<32x64xbf16>, vector<64x128xbf16>, vector<32x128xf32> -> vector<32x128xf32>
    %80 = arith.addf %72, %79 : vector<32x128xf32>
    %c0_80 = arith.constant 0 : index
    %c0_81 = arith.constant 0 : index
    %c1_82 = arith.constant 1 : index
    %c1_83 = arith.constant 1 : index
    %c0_84 = arith.constant 0 : index
    %81 = vector.load %arg1[%c0_80, %c0_81, %c1_82, %c1_83, %c0_84] : memref<1x4x5x9x64xf32, #tpu.memory_space<vmem>>, vector<1x1x4x8x64xf32>
    %82 = vector.shape_cast %81 : vector<1x1x4x8x64xf32> to vector<4x8x64xf32>
    %83 = vector.shape_cast %82 : vector<4x8x64xf32> to vector<32x64xf32>
    %84 = arith.truncf %83 : vector<32x64xf32> to vector<32x64xbf16>
    %c10 = arith.constant 10 : index
    %c0_85 = arith.constant 0 : index
    %c0_86 = arith.constant 0 : index
    %85 = vector.load %arg2[%c10, %c0_85, %c0_86] : memref<16x64x128xbf16, #tpu.memory_space<vmem>>, vector<1x64x128xbf16>
    %86 = vector.shape_cast %85 : vector<1x64x128xbf16> to vector<64x128xbf16>
    %cst_87 = arith.constant dense<0.000000e+00> : vector<32x128xf32>
    %87 = tpu.matmul %84, %86, %cst_87 {dimension_numbers = #tpu.dot_dimension_numbers<[1], [0], [0], [1], [0, 0, 1, 1], [], []>} : vector<32x64xbf16>, vector<64x128xbf16>, vector<32x128xf32> -> vector<32x128xf32>
    %88 = arith.addf %80, %87 : vector<32x128xf32>
    %c0_88 = arith.constant 0 : index
    %c1_89 = arith.constant 1 : index
    %c1_90 = arith.constant 1 : index
    %c1_91 = arith.constant 1 : index
    %c0_92 = arith.constant 0 : index
    %89 = vector.load %arg1[%c0_88, %c1_89, %c1_90, %c1_91, %c0_92] : memref<1x4x5x9x64xf32, #tpu.memory_space<vmem>>, vector<1x1x4x8x64xf32>
    %90 = vector.shape_cast %89 : vector<1x1x4x8x64xf32> to vector<4x8x64xf32>
    %91 = vector.shape_cast %90 : vector<4x8x64xf32> to vector<32x64xf32>
    %92 = arith.truncf %91 : vector<32x64xf32> to vector<32x64xbf16>
    %c11 = arith.constant 11 : index
    %c0_93 = arith.constant 0 : index
    %c0_94 = arith.constant 0 : index
    %93 = vector.load %arg2[%c11, %c0_93, %c0_94] : memref<16x64x128xbf16, #tpu.memory_space<vmem>>, vector<1x64x128xbf16>
    %94 = vector.shape_cast %93 : vector<1x64x128xbf16> to vector<64x128xbf16>
    %cst_95 = arith.constant dense<0.000000e+00> : vector<32x128xf32>
    %95 = tpu.matmul %92, %94, %cst_95 {dimension_numbers = #tpu.dot_dimension_numbers<[1], [0], [0], [1], [0, 0, 1, 1], [], []>} : vector<32x64xbf16>, vector<64x128xbf16>, vector<32x128xf32> -> vector<32x128xf32>
    %96 = arith.addf %88, %95 : vector<32x128xf32>
    %c0_96 = arith.constant 0 : index
    %c2_97 = arith.constant 2 : index
    %c1_98 = arith.constant 1 : index
    %c0_99 = arith.constant 0 : index
    %c0_100 = arith.constant 0 : index
    %97 = vector.load %arg1[%c0_96, %c2_97, %c1_98, %c0_99, %c0_100] : memref<1x4x5x9x64xf32, #tpu.memory_space<vmem>>, vector<1x1x4x8x64xf32>
    %98 = vector.shape_cast %97 : vector<1x1x4x8x64xf32> to vector<4x8x64xf32>
    %99 = vector.shape_cast %98 : vector<4x8x64xf32> to vector<32x64xf32>
    %100 = arith.truncf %99 : vector<32x64xf32> to vector<32x64xbf16>
    %c12 = arith.constant 12 : index
    %c0_101 = arith.constant 0 : index
    %c0_102 = arith.constant 0 : index
    %101 = vector.load %arg2[%c12, %c0_101, %c0_102] : memref<16x64x128xbf16, #tpu.memory_space<vmem>>, vector<1x64x128xbf16>
    %102 = vector.shape_cast %101 : vector<1x64x128xbf16> to vector<64x128xbf16>
    %cst_103 = arith.constant dense<0.000000e+00> : vector<32x128xf32>
    %103 = tpu.matmul %100, %102, %cst_103 {dimension_numbers = #tpu.dot_dimension_numbers<[1], [0], [0], [1], [0, 0, 1, 1], [], []>} : vector<32x64xbf16>, vector<64x128xbf16>, vector<32x128xf32> -> vector<32x128xf32>
    %104 = arith.addf %96, %103 : vector<32x128xf32>
    %c0_104 = arith.constant 0 : index
    %c3_105 = arith.constant 3 : index
    %c1_106 = arith.constant 1 : index
    %c0_107 = arith.constant 0 : index
    %c0_108 = arith.constant 0 : index
    %105 = vector.load %arg1[%c0_104, %c3_105, %c1_106, %c0_107, %c0_108] : memref<1x4x5x9x64xf32, #tpu.memory_space<vmem>>, vector<1x1x4x8x64xf32>
    %106 = vector.shape_cast %105 : vector<1x1x4x8x64xf32> to vector<4x8x64xf32>
    %107 = vector.shape_cast %106 : vector<4x8x64xf32> to vector<32x64xf32>
    %108 = arith.truncf %107 : vector<32x64xf32> to vector<32x64xbf16>
    %c13 = arith.constant 13 : index
    %c0_109 = arith.constant 0 : index
    %c0_110 = arith.constant 0 : index
    %109 = vector.load %arg2[%c13, %c0_109, %c0_110] : memref<16x64x128xbf16, #tpu.memory_space<vmem>>, vector<1x64x128xbf16>
    %110 = vector.shape_cast %109 : vector<1x64x128xbf16> to vector<64x128xbf16>
    %cst_111 = arith.constant dense<0.000000e+00> : vector<32x128xf32>
    %111 = tpu.matmul %108, %110, %cst_111 {dimension_numbers = #tpu.dot_dimension_numbers<[1], [0], [0], [1], [0, 0, 1, 1], [], []>} : vector<32x64xbf16>, vector<64x128xbf16>, vector<32x128xf32> -> vector<32x128xf32>
    %112 = arith.addf %104, %111 : vector<32x128xf32>
    %c0_112 = arith.constant 0 : index
    %c2_113 = arith.constant 2 : index
    %c1_114 = arith.constant 1 : index
    %c1_115 = arith.constant 1 : index
    %c0_116 = arith.constant 0 : index
    %113 = vector.load %arg1[%c0_112, %c2_113, %c1_114, %c1_115, %c0_116] : memref<1x4x5x9x64xf32, #tpu.memory_space<vmem>>, vector<1x1x4x8x64xf32>
    %114 = vector.shape_cast %113 : vector<1x1x4x8x64xf32> to vector<4x8x64xf32>
    %115 = vector.shape_cast %114 : vector<4x8x64xf32> to vector<32x64xf32>
    %116 = arith.truncf %115 : vector<32x64xf32> to vector<32x64xbf16>
    %c14 = arith.constant 14 : index
    %c0_117 = arith.constant 0 : index
    %c0_118 = arith.constant 0 : index
    %117 = vector.load %arg2[%c14, %c0_117, %c0_118] : memref<16x64x128xbf16, #tpu.memory_space<vmem>>, vector<1x64x128xbf16>
    %118 = vector.shape_cast %117 : vector<1x64x128xbf16> to vector<64x128xbf16>
    %cst_119 = arith.constant dense<0.000000e+00> : vector<32x128xf32>
    %119 = tpu.matmul %116, %118, %cst_119 {dimension_numbers = #tpu.dot_dimension_numbers<[1], [0], [0], [1], [0, 0, 1, 1], [], []>} : vector<32x64xbf16>, vector<64x128xbf16>, vector<32x128xf32> -> vector<32x128xf32>
    %120 = arith.addf %112, %119 : vector<32x128xf32>
    %c0_120 = arith.constant 0 : index
    %c3_121 = arith.constant 3 : index
    %c1_122 = arith.constant 1 : index
    %c1_123 = arith.constant 1 : index
    %c0_124 = arith.constant 0 : index
    %121 = vector.load %arg1[%c0_120, %c3_121, %c1_122, %c1_123, %c0_124] : memref<1x4x5x9x64xf32, #tpu.memory_space<vmem>>, vector<1x1x4x8x64xf32>
    %122 = vector.shape_cast %121 : vector<1x1x4x8x64xf32> to vector<4x8x64xf32>
    %123 = vector.shape_cast %122 : vector<4x8x64xf32> to vector<32x64xf32>
    %124 = arith.truncf %123 : vector<32x64xf32> to vector<32x64xbf16>
    %c15 = arith.constant 15 : index
    %c0_125 = arith.constant 0 : index
    %c0_126 = arith.constant 0 : index
    %125 = vector.load %arg2[%c15, %c0_125, %c0_126] : memref<16x64x128xbf16, #tpu.memory_space<vmem>>, vector<1x64x128xbf16>
    %126 = vector.shape_cast %125 : vector<1x64x128xbf16> to vector<64x128xbf16>
    %cst_127 = arith.constant dense<0.000000e+00> : vector<32x128xf32>
    %127 = tpu.matmul %124, %126, %cst_127 {dimension_numbers = #tpu.dot_dimension_numbers<[1], [0], [0], [1], [0, 0, 1, 1], [], []>} : vector<32x64xbf16>, vector<64x128xbf16>, vector<32x128xf32> -> vector<32x128xf32>
    %128 = arith.addf %120, %127 : vector<32x128xf32>
    %c0_128 = arith.constant 0 : index
    %c0_129 = arith.constant 0 : index
    %129 = vector.load %arg3[%c0_128, %c0_129] : memref<1x128xf32, #tpu.memory_space<vmem>>, vector<1x128xf32>
    %130 = vector.broadcast %129 : vector<1x128xf32> to vector<32x128xf32>
    %131 = arith.addf %128, %130 : vector<32x128xf32>
    %cst_130 = arith.constant 2.000000e-01 : f32
    %132 = vector.broadcast %cst_130 : f32 to vector<32x128xf32>
    %133 = arith.mulf %132, %131 : vector<32x128xf32>
    %134 = arith.maximumf %131, %133 : vector<32x128xf32>
    %135 = vector.shape_cast %134 : vector<32x128xf32> to vector<4x8x128xf32>
    %136 = vector.extract_strided_slice %135 {offsets = [0, 0, 0], sizes = [4, 4, 128], strides = [1, 1, 1]} : vector<4x8x128xf32> to vector<4x4x128xf32>
    %c0_131 = arith.constant 0 : index
    %c0_132 = arith.constant 0 : index
    %c0_133 = arith.constant 0 : index
    %c0_134 = arith.constant 0 : index
    %137 = vector.load %arg4[%c0_131, %c0_132, %c0_133, %c0_134] : memref<1x4x4x128xf32, #tpu.memory_space<vmem>>, vector<1x4x4x128xf32>
    %138 = vector.shape_cast %137 : vector<1x4x4x128xf32> to vector<4x4x128xf32>
    %139 = vector.shape_cast %136 : vector<4x4x128xf32> to vector<1x4x4x128xf32>
    tpu.vector_store %arg4[%c0_131, %c0_132, %c0_133, %c0_134], %139 {strides = array<i32>} : memref<1x4x4x128xf32, #tpu.memory_space<vmem>>, vector<1x4x4x128xf32>,
    return
  }
  func.func @transform_0(%arg0: i32) -> (i32, i32, i32, i32, i32) {
    %c0_i32 = arith.constant 0 : i32
    %c0_i32_0 = arith.constant 0 : i32
    %c0_i32_1 = arith.constant 0 : i32
    %c0_i32_2 = arith.constant 0 : i32
    %c0_i32_3 = arith.constant 0 : i32
    return %arg0, %c0_i32, %c0_i32_0, %c0_i32_1, %c0_i32_2 : i32, i32, i32, i32, i32
  }
  func.func @transform_1(%arg0: i32) -> (i32, i32, i32) {
    %c0_i32 = arith.constant 0 : i32
    %c0_i32_0 = arith.constant 0 : i32
    %c0_i32_1 = arith.constant 0 : i32
    %c0_i32_2 = arith.constant 0 : i32
    return %c0_i32, %c0_i32_0, %c0_i32_1 : i32, i32, i32
  }
  func.func @transform_2(%arg0: i32) -> (i32, i32) {
    %c0_i32 = arith.constant 0 : i32
    %c0_i32_0 = arith.constant 0 : i32
    %c0_i32_1 = arith.constant 0 : i32
    return %c0_i32, %c0_i32_0 : i32, i32
  }
  func.func @transform_3(%arg0: i32) -> (i32, i32, i32, i32) {
    %c0_i32 = arith.constant 0 : i32
    %c0_i32_0 = arith.constant 0 : i32
    %c0_i32_1 = arith.constant 0 : i32
    %c0_i32_2 = arith.constant 0 : i32
    return %arg0, %c0_i32, %c0_i32_0, %c0_i32_1 : i32, i32, i32, i32
  }
}

module attributes {stable_mosaic.version = 11 : i64} {
  func.func @_conv_bias_lrelu_kernel(%arg0: i32, %arg1: memref<1x1x6x11x128xf32, #tpu.memory_space<vmem>>, %arg2: memref<16x128x256xbf16, #tpu.memory_space<vmem>>, %arg3: memref<1x256xf32, #tpu.memory_space<vmem>>, %arg4: memref<1x3x3x256xf32, #tpu.memory_space<vmem>>) attributes {dimension_semantics = [#tpu.dimension_semantics<parallel>], iteration_bounds = array<i64: 2>, scalar_prefetch = 0 : i64, scratch_operands = 0 : i64, tpu.core_type = #tpu.core_type<tc>, window_params = [{transform_indices = @transform_0, window_bounds = array<i64: 1, 1, 6, 11, 128>}, {pipeline_mode = #tpu.pipeline_mode<synchronous>, transform_indices = @transform_1, window_bounds = array<i64: 16, 128, 256>}, {pipeline_mode = #tpu.pipeline_mode<synchronous>, transform_indices = @transform_2, window_bounds = array<i64: 1, 256>}, {transform_indices = @transform_3, window_bounds = array<i64: 1, 3, 3, 256>}]} {
    %cst = arith.constant 0.000000e+00 : f32
    %0 = vector.broadcast %cst : f32 to vector<24x256xf32>
    %c0 = arith.constant 0 : index
    %c0_0 = arith.constant 0 : index
    %c0_1 = arith.constant 0 : index
    %c0_2 = arith.constant 0 : index
    %c0_3 = arith.constant 0 : index
    %1 = vector.load %arg1[%c0, %c0_0, %c0_1, %c0_2, %c0_3] : memref<1x1x6x11x128xf32, #tpu.memory_space<vmem>>, vector<1x1x3x8x128xf32>
    %2 = vector.shape_cast %1 : vector<1x1x3x8x128xf32> to vector<3x8x128xf32>
    %3 = vector.shape_cast %2 : vector<3x8x128xf32> to vector<24x128xf32>
    %4 = arith.truncf %3 : vector<24x128xf32> to vector<24x128xbf16>
    %c0_4 = arith.constant 0 : index
    %c0_5 = arith.constant 0 : index
    %c0_6 = arith.constant 0 : index
    %5 = vector.load %arg2[%c0_4, %c0_5, %c0_6] : memref<16x128x256xbf16, #tpu.memory_space<vmem>>, vector<1x128x256xbf16>
    %6 = vector.shape_cast %5 : vector<1x128x256xbf16> to vector<128x256xbf16>
    %cst_7 = arith.constant dense<0.000000e+00> : vector<24x256xf32>
    %7 = tpu.matmul %4, %6, %cst_7 {dimension_numbers = #tpu.dot_dimension_numbers<[1], [0], [0], [1], [0, 0, 1, 1], [], []>} : vector<24x128xbf16>, vector<128x256xbf16>, vector<24x256xf32> -> vector<24x256xf32>
    %8 = arith.addf %0, %7 : vector<24x256xf32>
    %c0_8 = arith.constant 0 : index
    %c0_9 = arith.constant 0 : index
    %c0_10 = arith.constant 0 : index
    %c1 = arith.constant 1 : index
    %c0_11 = arith.constant 0 : index
    %9 = vector.load %arg1[%c0_8, %c0_9, %c0_10, %c1, %c0_11] : memref<1x1x6x11x128xf32, #tpu.memory_space<vmem>>, vector<1x1x3x8x128xf32>
    %10 = vector.shape_cast %9 : vector<1x1x3x8x128xf32> to vector<3x8x128xf32>
    %11 = vector.shape_cast %10 : vector<3x8x128xf32> to vector<24x128xf32>
    %12 = arith.truncf %11 : vector<24x128xf32> to vector<24x128xbf16>
    %c1_12 = arith.constant 1 : index
    %c0_13 = arith.constant 0 : index
    %c0_14 = arith.constant 0 : index
    %13 = vector.load %arg2[%c1_12, %c0_13, %c0_14] : memref<16x128x256xbf16, #tpu.memory_space<vmem>>, vector<1x128x256xbf16>
    %14 = vector.shape_cast %13 : vector<1x128x256xbf16> to vector<128x256xbf16>
    %cst_15 = arith.constant dense<0.000000e+00> : vector<24x256xf32>
    %15 = tpu.matmul %12, %14, %cst_15 {dimension_numbers = #tpu.dot_dimension_numbers<[1], [0], [0], [1], [0, 0, 1, 1], [], []>} : vector<24x128xbf16>, vector<128x256xbf16>, vector<24x256xf32> -> vector<24x256xf32>
    %16 = arith.addf %8, %15 : vector<24x256xf32>
    %c0_16 = arith.constant 0 : index
    %c0_17 = arith.constant 0 : index
    %c0_18 = arith.constant 0 : index
    %c2 = arith.constant 2 : index
    %c0_19 = arith.constant 0 : index
    %17 = vector.load %arg1[%c0_16, %c0_17, %c0_18, %c2, %c0_19] : memref<1x1x6x11x128xf32, #tpu.memory_space<vmem>>, vector<1x1x3x8x128xf32>
    %18 = vector.shape_cast %17 : vector<1x1x3x8x128xf32> to vector<3x8x128xf32>
    %19 = vector.shape_cast %18 : vector<3x8x128xf32> to vector<24x128xf32>
    %20 = arith.truncf %19 : vector<24x128xf32> to vector<24x128xbf16>
    %c2_20 = arith.constant 2 : index
    %c0_21 = arith.constant 0 : index
    %c0_22 = arith.constant 0 : index
    %21 = vector.load %arg2[%c2_20, %c0_21, %c0_22] : memref<16x128x256xbf16, #tpu.memory_space<vmem>>, vector<1x128x256xbf16>
    %22 = vector.shape_cast %21 : vector<1x128x256xbf16> to vector<128x256xbf16>
    %cst_23 = arith.constant dense<0.000000e+00> : vector<24x256xf32>
    %23 = tpu.matmul %20, %22, %cst_23 {dimension_numbers = #tpu.dot_dimension_numbers<[1], [0], [0], [1], [0, 0, 1, 1], [], []>} : vector<24x128xbf16>, vector<128x256xbf16>, vector<24x256xf32> -> vector<24x256xf32>
    %24 = arith.addf %16, %23 : vector<24x256xf32>
    %c0_24 = arith.constant 0 : index
    %c0_25 = arith.constant 0 : index
    %c0_26 = arith.constant 0 : index
    %c3 = arith.constant 3 : index
    %c0_27 = arith.constant 0 : index
    %25 = vector.load %arg1[%c0_24, %c0_25, %c0_26, %c3, %c0_27] : memref<1x1x6x11x128xf32, #tpu.memory_space<vmem>>, vector<1x1x3x8x128xf32>
    %26 = vector.shape_cast %25 : vector<1x1x3x8x128xf32> to vector<3x8x128xf32>
    %27 = vector.shape_cast %26 : vector<3x8x128xf32> to vector<24x128xf32>
    %28 = arith.truncf %27 : vector<24x128xf32> to vector<24x128xbf16>
    %c3_28 = arith.constant 3 : index
    %c0_29 = arith.constant 0 : index
    %c0_30 = arith.constant 0 : index
    %29 = vector.load %arg2[%c3_28, %c0_29, %c0_30] : memref<16x128x256xbf16, #tpu.memory_space<vmem>>, vector<1x128x256xbf16>
    %30 = vector.shape_cast %29 : vector<1x128x256xbf16> to vector<128x256xbf16>
    %cst_31 = arith.constant dense<0.000000e+00> : vector<24x256xf32>
    %31 = tpu.matmul %28, %30, %cst_31 {dimension_numbers = #tpu.dot_dimension_numbers<[1], [0], [0], [1], [0, 0, 1, 1], [], []>} : vector<24x128xbf16>, vector<128x256xbf16>, vector<24x256xf32> -> vector<24x256xf32>
    %32 = arith.addf %24, %31 : vector<24x256xf32>
    %c0_32 = arith.constant 0 : index
    %c0_33 = arith.constant 0 : index
    %c1_34 = arith.constant 1 : index
    %c0_35 = arith.constant 0 : index
    %c0_36 = arith.constant 0 : index
    %33 = vector.load %arg1[%c0_32, %c0_33, %c1_34, %c0_35, %c0_36] : memref<1x1x6x11x128xf32, #tpu.memory_space<vmem>>, vector<1x1x3x8x128xf32>
    %34 = vector.shape_cast %33 : vector<1x1x3x8x128xf32> to vector<3x8x128xf32>
    %35 = vector.shape_cast %34 : vector<3x8x128xf32> to vector<24x128xf32>
    %36 = arith.truncf %35 : vector<24x128xf32> to vector<24x128xbf16>
    %c4 = arith.constant 4 : index
    %c0_37 = arith.constant 0 : index
    %c0_38 = arith.constant 0 : index
    %37 = vector.load %arg2[%c4, %c0_37, %c0_38] : memref<16x128x256xbf16, #tpu.memory_space<vmem>>, vector<1x128x256xbf16>
    %38 = vector.shape_cast %37 : vector<1x128x256xbf16> to vector<128x256xbf16>
    %cst_39 = arith.constant dense<0.000000e+00> : vector<24x256xf32>
    %39 = tpu.matmul %36, %38, %cst_39 {dimension_numbers = #tpu.dot_dimension_numbers<[1], [0], [0], [1], [0, 0, 1, 1], [], []>} : vector<24x128xbf16>, vector<128x256xbf16>, vector<24x256xf32> -> vector<24x256xf32>
    %40 = arith.addf %32, %39 : vector<24x256xf32>
    %c0_40 = arith.constant 0 : index
    %c0_41 = arith.constant 0 : index
    %c1_42 = arith.constant 1 : index
    %c1_43 = arith.constant 1 : index
    %c0_44 = arith.constant 0 : index
    %41 = vector.load %arg1[%c0_40, %c0_41, %c1_42, %c1_43, %c0_44] : memref<1x1x6x11x128xf32, #tpu.memory_space<vmem>>, vector<1x1x3x8x128xf32>
    %42 = vector.shape_cast %41 : vector<1x1x3x8x128xf32> to vector<3x8x128xf32>
    %43 = vector.shape_cast %42 : vector<3x8x128xf32> to vector<24x128xf32>
    %44 = arith.truncf %43 : vector<24x128xf32> to vector<24x128xbf16>
    %c5 = arith.constant 5 : index
    %c0_45 = arith.constant 0 : index
    %c0_46 = arith.constant 0 : index
    %45 = vector.load %arg2[%c5, %c0_45, %c0_46] : memref<16x128x256xbf16, #tpu.memory_space<vmem>>, vector<1x128x256xbf16>
    %46 = vector.shape_cast %45 : vector<1x128x256xbf16> to vector<128x256xbf16>
    %cst_47 = arith.constant dense<0.000000e+00> : vector<24x256xf32>
    %47 = tpu.matmul %44, %46, %cst_47 {dimension_numbers = #tpu.dot_dimension_numbers<[1], [0], [0], [1], [0, 0, 1, 1], [], []>} : vector<24x128xbf16>, vector<128x256xbf16>, vector<24x256xf32> -> vector<24x256xf32>
    %48 = arith.addf %40, %47 : vector<24x256xf32>
    %c0_48 = arith.constant 0 : index
    %c0_49 = arith.constant 0 : index
    %c1_50 = arith.constant 1 : index
    %c2_51 = arith.constant 2 : index
    %c0_52 = arith.constant 0 : index
    %49 = vector.load %arg1[%c0_48, %c0_49, %c1_50, %c2_51, %c0_52] : memref<1x1x6x11x128xf32, #tpu.memory_space<vmem>>, vector<1x1x3x8x128xf32>
    %50 = vector.shape_cast %49 : vector<1x1x3x8x128xf32> to vector<3x8x128xf32>
    %51 = vector.shape_cast %50 : vector<3x8x128xf32> to vector<24x128xf32>
    %52 = arith.truncf %51 : vector<24x128xf32> to vector<24x128xbf16>
    %c6 = arith.constant 6 : index
    %c0_53 = arith.constant 0 : index
    %c0_54 = arith.constant 0 : index
    %53 = vector.load %arg2[%c6, %c0_53, %c0_54] : memref<16x128x256xbf16, #tpu.memory_space<vmem>>, vector<1x128x256xbf16>
    %54 = vector.shape_cast %53 : vector<1x128x256xbf16> to vector<128x256xbf16>
    %cst_55 = arith.constant dense<0.000000e+00> : vector<24x256xf32>
    %55 = tpu.matmul %52, %54, %cst_55 {dimension_numbers = #tpu.dot_dimension_numbers<[1], [0], [0], [1], [0, 0, 1, 1], [], []>} : vector<24x128xbf16>, vector<128x256xbf16>, vector<24x256xf32> -> vector<24x256xf32>
    %56 = arith.addf %48, %55 : vector<24x256xf32>
    %c0_56 = arith.constant 0 : index
    %c0_57 = arith.constant 0 : index
    %c1_58 = arith.constant 1 : index
    %c3_59 = arith.constant 3 : index
    %c0_60 = arith.constant 0 : index
    %57 = vector.load %arg1[%c0_56, %c0_57, %c1_58, %c3_59, %c0_60] : memref<1x1x6x11x128xf32, #tpu.memory_space<vmem>>, vector<1x1x3x8x128xf32>
    %58 = vector.shape_cast %57 : vector<1x1x3x8x128xf32> to vector<3x8x128xf32>
    %59 = vector.shape_cast %58 : vector<3x8x128xf32> to vector<24x128xf32>
    %60 = arith.truncf %59 : vector<24x128xf32> to vector<24x128xbf16>
    %c7 = arith.constant 7 : index
    %c0_61 = arith.constant 0 : index
    %c0_62 = arith.constant 0 : index
    %61 = vector.load %arg2[%c7, %c0_61, %c0_62] : memref<16x128x256xbf16, #tpu.memory_space<vmem>>, vector<1x128x256xbf16>
    %62 = vector.shape_cast %61 : vector<1x128x256xbf16> to vector<128x256xbf16>
    %cst_63 = arith.constant dense<0.000000e+00> : vector<24x256xf32>
    %63 = tpu.matmul %60, %62, %cst_63 {dimension_numbers = #tpu.dot_dimension_numbers<[1], [0], [0], [1], [0, 0, 1, 1], [], []>} : vector<24x128xbf16>, vector<128x256xbf16>, vector<24x256xf32> -> vector<24x256xf32>
    %64 = arith.addf %56, %63 : vector<24x256xf32>
    %c0_64 = arith.constant 0 : index
    %c0_65 = arith.constant 0 : index
    %c2_66 = arith.constant 2 : index
    %c0_67 = arith.constant 0 : index
    %c0_68 = arith.constant 0 : index
    %65 = vector.load %arg1[%c0_64, %c0_65, %c2_66, %c0_67, %c0_68] : memref<1x1x6x11x128xf32, #tpu.memory_space<vmem>>, vector<1x1x3x8x128xf32>
    %66 = vector.shape_cast %65 : vector<1x1x3x8x128xf32> to vector<3x8x128xf32>
    %67 = vector.shape_cast %66 : vector<3x8x128xf32> to vector<24x128xf32>
    %68 = arith.truncf %67 : vector<24x128xf32> to vector<24x128xbf16>
    %c8 = arith.constant 8 : index
    %c0_69 = arith.constant 0 : index
    %c0_70 = arith.constant 0 : index
    %69 = vector.load %arg2[%c8, %c0_69, %c0_70] : memref<16x128x256xbf16, #tpu.memory_space<vmem>>, vector<1x128x256xbf16>
    %70 = vector.shape_cast %69 : vector<1x128x256xbf16> to vector<128x256xbf16>
    %cst_71 = arith.constant dense<0.000000e+00> : vector<24x256xf32>
    %71 = tpu.matmul %68, %70, %cst_71 {dimension_numbers = #tpu.dot_dimension_numbers<[1], [0], [0], [1], [0, 0, 1, 1], [], []>} : vector<24x128xbf16>, vector<128x256xbf16>, vector<24x256xf32> -> vector<24x256xf32>
    %72 = arith.addf %64, %71 : vector<24x256xf32>
    %c0_72 = arith.constant 0 : index
    %c0_73 = arith.constant 0 : index
    %c2_74 = arith.constant 2 : index
    %c1_75 = arith.constant 1 : index
    %c0_76 = arith.constant 0 : index
    %73 = vector.load %arg1[%c0_72, %c0_73, %c2_74, %c1_75, %c0_76] : memref<1x1x6x11x128xf32, #tpu.memory_space<vmem>>, vector<1x1x3x8x128xf32>
    %74 = vector.shape_cast %73 : vector<1x1x3x8x128xf32> to vector<3x8x128xf32>
    %75 = vector.shape_cast %74 : vector<3x8x128xf32> to vector<24x128xf32>
    %76 = arith.truncf %75 : vector<24x128xf32> to vector<24x128xbf16>
    %c9 = arith.constant 9 : index
    %c0_77 = arith.constant 0 : index
    %c0_78 = arith.constant 0 : index
    %77 = vector.load %arg2[%c9, %c0_77, %c0_78] : memref<16x128x256xbf16, #tpu.memory_space<vmem>>, vector<1x128x256xbf16>
    %78 = vector.shape_cast %77 : vector<1x128x256xbf16> to vector<128x256xbf16>
    %cst_79 = arith.constant dense<0.000000e+00> : vector<24x256xf32>
    %79 = tpu.matmul %76, %78, %cst_79 {dimension_numbers = #tpu.dot_dimension_numbers<[1], [0], [0], [1], [0, 0, 1, 1], [], []>} : vector<24x128xbf16>, vector<128x256xbf16>, vector<24x256xf32> -> vector<24x256xf32>
    %80 = arith.addf %72, %79 : vector<24x256xf32>
    %c0_80 = arith.constant 0 : index
    %c0_81 = arith.constant 0 : index
    %c2_82 = arith.constant 2 : index
    %c2_83 = arith.constant 2 : index
    %c0_84 = arith.constant 0 : index
    %81 = vector.load %arg1[%c0_80, %c0_81, %c2_82, %c2_83, %c0_84] : memref<1x1x6x11x128xf32, #tpu.memory_space<vmem>>, vector<1x1x3x8x128xf32>
    %82 = vector.shape_cast %81 : vector<1x1x3x8x128xf32> to vector<3x8x128xf32>
    %83 = vector.shape_cast %82 : vector<3x8x128xf32> to vector<24x128xf32>
    %84 = arith.truncf %83 : vector<24x128xf32> to vector<24x128xbf16>
    %c10 = arith.constant 10 : index
    %c0_85 = arith.constant 0 : index
    %c0_86 = arith.constant 0 : index
    %85 = vector.load %arg2[%c10, %c0_85, %c0_86] : memref<16x128x256xbf16, #tpu.memory_space<vmem>>, vector<1x128x256xbf16>
    %86 = vector.shape_cast %85 : vector<1x128x256xbf16> to vector<128x256xbf16>
    %cst_87 = arith.constant dense<0.000000e+00> : vector<24x256xf32>
    %87 = tpu.matmul %84, %86, %cst_87 {dimension_numbers = #tpu.dot_dimension_numbers<[1], [0], [0], [1], [0, 0, 1, 1], [], []>} : vector<24x128xbf16>, vector<128x256xbf16>, vector<24x256xf32> -> vector<24x256xf32>
    %88 = arith.addf %80, %87 : vector<24x256xf32>
    %c0_88 = arith.constant 0 : index
    %c0_89 = arith.constant 0 : index
    %c2_90 = arith.constant 2 : index
    %c3_91 = arith.constant 3 : index
    %c0_92 = arith.constant 0 : index
    %89 = vector.load %arg1[%c0_88, %c0_89, %c2_90, %c3_91, %c0_92] : memref<1x1x6x11x128xf32, #tpu.memory_space<vmem>>, vector<1x1x3x8x128xf32>
    %90 = vector.shape_cast %89 : vector<1x1x3x8x128xf32> to vector<3x8x128xf32>
    %91 = vector.shape_cast %90 : vector<3x8x128xf32> to vector<24x128xf32>
    %92 = arith.truncf %91 : vector<24x128xf32> to vector<24x128xbf16>
    %c11 = arith.constant 11 : index
    %c0_93 = arith.constant 0 : index
    %c0_94 = arith.constant 0 : index
    %93 = vector.load %arg2[%c11, %c0_93, %c0_94] : memref<16x128x256xbf16, #tpu.memory_space<vmem>>, vector<1x128x256xbf16>
    %94 = vector.shape_cast %93 : vector<1x128x256xbf16> to vector<128x256xbf16>
    %cst_95 = arith.constant dense<0.000000e+00> : vector<24x256xf32>
    %95 = tpu.matmul %92, %94, %cst_95 {dimension_numbers = #tpu.dot_dimension_numbers<[1], [0], [0], [1], [0, 0, 1, 1], [], []>} : vector<24x128xbf16>, vector<128x256xbf16>, vector<24x256xf32> -> vector<24x256xf32>
    %96 = arith.addf %88, %95 : vector<24x256xf32>
    %c0_96 = arith.constant 0 : index
    %c0_97 = arith.constant 0 : index
    %c3_98 = arith.constant 3 : index
    %c0_99 = arith.constant 0 : index
    %c0_100 = arith.constant 0 : index
    %97 = vector.load %arg1[%c0_96, %c0_97, %c3_98, %c0_99, %c0_100] : memref<1x1x6x11x128xf32, #tpu.memory_space<vmem>>, vector<1x1x3x8x128xf32>
    %98 = vector.shape_cast %97 : vector<1x1x3x8x128xf32> to vector<3x8x128xf32>
    %99 = vector.shape_cast %98 : vector<3x8x128xf32> to vector<24x128xf32>
    %100 = arith.truncf %99 : vector<24x128xf32> to vector<24x128xbf16>
    %c12 = arith.constant 12 : index
    %c0_101 = arith.constant 0 : index
    %c0_102 = arith.constant 0 : index
    %101 = vector.load %arg2[%c12, %c0_101, %c0_102] : memref<16x128x256xbf16, #tpu.memory_space<vmem>>, vector<1x128x256xbf16>
    %102 = vector.shape_cast %101 : vector<1x128x256xbf16> to vector<128x256xbf16>
    %cst_103 = arith.constant dense<0.000000e+00> : vector<24x256xf32>
    %103 = tpu.matmul %100, %102, %cst_103 {dimension_numbers = #tpu.dot_dimension_numbers<[1], [0], [0], [1], [0, 0, 1, 1], [], []>} : vector<24x128xbf16>, vector<128x256xbf16>, vector<24x256xf32> -> vector<24x256xf32>
    %104 = arith.addf %96, %103 : vector<24x256xf32>
    %c0_104 = arith.constant 0 : index
    %c0_105 = arith.constant 0 : index
    %c3_106 = arith.constant 3 : index
    %c1_107 = arith.constant 1 : index
    %c0_108 = arith.constant 0 : index
    %105 = vector.load %arg1[%c0_104, %c0_105, %c3_106, %c1_107, %c0_108] : memref<1x1x6x11x128xf32, #tpu.memory_space<vmem>>, vector<1x1x3x8x128xf32>
    %106 = vector.shape_cast %105 : vector<1x1x3x8x128xf32> to vector<3x8x128xf32>
    %107 = vector.shape_cast %106 : vector<3x8x128xf32> to vector<24x128xf32>
    %108 = arith.truncf %107 : vector<24x128xf32> to vector<24x128xbf16>
    %c13 = arith.constant 13 : index
    %c0_109 = arith.constant 0 : index
    %c0_110 = arith.constant 0 : index
    %109 = vector.load %arg2[%c13, %c0_109, %c0_110] : memref<16x128x256xbf16, #tpu.memory_space<vmem>>, vector<1x128x256xbf16>
    %110 = vector.shape_cast %109 : vector<1x128x256xbf16> to vector<128x256xbf16>
    %cst_111 = arith.constant dense<0.000000e+00> : vector<24x256xf32>
    %111 = tpu.matmul %108, %110, %cst_111 {dimension_numbers = #tpu.dot_dimension_numbers<[1], [0], [0], [1], [0, 0, 1, 1], [], []>} : vector<24x128xbf16>, vector<128x256xbf16>, vector<24x256xf32> -> vector<24x256xf32>
    %112 = arith.addf %104, %111 : vector<24x256xf32>
    %c0_112 = arith.constant 0 : index
    %c0_113 = arith.constant 0 : index
    %c3_114 = arith.constant 3 : index
    %c2_115 = arith.constant 2 : index
    %c0_116 = arith.constant 0 : index
    %113 = vector.load %arg1[%c0_112, %c0_113, %c3_114, %c2_115, %c0_116] : memref<1x1x6x11x128xf32, #tpu.memory_space<vmem>>, vector<1x1x3x8x128xf32>
    %114 = vector.shape_cast %113 : vector<1x1x3x8x128xf32> to vector<3x8x128xf32>
    %115 = vector.shape_cast %114 : vector<3x8x128xf32> to vector<24x128xf32>
    %116 = arith.truncf %115 : vector<24x128xf32> to vector<24x128xbf16>
    %c14 = arith.constant 14 : index
    %c0_117 = arith.constant 0 : index
    %c0_118 = arith.constant 0 : index
    %117 = vector.load %arg2[%c14, %c0_117, %c0_118] : memref<16x128x256xbf16, #tpu.memory_space<vmem>>, vector<1x128x256xbf16>
    %118 = vector.shape_cast %117 : vector<1x128x256xbf16> to vector<128x256xbf16>
    %cst_119 = arith.constant dense<0.000000e+00> : vector<24x256xf32>
    %119 = tpu.matmul %116, %118, %cst_119 {dimension_numbers = #tpu.dot_dimension_numbers<[1], [0], [0], [1], [0, 0, 1, 1], [], []>} : vector<24x128xbf16>, vector<128x256xbf16>, vector<24x256xf32> -> vector<24x256xf32>
    %120 = arith.addf %112, %119 : vector<24x256xf32>
    %c0_120 = arith.constant 0 : index
    %c0_121 = arith.constant 0 : index
    %c3_122 = arith.constant 3 : index
    %c3_123 = arith.constant 3 : index
    %c0_124 = arith.constant 0 : index
    %121 = vector.load %arg1[%c0_120, %c0_121, %c3_122, %c3_123, %c0_124] : memref<1x1x6x11x128xf32, #tpu.memory_space<vmem>>, vector<1x1x3x8x128xf32>
    %122 = vector.shape_cast %121 : vector<1x1x3x8x128xf32> to vector<3x8x128xf32>
    %123 = vector.shape_cast %122 : vector<3x8x128xf32> to vector<24x128xf32>
    %124 = arith.truncf %123 : vector<24x128xf32> to vector<24x128xbf16>
    %c15 = arith.constant 15 : index
    %c0_125 = arith.constant 0 : index
    %c0_126 = arith.constant 0 : index
    %125 = vector.load %arg2[%c15, %c0_125, %c0_126] : memref<16x128x256xbf16, #tpu.memory_space<vmem>>, vector<1x128x256xbf16>
    %126 = vector.shape_cast %125 : vector<1x128x256xbf16> to vector<128x256xbf16>
    %cst_127 = arith.constant dense<0.000000e+00> : vector<24x256xf32>
    %127 = tpu.matmul %124, %126, %cst_127 {dimension_numbers = #tpu.dot_dimension_numbers<[1], [0], [0], [1], [0, 0, 1, 1], [], []>} : vector<24x128xbf16>, vector<128x256xbf16>, vector<24x256xf32> -> vector<24x256xf32>
    %128 = arith.addf %120, %127 : vector<24x256xf32>
    %c0_128 = arith.constant 0 : index
    %c0_129 = arith.constant 0 : index
    %129 = vector.load %arg3[%c0_128, %c0_129] : memref<1x256xf32, #tpu.memory_space<vmem>>, vector<1x256xf32>
    %130 = vector.broadcast %129 : vector<1x256xf32> to vector<24x256xf32>
    %131 = arith.addf %128, %130 : vector<24x256xf32>
    %cst_130 = arith.constant 2.000000e-01 : f32
    %132 = vector.broadcast %cst_130 : f32 to vector<24x256xf32>
    %133 = arith.mulf %132, %131 : vector<24x256xf32>
    %134 = arith.maximumf %131, %133 : vector<24x256xf32>
    %135 = vector.shape_cast %134 : vector<24x256xf32> to vector<3x8x256xf32>
    %136 = vector.extract_strided_slice %135 {offsets = [0, 0, 0], sizes = [3, 3, 256], strides = [1, 1, 1]} : vector<3x8x256xf32> to vector<3x3x256xf32>
    %c0_131 = arith.constant 0 : index
    %c0_132 = arith.constant 0 : index
    %c0_133 = arith.constant 0 : index
    %c0_134 = arith.constant 0 : index
    %137 = vector.load %arg4[%c0_131, %c0_132, %c0_133, %c0_134] : memref<1x3x3x256xf32, #tpu.memory_space<vmem>>, vector<1x3x3x256xf32>
    %138 = vector.shape_cast %137 : vector<1x3x3x256xf32> to vector<3x3x256xf32>
    %139 = vector.shape_cast %136 : vector<3x3x256xf32> to vector<1x3x3x256xf32>
    tpu.vector_store %arg4[%c0_131, %c0_132, %c0_133, %c0_134], %139 {strides = array<i32>} : memref<1x3x3x256xf32, #tpu.memory_space<vmem>>, vector<1x3x3x256xf32>,
    return
  }
  func.func @transform_0(%arg0: i32) -> (i32, i32, i32, i32, i32) {
    %c0_i32 = arith.constant 0 : i32
    %c0_i32_0 = arith.constant 0 : i32
    %c0_i32_1 = arith.constant 0 : i32
    %c0_i32_2 = arith.constant 0 : i32
    %c0_i32_3 = arith.constant 0 : i32
    return %arg0, %c0_i32, %c0_i32_0, %c0_i32_1, %c0_i32_2 : i32, i32, i32, i32, i32
  }
  func.func @transform_1(%arg0: i32) -> (i32, i32, i32) {
    %c0_i32 = arith.constant 0 : i32
    %c0_i32_0 = arith.constant 0 : i32
    %c0_i32_1 = arith.constant 0 : i32
    %c0_i32_2 = arith.constant 0 : i32
    return %c0_i32, %c0_i32_0, %c0_i32_1 : i32, i32, i32
  }
  func.func @transform_2(%arg0: i32) -> (i32, i32) {
    %c0_i32 = arith.constant 0 : i32
    %c0_i32_0 = arith.constant 0 : i32
    %c0_i32_1 = arith.constant 0 : i32
    return %c0_i32, %c0_i32_0 : i32, i32
  }
  func.func @transform_3(%arg0: i32) -> (i32, i32, i32, i32) {
    %c0_i32 = arith.constant 0 : i32
    %c0_i32_0 = arith.constant 0 : i32
    %c0_i32_1 = arith.constant 0 : i32
    %c0_i32_2 = arith.constant 0 : i32
    return %arg0, %c0_i32, %c0_i32_0, %c0_i32_1 : i32, i32, i32, i32
  }
}

module attributes {stable_mosaic.version = 11 : i64} {
  func.func @_conv_bias_lrelu_kernel(%arg0: i32, %arg1: memref<1x1x5x11x256xf32, #tpu.memory_space<vmem>>, %arg2: memref<16x256x1xbf16, #tpu.memory_space<vmem>>, %arg3: memref<1x1xf32, #tpu.memory_space<vmem>>, %arg4: memref<1x2x2x1xf32, #tpu.memory_space<vmem>>) attributes {dimension_semantics = [#tpu.dimension_semantics<parallel>], iteration_bounds = array<i64: 2>, scalar_prefetch = 0 : i64, scratch_operands = 0 : i64, tpu.core_type = #tpu.core_type<tc>, window_params = [{transform_indices = @transform_0, window_bounds = array<i64: 1, 1, 5, 11, 256>}, {pipeline_mode = #tpu.pipeline_mode<synchronous>, transform_indices = @transform_1, window_bounds = array<i64: 16, 256, 1>}, {pipeline_mode = #tpu.pipeline_mode<synchronous>, transform_indices = @transform_2, window_bounds = array<i64: 1, 1>}, {transform_indices = @transform_3, window_bounds = array<i64: 1, 2, 2, 1>}]} {
    %cst = arith.constant 0.000000e+00 : f32
    %0 = vector.broadcast %cst : f32 to vector<16x1xf32>
    %c0 = arith.constant 0 : index
    %c0_0 = arith.constant 0 : index
    %c0_1 = arith.constant 0 : index
    %c0_2 = arith.constant 0 : index
    %c0_3 = arith.constant 0 : index
    %1 = vector.load %arg1[%c0, %c0_0, %c0_1, %c0_2, %c0_3] : memref<1x1x5x11x256xf32, #tpu.memory_space<vmem>>, vector<1x1x2x8x256xf32>
    %2 = vector.shape_cast %1 : vector<1x1x2x8x256xf32> to vector<2x8x256xf32>
    %3 = vector.shape_cast %2 : vector<2x8x256xf32> to vector<16x256xf32>
    %4 = arith.truncf %3 : vector<16x256xf32> to vector<16x256xbf16>
    %c0_4 = arith.constant 0 : index
    %c0_5 = arith.constant 0 : index
    %c0_6 = arith.constant 0 : index
    %5 = vector.load %arg2[%c0_4, %c0_5, %c0_6] : memref<16x256x1xbf16, #tpu.memory_space<vmem>>, vector<1x256x1xbf16>
    %6 = vector.shape_cast %5 : vector<1x256x1xbf16> to vector<256x1xbf16>
    %cst_7 = arith.constant dense<0.000000e+00> : vector<16x1xf32>
    %7 = tpu.matmul %4, %6, %cst_7 {dimension_numbers = #tpu.dot_dimension_numbers<[1], [0], [0], [1], [0, 0, 1, 1], [], []>} : vector<16x256xbf16>, vector<256x1xbf16>, vector<16x1xf32> -> vector<16x1xf32>
    %8 = arith.addf %0, %7 : vector<16x1xf32>
    %c0_8 = arith.constant 0 : index
    %c0_9 = arith.constant 0 : index
    %c0_10 = arith.constant 0 : index
    %c1 = arith.constant 1 : index
    %c0_11 = arith.constant 0 : index
    %9 = vector.load %arg1[%c0_8, %c0_9, %c0_10, %c1, %c0_11] : memref<1x1x5x11x256xf32, #tpu.memory_space<vmem>>, vector<1x1x2x8x256xf32>
    %10 = vector.shape_cast %9 : vector<1x1x2x8x256xf32> to vector<2x8x256xf32>
    %11 = vector.shape_cast %10 : vector<2x8x256xf32> to vector<16x256xf32>
    %12 = arith.truncf %11 : vector<16x256xf32> to vector<16x256xbf16>
    %c1_12 = arith.constant 1 : index
    %c0_13 = arith.constant 0 : index
    %c0_14 = arith.constant 0 : index
    %13 = vector.load %arg2[%c1_12, %c0_13, %c0_14] : memref<16x256x1xbf16, #tpu.memory_space<vmem>>, vector<1x256x1xbf16>
    %14 = vector.shape_cast %13 : vector<1x256x1xbf16> to vector<256x1xbf16>
    %cst_15 = arith.constant dense<0.000000e+00> : vector<16x1xf32>
    %15 = tpu.matmul %12, %14, %cst_15 {dimension_numbers = #tpu.dot_dimension_numbers<[1], [0], [0], [1], [0, 0, 1, 1], [], []>} : vector<16x256xbf16>, vector<256x1xbf16>, vector<16x1xf32> -> vector<16x1xf32>
    %16 = arith.addf %8, %15 : vector<16x1xf32>
    %c0_16 = arith.constant 0 : index
    %c0_17 = arith.constant 0 : index
    %c0_18 = arith.constant 0 : index
    %c2 = arith.constant 2 : index
    %c0_19 = arith.constant 0 : index
    %17 = vector.load %arg1[%c0_16, %c0_17, %c0_18, %c2, %c0_19] : memref<1x1x5x11x256xf32, #tpu.memory_space<vmem>>, vector<1x1x2x8x256xf32>
    %18 = vector.shape_cast %17 : vector<1x1x2x8x256xf32> to vector<2x8x256xf32>
    %19 = vector.shape_cast %18 : vector<2x8x256xf32> to vector<16x256xf32>
    %20 = arith.truncf %19 : vector<16x256xf32> to vector<16x256xbf16>
    %c2_20 = arith.constant 2 : index
    %c0_21 = arith.constant 0 : index
    %c0_22 = arith.constant 0 : index
    %21 = vector.load %arg2[%c2_20, %c0_21, %c0_22] : memref<16x256x1xbf16, #tpu.memory_space<vmem>>, vector<1x256x1xbf16>
    %22 = vector.shape_cast %21 : vector<1x256x1xbf16> to vector<256x1xbf16>
    %cst_23 = arith.constant dense<0.000000e+00> : vector<16x1xf32>
    %23 = tpu.matmul %20, %22, %cst_23 {dimension_numbers = #tpu.dot_dimension_numbers<[1], [0], [0], [1], [0, 0, 1, 1], [], []>} : vector<16x256xbf16>, vector<256x1xbf16>, vector<16x1xf32> -> vector<16x1xf32>
    %24 = arith.addf %16, %23 : vector<16x1xf32>
    %c0_24 = arith.constant 0 : index
    %c0_25 = arith.constant 0 : index
    %c0_26 = arith.constant 0 : index
    %c3 = arith.constant 3 : index
    %c0_27 = arith.constant 0 : index
    %25 = vector.load %arg1[%c0_24, %c0_25, %c0_26, %c3, %c0_27] : memref<1x1x5x11x256xf32, #tpu.memory_space<vmem>>, vector<1x1x2x8x256xf32>
    %26 = vector.shape_cast %25 : vector<1x1x2x8x256xf32> to vector<2x8x256xf32>
    %27 = vector.shape_cast %26 : vector<2x8x256xf32> to vector<16x256xf32>
    %28 = arith.truncf %27 : vector<16x256xf32> to vector<16x256xbf16>
    %c3_28 = arith.constant 3 : index
    %c0_29 = arith.constant 0 : index
    %c0_30 = arith.constant 0 : index
    %29 = vector.load %arg2[%c3_28, %c0_29, %c0_30] : memref<16x256x1xbf16, #tpu.memory_space<vmem>>, vector<1x256x1xbf16>
    %30 = vector.shape_cast %29 : vector<1x256x1xbf16> to vector<256x1xbf16>
    %cst_31 = arith.constant dense<0.000000e+00> : vector<16x1xf32>
    %31 = tpu.matmul %28, %30, %cst_31 {dimension_numbers = #tpu.dot_dimension_numbers<[1], [0], [0], [1], [0, 0, 1, 1], [], []>} : vector<16x256xbf16>, vector<256x1xbf16>, vector<16x1xf32> -> vector<16x1xf32>
    %32 = arith.addf %24, %31 : vector<16x1xf32>
    %c0_32 = arith.constant 0 : index
    %c0_33 = arith.constant 0 : index
    %c1_34 = arith.constant 1 : index
    %c0_35 = arith.constant 0 : index
    %c0_36 = arith.constant 0 : index
    %33 = vector.load %arg1[%c0_32, %c0_33, %c1_34, %c0_35, %c0_36] : memref<1x1x5x11x256xf32, #tpu.memory_space<vmem>>, vector<1x1x2x8x256xf32>
    %34 = vector.shape_cast %33 : vector<1x1x2x8x256xf32> to vector<2x8x256xf32>
    %35 = vector.shape_cast %34 : vector<2x8x256xf32> to vector<16x256xf32>
    %36 = arith.truncf %35 : vector<16x256xf32> to vector<16x256xbf16>
    %c4 = arith.constant 4 : index
    %c0_37 = arith.constant 0 : index
    %c0_38 = arith.constant 0 : index
    %37 = vector.load %arg2[%c4, %c0_37, %c0_38] : memref<16x256x1xbf16, #tpu.memory_space<vmem>>, vector<1x256x1xbf16>
    %38 = vector.shape_cast %37 : vector<1x256x1xbf16> to vector<256x1xbf16>
    %cst_39 = arith.constant dense<0.000000e+00> : vector<16x1xf32>
    %39 = tpu.matmul %36, %38, %cst_39 {dimension_numbers = #tpu.dot_dimension_numbers<[1], [0], [0], [1], [0, 0, 1, 1], [], []>} : vector<16x256xbf16>, vector<256x1xbf16>, vector<16x1xf32> -> vector<16x1xf32>
    %40 = arith.addf %32, %39 : vector<16x1xf32>
    %c0_40 = arith.constant 0 : index
    %c0_41 = arith.constant 0 : index
    %c1_42 = arith.constant 1 : index
    %c1_43 = arith.constant 1 : index
    %c0_44 = arith.constant 0 : index
    %41 = vector.load %arg1[%c0_40, %c0_41, %c1_42, %c1_43, %c0_44] : memref<1x1x5x11x256xf32, #tpu.memory_space<vmem>>, vector<1x1x2x8x256xf32>
    %42 = vector.shape_cast %41 : vector<1x1x2x8x256xf32> to vector<2x8x256xf32>
    %43 = vector.shape_cast %42 : vector<2x8x256xf32> to vector<16x256xf32>
    %44 = arith.truncf %43 : vector<16x256xf32> to vector<16x256xbf16>
    %c5 = arith.constant 5 : index
    %c0_45 = arith.constant 0 : index
    %c0_46 = arith.constant 0 : index
    %45 = vector.load %arg2[%c5, %c0_45, %c0_46] : memref<16x256x1xbf16, #tpu.memory_space<vmem>>, vector<1x256x1xbf16>
    %46 = vector.shape_cast %45 : vector<1x256x1xbf16> to vector<256x1xbf16>
    %cst_47 = arith.constant dense<0.000000e+00> : vector<16x1xf32>
    %47 = tpu.matmul %44, %46, %cst_47 {dimension_numbers = #tpu.dot_dimension_numbers<[1], [0], [0], [1], [0, 0, 1, 1], [], []>} : vector<16x256xbf16>, vector<256x1xbf16>, vector<16x1xf32> -> vector<16x1xf32>
    %48 = arith.addf %40, %47 : vector<16x1xf32>
    %c0_48 = arith.constant 0 : index
    %c0_49 = arith.constant 0 : index
    %c1_50 = arith.constant 1 : index
    %c2_51 = arith.constant 2 : index
    %c0_52 = arith.constant 0 : index
    %49 = vector.load %arg1[%c0_48, %c0_49, %c1_50, %c2_51, %c0_52] : memref<1x1x5x11x256xf32, #tpu.memory_space<vmem>>, vector<1x1x2x8x256xf32>
    %50 = vector.shape_cast %49 : vector<1x1x2x8x256xf32> to vector<2x8x256xf32>
    %51 = vector.shape_cast %50 : vector<2x8x256xf32> to vector<16x256xf32>
    %52 = arith.truncf %51 : vector<16x256xf32> to vector<16x256xbf16>
    %c6 = arith.constant 6 : index
    %c0_53 = arith.constant 0 : index
    %c0_54 = arith.constant 0 : index
    %53 = vector.load %arg2[%c6, %c0_53, %c0_54] : memref<16x256x1xbf16, #tpu.memory_space<vmem>>, vector<1x256x1xbf16>
    %54 = vector.shape_cast %53 : vector<1x256x1xbf16> to vector<256x1xbf16>
    %cst_55 = arith.constant dense<0.000000e+00> : vector<16x1xf32>
    %55 = tpu.matmul %52, %54, %cst_55 {dimension_numbers = #tpu.dot_dimension_numbers<[1], [0], [0], [1], [0, 0, 1, 1], [], []>} : vector<16x256xbf16>, vector<256x1xbf16>, vector<16x1xf32> -> vector<16x1xf32>
    %56 = arith.addf %48, %55 : vector<16x1xf32>
    %c0_56 = arith.constant 0 : index
    %c0_57 = arith.constant 0 : index
    %c1_58 = arith.constant 1 : index
    %c3_59 = arith.constant 3 : index
    %c0_60 = arith.constant 0 : index
    %57 = vector.load %arg1[%c0_56, %c0_57, %c1_58, %c3_59, %c0_60] : memref<1x1x5x11x256xf32, #tpu.memory_space<vmem>>, vector<1x1x2x8x256xf32>
    %58 = vector.shape_cast %57 : vector<1x1x2x8x256xf32> to vector<2x8x256xf32>
    %59 = vector.shape_cast %58 : vector<2x8x256xf32> to vector<16x256xf32>
    %60 = arith.truncf %59 : vector<16x256xf32> to vector<16x256xbf16>
    %c7 = arith.constant 7 : index
    %c0_61 = arith.constant 0 : index
    %c0_62 = arith.constant 0 : index
    %61 = vector.load %arg2[%c7, %c0_61, %c0_62] : memref<16x256x1xbf16, #tpu.memory_space<vmem>>, vector<1x256x1xbf16>
    %62 = vector.shape_cast %61 : vector<1x256x1xbf16> to vector<256x1xbf16>
    %cst_63 = arith.constant dense<0.000000e+00> : vector<16x1xf32>
    %63 = tpu.matmul %60, %62, %cst_63 {dimension_numbers = #tpu.dot_dimension_numbers<[1], [0], [0], [1], [0, 0, 1, 1], [], []>} : vector<16x256xbf16>, vector<256x1xbf16>, vector<16x1xf32> -> vector<16x1xf32>
    %64 = arith.addf %56, %63 : vector<16x1xf32>
    %c0_64 = arith.constant 0 : index
    %c0_65 = arith.constant 0 : index
    %c2_66 = arith.constant 2 : index
    %c0_67 = arith.constant 0 : index
    %c0_68 = arith.constant 0 : index
    %65 = vector.load %arg1[%c0_64, %c0_65, %c2_66, %c0_67, %c0_68] : memref<1x1x5x11x256xf32, #tpu.memory_space<vmem>>, vector<1x1x2x8x256xf32>
    %66 = vector.shape_cast %65 : vector<1x1x2x8x256xf32> to vector<2x8x256xf32>
    %67 = vector.shape_cast %66 : vector<2x8x256xf32> to vector<16x256xf32>
    %68 = arith.truncf %67 : vector<16x256xf32> to vector<16x256xbf16>
    %c8 = arith.constant 8 : index
    %c0_69 = arith.constant 0 : index
    %c0_70 = arith.constant 0 : index
    %69 = vector.load %arg2[%c8, %c0_69, %c0_70] : memref<16x256x1xbf16, #tpu.memory_space<vmem>>, vector<1x256x1xbf16>
    %70 = vector.shape_cast %69 : vector<1x256x1xbf16> to vector<256x1xbf16>
    %cst_71 = arith.constant dense<0.000000e+00> : vector<16x1xf32>
    %71 = tpu.matmul %68, %70, %cst_71 {dimension_numbers = #tpu.dot_dimension_numbers<[1], [0], [0], [1], [0, 0, 1, 1], [], []>} : vector<16x256xbf16>, vector<256x1xbf16>, vector<16x1xf32> -> vector<16x1xf32>
    %72 = arith.addf %64, %71 : vector<16x1xf32>
    %c0_72 = arith.constant 0 : index
    %c0_73 = arith.constant 0 : index
    %c2_74 = arith.constant 2 : index
    %c1_75 = arith.constant 1 : index
    %c0_76 = arith.constant 0 : index
    %73 = vector.load %arg1[%c0_72, %c0_73, %c2_74, %c1_75, %c0_76] : memref<1x1x5x11x256xf32, #tpu.memory_space<vmem>>, vector<1x1x2x8x256xf32>
    %74 = vector.shape_cast %73 : vector<1x1x2x8x256xf32> to vector<2x8x256xf32>
    %75 = vector.shape_cast %74 : vector<2x8x256xf32> to vector<16x256xf32>
    %76 = arith.truncf %75 : vector<16x256xf32> to vector<16x256xbf16>
    %c9 = arith.constant 9 : index
    %c0_77 = arith.constant 0 : index
    %c0_78 = arith.constant 0 : index
    %77 = vector.load %arg2[%c9, %c0_77, %c0_78] : memref<16x256x1xbf16, #tpu.memory_space<vmem>>, vector<1x256x1xbf16>
    %78 = vector.shape_cast %77 : vector<1x256x1xbf16> to vector<256x1xbf16>
    %cst_79 = arith.constant dense<0.000000e+00> : vector<16x1xf32>
    %79 = tpu.matmul %76, %78, %cst_79 {dimension_numbers = #tpu.dot_dimension_numbers<[1], [0], [0], [1], [0, 0, 1, 1], [], []>} : vector<16x256xbf16>, vector<256x1xbf16>, vector<16x1xf32> -> vector<16x1xf32>
    %80 = arith.addf %72, %79 : vector<16x1xf32>
    %c0_80 = arith.constant 0 : index
    %c0_81 = arith.constant 0 : index
    %c2_82 = arith.constant 2 : index
    %c2_83 = arith.constant 2 : index
    %c0_84 = arith.constant 0 : index
    %81 = vector.load %arg1[%c0_80, %c0_81, %c2_82, %c2_83, %c0_84] : memref<1x1x5x11x256xf32, #tpu.memory_space<vmem>>, vector<1x1x2x8x256xf32>
    %82 = vector.shape_cast %81 : vector<1x1x2x8x256xf32> to vector<2x8x256xf32>
    %83 = vector.shape_cast %82 : vector<2x8x256xf32> to vector<16x256xf32>
    %84 = arith.truncf %83 : vector<16x256xf32> to vector<16x256xbf16>
    %c10 = arith.constant 10 : index
    %c0_85 = arith.constant 0 : index
    %c0_86 = arith.constant 0 : index
    %85 = vector.load %arg2[%c10, %c0_85, %c0_86] : memref<16x256x1xbf16, #tpu.memory_space<vmem>>, vector<1x256x1xbf16>
    %86 = vector.shape_cast %85 : vector<1x256x1xbf16> to vector<256x1xbf16>
    %cst_87 = arith.constant dense<0.000000e+00> : vector<16x1xf32>
    %87 = tpu.matmul %84, %86, %cst_87 {dimension_numbers = #tpu.dot_dimension_numbers<[1], [0], [0], [1], [0, 0, 1, 1], [], []>} : vector<16x256xbf16>, vector<256x1xbf16>, vector<16x1xf32> -> vector<16x1xf32>
    %88 = arith.addf %80, %87 : vector<16x1xf32>
    %c0_88 = arith.constant 0 : index
    %c0_89 = arith.constant 0 : index
    %c2_90 = arith.constant 2 : index
    %c3_91 = arith.constant 3 : index
    %c0_92 = arith.constant 0 : index
    %89 = vector.load %arg1[%c0_88, %c0_89, %c2_90, %c3_91, %c0_92] : memref<1x1x5x11x256xf32, #tpu.memory_space<vmem>>, vector<1x1x2x8x256xf32>
    %90 = vector.shape_cast %89 : vector<1x1x2x8x256xf32> to vector<2x8x256xf32>
    %91 = vector.shape_cast %90 : vector<2x8x256xf32> to vector<16x256xf32>
    %92 = arith.truncf %91 : vector<16x256xf32> to vector<16x256xbf16>
    %c11 = arith.constant 11 : index
    %c0_93 = arith.constant 0 : index
    %c0_94 = arith.constant 0 : index
    %93 = vector.load %arg2[%c11, %c0_93, %c0_94] : memref<16x256x1xbf16, #tpu.memory_space<vmem>>, vector<1x256x1xbf16>
    %94 = vector.shape_cast %93 : vector<1x256x1xbf16> to vector<256x1xbf16>
    %cst_95 = arith.constant dense<0.000000e+00> : vector<16x1xf32>
    %95 = tpu.matmul %92, %94, %cst_95 {dimension_numbers = #tpu.dot_dimension_numbers<[1], [0], [0], [1], [0, 0, 1, 1], [], []>} : vector<16x256xbf16>, vector<256x1xbf16>, vector<16x1xf32> -> vector<16x1xf32>
    %96 = arith.addf %88, %95 : vector<16x1xf32>
    %c0_96 = arith.constant 0 : index
    %c0_97 = arith.constant 0 : index
    %c3_98 = arith.constant 3 : index
    %c0_99 = arith.constant 0 : index
    %c0_100 = arith.constant 0 : index
    %97 = vector.load %arg1[%c0_96, %c0_97, %c3_98, %c0_99, %c0_100] : memref<1x1x5x11x256xf32, #tpu.memory_space<vmem>>, vector<1x1x2x8x256xf32>
    %98 = vector.shape_cast %97 : vector<1x1x2x8x256xf32> to vector<2x8x256xf32>
    %99 = vector.shape_cast %98 : vector<2x8x256xf32> to vector<16x256xf32>
    %100 = arith.truncf %99 : vector<16x256xf32> to vector<16x256xbf16>
    %c12 = arith.constant 12 : index
    %c0_101 = arith.constant 0 : index
    %c0_102 = arith.constant 0 : index
    %101 = vector.load %arg2[%c12, %c0_101, %c0_102] : memref<16x256x1xbf16, #tpu.memory_space<vmem>>, vector<1x256x1xbf16>
    %102 = vector.shape_cast %101 : vector<1x256x1xbf16> to vector<256x1xbf16>
    %cst_103 = arith.constant dense<0.000000e+00> : vector<16x1xf32>
    %103 = tpu.matmul %100, %102, %cst_103 {dimension_numbers = #tpu.dot_dimension_numbers<[1], [0], [0], [1], [0, 0, 1, 1], [], []>} : vector<16x256xbf16>, vector<256x1xbf16>, vector<16x1xf32> -> vector<16x1xf32>
    %104 = arith.addf %96, %103 : vector<16x1xf32>
    %c0_104 = arith.constant 0 : index
    %c0_105 = arith.constant 0 : index
    %c3_106 = arith.constant 3 : index
    %c1_107 = arith.constant 1 : index
    %c0_108 = arith.constant 0 : index
    %105 = vector.load %arg1[%c0_104, %c0_105, %c3_106, %c1_107, %c0_108] : memref<1x1x5x11x256xf32, #tpu.memory_space<vmem>>, vector<1x1x2x8x256xf32>
    %106 = vector.shape_cast %105 : vector<1x1x2x8x256xf32> to vector<2x8x256xf32>
    %107 = vector.shape_cast %106 : vector<2x8x256xf32> to vector<16x256xf32>
    %108 = arith.truncf %107 : vector<16x256xf32> to vector<16x256xbf16>
    %c13 = arith.constant 13 : index
    %c0_109 = arith.constant 0 : index
    %c0_110 = arith.constant 0 : index
    %109 = vector.load %arg2[%c13, %c0_109, %c0_110] : memref<16x256x1xbf16, #tpu.memory_space<vmem>>, vector<1x256x1xbf16>
    %110 = vector.shape_cast %109 : vector<1x256x1xbf16> to vector<256x1xbf16>
    %cst_111 = arith.constant dense<0.000000e+00> : vector<16x1xf32>
    %111 = tpu.matmul %108, %110, %cst_111 {dimension_numbers = #tpu.dot_dimension_numbers<[1], [0], [0], [1], [0, 0, 1, 1], [], []>} : vector<16x256xbf16>, vector<256x1xbf16>, vector<16x1xf32> -> vector<16x1xf32>
    %112 = arith.addf %104, %111 : vector<16x1xf32>
    %c0_112 = arith.constant 0 : index
    %c0_113 = arith.constant 0 : index
    %c3_114 = arith.constant 3 : index
    %c2_115 = arith.constant 2 : index
    %c0_116 = arith.constant 0 : index
    %113 = vector.load %arg1[%c0_112, %c0_113, %c3_114, %c2_115, %c0_116] : memref<1x1x5x11x256xf32, #tpu.memory_space<vmem>>, vector<1x1x2x8x256xf32>
    %114 = vector.shape_cast %113 : vector<1x1x2x8x256xf32> to vector<2x8x256xf32>
    %115 = vector.shape_cast %114 : vector<2x8x256xf32> to vector<16x256xf32>
    %116 = arith.truncf %115 : vector<16x256xf32> to vector<16x256xbf16>
    %c14 = arith.constant 14 : index
    %c0_117 = arith.constant 0 : index
    %c0_118 = arith.constant 0 : index
    %117 = vector.load %arg2[%c14, %c0_117, %c0_118] : memref<16x256x1xbf16, #tpu.memory_space<vmem>>, vector<1x256x1xbf16>
    %118 = vector.shape_cast %117 : vector<1x256x1xbf16> to vector<256x1xbf16>
    %cst_119 = arith.constant dense<0.000000e+00> : vector<16x1xf32>
    %119 = tpu.matmul %116, %118, %cst_119 {dimension_numbers = #tpu.dot_dimension_numbers<[1], [0], [0], [1], [0, 0, 1, 1], [], []>} : vector<16x256xbf16>, vector<256x1xbf16>, vector<16x1xf32> -> vector<16x1xf32>
    %120 = arith.addf %112, %119 : vector<16x1xf32>
    %c0_120 = arith.constant 0 : index
    %c0_121 = arith.constant 0 : index
    %c3_122 = arith.constant 3 : index
    %c3_123 = arith.constant 3 : index
    %c0_124 = arith.constant 0 : index
    %121 = vector.load %arg1[%c0_120, %c0_121, %c3_122, %c3_123, %c0_124] : memref<1x1x5x11x256xf32, #tpu.memory_space<vmem>>, vector<1x1x2x8x256xf32>
    %122 = vector.shape_cast %121 : vector<1x1x2x8x256xf32> to vector<2x8x256xf32>
    %123 = vector.shape_cast %122 : vector<2x8x256xf32> to vector<16x256xf32>
    %124 = arith.truncf %123 : vector<16x256xf32> to vector<16x256xbf16>
    %c15 = arith.constant 15 : index
    %c0_125 = arith.constant 0 : index
    %c0_126 = arith.constant 0 : index
    %125 = vector.load %arg2[%c15, %c0_125, %c0_126] : memref<16x256x1xbf16, #tpu.memory_space<vmem>>, vector<1x256x1xbf16>
    %126 = vector.shape_cast %125 : vector<1x256x1xbf16> to vector<256x1xbf16>
    %cst_127 = arith.constant dense<0.000000e+00> : vector<16x1xf32>
    %127 = tpu.matmul %124, %126, %cst_127 {dimension_numbers = #tpu.dot_dimension_numbers<[1], [0], [0], [1], [0, 0, 1, 1], [], []>} : vector<16x256xbf16>, vector<256x1xbf16>, vector<16x1xf32> -> vector<16x1xf32>
    %128 = arith.addf %120, %127 : vector<16x1xf32>
    %c0_128 = arith.constant 0 : index
    %c0_129 = arith.constant 0 : index
    %129 = vector.load %arg3[%c0_128, %c0_129] : memref<1x1xf32, #tpu.memory_space<vmem>>, vector<1x1xf32>
    %130 = vector.broadcast %129 : vector<1x1xf32> to vector<16x1xf32>
    %131 = arith.addf %128, %130 : vector<16x1xf32>
    %132 = vector.shape_cast %131 : vector<16x1xf32> to vector<2x8x1xf32>
    %133 = vector.extract_strided_slice %132 {offsets = [0, 0, 0], sizes = [2, 2, 1], strides = [1, 1, 1]} : vector<2x8x1xf32> to vector<2x2x1xf32>
    %c0_130 = arith.constant 0 : index
    %c0_131 = arith.constant 0 : index
    %c0_132 = arith.constant 0 : index
    %c0_133 = arith.constant 0 : index
    %134 = vector.load %arg4[%c0_130, %c0_131, %c0_132, %c0_133] : memref<1x2x2x1xf32, #tpu.memory_space<vmem>>, vector<1x2x2x1xf32>
    %135 = vector.shape_cast %134 : vector<1x2x2x1xf32> to vector<2x2x1xf32>
    %136 = vector.shape_cast %133 : vector<2x2x1xf32> to vector<1x2x2x1xf32>
    tpu.vector_store %arg4[%c0_130, %c0_131, %c0_132, %c0_133], %136 {strides = array<i32>} : memref<1x2x2x1xf32, #tpu.memory_space<vmem>>, vector<1x2x2x1xf32>,
    return
  }
  func.func @transform_0(%arg0: i32) -> (i32, i32, i32, i32, i32) {
    %c0_i32 = arith.constant 0 : i32
    %c0_i32_0 = arith.constant 0 : i32
    %c0_i32_1 = arith.constant 0 : i32
    %c0_i32_2 = arith.constant 0 : i32
    %c0_i32_3 = arith.constant 0 : i32
    return %arg0, %c0_i32, %c0_i32_0, %c0_i32_1, %c0_i32_2 : i32, i32, i32, i32, i32
  }
  func.func @transform_1(%arg0: i32) -> (i32, i32, i32) {
    %c0_i32 = arith.constant 0 : i32
    %c0_i32_0 = arith.constant 0 : i32
    %c0_i32_1 = arith.constant 0 : i32
    %c0_i32_2 = arith.constant 0 : i32
    return %c0_i32, %c0_i32_0, %c0_i32_1 : i32, i32, i32
  }
  func.func @transform_2(%arg0: i32) -> (i32, i32) {
    %c0_i32 = arith.constant 0 : i32
    %c0_i32_0 = arith.constant 0 : i32
    %c0_i32_1 = arith.constant 0 : i32
    return %c0_i32, %c0_i32_0 : i32, i32
  }
  func.func @transform_3(%arg0: i32) -> (i32, i32, i32, i32) {
    %c0_i32 = arith.constant 0 : i32
    %c0_i32_0 = arith.constant 0 : i32
    %c0_i32_1 = arith.constant 0 : i32
    %c0_i32_2 = arith.constant 0 : i32
    return %arg0, %c0_i32, %c0_i32_0, %c0_i32_1 : i32, i32, i32, i32
  }
}

</mosaic_0001>

<bundles_post_ra>
// kernel: discriminator_forward.5
= control target key start
LH: loop header
LB: loop body
LE: loop exit
PB: predicated region body
PF: predicated region fallthrough
CT: control target
= control target key end

     0   :  { %s7091_s12 = smov 0   ;;  %s7969_s0 = inlined_call_operand.vmem [shape: f32[2,4,17,17,4], index: 0, kind: input, shape index: {}]   ;;  %s7970_s1 = inlined_call_operand.vmem [shape: bf16[16,4,32], index: 1, kind: input, shape index: {}]   ;;  %s7971_s2 = inlined_call_operand.vmem [shape: f32[1,32], index: 2, kind: input, shape index: {}]   ;;  %s7972_s3 = inlined_call_operand.vmem [shape: f32[2,16,16,32], index: 3, kind: output, shape index: {}]  }
   0x1 LB: > { %s5011_s13 = sadd.s32 4294967295, %s7069_s12   ;;  %p5015_p0 = scmp.ge.s32.totalorder %s7069_s12, 1  ;;  %s7069_s12 = sphi %s7091_s12, %s13_s12  }
   0x2   : > { %p137_p1 = scmp.lt.s32.totalorder %s7069_s12, 3 }
   0x4   : > { %p138_p2 = pnand %p5015_p0, %p137_p1 }
   0x5   : > { %v5051_v0 = vld [vmem:[%s7970_s1 + $0x2] sm:$0x3] (!%p138_p2)  ;;  %vm321_vm0 = vcmask (!%p138_p2), 1041408   ;;  %v5378_v1 = vld [vmem:[%s7970_s1 + $0x10] sm:$0x3] (!%p138_p2)  ;;  %p161_p3 = scmp.lt.s32.totalorder (!%p138_p2), %s5011_s13, 1 }
   0x6   : > { %141 = sbr.rel (%p138_p2) target bundleno = 751 (0x2ef), region = 32  ;;  %7038 = vmatprep.subr.msk.bf16.mxu1 (!%p138_p2), %vm321_vm0, %v5051_v0  ;;  %7046 = vmatprep.subr.msk.bf16.mxu0 (!%p138_p2), %vm321_vm0, %v5378_v1  ;;  %v323_v2 = vsel (!%p138_p2), %vm321_vm0, %v5051_v0, 0  ;;  %v2564_v3 = vsel (!%p138_p2), %vm321_vm0, %v5378_v1, 0  ;;  %v220_v4 = vld [vmem:[%s7970_s1] sm:$0x3] (!%p138_p2)  ;;  %vm272_vm1 = vcmask (!%p138_p2), 31744  }
   0x7   : > { %6015 = vmatpush3.bf16.msra.mxu1 (!%p138_p2), %v323_v2  ;;  %6287 = vmatpush3.bf16.msra.mxu0 (!%p138_p2), %v2564_v3  ;;  %v5427_v5 = vld [vmem:[%s7970_s1 + $0x12] sm:$0x3] (!%p138_p2)  ;;  %v535_v15 = vsel (!%p138_p2), %vm321_vm0, %v220_v4, 0  ;;  %v7157_v26 = vld [vmem:[%s7970_s1 + $0x4] sm:$0x3] (!%p138_p2)  ;;  %vm4923_vm2 = vcmask (!%p138_p2), 261120  }
   0x8   : > { %7039 = vmatprep.subr.msk.bf16.mxu1 (!%p138_p2), %vm321_vm0, %v220_v4  ;;  %7047 = vmatprep.subr.msk.bf16.mxu0 (!%p138_p2), %vm321_vm0, %v5427_v5  ;;  %v2859_v20 = vsel (!%p138_p2), %vm321_vm0, %v5427_v5, 0  ;;  %v7162_v27 = vld [vmem:[%s7970_s1 + $0x14] sm:$0x3] (!%p138_p2) }
   0xd   : > { %s7974_s13 = smov (!%p161_p3, %s5011_s13), 1 }
   0xe   : > { %s7054_s22 = smul.u32 1632, %s7974_s13 }
  0x10   : > { %s7123_s25 = scalar_lea.vmem %s7969_s0, %s7054_s22 }
  0x11   : > { %v5019_v6 = vld [vmem:[%s7123_s25 + $0x198] sm:$0xff]  ;;  %v5020_v7 = vld [vmem:[%s7123_s25 + $0x1a0] sm:$0xff]  ;;  %v5021_v11 = vld [vmem:[%s7123_s25 + $0x1b0] sm:$0xff] }
  0x12   : > { %v5346_v8 = vld [vmem:[%s7123_s25 + $0x18] sm:$0xff]  ;;  %v254_v9 = vpack.c.bf16 %v5020_v7, %v5019_v6  ;;  %v5347_v10 = vld [vmem:[%s7123_s25 + $0x20] sm:$0xff]  ;;  %v5348_v16 = vld [vmem:[%s7123_s25 + $0x30] sm:$0xff] }
  0x13   : > { %v5022_v12 = vld [vmem:[%s7123_s25 + $0x1b8] sm:$0xff]  ;;  %v7131_v13 = vpack.c.bf16 %v5347_v10, %v5346_v8  ;;  %v5023_v18 = vld [vmem:[%s7123_s25 + $0x1c8] sm:$0xff]  ;;  %v5024_v21 = vld [vmem:[%s7123_s25 + $0x1d0] sm:$0xff] }
  0x14   : > { %v7133_v14 = vpack.c.bf16 %v5022_v12, %v5021_v11  ;;  %v5349_v17 = vld [vmem:[%s7123_s25 + $0x38] sm:$0xff]  ;;  %6016 = vmatprep.mubr.msk.bf16.mxu1 %vm272_vm1, %v254_v9  ;;  %v5350_v22 = vld [vmem:[%s7123_s25 + $0x48] sm:$0xff]  ;;  %v5351_v23 = vld [vmem:[%s7123_s25 + $0x50] sm:$0xff]  ;;  %v7150_v24 = vpack.c.bf16 %v5024_v21, %v5023_v18 }
  0x15   : > { %v7140_v19 = vpack.c.bf16 %v5349_v17, %v5348_v16  ;;  %6288 = vmatprep.mubr.msk.bf16.mxu0 %vm272_vm1, %v7131_v13  ;;  %v7152_v25 = vpack.c.bf16 %v5351_v23, %v5350_v22  ;;  %v5025_v28 = vld [vmem:[%s7123_s25 + $0x1e0] sm:$0xff]  ;;  %v5026_v29 = vld [vmem:[%s7123_s25 + $0x1e8] sm:$0xff]  ;;  %v5027_v32 = vld [vmem:[%s7123_s25 + $0x1f8] sm:$0xff] }
  0x16   : > { %6017 = vmatmul.mubr.msk.bf16.vlgmr.msra.gmra.mrb[0].mxu1 %vm272_vm1, %v7133_v14  ;;  %v5352_v30 = vld [vmem:[%s7123_s25 + $0x60] sm:$0xff]  ;;  %v5353_v31 = vld [vmem:[%s7123_s25 + $0x68] sm:$0xff]  ;;  %v5354_v34 = vld [vmem:[%s7123_s25 + $0x78] sm:$0xff]  ;;  %v7180_v36 = vpack.c.bf16 %v5026_v29, %v5025_v28 }
  0x17   : > { %6049 = vmatpush3.bf16.msra.mxu1 %v535_v15  ;;  %6289 = vmatmul.mubr.msk.bf16.vlgmr.msra.gmra.mrb[0].mxu0 %vm272_vm1, %v7140_v19  ;;  %v5028_v33 = vld [vmem:[%s7123_s25 + $0x200] sm:$0xff]  ;;  %v7184_v37 = vpack.c.bf16 %v5353_v31, %v5352_v30  ;;  %v5029_v40 = vld [vmem:[%s7123_s25 + $0x210] sm:$0xff]  ;;  %v5030_v41 = vld [vmem:[%s7123_s25 + $0x218] sm:$0xff] }
  0x18   : > { %6321 = vmatpush3.bf16.msra.mxu0 %v2859_v20  ;;  %6020 = vmatprep.mubr.msk.bf16.mxu1 %vm272_vm1, %v7150_v24  ;;  %v5355_v35 = vld [vmem:[%s7123_s25 + $0x80] sm:$0xff]  ;;  %v7186_v38 = vpack.c.bf16 %v5028_v33, %v5027_v32  ;;  %v5356_v42 = vld [vmem:[%s7123_s25 + $0x90] sm:$0xff]  ;;  %v5357_v43 = vld [vmem:[%s7123_s25 + $0x98] sm:$0xff]  ;;  %v7206_v48 = vpack.c.bf16 %v5030_v41, %v5029_v40 }
  0x19   : > { %6292 = vmatprep.mubr.msk.bf16.mxu0 %vm272_vm1, %v7152_v25  ;;  %7040 = vmatprep.subr.msk.bf16.mxu1 %vm321_vm0, %v7157_v26  ;;  %v7188_v39 = vpack.c.bf16 %v5355_v35, %v5354_v34  ;;  %v5031_v44 = vld [vmem:[%s7123_s25 + $0x228] sm:$0xff]  ;;  %v5032_v45 = vld [vmem:[%s7123_s25 + $0x230] sm:$0xff]  ;;  %v7208_v49 = vpack.c.bf16 %v5357_v43, %v5356_v42  ;;  %v5033_v52 = vld [vmem:[%s7123_s25 + $0x240] sm:$0xff] }
  0x1a   : > { %7048 = vmatprep.subr.msk.bf16.mxu0 %vm321_vm0, %v7162_v27  ;;  %v5358_v46 = vld [vmem:[%s7123_s25 + $0xa8] sm:$0xff]  ;;  %v5359_v47 = vld [vmem:[%s7123_s25 + $0xb0] sm:$0xff]  ;;  %v7210_v50 = vpack.c.bf16 %v5032_v45, %v5031_v44  ;;  %v5360_v54 = vld [vmem:[%s7123_s25 + $0xc0] sm:$0xff] }
  0x1b   : > { %v7212_v51 = vpack.c.bf16 %v5359_v47, %v5358_v46  ;;  %v5034_v53 = vld [vmem:[%s7123_s25 + $0x248] sm:$0xff]  ;;  %v5035_v56 = vld [vmem:[%s7123_s25 + $0x258] sm:$0xff]  ;;  %v5036_v57 = vld [vmem:[%s7123_s25 + $0x260] sm:$0xff] }
  0x1c   : > { %v5361_v55 = vld [vmem:[%s7123_s25 + $0xc8] sm:$0xff]  ;;  %v5362_v58 = vld [vmem:[%s7123_s25 + $0xd8] sm:$0xff]  ;;  %v5363_v59 = vld [vmem:[%s7123_s25 + $0xe0] sm:$0xff]  ;;  %v7230_v60 = vpack.c.bf16 %v5034_v53, %v5033_v52  ;;  %v7234_v62 = vpack.c.bf16 %v5036_v57, %v5035_v56 }
  0x1d   : > { %v7232_v61 = vpack.c.bf16 %v5361_v55, %v5360_v54  ;;  %v7236_v63 = vpack.c.bf16 %v5363_v59, %v5362_v58  ;;  %v5037_v0 = vld [vmem:[%s7123_s25 + $0x270] sm:$0xff]  ;;  %v5038_v1 = vld [vmem:[%s7123_s25 + $0x278] sm:$0xff]  ;;  %v5039_v4 = vld [vmem:[%s7123_s25 + $0x288] sm:$0xff] }
  0x1e   : > { %6021 = vmatmul.mubr.msk.bf16.gmra.mrb[4].mxu1 %vm272_vm1, %v7180_v36  ;;  %v5364_v2 = vld [vmem:[%s7123_s25 + $0xf0] sm:$0xff]  ;;  %v5365_v3 = vld [vmem:[%s7123_s25 + $0xf8] sm:$0xff]  ;;  %v5366_v6 = vld [vmem:[%s7123_s25 + $0x108] sm:$0xff]  ;;  %v7254_v8 = vpack.c.bf16 %v5038_v1, %v5037_v0  ;;  %v797_v0 = vsel %vm321_vm0, %v7157_v26, 0  ;;  %v3153_v1 = vsel %vm321_vm0, %v7162_v27, 0 }
  0x1f   : > { %6293 = vmatmul.mubr.msk.bf16.gmra.mrb[4].mxu0 %vm272_vm1, %v7184_v37  ;;  %6024 = vmatprep.mubr.msk.bf16.mxu1 %vm272_vm1, %v7186_v38  ;;  %v5040_v5 = vld [vmem:[%s7123_s25 + $0x290] sm:$0xff]  ;;  %v7256_v9 = vpack.c.bf16 %v5365_v3, %v5364_v2  ;;  %v5041_v12 = vld [vmem:[%s7123_s25 + $0x2a0] sm:$0xff]  ;;  %v5042_v15 = vld [vmem:[%s7123_s25 + $0x2a8] sm:$0xff] }
  0x20   : > { %6296 = vmatprep.mubr.msk.bf16.mxu0 %vm272_vm1, %v7188_v39  ;;  %v5367_v7 = vld [vmem:[%s7123_s25 + $0x110] sm:$0xff]  ;;  %v7258_v10 = vpack.c.bf16 %v5040_v5, %v5039_v4  ;;  %v5368_v16 = vld [vmem:[%s7123_s25 + $0x120] sm:$0xff]  ;;  %v5369_v17 = vld [vmem:[%s7123_s25 + $0x128] sm:$0xff]  ;;  %v7278_v23 = vpack.c.bf16 %v5042_v15, %v5041_v12 }
  0x21   : > { %v7260_v11 = vpack.c.bf16 %v5367_v7, %v5366_v6  ;;  %v5043_v18 = vld [vmem:[%s7123_s25 + $0x2b8] sm:$0xff]  ;;  %v5044_v20 = vld [vmem:[%s7123_s25 + $0x2c0] sm:$0xff]  ;;  %v7280_v28 = vpack.c.bf16 %v5369_v17, %v5368_v16  ;;  %v5045_v31 = vld [vmem:[%s7123_s25 + $0x2d0] sm:$0xff] }
  0x22   : > { %v5370_v21 = vld [vmem:[%s7123_s25 + $0x138] sm:$0xff]  ;;  %v5371_v22 = vld [vmem:[%s7123_s25 + $0x140] sm:$0xff]  ;;  %v7282_v29 = vpack.c.bf16 %v5044_v20, %v5043_v18  ;;  %v5372_v33 = vld [vmem:[%s7123_s25 + $0x150] sm:$0xff] }
  0x23   : > { %v7284_v30 = vpack.c.bf16 %v5371_v22, %v5370_v21  ;;  %v5046_v32 = vld [vmem:[%s7123_s25 + $0x2d8] sm:$0xff]  ;;  %v5047_v35 = vld [vmem:[%s7123_s25 + $0x2e8] sm:$0xff]  ;;  %v5048_v40 = vld [vmem:[%s7123_s25 + $0x2f0] sm:$0xff] }
  0x24   : > { %v5373_v34 = vld [vmem:[%s7123_s25 + $0x158] sm:$0xff]  ;;  %v5374_v41 = vld [vmem:[%s7123_s25 + $0x168] sm:$0xff]  ;;  %v5375_v42 = vld [vmem:[%s7123_s25 + $0x170] sm:$0xff]  ;;  %v267_v43 = vpack.c.bf16 %v5046_v32, %v5045_v31  ;;  %v268_v45 = vpack.c.bf16 %v5048_v40, %v5047_v35 }
  0x25   : > { %v2510_v44 = vpack.c.bf16 %v5373_v34, %v5372_v33  ;;  %v7302_v46 = vpack.c.bf16 %v5375_v42, %v5374_v41  ;;  %v5049_v47 = vld [vmem:[%s7123_s25 + $0x300] sm:$0xff]  ;;  %v5050_v52 = vld [vmem:[%s7123_s25 + $0x308] sm:$0xff]  ;;  %v7411_v3 = vld [vmem:[%s7970_s1 + $0x18] sm:$0x3] }
  0x26   : > { %6025 = vmatmul.mubr.msk.bf16.gmra.mrb[8].mxu1 %vm272_vm1, %v7206_v48  ;;  %v5376_v53 = vld [vmem:[%s7123_s25 + $0x180] sm:$0xff]  ;;  %v5377_v54 = vld [vmem:[%s7123_s25 + $0x188] sm:$0xff]  ;;  %v269_v57 = vpack.c.bf16 %v5050_v52, %v5049_v47  ;;  %v5457_v15 = vld [vmem:[%s7123_s25 + $0xb1] sm:$0xff] }
  0x27   : > { %6297 = vmatmul.mubr.msk.bf16.gmra.mrb[8].mxu0 %vm272_vm1, %v7208_v49  ;;  %6028 = vmatprep.mubr.msk.bf16.mxu1 %vm272_vm1, %v7210_v50  ;;  %v172_v55 = vld [vmem:[%s7123_s25] sm:$0xff]  ;;  %v173_v56 = vld [vmem:[%s7123_s25 + $0x8] sm:$0xff]  ;;  %v2512_v58 = vpack.c.bf16 %v5377_v54, %v5376_v53  ;;  %v5465_v32 = vld [vmem:[%s7123_s25 + $0x111] sm:$0xff] }
  0x28   : > { %6300 = vmatprep.mubr.msk.bf16.mxu0 %vm272_vm1, %v7212_v51  ;;  %v204_v59 = vpack.c.bf16 %v173_v56, %v172_v55  ;;  %v5133_v2 = vld [vmem:[%s7970_s1 + $0x6] sm:$0x3]  ;;  %v5444_v26 = vld [vmem:[%s7123_s25 + $0x19] sm:$0xff]  ;;  %v5451_v5 = vld [vmem:[%s7123_s25 + $0x69] sm:$0xff] }
  0x29   : > { %v5445_v27 = vld [vmem:[%s7123_s25 + $0x21] sm:$0xff]  ;;  %v5452_v6 = vld [vmem:[%s7123_s25 + $0x79] sm:$0xff]  ;;  %v5456_v12 = vld [vmem:[%s7123_s25 + $0xa9] sm:$0xff] }
  0x2a   : > { %v5450_v4 = vld [vmem:[%s7123_s25 + $0x61] sm:$0xff]  ;;  %v3092_v17 = vpack.c.bf16 %v5457_v15, %v5456_v12  ;;  %v5459_v20 = vld [vmem:[%s7123_s25 + $0xc9] sm:$0xff]  ;;  %v5460_v21 = vld [vmem:[%s7123_s25 + $0xd9] sm:$0xff] }
  0x2b   : > { %v5453_v7 = vld [vmem:[%s7123_s25 + $0x81] sm:$0xff]  ;;  %v5464_v31 = vld [vmem:[%s7123_s25 + $0x109] sm:$0xff]  ;;  %v5468_v41 = vld [vmem:[%s7123_s25 + $0x139] sm:$0xff] }
  0x2c   : > { %v5458_v18 = vld [vmem:[%s7123_s25 + $0xc1] sm:$0xff]  ;;  %v3096_v34 = vpack.c.bf16 %v5465_v32, %v5464_v31  ;;  %v5467_v40 = vld [vmem:[%s7123_s25 + $0x129] sm:$0xff]  ;;  %v5473_v52 = vld [vmem:[%s7123_s25 + $0x171] sm:$0xff] }
  0x2d   : > { %v5461_v22 = vld [vmem:[%s7123_s25 + $0xe1] sm:$0xff]  ;;  %v5472_v47 = vld [vmem:[%s7123_s25 + $0x169] sm:$0xff] }
  0x2e   : > { %6029 = vmatmul.mubr.msk.bf16.gmra.mrb[12].mxu1 %vm272_vm1, %v7230_v60  ;;  %v5466_v35 = vld [vmem:[%s7123_s25 + $0x121] sm:$0xff]  ;;  %v3100_v54 = vpack.c.bf16 %v5473_v52, %v5472_v47  ;;  %v5475_v56 = vld [vmem:[%s7123_s25 + $0x189] sm:$0xff] }
  0x2f   : > { %6301 = vmatmul.mubr.msk.bf16.gmra.mrb[12].mxu0 %vm272_vm1, %v7232_v61  ;;  %6032 = vmatprep.mubr.msk.bf16.mxu1 %vm272_vm1, %v7234_v62  ;;  %v5469_v42 = vld [vmem:[%s7123_s25 + $0x141] sm:$0xff]  ;;  %v5511_v15 = vld [vmem:[%s7123_s25 + $0x289] sm:$0xff] }
  0x30   : > { %6304 = vmatprep.mubr.msk.bf16.mxu0 %vm272_vm1, %v7236_v63  ;;  %v5474_v55 = vld [vmem:[%s7123_s25 + $0x181] sm:$0xff]  ;;  %v5519_v32 = vld [vmem:[%s7123_s25 + $0x2e9] sm:$0xff] }
  0x31   : > { %v5543_v47 = vld [vmem:[%s7123_s25 + $0x350] sm:$0xff] }
  0x36   : > { %6033 = vmatmul.mubr.msk.bf16.gmra.mrb[16].mxu1 %vm272_vm1, %v7254_v8 }
  0x37   : > { %6305 = vmatmul.mubr.msk.bf16.gmra.mrb[16].mxu0 %vm272_vm1, %v7256_v9  ;;  %6036 = vmatprep.mubr.msk.bf16.mxu1 %vm272_vm1, %v7258_v10 }
  0x38   : > { %6308 = vmatprep.mubr.msk.bf16.mxu0 %vm272_vm1, %v7260_v11 }
  0x3e   : > { %6037 = vmatmul.mubr.msk.bf16.gmra.mrb[20].mxu1 %vm272_vm1, %v7278_v23 }
  0x3f   : > { %6309 = vmatmul.mubr.msk.bf16.gmra.mrb[20].mxu0 %vm272_vm1, %v7280_v28  ;;  %6040 = vmatprep.mubr.msk.bf16.mxu1 %vm272_vm1, %v7282_v29 }
  0x40   : > { %6312 = vmatprep.mubr.msk.bf16.mxu0 %vm272_vm1, %v7284_v30 }
  0x46   : > { %6041 = vmatmul.mubr.msk.bf16.gmra.mrb[24].mxu1 %vm272_vm1, %v267_v43 }
  0x47   : > { %6313 = vmatmul.mubr.msk.bf16.gmra.mrb[24].mxu0 %vm272_vm1, %v2510_v44  ;;  %6044 = vmatprep.mubr.msk.bf16.mxu1 %vm272_vm1, %v268_v45 }
  0x48   : > { %6316 = vmatprep.mubr.msk.bf16.mxu0 %vm272_vm1, %v7302_v46 }
  0x4e   : > { %6045 = vmatmul.mubr.msk.bf16.gmra.mrb[28].mxu1 %vm272_vm1, %v269_v57 }
  0x4f   : > { %6317 = vmatmul.mubr.msk.bf16.gmra.mrb[28].mxu0 %vm272_vm1, %v2512_v58  ;;  %6050 = vmatprep.mubr.msk.bf16.mxu1 %vm272_vm1, %v204_v59  ;;  %v5102_v58 = vld [vmem:[%s7123_s25 + $0x1a1] sm:$0xff]  ;;  %v5493_v59 = vld [vmem:[%s7123_s25 + $0x1b1] sm:$0xff] }
  0x50   : > { %6322 = vmatprep.mubr.msk.bf16.mxu0 %vm272_vm1, %v7133_v14  ;;  %v5525_v14 = vld [vmem:[%s7970_s1 + $0x16] sm:$0x3] }
  0x56   : > { %6051 = vmatmul.mubr.msk.bf16.vlgmr.msra.gmra.mrb[0].mxu1 %vm272_vm1, %v7131_v13  ;;  %v5425_v13 = vld [vmem:[%s7123_s25 + $0x318] sm:$0xff] }
  0x57   : > { %6083 = vmatpush3.bf16.msra.mxu1 %v797_v0  ;;  %6323 = vmatmul.mubr.msk.bf16.vlgmr.msra.gmra.mrb[0].mxu0 %vm272_vm1, %v7150_v24  ;;  %v698_v24 = vld [vmem:[%s7123_s25 + $0x1] sm:$0xff]  ;;  %v5494_v0 = vld [vmem:[%s7123_s25 + $0x1b9] sm:$0xff] }
  0x58   : > { %6355 = vmatpush3.bf16.msra.mxu0 %v3153_v1  ;;  %6054 = vmatprep.mubr.msk.bf16.mxu1 %vm272_vm1, %v7140_v19  ;;  %v5426_v19 = vld [vmem:[%s7123_s25 + $0x320] sm:$0xff]  ;;  %v3101_v1 = vpack.c.bf16 %v5475_v56, %v5474_v55  ;;  %v5545_v56 = vld [vmem:[%s7123_s25 + $0x368] sm:$0xff] }
  0x59   : > { %6326 = vmatprep.mubr.msk.bf16.mxu0 %vm272_vm1, %v7180_v36  ;;  %7041 = vmatprep.subr.msk.bf16.mxu1 %vm321_vm0, %v5133_v2  ;;  %v2807_v36 = vpack.c.bf16 %v5426_v19, %v5425_v13  ;;  %v5495_v13 = vld [vmem:[%s7123_s25 + $0x1c9] sm:$0xff]  ;;  %v5496_v19 = vld [vmem:[%s7123_s25 + $0x1d1] sm:$0xff]  ;;  %v5544_v55 = vld [vmem:[%s7123_s25 + $0x360] sm:$0xff] }
  0x5a   : > { %7049 = vmatprep.subr.msk.bf16.mxu0 %vm321_vm0, %v5525_v14 }
  0x5e   : > { %6055 = vmatmul.mubr.msk.bf16.gmra.mrb[4].mxu1 %vm272_vm1, %v7152_v25  ;;  %v699_v25 = vld [vmem:[%s7123_s25 + $0x9] sm:$0xff] }
  0x5f   : > { %6327 = vmatmul.mubr.msk.bf16.gmra.mrb[4].mxu0 %vm272_vm1, %v7186_v38  ;;  %6058 = vmatprep.mubr.msk.bf16.mxu1 %vm272_vm1, %v7184_v37  ;;  %v730_v37 = vpack.c.bf16 %v699_v25, %v698_v24  ;;  %v3086_v38 = vpack.c.bf16 %v5445_v27, %v5444_v26  ;;  %v5497_v24 = vld [vmem:[%s7123_s25 + $0x1e1] sm:$0xff]  ;;  %v5498_v25 = vld [vmem:[%s7123_s25 + $0x1e9] sm:$0xff]  ;;  %v3381_v26 = vpack.c.bf16 %v5496_v19, %v5495_v13  ;;  %v7579_v13 = vld [vmem:[%s7970_s1 + $0x1c] sm:$0x3] }
  0x60   : > { %6330 = vmatprep.mubr.msk.bf16.mxu0 %vm272_vm1, %v7206_v48  ;;  %v5447_v48 = vld [vmem:[%s7123_s25 + $0x39] sm:$0xff]  ;;  %v5548_v19 = vld [vmem:[%s7123_s25 + $0x390] sm:$0xff] }
  0x66   : > { %6059 = vmatmul.mubr.msk.bf16.gmra.mrb[8].mxu1 %vm272_vm1, %v7188_v39  ;;  %v5446_v39 = vld [vmem:[%s7123_s25 + $0x31] sm:$0xff] }
  0x67   : > { %6331 = vmatmul.mubr.msk.bf16.gmra.mrb[8].mxu0 %vm272_vm1, %v7210_v50  ;;  %6062 = vmatprep.mubr.msk.bf16.mxu1 %vm272_vm1, %v7208_v49  ;;  %v5448_v49 = vld [vmem:[%s7123_s25 + $0x49] sm:$0xff]  ;;  %v5449_v50 = vld [vmem:[%s7123_s25 + $0x51] sm:$0xff] }
  0x68   : > { %6334 = vmatprep.mubr.msk.bf16.mxu0 %vm272_vm1, %v7230_v60  ;;  %v1091_v60 = vsel %vm321_vm0, %v5133_v2, 0 }
  0x6e   : > { %6063 = vmatmul.mubr.msk.bf16.gmra.mrb[12].mxu1 %vm272_vm1, %v7212_v51  ;;  %v3087_v51 = vpack.c.bf16 %v5447_v48, %v5446_v39  ;;  %v7495_v39 = vld [vmem:[%s7970_s1 + $0x1a] sm:$0x3] }
  0x6f   : > { %6335 = vmatmul.mubr.msk.bf16.gmra.mrb[12].mxu0 %vm272_vm1, %v7234_v62  ;;  %6066 = vmatprep.mubr.msk.bf16.mxu1 %vm272_vm1, %v7232_v61  ;;  %v3447_v61 = vsel %vm321_vm0, %v5525_v14, 0  ;;  %v3088_v62 = vpack.c.bf16 %v5449_v50, %v5448_v49  ;;  %v3380_v14 = vpack.c.bf16 %v5494_v0, %v5493_v59  ;;  %v5499_v48 = vld [vmem:[%s7123_s25 + $0x1f9] sm:$0xff]  ;;  %v5500_v49 = vld [vmem:[%s7123_s25 + $0x201] sm:$0xff]  ;;  %v5501_v50 = vld [vmem:[%s7123_s25 + $0x211] sm:$0xff]  ;;  %v3676_v59 = vpack.c.bf16 %v5545_v56, %v5544_v55 }
  0x70   : > { %6338 = vmatprep.mubr.msk.bf16.mxu0 %vm272_vm1, %v7254_v8  ;;  %v3089_v8 = vpack.c.bf16 %v5451_v5, %v5450_v4  ;;  %v5506_v4 = vld [vmem:[%s7123_s25 + $0x249] sm:$0xff]  ;;  %v7663_v55 = vld [vmem:[%s7970_s1 + $0x1e] sm:$0x3] }
  0x71   : > { %v5597_v56 = vld [vmem:[%s7123_s25 + $0x528] sm:$0xff] }
  0x76   : > { %6067 = vmatmul.mubr.msk.bf16.gmra.mrb[16].mxu1 %vm272_vm1, %v7236_v63  ;;  %v7405_v63 = vld [vmem:[%s7970_s1 + $0x8] sm:$0x3] }
  0x77   : > { %6339 = vmatmul.mubr.msk.bf16.gmra.mrb[16].mxu0 %vm272_vm1, %v7258_v10  ;;  %6070 = vmatprep.mubr.msk.bf16.mxu1 %vm272_vm1, %v7256_v9  ;;  %v3090_v9 = vpack.c.bf16 %v5453_v7, %v5452_v6  ;;  %v5454_v10 = vld [vmem:[%s7123_s25 + $0x91] sm:$0xff]  ;;  %v1386_v27 = vsel %vm321_vm0, %v7405_v63, 0  ;;  %v5507_v7 = vld [vmem:[%s7123_s25 + $0x259] sm:$0xff] }
  0x78   : > { %6342 = vmatprep.mubr.msk.bf16.mxu0 %vm272_vm1, %v7278_v23  ;;  %v3093_v23 = vpack.c.bf16 %v5459_v20, %v5458_v18  ;;  %v5514_v18 = vld [vmem:[%s7123_s25 + $0x2a9] sm:$0xff] }
  0x7e   : > { %6071 = vmatmul.mubr.msk.bf16.gmra.mrb[20].mxu1 %vm272_vm1, %v7260_v11  ;;  %v5455_v11 = vld [vmem:[%s7123_s25 + $0x99] sm:$0xff] }
  0x7f   : > { %6343 = vmatmul.mubr.msk.bf16.gmra.mrb[20].mxu0 %vm272_vm1, %v7282_v29  ;;  %6074 = vmatprep.mubr.msk.bf16.mxu1 %vm272_vm1, %v7280_v28  ;;  %v3091_v16 = vpack.c.bf16 %v5455_v11, %v5454_v10  ;;  %v3094_v28 = vpack.c.bf16 %v5461_v22, %v5460_v21  ;;  %v5462_v29 = vld [vmem:[%s7123_s25 + $0xf1] sm:$0xff]  ;;  %v5510_v10 = vld [vmem:[%s7123_s25 + $0x279] sm:$0xff] }
  0x80   : > { %6346 = vmatprep.mubr.msk.bf16.mxu0 %vm272_vm1, %v267_v43  ;;  %v3097_v43 = vpack.c.bf16 %v5467_v40, %v5466_v35  ;;  %v5515_v22 = vld [vmem:[%s7123_s25 + $0x2b9] sm:$0xff]  ;;  %v5522_v35 = vld [vmem:[%s7123_s25 + $0x309] sm:$0xff] }
  0x86   : > { %6075 = vmatmul.mubr.msk.bf16.gmra.mrb[24].mxu1 %vm272_vm1, %v7284_v30  ;;  %v5463_v30 = vld [vmem:[%s7123_s25 + $0xf9] sm:$0xff] }
  0x87   : > { %6347 = vmatmul.mubr.msk.bf16.gmra.mrb[24].mxu0 %vm272_vm1, %v268_v45  ;;  %6078 = vmatprep.mubr.msk.bf16.mxu1 %vm272_vm1, %v2510_v44  ;;  %v3095_v33 = vpack.c.bf16 %v5463_v30, %v5462_v29  ;;  %v3098_v44 = vpack.c.bf16 %v5469_v42, %v5468_v41  ;;  %v5470_v45 = vld [vmem:[%s7123_s25 + $0x151] sm:$0xff]  ;;  %v5518_v29 = vld [vmem:[%s7123_s25 + $0x2d9] sm:$0xff] }
  0x88   : > { %6350 = vmatprep.mubr.msk.bf16.mxu0 %vm272_vm1, %v269_v57  ;;  %v5101_v57 = vld [vmem:[%s7123_s25 + $0x199] sm:$0xff] }
  0x89   : > { %v1024_v2 = vpack.c.bf16 %v5102_v58, %v5101_v57  ;;  %v5523_v42 = vld [vmem:[%s7123_s25 + $0x319] sm:$0xff] }
  0x8a   : > { %v5546_v57 = vld [vmem:[%s7123_s25 + $0x378] sm:$0xff]  ;;  %v5547_v58 = vld [vmem:[%s7123_s25 + $0x380] sm:$0xff] }
  0x8e   : > { %6079 = vmatmul.mubr.msk.bf16.gmra.mrb[28].mxu1 %vm272_vm1, %v7302_v46  ;;  %v5471_v46 = vld [vmem:[%s7123_s25 + $0x159] sm:$0xff] }
  0x8f   : > { %6351 = vmatmul.mubr.msk.bf16.gmra.mrb[28].mxu0 %vm272_vm1, %v2807_v36  ;;  %6084 = vmatprep.mubr.msk.bf16.mxu1 %vm272_vm1, %v730_v37  ;;  %v3099_v53 = vpack.c.bf16 %v5471_v46, %v5470_v45  ;;  %v3742_v36 = vsel %vm321_vm0, %v7411_v3, 0  ;;  %v3382_v37 = vpack.c.bf16 %v5498_v25, %v5497_v24  ;;  %v5151_v45 = vld [vmem:[%s7123_s25 + $0x338] sm:$0xff]  ;;  %v5542_v46 = vld [vmem:[%s7123_s25 + $0x348] sm:$0xff] }
  0x90   : > { %6356 = vmatprep.mubr.msk.bf16.mxu0 %vm272_vm1, %v3086_v38  ;;  %v5549_v24 = vld [vmem:[%s7123_s25 + $0x398] sm:$0xff]  ;;  %v5550_v25 = vld [vmem:[%s7123_s25 + $0x3a8] sm:$0xff] }
  0x96   : > { %6085 = vmatmul.mubr.msk.bf16.vlgmr.msra.gmra.mrb[0].mxu1 %vm272_vm1, %v3086_v38  ;;  %v7489_v38 = vld [vmem:[%s7970_s1 + $0xa] sm:$0x3] }
  0x97   : > { %6117 = vmatpush3.bf16.msra.mxu1 %v1091_v60  ;;  %6357 = vmatmul.mubr.msk.bf16.vlgmr.msra.gmra.mrb[0].mxu0 %vm272_vm1, %v3087_v51  ;;  %v3383_v60 = vpack.c.bf16 %v5500_v49, %v5499_v48  ;;  %v1681_v0 = vsel %vm321_vm0, %v7489_v38, 0  ;;  %v5555_v48 = vld [vmem:[%s7123_s25 + $0x3e0] sm:$0xff] }
  0x98   : > { %6389 = vmatpush3.bf16.msra.mxu0 %v3447_v61  ;;  %6088 = vmatprep.mubr.msk.bf16.mxu1 %vm272_vm1, %v3087_v51  ;;  %v5502_v51 = vld [vmem:[%s7123_s25 + $0x219] sm:$0xff] }
  0x99   : > { %6360 = vmatprep.mubr.msk.bf16.mxu0 %vm272_vm1, %v3088_v62  ;;  %7042 = vmatprep.subr.msk.bf16.mxu1 %vm321_vm0, %v7405_v63  ;;  %v3384_v61 = vpack.c.bf16 %v5502_v51, %v5501_v50  ;;  %v5504_v63 = vld [vmem:[%s7123_s25 + $0x231] sm:$0xff] }
  0x9a   : > { %7050 = vmatprep.subr.msk.bf16.mxu0 %vm321_vm0, %v7411_v3  ;;  %v5505_v3 = vld [vmem:[%s7123_s25 + $0x241] sm:$0xff]  ;;  %v5556_v51 = vld [vmem:[%s7123_s25 + $0x3f0] sm:$0xff] }
  0x9b   : > { %v3386_v6 = vpack.c.bf16 %v5506_v4, %v5505_v3  ;;  %v5560_v4 = vld [vmem:[%s7123_s25 + $0x420] sm:$0xff] }
  0x9e   : > { %6089 = vmatmul.mubr.msk.bf16.gmra.mrb[4].mxu1 %vm272_vm1, %v3088_v62  ;;  %v5503_v62 = vld [vmem:[%s7123_s25 + $0x229] sm:$0xff] }
  0x9f   : > { %6361 = vmatmul.mubr.msk.bf16.gmra.mrb[4].mxu0 %vm272_vm1, %v3089_v8  ;;  %6092 = vmatprep.mubr.msk.bf16.mxu1 %vm272_vm1, %v3089_v8  ;;  %v3385_v5 = vpack.c.bf16 %v5504_v63, %v5503_v62  ;;  %v5508_v8 = vld [vmem:[%s7123_s25 + $0x261] sm:$0xff]  ;;  %v5559_v62 = vld [vmem:[%s7123_s25 + $0x410] sm:$0xff] }
  0xa0   : > { %6364 = vmatprep.mubr.msk.bf16.mxu0 %vm272_vm1, %v3090_v9  ;;  %v3387_v11 = vpack.c.bf16 %v5508_v8, %v5507_v7  ;;  %v5563_v7 = vld [vmem:[%s7123_s25 + $0x440] sm:$0xff] }
  0xa6   : > { %6093 = vmatmul.mubr.msk.bf16.gmra.mrb[8].mxu1 %vm272_vm1, %v3090_v9  ;;  %v5509_v9 = vld [vmem:[%s7123_s25 + $0x271] sm:$0xff] }
  0xa7   : > { %6365 = vmatmul.mubr.msk.bf16.gmra.mrb[8].mxu0 %vm272_vm1, %v3091_v16  ;;  %6096 = vmatprep.mubr.msk.bf16.mxu1 %vm272_vm1, %v3091_v16  ;;  %v3388_v12 = vpack.c.bf16 %v5510_v10, %v5509_v9  ;;  %v5512_v16 = vld [vmem:[%s7123_s25 + $0x291] sm:$0xff] }
  0xa8   : > { %6368 = vmatprep.mubr.msk.bf16.mxu0 %vm272_vm1, %v3092_v17  ;;  %v3389_v20 = vpack.c.bf16 %v5512_v16, %v5511_v15  ;;  %v5564_v10 = vld [vmem:[%s7123_s25 + $0x450] sm:$0xff] }
  0xa9   : > { %v5567_v15 = vld [vmem:[%s7123_s25 + $0x470] sm:$0xff] }
  0xae   : > { %6097 = vmatmul.mubr.msk.bf16.gmra.mrb[12].mxu1 %vm272_vm1, %v3092_v17  ;;  %v5513_v17 = vld [vmem:[%s7123_s25 + $0x2a1] sm:$0xff] }
  0xaf   : > { %6369 = vmatmul.mubr.msk.bf16.gmra.mrb[12].mxu0 %vm272_vm1, %v3093_v23  ;;  %6100 = vmatprep.mubr.msk.bf16.mxu1 %vm272_vm1, %v3093_v23  ;;  %v3390_v21 = vpack.c.bf16 %v5514_v18, %v5513_v17  ;;  %v5516_v23 = vld [vmem:[%s7123_s25 + $0x2c1] sm:$0xff] }
  0xb0   : > { %6372 = vmatprep.mubr.msk.bf16.mxu0 %vm272_vm1, %v3094_v28  ;;  %v3391_v30 = vpack.c.bf16 %v5516_v23, %v5515_v22  ;;  %v5568_v18 = vld [vmem:[%s7123_s25 + $0x480] sm:$0xff] }
  0xb1   : > { %v5571_v22 = vld [vmem:[%s7123_s25 + $0x4a0] sm:$0xff] }
  0xb6   : > { %6101 = vmatmul.mubr.msk.bf16.gmra.mrb[16].mxu1 %vm272_vm1, %v3094_v28  ;;  %v5517_v28 = vld [vmem:[%s7123_s25 + $0x2d1] sm:$0xff] }
  0xb7   : > { %6373 = vmatmul.mubr.msk.bf16.gmra.mrb[16].mxu0 %vm272_vm1, %v3095_v33  ;;  %6104 = vmatprep.mubr.msk.bf16.mxu1 %vm272_vm1, %v3095_v33  ;;  %v3392_v31 = vpack.c.bf16 %v5518_v29, %v5517_v28  ;;  %v5520_v33 = vld [vmem:[%s7123_s25 + $0x2f1] sm:$0xff] }
  0xb8   : > { %6376 = vmatprep.mubr.msk.bf16.mxu0 %vm272_vm1, %v3096_v34  ;;  %v3393_v40 = vpack.c.bf16 %v5520_v33, %v5519_v32  ;;  %v5572_v29 = vld [vmem:[%s7123_s25 + $0x4b0] sm:$0xff]  ;;  %v5591_v33 = vld [vmem:[%s7123_s25 + $0x4e0] sm:$0xff] }
  0xb9   : > { %v5200_v32 = vld [vmem:[%s7123_s25 + $0x4d0] sm:$0xff] }
  0xbe   : > { %6105 = vmatmul.mubr.msk.bf16.gmra.mrb[20].mxu1 %vm272_vm1, %v3096_v34  ;;  %v5521_v34 = vld [vmem:[%s7123_s25 + $0x301] sm:$0xff] }
  0xbf   : > { %6377 = vmatmul.mubr.msk.bf16.gmra.mrb[20].mxu0 %vm272_vm1, %v3097_v43  ;;  %6108 = vmatprep.mubr.msk.bf16.mxu1 %vm272_vm1, %v3097_v43  ;;  %v3394_v41 = vpack.c.bf16 %v5522_v35, %v5521_v34  ;;  %v5524_v43 = vld [vmem:[%s7123_s25 + $0x321] sm:$0xff] }
  0xc0   : > { %6380 = vmatprep.mubr.msk.bf16.mxu0 %vm272_vm1, %v3098_v44  ;;  %v3395_v52 = vpack.c.bf16 %v5524_v43, %v5523_v42  ;;  %v5592_v34 = vld [vmem:[%s7123_s25 + $0x4e8] sm:$0xff]  ;;  %v5593_v42 = vld [vmem:[%s7123_s25 + $0x4f8] sm:$0xff]  ;;  %v5594_v43 = vld [vmem:[%s7123_s25 + $0x500] sm:$0xff] }
  0xc6   : > { %6109 = vmatmul.mubr.msk.bf16.gmra.mrb[24].mxu1 %vm272_vm1, %v3098_v44  ;;  %v5150_v44 = vld [vmem:[%s7123_s25 + $0x330] sm:$0xff] }
  0xc7   : > { %6381 = vmatmul.mubr.msk.bf16.gmra.mrb[24].mxu0 %vm272_vm1, %v3099_v53  ;;  %6112 = vmatprep.mubr.msk.bf16.mxu1 %vm272_vm1, %v3099_v53  ;;  %v1319_v53 = vpack.c.bf16 %v5151_v45, %v5150_v44  ;;  %v5595_v44 = vld [vmem:[%s7123_s25 + $0x510] sm:$0xff]  ;;  %v5596_v45 = vld [vmem:[%s7123_s25 + $0x518] sm:$0xff] }
  0xc8   : > { %6384 = vmatprep.mubr.msk.bf16.mxu0 %vm272_vm1, %v3100_v54 }
  0xce   : > { %6113 = vmatmul.mubr.msk.bf16.gmra.mrb[28].mxu1 %vm272_vm1, %v3100_v54  ;;  %v3675_v54 = vpack.c.bf16 %v5543_v47, %v5542_v46  ;;  %v3971_v46 = vpack.c.bf16 %v5594_v43, %v5593_v42  ;;  %v5647_v42 = vld [vmem:[%s7123_s25 + $0x399] sm:$0xff]  ;;  %v5648_v43 = vld [vmem:[%s7123_s25 + $0x3a9] sm:$0xff] }
  0xcf   : > { %6385 = vmatmul.mubr.msk.bf16.gmra.mrb[28].mxu0 %vm272_vm1, %v3101_v1  ;;  %6118 = vmatprep.mubr.msk.bf16.mxu1 %vm272_vm1, %v1024_v2  ;;  %v4037_v1 = vsel %vm321_vm0, %v7495_v39, 0  ;;  %v3677_v2 = vpack.c.bf16 %v5547_v58, %v5546_v57  ;;  %v5598_v57 = vld [vmem:[%s7123_s25 + $0x530] sm:$0xff]  ;;  %v5599_v58 = vld [vmem:[%s7123_s25 + $0x540] sm:$0xff] }
  0xd0   : > { %6390 = vmatprep.mubr.msk.bf16.mxu0 %vm272_vm1, %v3380_v14 }
  0xd6   : > { %6119 = vmatmul.mubr.msk.bf16.vlgmr.msra.gmra.mrb[0].mxu1 %vm272_vm1, %v3380_v14  ;;  %v7573_v14 = vld [vmem:[%s7970_s1 + $0xc] sm:$0x3] }
  0xd7   : > { %6151 = vmatpush3.bf16.msra.mxu1 %v1386_v27  ;;  %6391 = vmatmul.mubr.msk.bf16.vlgmr.msra.gmra.mrb[0].mxu0 %vm272_vm1, %v3381_v26  ;;  %v3678_v27 = vpack.c.bf16 %v5549_v24, %v5548_v19  ;;  %v1975_v47 = vsel %vm321_vm0, %v7573_v14, 0  ;;  %v5604_v19 = vld [vmem:[%s7123_s25 + $0x578] sm:$0xff] }
  0xd8   : > { %6423 = vmatpush3.bf16.msra.mxu0 %v3742_v36  ;;  %6122 = vmatprep.mubr.msk.bf16.mxu1 %vm272_vm1, %v3381_v26  ;;  %v5551_v26 = vld [vmem:[%s7123_s25 + $0x3b0] sm:$0xff] }
  0xd9   : > { %6394 = vmatprep.mubr.msk.bf16.mxu0 %vm272_vm1, %v3382_v37  ;;  %7043 = vmatprep.subr.msk.bf16.mxu1 %vm321_vm0, %v7489_v38  ;;  %v3679_v36 = vpack.c.bf16 %v5551_v26, %v5550_v25  ;;  %v5553_v38 = vld [vmem:[%s7123_s25 + $0x3c8] sm:$0xff] }
  0xda   : > { %7051 = vmatprep.subr.msk.bf16.mxu0 %vm321_vm0, %v7495_v39  ;;  %v5554_v39 = vld [vmem:[%s7123_s25 + $0x3d8] sm:$0xff]  ;;  %v5605_v26 = vld [vmem:[%s7123_s25 + $0x588] sm:$0xff] }
  0xdb   : > { %v3681_v50 = vpack.c.bf16 %v5555_v48, %v5554_v39  ;;  %v5609_v48 = vld [vmem:[%s7123_s25 + $0x5b8] sm:$0xff] }
  0xde   : > { %6123 = vmatmul.mubr.msk.bf16.gmra.mrb[4].mxu1 %vm272_vm1, %v3382_v37  ;;  %v5552_v37 = vld [vmem:[%s7123_s25 + $0x3c0] sm:$0xff] }
  0xdf   : > { %6395 = vmatmul.mubr.msk.bf16.gmra.mrb[4].mxu0 %vm272_vm1, %v3383_v60  ;;  %6126 = vmatprep.mubr.msk.bf16.mxu1 %vm272_vm1, %v3383_v60  ;;  %v3680_v49 = vpack.c.bf16 %v5553_v38, %v5552_v37  ;;  %v5557_v60 = vld [vmem:[%s7123_s25 + $0x3f8] sm:$0xff]  ;;  %v5608_v37 = vld [vmem:[%s7123_s25 + $0x5a8] sm:$0xff] }
  0xe0   : > { %6398 = vmatprep.mubr.msk.bf16.mxu0 %vm272_vm1, %v3384_v61  ;;  %v3682_v63 = vpack.c.bf16 %v5557_v60, %v5556_v51  ;;  %v5612_v51 = vld [vmem:[%s7123_s25 + $0x5d8] sm:$0xff] }
  0xe6   : > { %6127 = vmatmul.mubr.msk.bf16.gmra.mrb[8].mxu1 %vm272_vm1, %v3384_v61  ;;  %v5558_v61 = vld [vmem:[%s7123_s25 + $0x408] sm:$0xff] }
  0xe7   : > { %6399 = vmatmul.mubr.msk.bf16.gmra.mrb[8].mxu0 %vm272_vm1, %v3385_v5  ;;  %6130 = vmatprep.mubr.msk.bf16.mxu1 %vm272_vm1, %v3385_v5  ;;  %v3683_v3 = vpack.c.bf16 %v5559_v62, %v5558_v61  ;;  %v5561_v5 = vld [vmem:[%s7123_s25 + $0x428] sm:$0xff] }
  0xe8   : > { %6402 = vmatprep.mubr.msk.bf16.mxu0 %vm272_vm1, %v3386_v6  ;;  %v3684_v8 = vpack.c.bf16 %v5561_v5, %v5560_v4  ;;  %v5613_v62 = vld [vmem:[%s7123_s25 + $0x5e8] sm:$0xff] }
  0xe9   : > { %v5616_v4 = vld [vmem:[%s7123_s25 + $0x608] sm:$0xff] }
  0xee   : > { %6131 = vmatmul.mubr.msk.bf16.gmra.mrb[12].mxu1 %vm272_vm1, %v3386_v6  ;;  %v5562_v6 = vld [vmem:[%s7123_s25 + $0x438] sm:$0xff] }
  0xef   : > { %6403 = vmatmul.mubr.msk.bf16.gmra.mrb[12].mxu0 %vm272_vm1, %v3387_v11  ;;  %6134 = vmatprep.mubr.msk.bf16.mxu1 %vm272_vm1, %v3387_v11  ;;  %v3685_v9 = vpack.c.bf16 %v5563_v7, %v5562_v6  ;;  %v5565_v11 = vld [vmem:[%s7123_s25 + $0x458] sm:$0xff] }
  0xf0   : > { %6406 = vmatprep.mubr.msk.bf16.mxu0 %vm272_vm1, %v3388_v12  ;;  %v3686_v16 = vpack.c.bf16 %v5565_v11, %v5564_v10  ;;  %v5617_v7 = vld [vmem:[%s7123_s25 + $0x618] sm:$0xff] }
  0xf1   : > { %v5620_v10 = vld [vmem:[%s7123_s25 + $0x638] sm:$0xff] }
  0xf6   : > { %6135 = vmatmul.mubr.msk.bf16.gmra.mrb[16].mxu1 %vm272_vm1, %v3388_v12  ;;  %v5566_v12 = vld [vmem:[%s7123_s25 + $0x468] sm:$0xff] }
  0xf7   : > { %6407 = vmatmul.mubr.msk.bf16.gmra.mrb[16].mxu0 %vm272_vm1, %v3389_v20  ;;  %6138 = vmatprep.mubr.msk.bf16.mxu1 %vm272_vm1, %v3389_v20  ;;  %v3687_v17 = vpack.c.bf16 %v5567_v15, %v5566_v12  ;;  %v5569_v20 = vld [vmem:[%s7123_s25 + $0x488] sm:$0xff] }
  0xf8   : > { %6410 = vmatprep.mubr.msk.bf16.mxu0 %vm272_vm1, %v3390_v21  ;;  %v3688_v23 = vpack.c.bf16 %v5569_v20, %v5568_v18  ;;  %v5621_v15 = vld [vmem:[%s7123_s25 + $0x648] sm:$0xff]  ;;  %v5249_v18 = vld [vmem:[%s7123_s25 + $0x339] sm:$0xff] }
  0xf9   : > { %v5640_v20 = vld [vmem:[%s7123_s25 + $0x349] sm:$0xff] }
  0xfe   : > { %6139 = vmatmul.mubr.msk.bf16.gmra.mrb[20].mxu1 %vm272_vm1, %v3390_v21  ;;  %v5570_v21 = vld [vmem:[%s7123_s25 + $0x498] sm:$0xff] }
  0xff   : > { %6411 = vmatmul.mubr.msk.bf16.gmra.mrb[20].mxu0 %vm272_vm1, %v3391_v30  ;;  %6142 = vmatprep.mubr.msk.bf16.mxu1 %vm272_vm1, %v3391_v30  ;;  %v3689_v28 = vpack.c.bf16 %v5571_v22, %v5570_v21  ;;  %v5573_v30 = vld [vmem:[%s7123_s25 + $0x4b8] sm:$0xff] }
 0x100   : > { %6414 = vmatprep.mubr.msk.bf16.mxu0 %vm272_vm1, %v3392_v31  ;;  %v3690_v35 = vpack.c.bf16 %v5573_v30, %v5572_v29  ;;  %v5641_v21 = vld [vmem:[%s7123_s25 + $0x351] sm:$0xff]  ;;  %v5642_v29 = vld [vmem:[%s7123_s25 + $0x361] sm:$0xff]  ;;  %v5643_v30 = vld [vmem:[%s7123_s25 + $0x369] sm:$0xff] }
 0x106   : > { %6143 = vmatmul.mubr.msk.bf16.gmra.mrb[24].mxu1 %vm272_vm1, %v3392_v31  ;;  %v5199_v31 = vld [vmem:[%s7123_s25 + $0x4c8] sm:$0xff] }
 0x107   : > { %6415 = vmatmul.mubr.msk.bf16.gmra.mrb[24].mxu0 %vm272_vm1, %v3393_v40  ;;  %6146 = vmatprep.mubr.msk.bf16.mxu1 %vm272_vm1, %v3393_v40  ;;  %v1614_v40 = vpack.c.bf16 %v5200_v32, %v5199_v31  ;;  %v5644_v31 = vld [vmem:[%s7123_s25 + $0x379] sm:$0xff]  ;;  %v5645_v32 = vld [vmem:[%s7123_s25 + $0x381] sm:$0xff] }
 0x108   : > { %6418 = vmatprep.mubr.msk.bf16.mxu0 %vm272_vm1, %v3394_v41 }
 0x10e   : > { %6147 = vmatmul.mubr.msk.bf16.gmra.mrb[28].mxu1 %vm272_vm1, %v3394_v41  ;;  %v3970_v41 = vpack.c.bf16 %v5592_v34, %v5591_v33  ;;  %v4265_v33 = vpack.c.bf16 %v5643_v30, %v5642_v29  ;;  %v5699_v30 = vld [vmem:[%s7123_s25 + $0x559] sm:$0xff] }
 0x10f   : > { %6419 = vmatmul.mubr.msk.bf16.gmra.mrb[28].mxu0 %vm272_vm1, %v3395_v52  ;;  %6152 = vmatprep.mubr.msk.bf16.mxu1 %vm272_vm1, %v1319_v53  ;;  %v4331_v52 = vsel %vm321_vm0, %v7579_v13, 0  ;;  %v3972_v53 = vpack.c.bf16 %v5596_v45, %v5595_v44  ;;  %v5649_v44 = vld [vmem:[%s7123_s25 + $0x3b1] sm:$0xff] }
 0x110   : > { %6424 = vmatprep.mubr.msk.bf16.mxu0 %vm272_vm1, %v3675_v54 }
 0x116   : > { %6153 = vmatmul.mubr.msk.bf16.vlgmr.msra.gmra.mrb[0].mxu1 %vm272_vm1, %v3675_v54  ;;  %v7657_v54 = vld [vmem:[%s7970_s1 + $0xe] sm:$0x3] }
 0x117   : > { %6185 = vmatpush3.bf16.msra.mxu1 %v1681_v0  ;;  %6425 = vmatmul.mubr.msk.bf16.vlgmr.msra.gmra.mrb[0].mxu0 %vm272_vm1, %v3676_v59  ;;  %v3973_v0 = vpack.c.bf16 %v5598_v57, %v5597_v56  ;;  %v2269_v34 = vsel %vm321_vm0, %v7657_v54, 0  ;;  %v5654_v57 = vld [vmem:[%s7123_s25 + $0x3f1] sm:$0xff] }
 0x118   : > { %6457 = vmatpush3.bf16.msra.mxu0 %v4037_v1  ;;  %6156 = vmatprep.mubr.msk.bf16.mxu1 %vm272_vm1, %v3676_v59  ;;  %v5600_v59 = vld [vmem:[%s7123_s25 + $0x548] sm:$0xff] }
 0x119   : > { %6428 = vmatprep.mubr.msk.bf16.mxu0 %vm272_vm1, %v3677_v2  ;;  %7044 = vmatprep.subr.msk.bf16.mxu1 %vm321_vm0, %v7573_v14  ;;  %v3974_v1 = vpack.c.bf16 %v5600_v59, %v5599_v58  ;;  %v5602_v14 = vld [vmem:[%s7123_s25 + $0x560] sm:$0xff]  ;;  %v5656_v59 = vld [vmem:[%s7123_s25 + $0x409] sm:$0xff] }
 0x11a   : > { %7052 = vmatprep.subr.msk.bf16.mxu0 %vm321_vm0, %v7579_v13  ;;  %v5603_v13 = vld [vmem:[%s7123_s25 + $0x570] sm:$0xff]  ;;  %v5655_v58 = vld [vmem:[%s7123_s25 + $0x3f9] sm:$0xff] }
 0x11b   : > { %v3976_v25 = vpack.c.bf16 %v5604_v19, %v5603_v13  ;;  %v5659_v13 = vld [vmem:[%s7123_s25 + $0x429] sm:$0xff]  ;;  %v5660_v19 = vld [vmem:[%s7123_s25 + $0x439] sm:$0xff] }
 0x11e   : > { %6157 = vmatmul.mubr.msk.bf16.gmra.mrb[4].mxu1 %vm272_vm1, %v3677_v2  ;;  %v5601_v2 = vld [vmem:[%s7123_s25 + $0x558] sm:$0xff] }
 0x11f   : > { %6429 = vmatmul.mubr.msk.bf16.gmra.mrb[4].mxu0 %vm272_vm1, %v3678_v27  ;;  %6160 = vmatprep.mubr.msk.bf16.mxu1 %vm272_vm1, %v3678_v27  ;;  %v3975_v24 = vpack.c.bf16 %v5602_v14, %v5601_v2  ;;  %v5606_v27 = vld [vmem:[%s7123_s25 + $0x590] sm:$0xff]  ;;  %v5658_v14 = vld [vmem:[%s7123_s25 + $0x421] sm:$0xff] }
 0x120   : > { %6432 = vmatprep.mubr.msk.bf16.mxu0 %vm272_vm1, %v3679_v36  ;;  %v3977_v38 = vpack.c.bf16 %v5606_v27, %v5605_v26  ;;  %v5662_v27 = vld [vmem:[%s7123_s25 + $0x451] sm:$0xff] }
 0x126   : > { %6161 = vmatmul.mubr.msk.bf16.gmra.mrb[8].mxu1 %vm272_vm1, %v3679_v36  ;;  %v5607_v36 = vld [vmem:[%s7123_s25 + $0x5a0] sm:$0xff] }
 0x127   : > { %6433 = vmatmul.mubr.msk.bf16.gmra.mrb[8].mxu0 %vm272_vm1, %v3680_v49  ;;  %6164 = vmatprep.mubr.msk.bf16.mxu1 %vm272_vm1, %v3680_v49  ;;  %v3978_v39 = vpack.c.bf16 %v5608_v37, %v5607_v36  ;;  %v5610_v49 = vld [vmem:[%s7123_s25 + $0x5c0] sm:$0xff]  ;;  %v5664_v37 = vld [vmem:[%s7123_s25 + $0x469] sm:$0xff] }
 0x128   : > { %6436 = vmatprep.mubr.msk.bf16.mxu0 %vm272_vm1, %v3681_v50  ;;  %v3979_v60 = vpack.c.bf16 %v5610_v49, %v5609_v48  ;;  %v5663_v36 = vld [vmem:[%s7123_s25 + $0x459] sm:$0xff]  ;;  %v5666_v49 = vld [vmem:[%s7123_s25 + $0x481] sm:$0xff] }
 0x12e   : > { %6165 = vmatmul.mubr.msk.bf16.gmra.mrb[12].mxu1 %vm272_vm1, %v3681_v50  ;;  %v5611_v50 = vld [vmem:[%s7123_s25 + $0x5d0] sm:$0xff] }
 0x12f   : > { %6437 = vmatmul.mubr.msk.bf16.gmra.mrb[12].mxu0 %vm272_vm1, %v3682_v63  ;;  %6168 = vmatprep.mubr.msk.bf16.mxu1 %vm272_vm1, %v3682_v63  ;;  %v3980_v61 = vpack.c.bf16 %v5612_v51, %v5611_v50  ;;  %v5614_v63 = vld [vmem:[%s7123_s25 + $0x5f0] sm:$0xff]  ;;  %v5668_v51 = vld [vmem:[%s7123_s25 + $0x499] sm:$0xff] }
 0x130   : > { %6440 = vmatprep.mubr.msk.bf16.mxu0 %vm272_vm1, %v3683_v3  ;;  %v3981_v5 = vpack.c.bf16 %v5614_v63, %v5613_v62  ;;  %v5667_v50 = vld [vmem:[%s7123_s25 + $0x489] sm:$0xff]  ;;  %v5670_v63 = vld [vmem:[%s7123_s25 + $0x4b1] sm:$0xff] }
 0x136   : > { %6169 = vmatmul.mubr.msk.bf16.gmra.mrb[16].mxu1 %vm272_vm1, %v3683_v3  ;;  %v5615_v3 = vld [vmem:[%s7123_s25 + $0x600] sm:$0xff] }
 0x137   : > { %6441 = vmatmul.mubr.msk.bf16.gmra.mrb[16].mxu0 %vm272_vm1, %v3684_v8  ;;  %6172 = vmatprep.mubr.msk.bf16.mxu1 %vm272_vm1, %v3684_v8  ;;  %v3982_v6 = vpack.c.bf16 %v5616_v4, %v5615_v3  ;;  %v5618_v8 = vld [vmem:[%s7123_s25 + $0x620] sm:$0xff]  ;;  %v5297_v4 = vld [vmem:[%s7123_s25 + $0x4c9] sm:$0xff] }
 0x138   : > { %6444 = vmatprep.mubr.msk.bf16.mxu0 %vm272_vm1, %v3685_v9  ;;  %v3983_v11 = vpack.c.bf16 %v5618_v8, %v5617_v7  ;;  %v5671_v3 = vld [vmem:[%s7123_s25 + $0x4b9] sm:$0xff]  ;;  %v5690_v7 = vld [vmem:[%s7123_s25 + $0x4e9] sm:$0xff] }
 0x139   : > { %v4279_v8 = vpack.c.bf16 %v5671_v3, %v5670_v63 }
 0x13e   : > { %6173 = vmatmul.mubr.msk.bf16.gmra.mrb[20].mxu1 %vm272_vm1, %v3685_v9  ;;  %v5619_v9 = vld [vmem:[%s7123_s25 + $0x630] sm:$0xff] }
 0x13f   : > { %6445 = vmatmul.mubr.msk.bf16.gmra.mrb[20].mxu0 %vm272_vm1, %v3686_v16  ;;  %6176 = vmatprep.mubr.msk.bf16.mxu1 %vm272_vm1, %v3686_v16  ;;  %v3984_v12 = vpack.c.bf16 %v5620_v10, %v5619_v9  ;;  %v5622_v16 = vld [vmem:[%s7123_s25 + $0x650] sm:$0xff] }
 0x140   : > { %6448 = vmatprep.mubr.msk.bf16.mxu0 %vm272_vm1, %v3687_v17  ;;  %v3985_v22 = vpack.c.bf16 %v5622_v16, %v5621_v15  ;;  %v5693_v15 = vld [vmem:[%s7123_s25 + $0x511] sm:$0xff]  ;;  %v5694_v16 = vld [vmem:[%s7123_s25 + $0x519] sm:$0xff] }
 0x146   : > { %6177 = vmatmul.mubr.msk.bf16.gmra.mrb[24].mxu1 %vm272_vm1, %v3687_v17  ;;  %v5248_v17 = vld [vmem:[%s7123_s25 + $0x331] sm:$0xff] }
 0x147   : > { %6449 = vmatmul.mubr.msk.bf16.gmra.mrb[24].mxu0 %vm272_vm1, %v3688_v23  ;;  %6180 = vmatprep.mubr.msk.bf16.mxu1 %vm272_vm1, %v3688_v23  ;;  %v1908_v23 = vpack.c.bf16 %v5249_v18, %v5248_v17  ;;  %v4560_v18 = vpack.c.bf16 %v5694_v16, %v5693_v15 }
 0x148   : > { %6452 = vmatprep.mubr.msk.bf16.mxu0 %vm272_vm1, %v3689_v28 }
 0x14e   : > { %6181 = vmatmul.mubr.msk.bf16.gmra.mrb[28].mxu1 %vm272_vm1, %v3689_v28  ;;  %v4264_v28 = vpack.c.bf16 %v5641_v21, %v5640_v20  ;;  %v5695_v20 = vld [vmem:[%s7123_s25 + $0x529] sm:$0xff]  ;;  %v5696_v21 = vld [vmem:[%s7123_s25 + $0x531] sm:$0xff] }
 0x14f   : > { %6453 = vmatmul.mubr.msk.bf16.gmra.mrb[28].mxu0 %vm272_vm1, %v3690_v35  ;;  %6186 = vmatprep.mubr.msk.bf16.mxu1 %vm272_vm1, %v1614_v40  ;;  %v4625_v35 = vsel %vm321_vm0, %v7663_v55, 0  ;;  %v4266_v40 = vpack.c.bf16 %v5645_v32, %v5644_v31  ;;  %v5700_v31 = vld [vmem:[%s7123_s25 + $0x561] sm:$0xff]  ;;  %v5701_v32 = vld [vmem:[%s7123_s25 + $0x571] sm:$0xff] }
 0x150   : > { %6458 = vmatprep.mubr.msk.bf16.mxu0 %vm272_vm1, %v3970_v41 }
 0x156   : > { %6187 = vmatmul.mubr.msk.bf16.vlgmr.msra.gmra.mrb[0].mxu1 %vm272_vm1, %v3970_v41  ;;  %v5646_v41 = vld [vmem:[%s7123_s25 + $0x391] sm:$0xff] }
 0x157   : > { %6219 = vmatpush3.bf16.msra.mxu1 %v1975_v47  ;;  %6459 = vmatmul.mubr.msk.bf16.vlgmr.msra.gmra.mrb[0].mxu0 %vm272_vm1, %v3971_v46  ;;  %v4267_v45 = vpack.c.bf16 %v5647_v42, %v5646_v41  ;;  %v5650_v47 = vld [vmem:[%s7123_s25 + $0x3c1] sm:$0xff]  ;;  %v5704_v41 = vld [vmem:[%s7123_s25 + $0x591] sm:$0xff] }
 0x158   : > { %6491 = vmatpush3.bf16.msra.mxu0 %v4331_v52  ;;  %6190 = vmatprep.mubr.msk.bf16.mxu1 %vm272_vm1, %v3971_v46  ;;  %v4268_v46 = vpack.c.bf16 %v5649_v44, %v5648_v43  ;;  %v5651_v52 = vld [vmem:[%s7123_s25 + $0x3c9] sm:$0xff]  ;;  %v5705_v42 = vld [vmem:[%s7123_s25 + $0x5a1] sm:$0xff] }
 0x159   : > { %6462 = vmatprep.mubr.msk.bf16.mxu0 %vm272_vm1, %v3972_v53  ;;  %7045 = vmatprep.subr.msk.bf16.mxu1 %vm321_vm0, %v7657_v54  ;;  %v5653_v54 = vld [vmem:[%s7123_s25 + $0x3e1] sm:$0xff]  ;;  %v5706_v43 = vld [vmem:[%s7123_s25 + $0x5a9] sm:$0xff] }
 0x15a   : > { %7053 = vmatprep.subr.msk.bf16.mxu0 %vm321_vm0, %v7663_v55  ;;  %v4269_v55 = vpack.c.bf16 %v5651_v52, %v5650_v47  ;;  %v5708_v47 = vld [vmem:[%s7123_s25 + $0x5c1] sm:$0xff]  ;;  %v5709_v52 = vld [vmem:[%s7123_s25 + $0x5d1] sm:$0xff] }
 0x15e   : > { %6191 = vmatmul.mubr.msk.bf16.gmra.mrb[4].mxu1 %vm272_vm1, %v3972_v53  ;;  %v5652_v53 = vld [vmem:[%s7123_s25 + $0x3d9] sm:$0xff] }
 0x15f   : > { %6463 = vmatmul.mubr.msk.bf16.gmra.mrb[4].mxu0 %vm272_vm1, %v3973_v0  ;;  %6194 = vmatprep.mubr.msk.bf16.mxu1 %vm272_vm1, %v3973_v0  ;;  %v4270_v56 = vpack.c.bf16 %v5653_v54, %v5652_v53  ;;  %v5657_v0 = vld [vmem:[%s7123_s25 + $0x411] sm:$0xff]  ;;  %v5710_v53 = vld [vmem:[%s7123_s25 + $0x5d9] sm:$0xff] }
 0x160   : > { %6466 = vmatprep.mubr.msk.bf16.mxu0 %vm272_vm1, %v3974_v1  ;;  %v4272_v2 = vpack.c.bf16 %v5657_v0, %v5656_v59  ;;  %v5714_v59 = vld [vmem:[%s7123_s25 + $0x609] sm:$0xff] }
 0x166   : > { %6195 = vmatmul.mubr.msk.bf16.gmra.mrb[8].mxu1 %vm272_vm1, %v3974_v1  ;;  %v4271_v1 = vpack.c.bf16 %v5655_v58, %v5654_v57  ;;  %v5712_v57 = vld [vmem:[%s7123_s25 + $0x5f1] sm:$0xff]  ;;  %v5713_v58 = vld [vmem:[%s7123_s25 + $0x601] sm:$0xff] }
 0x167   : > { %6467 = vmatmul.mubr.msk.bf16.gmra.mrb[8].mxu0 %vm272_vm1, %v3975_v24  ;;  %6198 = vmatprep.mubr.msk.bf16.mxu1 %vm272_vm1, %v3975_v24  ;;  %v5661_v24 = vld [vmem:[%s7123_s25 + $0x441] sm:$0xff] }
 0x168   : > { %6470 = vmatprep.mubr.msk.bf16.mxu0 %vm272_vm1, %v3976_v25  ;;  %v4274_v26 = vpack.c.bf16 %v5661_v24, %v5660_v19  ;;  %v5718_v19 = vld [vmem:[%s7123_s25 + $0x639] sm:$0xff] }
 0x16e   : > { %6199 = vmatmul.mubr.msk.bf16.gmra.mrb[12].mxu1 %vm272_vm1, %v3976_v25  ;;  %v4273_v25 = vpack.c.bf16 %v5659_v13, %v5658_v14  ;;  %v5716_v14 = vld [vmem:[%s7123_s25 + $0x621] sm:$0xff]  ;;  %v5717_v13 = vld [vmem:[%s7123_s25 + $0x631] sm:$0xff] }
 0x16f   : > { %6471 = vmatmul.mubr.msk.bf16.gmra.mrb[12].mxu0 %vm272_vm1, %v3977_v38  ;;  %6202 = vmatprep.mubr.msk.bf16.mxu1 %vm272_vm1, %v3977_v38  ;;  %v5665_v38 = vld [vmem:[%s7123_s25 + $0x471] sm:$0xff] }
 0x170   : > { %6474 = vmatprep.mubr.msk.bf16.mxu0 %vm272_vm1, %v3978_v39  ;;  %v4276_v48 = vpack.c.bf16 %v5665_v38, %v5664_v37 }
 0x176   : > { %6203 = vmatmul.mubr.msk.bf16.gmra.mrb[16].mxu1 %vm272_vm1, %v3978_v39  ;;  %v4275_v39 = vpack.c.bf16 %v5663_v36, %v5662_v27  ;;  %v5720_v27 = vld [vmem:[%s7123_s25 + $0x651] sm:$0xff] }
 0x177   : > { %6475 = vmatmul.mubr.msk.bf16.gmra.mrb[16].mxu0 %vm272_vm1, %v3979_v60  ;;  %6206 = vmatprep.mubr.msk.bf16.mxu1 %vm272_vm1, %v3979_v60  ;;  %v5669_v60 = vld [vmem:[%s7123_s25 + $0x4a1] sm:$0xff] }
 0x178   : > { %6478 = vmatprep.mubr.msk.bf16.mxu0 %vm272_vm1, %v3980_v61  ;;  %v4278_v62 = vpack.c.bf16 %v5669_v60, %v5668_v51 }
 0x17e   : > { %6207 = vmatmul.mubr.msk.bf16.gmra.mrb[20].mxu1 %vm272_vm1, %v3980_v61  ;;  %v4277_v61 = vpack.c.bf16 %v5667_v50, %v5666_v49 }
 0x17f   : > { %6479 = vmatmul.mubr.msk.bf16.gmra.mrb[20].mxu0 %vm272_vm1, %v3981_v5  ;;  %6210 = vmatprep.mubr.msk.bf16.mxu1 %vm272_vm1, %v3981_v5  ;;  %v5298_v5 = vld [vmem:[%s7123_s25 + $0x4d1] sm:$0xff] }
 0x180   : > { %6482 = vmatprep.mubr.msk.bf16.mxu0 %vm272_vm1, %v3982_v6  ;;  %v2202_v9 = vpack.c.bf16 %v5298_v5, %v5297_v4 }
 0x186   : > { %6211 = vmatmul.mubr.msk.bf16.gmra.mrb[24].mxu1 %vm272_vm1, %v3982_v6  ;;  %v5689_v6 = vld [vmem:[%s7123_s25 + $0x4e1] sm:$0xff] }
 0x187   : > { %6483 = vmatmul.mubr.msk.bf16.gmra.mrb[24].mxu0 %vm272_vm1, %v3983_v11  ;;  %6214 = vmatprep.mubr.msk.bf16.mxu1 %vm272_vm1, %v3983_v11  ;;  %v4558_v10 = vpack.c.bf16 %v5690_v7, %v5689_v6  ;;  %v5691_v11 = vld [vmem:[%s7123_s25 + $0x4f9] sm:$0xff] }
 0x188   : > { %6486 = vmatprep.mubr.msk.bf16.mxu0 %vm272_vm1, %v3984_v12 }
 0x18e   : > { %6215 = vmatmul.mubr.msk.bf16.gmra.mrb[28].mxu1 %vm272_vm1, %v3984_v12  ;;  %v5692_v12 = vld [vmem:[%s7123_s25 + $0x501] sm:$0xff] }
 0x18f   : > { %6487 = vmatmul.mubr.msk.bf16.gmra.mrb[28].mxu0 %vm272_vm1, %v3985_v22  ;;  %6220 = vmatprep.mubr.msk.bf16.mxu1 %vm272_vm1, %v1908_v23  ;;  %v4559_v17 = vpack.c.bf16 %v5692_v12, %v5691_v11  ;;  %v5697_v22 = vld [vmem:[%s7123_s25 + $0x541] sm:$0xff]  ;;  %v5698_v23 = vld [vmem:[%s7123_s25 + $0x549] sm:$0xff] }
 0x190   : > { %6492 = vmatprep.mubr.msk.bf16.mxu0 %vm272_vm1, %v4264_v28  ;;  %v4562_v29 = vpack.c.bf16 %v5698_v23, %v5697_v22 }
 0x196   : > { %6221 = vmatmul.mubr.msk.bf16.vlgmr.msra.gmra.mrb[0].mxu1 %vm272_vm1, %v4264_v28  ;;  %v4561_v28 = vpack.c.bf16 %v5696_v21, %v5695_v20 }
 0x197   : > { %6253 = vmatpush3.bf16.msra.mxu1 %v2269_v34  ;;  %6493 = vmatmul.mubr.msk.bf16.vlgmr.msra.gmra.mrb[0].mxu0 %vm272_vm1, %v4265_v33  ;;  %v4563_v34 = vpack.c.bf16 %v5700_v31, %v5699_v30 }
 0x198   : > { %6525 = vmatpush3.bf16.msra.mxu0 %v4625_v35  ;;  %6224 = vmatprep.mubr.msk.bf16.mxu1 %vm272_vm1, %v4265_v33  ;;  %v5702_v33 = vld [vmem:[%s7123_s25 + $0x579] sm:$0xff] }
 0x199   : > { %6496 = vmatprep.mubr.msk.bf16.mxu0 %vm272_vm1, %v4266_v40  ;;  %v4564_v35 = vpack.c.bf16 %v5702_v33, %v5701_v32 }
 0x19e   : > { %6225 = vmatmul.mubr.msk.bf16.gmra.mrb[4].mxu1 %vm272_vm1, %v4266_v40  ;;  %v5703_v40 = vld [vmem:[%s7123_s25 + $0x589] sm:$0xff] }
 0x19f   : > { %6497 = vmatmul.mubr.msk.bf16.gmra.mrb[4].mxu0 %vm272_vm1, %v4267_v45  ;;  %6228 = vmatprep.mubr.msk.bf16.mxu1 %vm272_vm1, %v4267_v45  ;;  %v4565_v44 = vpack.c.bf16 %v5704_v41, %v5703_v40  ;;  %v4566_v45 = vpack.c.bf16 %v5706_v43, %v5705_v42 }
 0x1a0   : > { %6500 = vmatprep.mubr.msk.bf16.mxu0 %vm272_vm1, %v4268_v46 }
 0x1a6   : > { %6229 = vmatmul.mubr.msk.bf16.gmra.mrb[8].mxu1 %vm272_vm1, %v4268_v46  ;;  %v5707_v46 = vld [vmem:[%s7123_s25 + $0x5b9] sm:$0xff] }
 0x1a7   : > { %6501 = vmatmul.mubr.msk.bf16.gmra.mrb[8].mxu0 %vm272_vm1, %v4269_v55  ;;  %6232 = vmatprep.mubr.msk.bf16.mxu1 %vm272_vm1, %v4269_v55  ;;  %v4567_v54 = vpack.c.bf16 %v5708_v47, %v5707_v46  ;;  %v4568_v55 = vpack.c.bf16 %v5710_v53, %v5709_v52 }
 0x1a8   : > { %6504 = vmatprep.mubr.msk.bf16.mxu0 %vm272_vm1, %v4270_v56 }
 0x1ae   : > { %6233 = vmatmul.mubr.msk.bf16.gmra.mrb[12].mxu1 %vm272_vm1, %v4270_v56  ;;  %v5711_v56 = vld [vmem:[%s7123_s25 + $0x5e9] sm:$0xff] }
 0x1af   : > { %6505 = vmatmul.mubr.msk.bf16.gmra.mrb[12].mxu0 %vm272_vm1, %v4271_v1  ;;  %6236 = vmatprep.mubr.msk.bf16.mxu1 %vm272_vm1, %v4271_v1  ;;  %v4569_v0 = vpack.c.bf16 %v5712_v57, %v5711_v56  ;;  %v4570_v1 = vpack.c.bf16 %v5714_v59, %v5713_v58 }
 0x1b0   : > { %6508 = vmatprep.mubr.msk.bf16.mxu0 %vm272_vm1, %v4272_v2 }
 0x1b6   : > { %6237 = vmatmul.mubr.msk.bf16.gmra.mrb[16].mxu1 %vm272_vm1, %v4272_v2  ;;  %v5715_v2 = vld [vmem:[%s7123_s25 + $0x619] sm:$0xff] }
 0x1b7   : > { %6509 = vmatmul.mubr.msk.bf16.gmra.mrb[16].mxu0 %vm272_vm1, %v4273_v25  ;;  %6240 = vmatprep.mubr.msk.bf16.mxu1 %vm272_vm1, %v4273_v25  ;;  %v4571_v24 = vpack.c.bf16 %v5716_v14, %v5715_v2  ;;  %v4572_v25 = vpack.c.bf16 %v5718_v19, %v5717_v13 }
 0x1b8   : > { %6512 = vmatprep.mubr.msk.bf16.mxu0 %vm272_vm1, %v4274_v26 }
 0x1be   : > { %6241 = vmatmul.mubr.msk.bf16.gmra.mrb[20].mxu1 %vm272_vm1, %v4274_v26  ;;  %v5719_v26 = vld [vmem:[%s7123_s25 + $0x649] sm:$0xff]  ;;  %s5741_s25 = sshll.u32 %s7974_s13, 8 }
 0x1bf   : > { %6513 = vmatmul.mubr.msk.bf16.gmra.mrb[20].mxu0 %vm272_vm1, %v4275_v39  ;;  %6244 = vmatprep.mubr.msk.bf16.mxu1 %vm272_vm1, %v4275_v39  ;;  %v4573_v36 = vpack.c.bf16 %v5720_v27, %v5719_v26  ;;  %v7862_v39 = vld [vmem:[%s7971_s2] ss:$0 sm:$0xff]  ;;  %s7871_s30 = scalar_lea.vmem %s7972_s3, %s5741_s25 }
 0x1c0   : > { %6516 = vmatprep.mubr.msk.bf16.mxu0 %vm272_vm1, %v4276_v48 }
 0x1c6   : > { %6245 = vmatmul.mubr.msk.bf16.gmra.mrb[24].mxu1 %vm272_vm1, %v4276_v48 }
 0x1c7   : > { %6517 = vmatmul.mubr.msk.bf16.gmra.mrb[24].mxu0 %vm272_vm1, %v4277_v61  ;;  %6248 = vmatprep.mubr.msk.bf16.mxu1 %vm272_vm1, %v4277_v61 }
 0x1c8   : > { %6520 = vmatprep.mubr.msk.bf16.mxu0 %vm272_vm1, %v4278_v62 }
 0x1ce   : > { %6249 = vmatmul.mubr.msk.bf16.gmra.mrb[28].mxu1 %vm272_vm1, %v4278_v62 }
 0x1cf   : > { %6521 = vmatmul.mubr.msk.bf16.gmra.mrb[28].mxu0 %vm272_vm1, %v4279_v8  ;;  %6254 = vmatprep.mubr.msk.bf16.mxu1 %vm272_vm1, %v2202_v9 }
 0x1d0   : > { %6526 = vmatprep.mubr.msk.bf16.mxu0 %vm272_vm1, %v4558_v10 }
 0x1d6   : > { %6255 = vmatmul.mubr.msk.bf16.vlgmr.msra.gmra.mrb[0].mxu1 %vm272_vm1, %v4558_v10 }
 0x1d7   : > { %6527 = vmatmul.mubr.msk.bf16.vlgmr.msra.gmra.mrb[0].mxu0 %vm272_vm1, %v4559_v17  ;;  %6258 = vmatprep.mubr.msk.bf16.mxu1 %vm272_vm1, %v4559_v17 }
 0x1d8   : > { %6530 = vmatprep.mubr.msk.bf16.mxu0 %vm272_vm1, %v4560_v18 }
 0x1de   : > { %6259 = vmatmul.mubr.msk.bf16.gmra.mrb[4].mxu1 %vm272_vm1, %v4560_v18 }
 0x1df   : > { %6531 = vmatmul.mubr.msk.bf16.gmra.mrb[4].mxu0 %vm272_vm1, %v4561_v28  ;;  %6262 = vmatprep.mubr.msk.bf16.mxu1 %vm272_vm1, %v4561_v28 }
 0x1e0   : > { %6534 = vmatprep.mubr.msk.bf16.mxu0 %vm272_vm1, %v4562_v29 }
 0x1e6   : > { %6263 = vmatmul.mubr.msk.bf16.gmra.mrb[8].mxu1 %vm272_vm1, %v4562_v29 }
 0x1e7   : > { %6535 = vmatmul.mubr.msk.bf16.gmra.mrb[8].mxu0 %vm272_vm1, %v4563_v34  ;;  %6266 = vmatprep.mubr.msk.bf16.mxu1 %vm272_vm1, %v4563_v34 }
 0x1e8   : > { %6538 = vmatprep.mubr.msk.bf16.mxu0 %vm272_vm1, %v4564_v35 }
 0x1ee   : > { %6267 = vmatmul.mubr.msk.bf16.gmra.mrb[12].mxu1 %vm272_vm1, %v4564_v35 }
 0x1ef   : > { %6539 = vmatmul.mubr.msk.bf16.gmra.mrb[12].mxu0 %vm272_vm1, %v4565_v44  ;;  %6270 = vmatprep.mubr.msk.bf16.mxu1 %vm272_vm1, %v4565_v44 }
 0x1f0   : > { %6542 = vmatprep.mubr.msk.bf16.mxu0 %vm272_vm1, %v4566_v45 }
 0x1f6   : > { %6271 = vmatmul.mubr.msk.bf16.gmra.mrb[16].mxu1 %vm272_vm1, %v4566_v45 }
 0x1f7   : > { %6543 = vmatmul.mubr.msk.bf16.gmra.mrb[16].mxu0 %vm272_vm1, %v4567_v54  ;;  %6274 = vmatprep.mubr.msk.bf16.mxu1 %vm272_vm1, %v4567_v54 }
 0x1f8   : > { %6546 = vmatprep.mubr.msk.bf16.mxu0 %vm272_vm1, %v4568_v55 }
 0x1fe   : > { %6275 = vmatmul.mubr.msk.bf16.gmra.mrb[20].mxu1 %vm272_vm1, %v4568_v55 }
 0x1ff   : > { %6547 = vmatmul.mubr.msk.bf16.gmra.mrb[20].mxu0 %vm272_vm1, %v4569_v0  ;;  %6278 = vmatprep.mubr.msk.bf16.mxu1 %vm272_vm1, %v4569_v0 }
 0x200   : > { %6550 = vmatprep.mubr.msk.bf16.mxu0 %vm272_vm1, %v4570_v1 }
 0x206   : > { %6279 = vmatmul.mubr.msk.bf16.gmra.mrb[24].mxu1 %vm272_vm1, %v4570_v1 }
 0x207   : > { %6551 = vmatmul.mubr.msk.bf16.gmra.mrb[24].mxu0 %vm272_vm1, %v4571_v24  ;;  %6282 = vmatprep.mubr.msk.bf16.mxu1 %vm272_vm1, %v4571_v24 }
 0x208   : > { %6554 = vmatprep.mubr.msk.bf16.mxu0 %vm272_vm1, %v4572_v25 }
 0x20e   : > { %6283 = vmatmul.mubr.msk.bf16.gmra.mrb[28].mxu1 %vm272_vm1, %v4572_v25 }
 0x20f   : > { %6555 = vmatmul.mubr.msk.bf16.gmra.mrb[28].mxu0 %vm272_vm1, %v4573_v36 }
 0x2a9   : > { %v6256_v37 = vpop.f32.mrb[0].mxu1 }
 0x2aa   : > { %v6528_v38 = vpop.f32.mrb[0].mxu0  ;;  %v2305_v48 = vpop.f32.mrb[1].mxu1 }
 0x2ab   : > { %v6558_v49 = vadd.f32 %v6528_v38, %v6256_v37  ;;  %v4661_v50 = vpop.f32.mrb[1].mxu0  ;;  %v6257_v51 = vpop.f32.mrb[2].mxu1 }
 0x2ac   : > { %v6559_v60 = vadd.f32 %v4661_v50, %v2305_v48  ;;  %v6529_v61 = vpop.f32.mrb[2].mxu0  ;;  %v2308_v62 = vpop.f32.mrb[3].mxu1 }
 0x2ad   : > { %v4829_v63 = vadd.f32 %v6558_v49, %v7862_v39  ;;  %v6560_v3 = vadd.f32 %v6529_v61, %v6257_v51  ;;  %v4664_v4 = vpop.f32.mrb[3].mxu0 }
 0x2ae   : > { %v4827_v5 = vadd.f32 %v6559_v60, %v7862_v39  ;;  %v6561_v6 = vadd.f32 %v4664_v4, %v2308_v62 }
 0x2af   : > { %v4861_v7 = vmul.f32 0.2, %v4829_v63  ;;  %v4830_v8 = vadd.f32 %v6560_v3, %v7862_v39 }
 0x2b0   : > { %v4859_v9 = vmul.f32 0.2, %v4827_v5  ;;  %v4828_v10 = vadd.f32 %v6561_v6, %v7862_v39 }
 0x2b1   : > { %v4893_v11 = vmax.f32 %v4829_v63, %v4861_v7  ;;  %v4862_v12 = vmul.f32 0.2, %v4830_v8  ;;  %v6260_v15 = vpop.f32.mrb[4].mxu1 }
 0x2b2   : > { %v4891_v16 = vmax.f32 %v4827_v5, %v4859_v9  ;;  %v4860_v17 = vmul.f32 0.2, %v4828_v10  ;;  %v6532_v18 = vpop.f32.mrb[4].mxu0  ;;  %v2321_v20 = vpop.f32.mrb[5].mxu1 }
 0x2b3   : > { %4926 = vst.msk [vmem:[%s7871_s30 + $0x10] sm:$0xff] %vm4923_vm2, %v4893_v11  ;;  %v4894_v21 = vmax.f32 %v4830_v8, %v4862_v12  ;;  %v6562_v22 = vadd.f32 %v6532_v18, %v6260_v15  ;;  %v4677_v23 = vpop.f32.mrb[5].mxu0  ;;  %v6261_v28 = vpop.f32.mrb[6].mxu1 }
 0x2b4   : > { %4924 = vst.msk [vmem:[%s7871_s30] sm:$0xff] %vm4923_vm2, %v4891_v16  ;;  %v4892_v29 = vmax.f32 %v4828_v10, %v4860_v17  ;;  %v6563_v30 = vadd.f32 %v4677_v23, %v2321_v20  ;;  %v6533_v31 = vpop.f32.mrb[6].mxu0  ;;  %v2324_v32 = vpop.f32.mrb[7].mxu1 }
 0x2b5   : > { %4927 = vst.msk [vmem:[%s7871_s30 + $0x18] sm:$0xff] %vm4923_vm2, %v4894_v21  ;;  %v4833_v33 = vadd.f32 %v6562_v22, %v7862_v39  ;;  %v6564_v34 = vadd.f32 %v6533_v31, %v6261_v28  ;;  %v4680_v35 = vpop.f32.mrb[7].mxu0 }
 0x2b6   : > { %4925 = vst.msk [vmem:[%s7871_s30 + $0x8] sm:$0xff] %vm4923_vm2, %v4892_v29  ;;  %v4831_v40 = vadd.f32 %v6563_v30, %v7862_v39  ;;  %v6565_v41 = vadd.f32 %v4680_v35, %v2324_v32 }
 0x2b7   : > { %v4865_v42 = vmul.f32 0.2, %v4833_v33  ;;  %v4834_v43 = vadd.f32 %v6564_v34, %v7862_v39 }
 0x2b8   : > { %v4863_v44 = vmul.f32 0.2, %v4831_v40  ;;  %v4832_v45 = vadd.f32 %v6565_v41, %v7862_v39 }
 0x2b9   : > { %v4897_v46 = vmax.f32 %v4833_v33, %v4865_v42  ;;  %v4866_v47 = vmul.f32 0.2, %v4834_v43  ;;  %v6264_v52 = vpop.f32.mrb[8].mxu1 }
 0x2ba   : > { %v4895_v53 = vmax.f32 %v4831_v40, %v4863_v44  ;;  %v4864_v54 = vmul.f32 0.2, %v4832_v45  ;;  %v6536_v55 = vpop.f32.mrb[8].mxu0  ;;  %v2337_v56 = vpop.f32.mrb[9].mxu1 }
 0x2bb   : > { %4930 = vst.msk [vmem:[%s7871_s30 + $0x30] sm:$0xff] %vm4923_vm2, %v4897_v46  ;;  %v4898_v57 = vmax.f32 %v4834_v43, %v4866_v47  ;;  %v6566_v58 = vadd.f32 %v6536_v55, %v6264_v52  ;;  %v4693_v59 = vpop.f32.mrb[9].mxu0  ;;  %v6265_v0 = vpop.f32.mrb[10].mxu1 }
 0x2bc   : > { %4928 = vst.msk [vmem:[%s7871_s30 + $0x20] sm:$0xff] %vm4923_vm2, %v4895_v53  ;;  %v4896_v1 = vmax.f32 %v4832_v45, %v4864_v54  ;;  %v6567_v2 = vadd.f32 %v4693_v59, %v2337_v56  ;;  %v6537_v14 = vpop.f32.mrb[10].mxu0  ;;  %v2340_v13 = vpop.f32.mrb[11].mxu1 }
 0x2bd   : > { %4931 = vst.msk [vmem:[%s7871_s30 + $0x38] sm:$0xff] %vm4923_vm2, %v4898_v57  ;;  %v4837_v19 = vadd.f32 %v6566_v58, %v7862_v39  ;;  %v6568_v24 = vadd.f32 %v6537_v14, %v6265_v0  ;;  %v4696_v25 = vpop.f32.mrb[11].mxu0 }
 0x2be   : > { %4929 = vst.msk [vmem:[%s7871_s30 + $0x28] sm:$0xff] %vm4923_vm2, %v4896_v1  ;;  %v4835_v26 = vadd.f32 %v6567_v2, %v7862_v39  ;;  %v6569_v27 = vadd.f32 %v4696_v25, %v2340_v13 }
 0x2bf   : > { %v4869_v36 = vmul.f32 0.2, %v4837_v19  ;;  %v4838_v37 = vadd.f32 %v6568_v24, %v7862_v39 }
 0x2c0   : > { %v4867_v38 = vmul.f32 0.2, %v4835_v26  ;;  %v4836_v48 = vadd.f32 %v6569_v27, %v7862_v39 }
 0x2c1   : > { %v4901_v49 = vmax.f32 %v4837_v19, %v4869_v36  ;;  %v4870_v50 = vmul.f32 0.2, %v4838_v37  ;;  %v6268_v51 = vpop.f32.mrb[12].mxu1 }
 0x2c2   : > { %v4899_v60 = vmax.f32 %v4835_v26, %v4867_v38  ;;  %v4868_v61 = vmul.f32 0.2, %v4836_v48  ;;  %v6540_v62 = vpop.f32.mrb[12].mxu0  ;;  %v2353_v63 = vpop.f32.mrb[13].mxu1 }
 0x2c3   : > { %4934 = vst.msk [vmem:[%s7871_s30 + $0x50] sm:$0xff] %vm4923_vm2, %v4901_v49  ;;  %v4902_v3 = vmax.f32 %v4838_v37, %v4870_v50  ;;  %v6570_v4 = vadd.f32 %v6540_v62, %v6268_v51  ;;  %v4709_v5 = vpop.f32.mrb[13].mxu0  ;;  %v6269_v6 = vpop.f32.mrb[14].mxu1 }
 0x2c4   : > { %4932 = vst.msk [vmem:[%s7871_s30 + $0x40] sm:$0xff] %vm4923_vm2, %v4899_v60  ;;  %v4900_v7 = vmax.f32 %v4836_v48, %v4868_v61  ;;  %v6571_v8 = vadd.f32 %v4709_v5, %v2353_v63  ;;  %v6541_v9 = vpop.f32.mrb[14].mxu0  ;;  %v2356_v10 = vpop.f32.mrb[15].mxu1 }
 0x2c5   : > { %4935 = vst.msk [vmem:[%s7871_s30 + $0x58] sm:$0xff] %vm4923_vm2, %v4902_v3  ;;  %v4841_v11 = vadd.f32 %v6570_v4, %v7862_v39  ;;  %v6572_v12 = vadd.f32 %v6541_v9, %v6269_v6  ;;  %v4712_v15 = vpop.f32.mrb[15].mxu0 }
 0x2c6   : > { %4933 = vst.msk [vmem:[%s7871_s30 + $0x48] sm:$0xff] %vm4923_vm2, %v4900_v7  ;;  %v4839_v16 = vadd.f32 %v6571_v8, %v7862_v39  ;;  %v6573_v17 = vadd.f32 %v4712_v15, %v2356_v10 }
 0x2c7   : > { %v4873_v18 = vmul.f32 0.2, %v4841_v11  ;;  %v4842_v20 = vadd.f32 %v6572_v12, %v7862_v39 }
 0x2c8   : > { %v4871_v21 = vmul.f32 0.2, %v4839_v16  ;;  %v4840_v22 = vadd.f32 %v6573_v17, %v7862_v39 }
 0x2c9   : > { %v4905_v23 = vmax.f32 %v4841_v11, %v4873_v18  ;;  %v4874_v28 = vmul.f32 0.2, %v4842_v20  ;;  %v6272_v29 = vpop.f32.mrb[16].mxu1 }
 0x2ca   : > { %v4903_v30 = vmax.f32 %v4839_v16, %v4871_v21  ;;  %v4872_v31 = vmul.f32 0.2, %v4840_v22  ;;  %v6544_v32 = vpop.f32.mrb[16].mxu0  ;;  %v2369_v33 = vpop.f32.mrb[17].mxu1 }
 0x2cb   : > { %4938 = vst.msk [vmem:[%s7871_s30 + $0x70] sm:$0xff] %vm4923_vm2, %v4905_v23  ;;  %v4906_v34 = vmax.f32 %v4842_v20, %v4874_v28  ;;  %v6574_v35 = vadd.f32 %v6544_v32, %v6272_v29  ;;  %v4725_v40 = vpop.f32.mrb[17].mxu0  ;;  %v6273_v41 = vpop.f32.mrb[18].mxu1 }
 0x2cc   : > { %4936 = vst.msk [vmem:[%s7871_s30 + $0x60] sm:$0xff] %vm4923_vm2, %v4903_v30  ;;  %v4904_v42 = vmax.f32 %v4840_v22, %v4872_v31  ;;  %v6575_v43 = vadd.f32 %v4725_v40, %v2369_v33  ;;  %v6545_v44 = vpop.f32.mrb[18].mxu0  ;;  %v2372_v45 = vpop.f32.mrb[19].mxu1 }
 0x2cd   : > { %4939 = vst.msk [vmem:[%s7871_s30 + $0x78] sm:$0xff] %vm4923_vm2, %v4906_v34  ;;  %v4845_v46 = vadd.f32 %v6574_v35, %v7862_v39  ;;  %v6576_v47 = vadd.f32 %v6545_v44, %v6273_v41  ;;  %v4728_v52 = vpop.f32.mrb[19].mxu0 }
 0x2ce   : > { %4937 = vst.msk [vmem:[%s7871_s30 + $0x68] sm:$0xff] %vm4923_vm2, %v4904_v42  ;;  %v4843_v53 = vadd.f32 %v6575_v43, %v7862_v39  ;;  %v6577_v54 = vadd.f32 %v4728_v52, %v2372_v45 }
 0x2cf   : > { %v4877_v55 = vmul.f32 0.2, %v4845_v46  ;;  %v4846_v56 = vadd.f32 %v6576_v47, %v7862_v39 }
 0x2d0   : > { %v4875_v57 = vmul.f32 0.2, %v4843_v53  ;;  %v4844_v58 = vadd.f32 %v6577_v54, %v7862_v39 }
 0x2d1   : > { %v4909_v59 = vmax.f32 %v4845_v46, %v4877_v55  ;;  %v4878_v0 = vmul.f32 0.2, %v4846_v56  ;;  %v6276_v1 = vpop.f32.mrb[20].mxu1 }
 0x2d2   : > { %v4907_v2 = vmax.f32 %v4843_v53, %v4875_v57  ;;  %v4876_v14 = vmul.f32 0.2, %v4844_v58  ;;  %v6548_v13 = vpop.f32.mrb[20].mxu0  ;;  %v2385_v19 = vpop.f32.mrb[21].mxu1 }
 0x2d3   : > { %4942 = vst.msk [vmem:[%s7871_s30 + $0x90] sm:$0xff] %vm4923_vm2, %v4909_v59  ;;  %v4910_v24 = vmax.f32 %v4846_v56, %v4878_v0  ;;  %v6578_v25 = vadd.f32 %v6548_v13, %v6276_v1  ;;  %v4741_v26 = vpop.f32.mrb[21].mxu0  ;;  %v6277_v27 = vpop.f32.mrb[22].mxu1 }
 0x2d4   : > { %4940 = vst.msk [vmem:[%s7871_s30 + $0x80] sm:$0xff] %vm4923_vm2, %v4907_v2  ;;  %v4908_v36 = vmax.f32 %v4844_v58, %v4876_v14  ;;  %v6579_v37 = vadd.f32 %v4741_v26, %v2385_v19  ;;  %v6549_v38 = vpop.f32.mrb[22].mxu0  ;;  %v2388_v48 = vpop.f32.mrb[23].mxu1 }
 0x2d5   : > { %4943 = vst.msk [vmem:[%s7871_s30 + $0x98] sm:$0xff] %vm4923_vm2, %v4910_v24  ;;  %v4849_v49 = vadd.f32 %v6578_v25, %v7862_v39  ;;  %v6580_v50 = vadd.f32 %v6549_v38, %v6277_v27  ;;  %v4744_v51 = vpop.f32.mrb[23].mxu0 }
 0x2d6   : > { %4941 = vst.msk [vmem:[%s7871_s30 + $0x88] sm:$0xff] %vm4923_vm2, %v4908_v36  ;;  %v4847_v60 = vadd.f32 %v6579_v37, %v7862_v39  ;;  %v6581_v61 = vadd.f32 %v4744_v51, %v2388_v48 }
 0x2d7   : > { %v4881_v62 = vmul.f32 0.2, %v4849_v49  ;;  %v4850_v63 = vadd.f32 %v6580_v50, %v7862_v39 }
 0x2d8   : > { %v4879_v3 = vmul.f32 0.2, %v4847_v60  ;;  %v4848_v4 = vadd.f32 %v6581_v61, %v7862_v39 }
 0x2d9   : > { %v4913_v5 = vmax.f32 %v4849_v49, %v4881_v62  ;;  %v4882_v6 = vmul.f32 0.2, %v4850_v63  ;;  %v6280_v7 = vpop.f32.mrb[24].mxu1 }
 0x2da   : > { %v4911_v8 = vmax.f32 %v4847_v60, %v4879_v3  ;;  %v4880_v9 = vmul.f32 0.2, %v4848_v4  ;;  %v6552_v10 = vpop.f32.mrb[24].mxu0  ;;  %v2401_v11 = vpop.f32.mrb[25].mxu1 }
 0x2db   : > { %4946 = vst.msk [vmem:[%s7871_s30 + $0xb0] sm:$0xff] %vm4923_vm2, %v4913_v5  ;;  %v4914_v12 = vmax.f32 %v4850_v63, %v4882_v6  ;;  %v6582_v15 = vadd.f32 %v6552_v10, %v6280_v7  ;;  %v4757_v16 = vpop.f32.mrb[25].mxu0  ;;  %v6281_v17 = vpop.f32.mrb[26].mxu1 }
 0x2dc   : > { %4944 = vst.msk [vmem:[%s7871_s30 + $0xa0] sm:$0xff] %vm4923_vm2, %v4911_v8  ;;  %v4912_v18 = vmax.f32 %v4848_v4, %v4880_v9  ;;  %v6583_v20 = vadd.f32 %v4757_v16, %v2401_v11  ;;  %v6553_v21 = vpop.f32.mrb[26].mxu0  ;;  %v2404_v22 = vpop.f32.mrb[27].mxu1 }
 0x2dd   : > { %4947 = vst.msk [vmem:[%s7871_s30 + $0xb8] sm:$0xff] %vm4923_vm2, %v4914_v12  ;;  %v4853_v23 = vadd.f32 %v6582_v15, %v7862_v39  ;;  %v6584_v28 = vadd.f32 %v6553_v21, %v6281_v17  ;;  %v4760_v29 = vpop.f32.mrb[27].mxu0 }
 0x2de   : > { %4945 = vst.msk [vmem:[%s7871_s30 + $0xa8] sm:$0xff] %vm4923_vm2, %v4912_v18  ;;  %v4851_v30 = vadd.f32 %v6583_v20, %v7862_v39  ;;  %v6585_v31 = vadd.f32 %v4760_v29, %v2404_v22 }
 0x2df   : > { %v4885_v32 = vmul.f32 0.2, %v4853_v23  ;;  %v4854_v33 = vadd.f32 %v6584_v28, %v7862_v39 }
 0x2e0   : > { %v4883_v34 = vmul.f32 0.2, %v4851_v30  ;;  %v4852_v35 = vadd.f32 %v6585_v31, %v7862_v39 }
 0x2e1   : > { %v4917_v40 = vmax.f32 %v4853_v23, %v4885_v32  ;;  %v4886_v41 = vmul.f32 0.2, %v4854_v33  ;;  %v6284_v42 = vpop.f32.mrb[28].mxu1 }
 0x2e2   : > { %v4915_v43 = vmax.f32 %v4851_v30, %v4883_v34  ;;  %v4884_v44 = vmul.f32 0.2, %v4852_v35  ;;  %v6556_v45 = vpop.f32.mrb[28].mxu0  ;;  %v2417_v46 = vpop.f32.mrb[29].mxu1 }
 0x2e3   : > { %4950 = vst.msk [vmem:[%s7871_s30 + $0xd0] sm:$0xff] %vm4923_vm2, %v4917_v40  ;;  %v4918_v47 = vmax.f32 %v4854_v33, %v4886_v41  ;;  %v6586_v52 = vadd.f32 %v6556_v45, %v6284_v42  ;;  %v4773_v53 = vpop.f32.mrb[29].mxu0  ;;  %v6285_v54 = vpop.f32.mrb[30].mxu1 }
 0x2e4   : > { %4948 = vst.msk [vmem:[%s7871_s30 + $0xc0] sm:$0xff] %vm4923_vm2, %v4915_v43  ;;  %v4916_v55 = vmax.f32 %v4852_v35, %v4884_v44  ;;  %v6587_v56 = vadd.f32 %v4773_v53, %v2417_v46  ;;  %v6557_v57 = vpop.f32.mrb[30].mxu0  ;;  %v2420_v58 = vpop.f32.mrb[31].mxu1 }
 0x2e5   : > { %4951 = vst.msk [vmem:[%s7871_s30 + $0xd8] sm:$0xff] %vm4923_vm2, %v4918_v47  ;;  %v4857_v59 = vadd.f32 %v6586_v52, %v7862_v39  ;;  %v6588_v0 = vadd.f32 %v6557_v57, %v6285_v54  ;;  %v4776_v1 = vpop.f32.mrb[31].mxu0 }
 0x2e6   : > { %4949 = vst.msk [vmem:[%s7871_s30 + $0xc8] sm:$0xff] %vm4923_vm2, %v4916_v55  ;;  %v4855_v2 = vadd.f32 %v6587_v56, %v7862_v39  ;;  %v6589_v14 = vadd.f32 %v4776_v1, %v2420_v58 }
 0x2e7   : > { %v4889_v13 = vmul.f32 0.2, %v4857_v59  ;;  %v4858_v19 = vadd.f32 %v6588_v0, %v7862_v39 }
 0x2e8   : > { %v4887_v24 = vmul.f32 0.2, %v4855_v2  ;;  %v4856_v25 = vadd.f32 %v6589_v14, %v7862_v39 }
 0x2e9   : > { %v4921_v26 = vmax.f32 %v4857_v59, %v4889_v13  ;;  %v4890_v27 = vmul.f32 0.2, %v4858_v19 }
 0x2ea   : > { %v4919_v36 = vmax.f32 %v4855_v2, %v4887_v24  ;;  %v4888_v37 = vmul.f32 0.2, %v4856_v25 }
 0x2eb   : > { %4954 = vst.msk [vmem:[%s7871_s30 + $0xf0] sm:$0xff] %vm4923_vm2, %v4921_v26  ;;  %v4922_v38 = vmax.f32 %v4858_v19, %v4890_v27 }
 0x2ec   : > { %4952 = vst.msk [vmem:[%s7871_s30 + $0xe0] sm:$0xff] %vm4923_vm2, %v4919_v36  ;;  %v4920_v48 = vmax.f32 %v4856_v25, %v4888_v37 }
 0x2ed   : > { %4955 = vst.msk [vmem:[%s7871_s30 + $0xf8] sm:$0xff] %vm4923_vm2, %v4922_v38 }
 0x2ee   : > { %4953 = vst.msk [vmem:[%s7871_s30 + $0xe8] sm:$0xff] %vm4923_vm2, %v4920_v48 }
 0x2ef PF: > { %s13_s12 = sadd.s32 1, %s7069_s12  }
 0x2f0   : > { %p10_p4 = scmp.ge.s32.totalorder %s13_s12, 4  }
 0x2f2   :  { %12 = sbr.rel (!%p10_p4) target bundleno = 1 (0x1), region = 84 }

// kernel: discriminator_forward.6
= control target key start
LH: loop header
LB: loop body
LE: loop exit
PB: predicated region body
PF: predicated region fallthrough
CT: control target
= control target key end

     0   :  { %s2839_s12 = smov 0   ;;  %s3115_s0 = inlined_call_operand.vmem [shape: f32[2,4,9,9,32], index: 0, kind: input, shape index: {}]   ;;  %s3116_s1 = inlined_call_operand.vmem [shape: bf16[16,32,64], index: 1, kind: input, shape index: {}]   ;;  %s3117_s2 = inlined_call_operand.vmem [shape: f32[1,64], index: 2, kind: input, shape index: {}]   ;;  %s3118_s3 = inlined_call_operand.vmem [shape: f32[2,8,8,64], index: 3, kind: output, shape index: {}]  }
   0x1 LB: > { %s2082_s13 = sadd.s32 4294967295, %s2817_s12   ;;  %p2086_p0 = scmp.ge.s32.totalorder %s2817_s12, 1  ;;  %s2817_s12 = sphi %s2839_s12, %s13_s12  }
   0x2   : > { %p137_p1 = scmp.lt.s32.totalorder %s2817_s12, 3 }
   0x4   : > { %p138_p2 = pnand %p2086_p0, %p137_p1 }
   0x5   : > { %v2779_v0 = vld [vmem:[%s3116_s1 + $0x10] sm:$0xff] (!%p138_p2)   ;;  %p161_p3 = scmp.lt.s32.totalorder (!%p138_p2), %s2082_s13, 1  ;;  %v2780_v1 = vld [vmem:[%s3116_s1 + $0x80] sm:$0xff] (!%p138_p2)   ;;  %v2781_v2 = vld [vmem:[%s3116_s1 + $0x18] sm:$0xff] (!%p138_p2)   ;;  %vm218_vm0 = vcmask (!%p138_p2), 261120   ;;  %vm2018_vm1 = vcmask (!%p138_p2), 523264  }
   0x6   : > { %141 = sbr.rel (%p138_p2) target bundleno = 367 (0x16f), region = 32  ;;  %2458 = vmatprep.subr.bf16.mxu1 (!%p138_p2), %v2779_v0  ;;  %2554 = vmatprep.subr.bf16.mxu0 (!%p138_p2), %v2780_v1  ;;  %v2782_v3 = vld [vmem:[%s3116_s1 + $0x88] sm:$0xff] (!%p138_p2)   ;;  %v2783_v4 = vld [vmem:[%s3116_s1] sm:$0xff] (!%p138_p2)   ;;  %v2784_v5 = vld [vmem:[%s3116_s1 + $0x90] sm:$0xff] (!%p138_p2)  }
   0x7   : > { %2459 = vmatpush3.bf16.msra.mxu1 (!%p138_p2), %v2779_v0  ;;  %2555 = vmatpush3.bf16.msra.mxu0 (!%p138_p2), %v2780_v1  ;;  %v2785_v13 = vld [vmem:[%s3116_s1 + $0x8] sm:$0xff] (!%p138_p2)   ;;  %v2786_v29 = vld [vmem:[%s3116_s1 + $0x98] sm:$0xff] (!%p138_p2)   ;;  %v2787_v31 = vld [vmem:[%s3116_s1 + $0x20] sm:$0xff] (!%p138_p2)  }
   0x8   : > { %2460 = vmatprep.subr.bf16.mxu1 (!%p138_p2), %v2781_v2  ;;  %2556 = vmatprep.subr.bf16.mxu0 (!%p138_p2), %v2782_v3  ;;  %v2788_v33 = vld [vmem:[%s3116_s1 + $0xa0] sm:$0xff] (!%p138_p2)   ;;  %v2789_v41 = vld [vmem:[%s3116_s1 + $0x28] sm:$0xff] (!%p138_p2)   ;;  %v2791_v46 = vld [vmem:[%s3116_s1 + $0x30] sm:$0xff] (!%p138_p2)  }
   0x9   : > { %v2790_v42 = vld [vmem:[%s3116_s1 + $0xa8] sm:$0xff] (!%p138_p2)   ;;  %v2792_v48 = vld [vmem:[%s3116_s1 + $0xb0] sm:$0xff] (!%p138_p2)   ;;  %v2793_v62 = vld [vmem:[%s3116_s1 + $0x38] sm:$0xff] (!%p138_p2)  }
   0xa   : > { %v2794_v0 = vld [vmem:[%s3116_s1 + $0xb8] sm:$0xff] (!%p138_p2)  }
   0xb   : > { %2461 = vmatpush3.bf16.msra.mxu1 (!%p138_p2), %v2781_v2  ;;  %2557 = vmatpush3.bf16.msra.mxu0 (!%p138_p2), %v2782_v3  ;;  %v2795_v3 = vld [vmem:[%s3116_s1 + $0x40] sm:$0xff] (!%p138_p2)  }
   0xc   : > { %2470 = vmatprep.subr.bf16.mxu1 (!%p138_p2), %v2783_v4  ;;  %2566 = vmatprep.subr.bf16.mxu0 (!%p138_p2), %v2784_v5 }
   0xd   : > { %s3120_s13 = smov (!%p161_p3, %s2082_s13), 1 }
   0xe   : > { %s2770_s22 = smul.u32 576, %s3120_s13 }
  0x10   : > { %s2871_s29 = scalar_lea.vmem %s3115_s0, %s2770_s22 }
  0x11   : > { %v2090_v6 = vld [vmem:[%s2871_s29 + $0x90] sm:$0xff]  ;;  %v2091_v7 = vld [vmem:[%s2871_s29 + $0xa0] sm:$0xff] }
  0x12   : > { %v2214_v8 = vld [vmem:[%s2871_s29 + $0x10] sm:$0xff]  ;;  %v197_v9 = vpack.c.bf16 %v2091_v7, %v2090_v6  ;;  %v2215_v10 = vld [vmem:[%s2871_s29 + $0x20] sm:$0xff] }
  0x13   : > { %v2092_v11 = vld [vmem:[%s2871_s29 + $0xb0] sm:$0xff]  ;;  %v2093_v12 = vld [vmem:[%s2871_s29 + $0xc0] sm:$0xff]  ;;  %v1080_v14 = vpack.c.bf16 %v2215_v10, %v2214_v8 }
  0x14   : > { %v198_v15 = vpack.c.bf16 %v2093_v12, %v2092_v11  ;;  %v2216_v16 = vld [vmem:[%s2871_s29 + $0x30] sm:$0xff]  ;;  %v2217_v17 = vld [vmem:[%s2871_s29 + $0x40] sm:$0xff]  ;;  %2462 = vmatprep.mubr.msk.bf16.mxu1 %vm218_vm0, %v197_v9  ;;  %v1195_v36 = vpack.c.bf16 %v2092_v11, %v2091_v7 }
  0x15   : > { %v2094_v18 = vld [vmem:[%s2871_s29 + $0xd0] sm:$0xff]  ;;  %v1081_v19 = vpack.c.bf16 %v2217_v17, %v2216_v16  ;;  %v2095_v20 = vld [vmem:[%s2871_s29 + $0xe0] sm:$0xff]  ;;  %2558 = vmatprep.mubr.msk.bf16.mxu0 %vm218_vm0, %v1080_v14  ;;  %v181_v37 = vpack.c.bf16 %v2216_v16, %v2215_v10 }
  0x16   : > { %v2218_v21 = vld [vmem:[%s2871_s29 + $0x50] sm:$0xff]  ;;  %v2219_v22 = vld [vmem:[%s2871_s29 + $0x60] sm:$0xff]  ;;  %2463 = vmatmul.mubr.msk.bf16.vlgmr.msra.gmra.mrb[0].mxu1 %vm218_vm0, %v198_v15  ;;  %v199_v23 = vpack.c.bf16 %v2095_v20, %v2094_v18  ;;  %v1196_v38 = vpack.c.bf16 %v2094_v18, %v2093_v12  ;;  %v2797_v18 = vld [vmem:[%s3116_s1 + $0x48] sm:$0xff]  }
  0x17   : > { %v1082_v24 = vpack.c.bf16 %v2219_v22, %v2218_v21  ;;  %v2096_v25 = vld [vmem:[%s2871_s29 + $0xf0] sm:$0xff]  ;;  %v2097_v26 = vld [vmem:[%s2871_s29 + $0x100] sm:$0xff]  ;;  %2559 = vmatmul.mubr.msk.bf16.vlgmr.msra.gmra.mrb[0].mxu0 %vm218_vm0, %v1081_v19  ;;  %2471 = vmatpush3.bf16.msra.mxu1 %v2783_v4  ;;  %v182_v39 = vpack.c.bf16 %v2218_v21, %v2217_v17  ;;  %v2798_v19 = vld [vmem:[%s3116_s1 + $0xc8] sm:$0xff]  }
  0x18   : > { %v2220_v27 = vld [vmem:[%s2871_s29 + $0x70] sm:$0xff]  ;;  %v2221_v28 = vld [vmem:[%s2871_s29 + $0x80] sm:$0xff]  ;;  %2567 = vmatpush3.bf16.msra.mxu0 %v2784_v5  ;;  %2466 = vmatprep.mubr.msk.bf16.mxu1 %vm218_vm0, %v199_v23  ;;  %v200_v32 = vpack.c.bf16 %v2097_v26, %v2096_v25  ;;  %v1197_v40 = vpack.c.bf16 %v2096_v25, %v2095_v20 }
  0x19   : > { %v172_v30 = vld [vmem:[%s2871_s29] sm:$0xff]  ;;  %2562 = vmatprep.mubr.msk.bf16.mxu0 %vm218_vm0, %v1082_v24  ;;  %2472 = vmatprep.subr.bf16.mxu1 %v2785_v13  ;;  %v1083_v34 = vpack.c.bf16 %v2221_v28, %v2220_v27  ;;  %v2239_v43 = vld [vmem:[%s2871_s29 + $0x110] sm:$0xff]  ;;  %v183_v49 = vpack.c.bf16 %v2220_v27, %v2219_v22 }
  0x1a   : > { %2568 = vmatprep.subr.bf16.mxu0 %v2786_v29  ;;  %v180_v35 = vpack.c.bf16 %v2214_v8, %v172_v30  ;;  %v385_v44 = vld [vmem:[%s2871_s29 + $0x1] sm:$0xff]  ;;  %v386_v45 = vld [vmem:[%s2871_s29 + $0x11] sm:$0xff]  ;;  %v1198_v50 = vpack.c.bf16 %v2239_v43, %v2097_v26 }
  0x1b   : > { %2473 = vmatpush3.bf16.msra.mxu1 %v2785_v13  ;;  %v2251_v47 = vld [vmem:[%s2871_s29 + $0x21] sm:$0xff]  ;;  %v393_v51 = vpack.c.bf16 %v386_v45, %v385_v44  ;;  %v388_v53 = vld [vmem:[%s2871_s29 + $0x31] sm:$0xff] }
  0x1c   : > { %2569 = vmatpush3.bf16.msra.mxu0 %v2786_v29  ;;  %2482 = vmatprep.subr.bf16.mxu1 %v2787_v31  ;;  %v1309_v52 = vpack.c.bf16 %v2251_v47, %v386_v45  ;;  %v2253_v54 = vld [vmem:[%s2871_s29 + $0x41] sm:$0xff]  ;;  %v390_v55 = vld [vmem:[%s2871_s29 + $0x51] sm:$0xff]  ;;  %v394_v56 = vpack.c.bf16 %v388_v53, %v2251_v47 }
  0x1d   : > { %2578 = vmatprep.subr.bf16.mxu0 %v2788_v33  ;;  %v2255_v57 = vld [vmem:[%s2871_s29 + $0x61] sm:$0xff]  ;;  %v1310_v58 = vpack.c.bf16 %v2253_v54, %v388_v53  ;;  %v395_v59 = vpack.c.bf16 %v390_v55, %v2253_v54  ;;  %v392_v61 = vld [vmem:[%s2871_s29 + $0x71] sm:$0xff] }
  0x1e   : > { %2467 = vmatmul.mubr.msk.bf16.gmra.mrb[4].mxu1 %vm218_vm0, %v200_v32  ;;  %v1311_v60 = vpack.c.bf16 %v2255_v57, %v390_v55  ;;  %v2257_v63 = vld [vmem:[%s2871_s29 + $0x81] sm:$0xff]  ;;  %v2124_v1 = vld [vmem:[%s2871_s29 + $0x91] sm:$0xff]  ;;  %v396_v6 = vpack.c.bf16 %v392_v61, %v2255_v57 }
  0x1f   : > { %2563 = vmatmul.mubr.msk.bf16.gmra.mrb[4].mxu0 %vm218_vm0, %v1083_v34  ;;  %2474 = vmatprep.mubr.msk.bf16.mxu1 %vm218_vm0, %v180_v35  ;;  %v2125_v2 = vld [vmem:[%s2871_s29 + $0xa1] sm:$0xff]  ;;  %v2269_v4 = vld [vmem:[%s2871_s29 + $0xb1] sm:$0xff]  ;;  %v1312_v7 = vpack.c.bf16 %v2257_v63, %v392_v61 }
  0x20   : > { %2570 = vmatprep.mubr.msk.bf16.mxu0 %vm218_vm0, %v1195_v36  ;;  %v2796_v5 = vld [vmem:[%s3116_s1 + $0xc0] sm:$0xff]   ;;  %v507_v8 = vpack.c.bf16 %v2125_v2, %v2124_v1  ;;  %v1423_v9 = vpack.c.bf16 %v2269_v4, %v2125_v2  ;;  %v2271_v11 = vld [vmem:[%s2871_s29 + $0xd1] sm:$0xff]  ;;  %v2806_v61 = vld [vmem:[%s3116_s1 + $0xe8] sm:$0xff]  }
  0x21   : > { %v2127_v10 = vld [vmem:[%s2871_s29 + $0xc1] sm:$0xff]  ;;  %v2273_v14 = vld [vmem:[%s2871_s29 + $0xf1] sm:$0xff] }
  0x22   : > { %v2129_v12 = vld [vmem:[%s2871_s29 + $0xe1] sm:$0xff]  ;;  %v508_v13 = vpack.c.bf16 %v2127_v10, %v2269_v4  ;;  %v1424_v15 = vpack.c.bf16 %v2271_v11, %v2127_v10  ;;  %v2275_v21 = vld [vmem:[%s2871_s29 + $0x111] sm:$0xff] }
  0x23   : > { %v509_v16 = vpack.c.bf16 %v2129_v12, %v2271_v11  ;;  %v1425_v17 = vpack.c.bf16 %v2273_v14, %v2129_v12  ;;  %v2131_v20 = vld [vmem:[%s2871_s29 + $0x101] sm:$0xff]  ;;  %v2143_v23 = vld [vmem:[%s2871_s29 + $0x130] sm:$0xff] }
  0x24   : > { %v2142_v22 = vld [vmem:[%s2871_s29 + $0x120] sm:$0xff]  ;;  %v2799_v24 = vld [vmem:[%s3116_s1 + $0x50] sm:$0xff]   ;;  %v510_v27 = vpack.c.bf16 %v2131_v20, %v2273_v14  ;;  %v1426_v28 = vpack.c.bf16 %v2275_v21, %v2131_v20 }
  0x25   : > { %v2287_v25 = vld [vmem:[%s2871_s29 + $0x140] sm:$0xff]  ;;  %v2800_v26 = vld [vmem:[%s3116_s1 + $0xd0] sm:$0xff]   ;;  %v622_v29 = vpack.c.bf16 %v2143_v23, %v2142_v22 }
  0x26   : > { %2475 = vmatmul.mubr.msk.bf16.vlgmr.msra.gmra.mrb[0].mxu1 %vm218_vm0, %v181_v37  ;;  %v1538_v30 = vpack.c.bf16 %v2287_v25, %v2143_v23  ;;  %v2289_v32 = vld [vmem:[%s2871_s29 + $0x160] sm:$0xff]  ;;  %v2160_v43 = vld [vmem:[%s2871_s29 + $0x1b0] sm:$0xff] }
  0x27   : > { %2571 = vmatmul.mubr.msk.bf16.vlgmr.msra.gmra.mrb[0].mxu0 %vm218_vm0, %v1196_v38  ;;  %2483 = vmatpush3.bf16.msra.mxu1 %v2787_v31  ;;  %v2145_v31 = vld [vmem:[%s2871_s29 + $0x150] sm:$0xff]  ;;  %v2291_v35 = vld [vmem:[%s2871_s29 + $0x180] sm:$0xff] }
  0x28   : > { %2579 = vmatpush3.bf16.msra.mxu0 %v2788_v33  ;;  %2478 = vmatprep.mubr.msk.bf16.mxu1 %vm218_vm0, %v182_v39  ;;  %v2147_v33 = vld [vmem:[%s2871_s29 + $0x170] sm:$0xff]  ;;  %v623_v34 = vpack.c.bf16 %v2145_v31, %v2287_v25  ;;  %v1539_v36 = vpack.c.bf16 %v2289_v32, %v2145_v31  ;;  %v2801_v39 = vld [vmem:[%s3116_s1 + $0x58] sm:$0xff]   ;;  %v2161_v44 = vld [vmem:[%s2871_s29 + $0x1c0] sm:$0xff] }
  0x29   : > { %2574 = vmatprep.mubr.msk.bf16.mxu0 %vm218_vm0, %v1197_v40  ;;  %2484 = vmatprep.subr.bf16.mxu1 %v2789_v41  ;;  %v624_v37 = vpack.c.bf16 %v2147_v33, %v2289_v32  ;;  %v1540_v38 = vpack.c.bf16 %v2291_v35, %v2147_v33  ;;  %v2802_v40 = vld [vmem:[%s3116_s1 + $0xd8] sm:$0xff]   ;;  %v2803_v45 = vld [vmem:[%s3116_s1 + $0x60] sm:$0xff]   ;;  %v2307_v53 = vld [vmem:[%s2871_s29 + $0x1f0] sm:$0xff] }
  0x2a   : > { %2580 = vmatprep.subr.bf16.mxu0 %v2790_v42  ;;  %v2804_v47 = vld [vmem:[%s3116_s1 + $0xe0] sm:$0xff]   ;;  %v2311_v63 = vld [vmem:[%s2871_s29 + $0x230] sm:$0xff] }
  0x2b   : > { %2485 = vmatpush3.bf16.msra.mxu1 %v2789_v41  ;;  %v2149_v41 = vld [vmem:[%s2871_s29 + $0x190] sm:$0xff]  ;;  %v2165_v54 = vld [vmem:[%s2871_s29 + $0x200] sm:$0xff] }
  0x2c   : > { %2581 = vmatpush3.bf16.msra.mxu0 %v2790_v42  ;;  %2494 = vmatprep.subr.bf16.mxu1 %v2791_v46  ;;  %v2293_v42 = vld [vmem:[%s2871_s29 + $0x1a0] sm:$0xff]  ;;  %v2179_v1 = vld [vmem:[%s2871_s29 + $0x131] sm:$0xff] }
  0x2d   : > { %2590 = vmatprep.subr.bf16.mxu0 %v2792_v48  ;;  %v2807_v2 = vld [vmem:[%s3116_s1 + $0x70] sm:$0xff]   ;;  %v2325_v10 = vld [vmem:[%s2871_s29 + $0x161] sm:$0xff] }
  0x2e   : > { %2479 = vmatmul.mubr.msk.bf16.gmra.mrb[4].mxu1 %vm218_vm0, %v183_v49  ;;  %v1541_v49 = vpack.c.bf16 %v2293_v42, %v2149_v41  ;;  %v2808_v4 = vld [vmem:[%s3116_s1 + $0xf0] sm:$0xff]   ;;  %v2329_v20 = vld [vmem:[%s2871_s29 + $0x1a1] sm:$0xff]  ;;  %v2358_v42 = vld [vmem:[%s3117_s2] ss:$0 sm:$0xff] }
  0x2f   : > { %2575 = vmatmul.mubr.msk.bf16.gmra.mrb[4].mxu0 %vm218_vm0, %v1198_v50  ;;  %2486 = vmatprep.mubr.msk.bf16.mxu1 %vm218_vm0, %v393_v51  ;;  %v737_v50 = vpack.c.bf16 %v2161_v44, %v2160_v43  ;;  %v2183_v11 = vld [vmem:[%s2871_s29 + $0x171] sm:$0xff]  ;;  %v2197_v22 = vld [vmem:[%s2871_s29 + $0x1c1] sm:$0xff] }
  0x30   : > { %2582 = vmatprep.mubr.msk.bf16.mxu0 %vm218_vm0, %v1309_v52  ;;  %v2163_v52 = vld [vmem:[%s2871_s29 + $0x1e0] sm:$0xff]  ;;  %v2196_v21 = vld [vmem:[%s2871_s29 + $0x1b1] sm:$0xff] }
  0x31   : > { %v1654_v57 = vpack.c.bf16 %v2307_v53, %v2163_v52  ;;  %v2341_v23 = vld [vmem:[%s2871_s29 + $0x1d1] sm:$0xff] }
  0x32   : > { %v2345_v31 = vld [vmem:[%s2871_s29 + $0x211] sm:$0xff] }
  0x36   : > { %2487 = vmatmul.mubr.msk.bf16.vlgmr.msra.gmra.mrb[0].mxu1 %vm218_vm0, %v394_v56  ;;  %v2309_v56 = vld [vmem:[%s2871_s29 + $0x210] sm:$0xff] }
  0x37   : > { %2583 = vmatmul.mubr.msk.bf16.vlgmr.msra.gmra.mrb[0].mxu0 %vm218_vm0, %v1310_v58  ;;  %2495 = vmatpush3.bf16.msra.mxu1 %v2791_v46  ;;  %v2305_v46 = vld [vmem:[%s2871_s29 + $0x1d0] sm:$0xff]  ;;  %v739_v58 = vpack.c.bf16 %v2165_v54, %v2307_v53 }
  0x38   : > { %2591 = vmatpush3.bf16.msra.mxu0 %v2792_v48  ;;  %2490 = vmatprep.mubr.msk.bf16.mxu1 %vm218_vm0, %v395_v59  ;;  %v625_v48 = vpack.c.bf16 %v2149_v41, %v2291_v35  ;;  %v1653_v51 = vpack.c.bf16 %v2305_v46, %v2161_v44  ;;  %v738_v55 = vpack.c.bf16 %v2163_v52, %v2305_v46 }
  0x39   : > { %2586 = vmatprep.mubr.msk.bf16.mxu0 %vm218_vm0, %v1311_v60  ;;  %2496 = vmatprep.subr.bf16.mxu1 %v2793_v62  ;;  %v1655_v59 = vpack.c.bf16 %v2309_v56, %v2165_v54  ;;  %v2805_v60 = vld [vmem:[%s3116_s1 + $0x68] sm:$0xff]  }
  0x3a   : > { %2592 = vmatprep.subr.bf16.mxu0 %v2794_v0 }
  0x3b   : > { %2497 = vmatpush3.bf16.msra.mxu1 %v2793_v62  ;;  %v2167_v62 = vld [vmem:[%s2871_s29 + $0x220] sm:$0xff] }
  0x3c   : > { %2593 = vmatpush3.bf16.msra.mxu0 %v2794_v0  ;;  %2506 = vmatprep.subr.bf16.mxu1 %v2795_v3  ;;  %v2178_v0 = vld [vmem:[%s2871_s29 + $0x121] sm:$0xff] }
  0x3d   : > { %2602 = vmatprep.subr.bf16.mxu0 %v2796_v5 }
  0x3e   : > { %2491 = vmatmul.mubr.msk.bf16.gmra.mrb[4].mxu1 %vm218_vm0, %v396_v6  ;;  %v1656_v6 = vpack.c.bf16 %v2311_v63, %v2167_v62 }
  0x3f   : > { %2587 = vmatmul.mubr.msk.bf16.gmra.mrb[4].mxu0 %vm218_vm0, %v1312_v7  ;;  %2498 = vmatprep.mubr.msk.bf16.mxu1 %vm218_vm0, %v507_v8  ;;  %v851_v7 = vpack.c.bf16 %v2179_v1, %v2178_v0 }
  0x40   : > { %2594 = vmatprep.mubr.msk.bf16.mxu0 %vm218_vm0, %v1423_v9  ;;  %v2181_v9 = vld [vmem:[%s2871_s29 + $0x151] sm:$0xff] }
  0x41   : > { %v1768_v14 = vpack.c.bf16 %v2325_v10, %v2181_v9 }
  0x46   : > { %2499 = vmatmul.mubr.msk.bf16.vlgmr.msra.gmra.mrb[0].mxu1 %vm218_vm0, %v508_v13  ;;  %v2327_v13 = vld [vmem:[%s2871_s29 + $0x181] sm:$0xff] }
  0x47   : > { %2595 = vmatmul.mubr.msk.bf16.vlgmr.msra.gmra.mrb[0].mxu0 %vm218_vm0, %v1424_v15  ;;  %2507 = vmatpush3.bf16.msra.mxu1 %v2795_v3  ;;  %v2323_v3 = vld [vmem:[%s2871_s29 + $0x141] sm:$0xff]  ;;  %v853_v15 = vpack.c.bf16 %v2183_v11, %v2325_v10 }
  0x48   : > { %2603 = vmatpush3.bf16.msra.mxu0 %v2796_v5  ;;  %2502 = vmatprep.mubr.msk.bf16.mxu1 %vm218_vm0, %v509_v16  ;;  %v740_v5 = vpack.c.bf16 %v2167_v62, %v2309_v56  ;;  %v1767_v8 = vpack.c.bf16 %v2323_v3, %v2179_v1  ;;  %v852_v12 = vpack.c.bf16 %v2181_v9, %v2323_v3 }
  0x49   : > { %2598 = vmatprep.mubr.msk.bf16.mxu0 %vm218_vm0, %v1425_v17  ;;  %2508 = vmatprep.subr.bf16.mxu1 %v2797_v18  ;;  %v1769_v16 = vpack.c.bf16 %v2327_v13, %v2183_v11  ;;  %v2809_v17 = vld [vmem:[%s3116_s1 + $0x78] sm:$0xff]  }
  0x4a   : > { %2604 = vmatprep.subr.bf16.mxu0 %v2798_v19 }
  0x4b   : > { %2509 = vmatpush3.bf16.msra.mxu1 %v2797_v18  ;;  %v2810_v18 = vld [vmem:[%s3116_s1 + $0xf8] sm:$0xff]  }
  0x4c   : > { %2605 = vmatpush3.bf16.msra.mxu0 %v2798_v19  ;;  %2518 = vmatprep.subr.bf16.mxu1 %v2799_v24  ;;  %v2185_v19 = vld [vmem:[%s2871_s29 + $0x191] sm:$0xff] }
  0x4d   : > { %2614 = vmatprep.subr.bf16.mxu0 %v2800_v26  ;;  %v1770_v25 = vpack.c.bf16 %v2329_v20, %v2185_v19 }
  0x4e   : > { %2503 = vmatmul.mubr.msk.bf16.gmra.mrb[4].mxu1 %vm218_vm0, %v510_v27  ;;  %v1881_v27 = vpack.c.bf16 %v2341_v23, %v2197_v22 }
  0x4f   : > { %2599 = vmatmul.mubr.msk.bf16.gmra.mrb[4].mxu0 %vm218_vm0, %v1426_v28  ;;  %2510 = vmatprep.mubr.msk.bf16.mxu1 %vm218_vm0, %v622_v29  ;;  %v2199_v28 = vld [vmem:[%s2871_s29 + $0x1e1] sm:$0xff]  ;;  %v2343_v29 = vld [vmem:[%s2871_s29 + $0x1f1] sm:$0xff] }
  0x50   : > { %2606 = vmatprep.mubr.msk.bf16.mxu0 %vm218_vm0, %v1538_v30  ;;  %v2201_v30 = vld [vmem:[%s2871_s29 + $0x201] sm:$0xff]  ;;  %v966_v32 = vpack.c.bf16 %v2199_v28, %v2341_v23  ;;  %v1882_v33 = vpack.c.bf16 %v2343_v29, %v2199_v28 }
  0x51   : > { %v1883_v35 = vpack.c.bf16 %v2345_v31, %v2201_v30 }
  0x56   : > { %2511 = vmatmul.mubr.msk.bf16.vlgmr.msra.gmra.mrb[0].mxu1 %vm218_vm0, %v623_v34  ;;  %v967_v34 = vpack.c.bf16 %v2201_v30, %v2343_v29 }
  0x57   : > { %2607 = vmatmul.mubr.msk.bf16.vlgmr.msra.gmra.mrb[0].mxu0 %vm218_vm0, %v1539_v36  ;;  %2519 = vmatpush3.bf16.msra.mxu1 %v2799_v24  ;;  %v854_v24 = vpack.c.bf16 %v2185_v19, %v2327_v13  ;;  %v2203_v36 = vld [vmem:[%s2871_s29 + $0x221] sm:$0xff] }
  0x58   : > { %2615 = vmatpush3.bf16.msra.mxu0 %v2800_v26  ;;  %2514 = vmatprep.mubr.msk.bf16.mxu1 %vm218_vm0, %v624_v37  ;;  %v965_v26 = vpack.c.bf16 %v2197_v22, %v2196_v21  ;;  %v2347_v37 = vld [vmem:[%s2871_s29 + $0x231] sm:$0xff]  ;;  %s2361_s29 = sshll.u32 %s3120_s13, 6 }
  0x59   : > { %2610 = vmatprep.mubr.msk.bf16.mxu0 %vm218_vm0, %v1540_v38  ;;  %2520 = vmatprep.subr.bf16.mxu1 %v2801_v39  ;;  %v968_v38 = vpack.c.bf16 %v2203_v36, %v2345_v31  ;;  %s3094_s11 = scalar_lea.vmem %s3118_s3, %s2361_s29 }
  0x5a   : > { %2616 = vmatprep.subr.bf16.mxu0 %v2802_v40 }
  0x5b   : > { %2521 = vmatpush3.bf16.msra.mxu1 %v2801_v39  ;;  %v1884_v39 = vpack.c.bf16 %v2347_v37, %v2203_v36 }
  0x5c   : > { %2617 = vmatpush3.bf16.msra.mxu0 %v2802_v40  ;;  %2530 = vmatprep.subr.bf16.mxu1 %v2803_v45 }
  0x5d   : > { %2626 = vmatprep.subr.bf16.mxu0 %v2804_v47 }
  0x5e   : > { %2515 = vmatmul.mubr.msk.bf16.gmra.mrb[4].mxu1 %vm218_vm0, %v625_v48 }
  0x5f   : > { %2611 = vmatmul.mubr.msk.bf16.gmra.mrb[4].mxu0 %vm218_vm0, %v1541_v49  ;;  %2522 = vmatprep.mubr.msk.bf16.mxu1 %vm218_vm0, %v737_v50 }
  0x60   : > { %2618 = vmatprep.mubr.msk.bf16.mxu0 %vm218_vm0, %v1653_v51 }
  0x66   : > { %2523 = vmatmul.mubr.msk.bf16.vlgmr.msra.gmra.mrb[0].mxu1 %vm218_vm0, %v738_v55 }
  0x67   : > { %2619 = vmatmul.mubr.msk.bf16.vlgmr.msra.gmra.mrb[0].mxu0 %vm218_vm0, %v1654_v57  ;;  %2531 = vmatpush3.bf16.msra.mxu1 %v2803_v45 }
  0x68   : > { %2627 = vmatpush3.bf16.msra.mxu0 %v2804_v47  ;;  %2526 = vmatprep.mubr.msk.bf16.mxu1 %vm218_vm0, %v739_v58 }
  0x69   : > { %2622 = vmatprep.mubr.msk.bf16.mxu0 %vm218_vm0, %v1655_v59  ;;  %2532 = vmatprep.subr.bf16.mxu1 %v2805_v60 }
  0x6a   : > { %2628 = vmatprep.subr.bf16.mxu0 %v2806_v61 }
  0x6b   : > { %2533 = vmatpush3.bf16.msra.mxu1 %v2805_v60 }
  0x6c   : > { %2629 = vmatpush3.bf16.msra.mxu0 %v2806_v61  ;;  %2542 = vmatprep.subr.bf16.mxu1 %v2807_v2 }
  0x6d   : > { %2638 = vmatprep.subr.bf16.mxu0 %v2808_v4 }
  0x6e   : > { %2527 = vmatmul.mubr.msk.bf16.gmra.mrb[4].mxu1 %vm218_vm0, %v740_v5 }
  0x6f   : > { %2623 = vmatmul.mubr.msk.bf16.gmra.mrb[4].mxu0 %vm218_vm0, %v1656_v6  ;;  %2534 = vmatprep.mubr.msk.bf16.mxu1 %vm218_vm0, %v851_v7 }
  0x70   : > { %2630 = vmatprep.mubr.msk.bf16.mxu0 %vm218_vm0, %v1767_v8 }
  0x76   : > { %2535 = vmatmul.mubr.msk.bf16.vlgmr.msra.gmra.mrb[0].mxu1 %vm218_vm0, %v852_v12 }
  0x77   : > { %2631 = vmatmul.mubr.msk.bf16.vlgmr.msra.gmra.mrb[0].mxu0 %vm218_vm0, %v1768_v14  ;;  %2543 = vmatpush3.bf16.msra.mxu1 %v2807_v2 }
  0x78   : > { %2639 = vmatpush3.bf16.msra.mxu0 %v2808_v4  ;;  %2538 = vmatprep.mubr.msk.bf16.mxu1 %vm218_vm0, %v853_v15 }
  0x79   : > { %2634 = vmatprep.mubr.msk.bf16.mxu0 %vm218_vm0, %v1769_v16  ;;  %2544 = vmatprep.subr.bf16.mxu1 %v2809_v17 }
  0x7a   : > { %2640 = vmatprep.subr.bf16.mxu0 %v2810_v18 }
  0x7b   : > { %2545 = vmatpush3.bf16.msra.mxu1 %v2809_v17 }
  0x7c   : > { %2641 = vmatpush3.bf16.msra.mxu0 %v2810_v18 }
  0x7e   : > { %2539 = vmatmul.mubr.msk.bf16.gmra.mrb[4].mxu1 %vm218_vm0, %v854_v24 }
  0x7f   : > { %2635 = vmatmul.mubr.msk.bf16.gmra.mrb[4].mxu0 %vm218_vm0, %v1770_v25  ;;  %2546 = vmatprep.mubr.msk.bf16.mxu1 %vm218_vm0, %v965_v26 }
  0x80   : > { %2642 = vmatprep.mubr.msk.bf16.mxu0 %vm218_vm0, %v1881_v27 }
  0x86   : > { %2547 = vmatmul.mubr.msk.bf16.vlgmr.msra.gmra.mrb[0].mxu1 %vm218_vm0, %v966_v32 }
  0x87   : > { %2643 = vmatmul.mubr.msk.bf16.vlgmr.msra.gmra.mrb[0].mxu0 %vm218_vm0, %v1882_v33  ;;  %2550 = vmatprep.mubr.msk.bf16.mxu1 %vm218_vm0, %v967_v34 }
  0x88   : > { %2646 = vmatprep.mubr.msk.bf16.mxu0 %vm218_vm0, %v1883_v35 }
  0x8e   : > { %2551 = vmatmul.mubr.msk.bf16.gmra.mrb[4].mxu1 %vm218_vm0, %v968_v38 }
  0x8f   : > { %2647 = vmatmul.mubr.msk.bf16.gmra.mrb[4].mxu0 %vm218_vm0, %v1884_v39 }
 0x159   : > { %v2548_v40 = vpop.f32.mrb[0].mxu1 }
 0x15a   : > { %v2644_v41 = vpop.f32.mrb[0].mxu0  ;;  %v1032_v43 = vpop.f32.mrb[1].mxu1 }
 0x15b   : > { %v2650_v44 = vadd.f32 %v2644_v41, %v2548_v40  ;;  %v1948_v45 = vpop.f32.mrb[1].mxu0  ;;  %v2549_v46 = vpop.f32.mrb[2].mxu1 }
 0x15c   : > { %v2651_v47 = vadd.f32 %v1948_v45, %v1032_v43  ;;  %v2645_v48 = vpop.f32.mrb[2].mxu0  ;;  %v1035_v49 = vpop.f32.mrb[3].mxu1 }
 0x15d   : > { %v1996_v50 = vadd.f32 %v2650_v44, %v2358_v42  ;;  %v2652_v51 = vadd.f32 %v2645_v48, %v2549_v46  ;;  %v1951_v52 = vpop.f32.mrb[3].mxu0 }
 0x15e   : > { %v1994_v53 = vadd.f32 %v2651_v47, %v2358_v42  ;;  %v2653_v54 = vadd.f32 %v1951_v52, %v1035_v49 }
 0x15f   : > { %v2004_v55 = vmul.f32 0.2, %v1996_v50  ;;  %v1997_v56 = vadd.f32 %v2652_v51, %v2358_v42 }
 0x160   : > { %v2002_v57 = vmul.f32 0.2, %v1994_v53  ;;  %v1995_v58 = vadd.f32 %v2653_v54, %v2358_v42 }
 0x161   : > { %v2012_v59 = vmax.f32 %v1996_v50, %v2004_v55  ;;  %v2005_v60 = vmul.f32 0.2, %v1997_v56  ;;  %v2552_v61 = vpop.f32.mrb[4].mxu1 }
 0x162   : > { %v2010_v62 = vmax.f32 %v1994_v53, %v2002_v57  ;;  %v2003_v63 = vmul.f32 0.2, %v1995_v58  ;;  %v2648_v0 = vpop.f32.mrb[4].mxu0  ;;  %v1048_v1 = vpop.f32.mrb[5].mxu1 }
 0x163   : > { %2021 = vst.msk [vmem:[%s3094_s11 + $0x10] sm:$0xff] %vm2018_vm1, %v2012_v59  ;;  %v2013_v2 = vmax.f32 %v1997_v56, %v2005_v60  ;;  %v2654_v3 = vadd.f32 %v2648_v0, %v2552_v61  ;;  %v1964_v4 = vpop.f32.mrb[5].mxu0  ;;  %v2553_v5 = vpop.f32.mrb[6].mxu1 }
 0x164   : > { %2019 = vst.msk [vmem:[%s3094_s11] sm:$0xff] %vm2018_vm1, %v2010_v62  ;;  %v2011_v6 = vmax.f32 %v1995_v58, %v2003_v63  ;;  %v2655_v7 = vadd.f32 %v1964_v4, %v1048_v1  ;;  %v2649_v8 = vpop.f32.mrb[6].mxu0  ;;  %v1051_v9 = vpop.f32.mrb[7].mxu1 }
 0x165   : > { %2022 = vst.msk [vmem:[%s3094_s11 + $0x18] sm:$0xff] %vm2018_vm1, %v2013_v2  ;;  %v2000_v10 = vadd.f32 %v2654_v3, %v2358_v42  ;;  %v2656_v11 = vadd.f32 %v2649_v8, %v2553_v5  ;;  %v1967_v12 = vpop.f32.mrb[7].mxu0 }
 0x166   : > { %2020 = vst.msk [vmem:[%s3094_s11 + $0x8] sm:$0xff] %vm2018_vm1, %v2011_v6  ;;  %v1998_v13 = vadd.f32 %v2655_v7, %v2358_v42  ;;  %v2657_v14 = vadd.f32 %v1967_v12, %v1051_v9 }
 0x167   : > { %v2008_v15 = vmul.f32 0.2, %v2000_v10  ;;  %v2001_v16 = vadd.f32 %v2656_v11, %v2358_v42 }
 0x168   : > { %v2006_v17 = vmul.f32 0.2, %v1998_v13  ;;  %v1999_v18 = vadd.f32 %v2657_v14, %v2358_v42 }
 0x169   : > { %v2016_v19 = vmax.f32 %v2000_v10, %v2008_v15  ;;  %v2009_v20 = vmul.f32 0.2, %v2001_v16 }
 0x16a   : > { %v2014_v21 = vmax.f32 %v1998_v13, %v2006_v17  ;;  %v2007_v22 = vmul.f32 0.2, %v1999_v18 }
 0x16b   : > { %2025 = vst.msk [vmem:[%s3094_s11 + $0x30] sm:$0xff] %vm2018_vm1, %v2016_v19  ;;  %v2017_v23 = vmax.f32 %v2001_v16, %v2009_v20 }
 0x16c   : > { %2023 = vst.msk [vmem:[%s3094_s11 + $0x20] sm:$0xff] %vm2018_vm1, %v2014_v21  ;;  %v2015_v24 = vmax.f32 %v1999_v18, %v2007_v22 }
 0x16d   : > { %2026 = vst.msk [vmem:[%s3094_s11 + $0x38] sm:$0xff] %vm2018_vm1, %v2017_v23 }
 0x16e   : > { %2024 = vst.msk [vmem:[%s3094_s11 + $0x28] sm:$0xff] %vm2018_vm1, %v2015_v24 }
 0x16f PF: > { %s13_s12 = sadd.s32 1, %s2817_s12  }
 0x170   : > { %p10_p4 = scmp.ge.s32.totalorder %s13_s12, 4  }
 0x172   :  { %12 = sbr.rel (!%p10_p4) target bundleno = 1 (0x1), region = 84 }

// kernel: discriminator_forward.7
= control target key start
LH: loop header
LB: loop body
LE: loop exit
PB: predicated region body
PF: predicated region fallthrough
CT: control target
= control target key end

     0   :  { %s2550_s12 = smov 0   ;;  %s2840_s0 = inlined_call_operand.vmem [shape: f32[2,4,5,9,64], index: 0, kind: input, shape index: {}]   ;;  %s2841_s1 = inlined_call_operand.vmem [shape: bf16[16,64,128], index: 1, kind: input, shape index: {}]   ;;  %s2842_s2 = inlined_call_operand.vmem [shape: f32[1,128], index: 2, kind: input, shape index: {}]   ;;  %s2843_s3 = inlined_call_operand.vmem [shape: f32[2,4,4,128], index: 3, kind: output, shape index: {}]  }
   0x1 LB: > { %s1817_s13 = sadd.s32 4294967295, %s2528_s12   ;;  %p1821_p0 = scmp.ge.s32.totalorder %s2528_s12, 1  ;;  %s2528_s12 = sphi %s2550_s12, %s13_s12  }
   0x2   : > { %p137_p1 = scmp.lt.s32.totalorder %s2528_s12, 3 }
   0x4   : > { %p138_p2 = pnand %p1821_p0, %p137_p1 }
   0x5   : > { %v2458_v0 = vld [vmem:[%s2841_s1 + $0x20] sm:$0xff] (!%p138_p2)   ;;  %p161_p3 = scmp.lt.s32.totalorder (!%p138_p2), %s1817_s13, 1  ;;  %v2460_v2 = vld [vmem:[%s2841_s1 + $0x28] sm:$0xff] (!%p138_p2)   ;;  %v2462_v4 = vld [vmem:[%s2841_s1 + $0x30] sm:$0xff] (!%p138_p2)   ;;  %vm226_vm0 = vcmask (!%p138_p2), 523264  }
   0x6   : > { %141 = sbr.rel (%p138_p2) target bundleno = 359 (0x167), region = 32  ;;  %v2459_v1 = vld [vmem:[%s2841_s1 + $0x100] sm:$0xff] (!%p138_p2)   ;;  %2197 = vmatprep.subr.bf16.mxu1 (!%p138_p2), %v2458_v0  ;;  %v2461_v3 = vld [vmem:[%s2841_s1 + $0x108] sm:$0xff] (!%p138_p2)   ;;  %v2463_v5 = vld [vmem:[%s2841_s1 + $0x110] sm:$0xff] (!%p138_p2)  }
   0x7   : > { %2293 = vmatprep.subr.bf16.mxu0 (!%p138_p2), %v2459_v1  ;;  %2198 = vmatpush3.bf16.msra.mxu1 (!%p138_p2), %v2458_v0  ;;  %v2464_v6 = vld [vmem:[%s2841_s1 + $0x38] sm:$0xff] (!%p138_p2)   ;;  %v2466_v13 = vld [vmem:[%s2841_s1] sm:$0xff] (!%p138_p2)   ;;  %v2468_v22 = vld [vmem:[%s2841_s1 + $0x8] sm:$0xff] (!%p138_p2)  }
   0x8   : > { %2294 = vmatpush3.bf16.msra.mxu0 (!%p138_p2), %v2459_v1  ;;  %2199 = vmatprep.subr.bf16.mxu1 (!%p138_p2), %v2460_v2  ;;  %v2465_v9 = vld [vmem:[%s2841_s1 + $0x118] sm:$0xff] (!%p138_p2)   ;;  %v2467_v19 = vld [vmem:[%s2841_s1 + $0x120] sm:$0xff] (!%p138_p2)   ;;  %v2469_v23 = vld [vmem:[%s2841_s1 + $0x128] sm:$0xff] (!%p138_p2)  }
   0x9   : > { %2295 = vmatprep.subr.bf16.mxu0 (!%p138_p2), %v2461_v3  ;;  %v2470_v27 = vld [vmem:[%s2841_s1 + $0x10] sm:$0xff] (!%p138_p2)   ;;  %v2472_v29 = vld [vmem:[%s2841_s1 + $0x18] sm:$0xff] (!%p138_p2)   ;;  %v2474_v31 = vld [vmem:[%s2841_s1 + $0x40] sm:$0xff] (!%p138_p2)  }
   0xa   : > { %v2471_v28 = vld [vmem:[%s2841_s1 + $0x130] sm:$0xff] (!%p138_p2)   ;;  %v2473_v30 = vld [vmem:[%s2841_s1 + $0x138] sm:$0xff] (!%p138_p2)   ;;  %v2475_v33 = vld [vmem:[%s2841_s1 + $0x140] sm:$0xff] (!%p138_p2)  }
   0xb   : > { %2200 = vmatpush3.bf16.msra.mxu1 (!%p138_p2), %v2460_v2  ;;  %v2476_v39 = vld [vmem:[%s2841_s1 + $0x48] sm:$0xff] (!%p138_p2)   ;;  %v2478_v43 = vld [vmem:[%s2841_s1 + $0x50] sm:$0xff] (!%p138_p2)   ;;  %v2480_v45 = vld [vmem:[%s2841_s1 + $0x58] sm:$0xff] (!%p138_p2)  }
   0xc   : > { %2296 = vmatpush3.bf16.msra.mxu0 (!%p138_p2), %v2461_v3  ;;  %2201 = vmatprep.subr.bf16.mxu1 (!%p138_p2), %v2462_v4  ;;  %v2477_v40 = vld [vmem:[%s2841_s1 + $0x148] sm:$0xff] (!%p138_p2)   ;;  %v2479_v44 = vld [vmem:[%s2841_s1 + $0x150] sm:$0xff] (!%p138_p2)   ;;  %v2481_v46 = vld [vmem:[%s2841_s1 + $0x158] sm:$0xff] (!%p138_p2)  }
   0xd   : > { %s2845_s13 = smov (!%p161_p3, %s1817_s13), 1  ;;  %2297 = vmatprep.subr.bf16.mxu0 %v2463_v5  ;;  %v2482_v47 = vld [vmem:[%s2841_s1 + $0x60] sm:$0xff]   ;;  %v2484_v56 = vld [vmem:[%s2841_s1 + $0x68] sm:$0xff]   ;;  %v2486_v60 = vld [vmem:[%s2841_s1 + $0x70] sm:$0xff]  }
   0xe   : > { %s2449_s24 = smul.u32 320, %s2845_s13  ;;  %v2483_v50 = vld [vmem:[%s2841_s1 + $0x160] sm:$0xff]   ;;  %v2485_v57 = vld [vmem:[%s2841_s1 + $0x168] sm:$0xff]   ;;  %v2487_v61 = vld [vmem:[%s2841_s1 + $0x170] sm:$0xff]  }
   0xf   : > { %2202 = vmatpush3.bf16.msra.mxu1 %v2462_v4  ;;  %v2488_v62 = vld [vmem:[%s2841_s1 + $0x78] sm:$0xff]   ;;  %v2490_v0 = vld [vmem:[%s2841_s1 + $0x80] sm:$0xff]  }
  0x10   : > { %s2582_s29 = scalar_lea.vmem %s2840_s0, %s2449_s24  ;;  %2298 = vmatpush3.bf16.msra.mxu0 %v2463_v5  ;;  %2203 = vmatprep.subr.bf16.mxu1 %v2464_v6  ;;  %v2489_v63 = vld [vmem:[%s2841_s1 + $0x178] sm:$0xff]   ;;  %v2491_v1 = vld [vmem:[%s2841_s1 + $0x180] sm:$0xff]  }
  0x11   : > { %v1825_v7 = vld [vmem:[%s2582_s29 + $0x50] sm:$0xff]  ;;  %v1826_v8 = vld [vmem:[%s2582_s29 + $0x60] sm:$0xff]  ;;  %2299 = vmatprep.subr.bf16.mxu0 %v2465_v9 }
  0x12   : > { %v191_v10 = vpack.c.bf16 %v1826_v8, %v1825_v7  ;;  %v1953_v11 = vld [vmem:[%s2582_s29 + $0x10] sm:$0xff]  ;;  %v1954_v12 = vld [vmem:[%s2582_s29 + $0x20] sm:$0xff] }
  0x13   : > { %v956_v14 = vpack.c.bf16 %v1954_v12, %v1953_v11  ;;  %v1827_v15 = vld [vmem:[%s2582_s29 + $0x70] sm:$0xff]  ;;  %v1828_v16 = vld [vmem:[%s2582_s29 + $0x80] sm:$0xff]  ;;  %2204 = vmatpush3.bf16.msra.mxu1 %v2464_v6 }
  0x14   : > { %2205 = vmatprep.mubr.msk.bf16.mxu1 %vm226_vm0, %v191_v10  ;;  %v1955_v17 = vld [vmem:[%s2582_s29 + $0x30] sm:$0xff]  ;;  %v1956_v18 = vld [vmem:[%s2582_s29 + $0x40] sm:$0xff]  ;;  %v192_v20 = vpack.c.bf16 %v1828_v16, %v1827_v15  ;;  %2300 = vmatpush3.bf16.msra.mxu0 %v2465_v9  ;;  %v1055_v25 = vpack.c.bf16 %v1827_v15, %v1826_v8  ;;  %v2492_v9 = vld [vmem:[%s2841_s1 + $0x88] sm:$0xff]  }
  0x15   : > { %2301 = vmatprep.mubr.msk.bf16.mxu0 %vm226_vm0, %v956_v14  ;;  %v957_v21 = vpack.c.bf16 %v1956_v18, %v1955_v17  ;;  %2209 = vmatprep.subr.bf16.mxu1 %v2466_v13  ;;  %v172_v24 = vld [vmem:[%s2582_s29] sm:$0xff]  ;;  %v1974_v32 = vld [vmem:[%s2582_s29 + $0x90] sm:$0xff]  ;;  %v177_v34 = vpack.c.bf16 %v1955_v17, %v1954_v12  ;;  %v2493_v10 = vld [vmem:[%s2841_s1 + $0x188] sm:$0xff]  }
  0x16   : > { %2305 = vmatprep.subr.bf16.mxu0 %v2467_v19  ;;  %2206 = vmatmul.mubr.msk.bf16.vlgmr.msra.gmra.mrb[0].mxu1 %vm226_vm0, %v192_v20  ;;  %v176_v26 = vpack.c.bf16 %v1953_v11, %v172_v24  ;;  %v361_v35 = vld [vmem:[%s2582_s29 + $0x1] sm:$0xff]  ;;  %v362_v36 = vld [vmem:[%s2582_s29 + $0x11] sm:$0xff]  ;;  %v1056_v37 = vpack.c.bf16 %v1974_v32, %v1828_v16 }
  0x17   : > { %2210 = vmatpush3.bf16.msra.mxu1 %v2466_v13  ;;  %2302 = vmatmul.mubr.msk.bf16.vlgmr.msra.gmra.mrb[0].mxu0 %vm226_vm0, %v957_v21  ;;  %v1990_v38 = vld [vmem:[%s2582_s29 + $0x21] sm:$0xff]  ;;  %v365_v41 = vpack.c.bf16 %v362_v36, %v361_v35  ;;  %v364_v48 = vld [vmem:[%s2582_s29 + $0x31] sm:$0xff] }
  0x18   : > { %2306 = vmatpush3.bf16.msra.mxu0 %v2467_v19  ;;  %2211 = vmatprep.subr.bf16.mxu1 %v2468_v22  ;;  %v1153_v42 = vpack.c.bf16 %v1990_v38, %v362_v36  ;;  %v1992_v49 = vld [vmem:[%s2582_s29 + $0x41] sm:$0xff]  ;;  %v366_v51 = vpack.c.bf16 %v364_v48, %v1990_v38  ;;  %v1863_v52 = vld [vmem:[%s2582_s29 + $0x51] sm:$0xff] }
  0x19   : > { %2307 = vmatprep.subr.bf16.mxu0 %v2469_v23  ;;  %2217 = vmatprep.mubr.msk.bf16.mxu1 %vm226_vm0, %v176_v26  ;;  %v1864_v53 = vld [vmem:[%s2582_s29 + $0x61] sm:$0xff]  ;;  %v1154_v54 = vpack.c.bf16 %v1992_v49, %v364_v48  ;;  %v2008_v55 = vld [vmem:[%s2582_s29 + $0x71] sm:$0xff] }
  0x1a   : > { %2313 = vmatprep.mubr.msk.bf16.mxu0 %vm226_vm0, %v1055_v25  ;;  %v463_v58 = vpack.c.bf16 %v1864_v53, %v1863_v52  ;;  %v1251_v59 = vpack.c.bf16 %v2008_v55, %v1864_v53  ;;  %v1866_v2 = vld [vmem:[%s2582_s29 + $0x81] sm:$0xff]  ;;  %v2010_v3 = vld [vmem:[%s2582_s29 + $0x91] sm:$0xff] }
  0x1b   : > { %2212 = vmatpush3.bf16.msra.mxu1 %v2468_v22  ;;  %v1881_v4 = vld [vmem:[%s2582_s29 + $0xa0] sm:$0xff]  ;;  %v464_v5 = vpack.c.bf16 %v1866_v2, %v2008_v55  ;;  %v1882_v6 = vld [vmem:[%s2582_s29 + $0xb0] sm:$0xff]  ;;  %v1252_v7 = vpack.c.bf16 %v2010_v3, %v1866_v2  ;;  %v2496_v15 = vld [vmem:[%s2841_s1 + $0x98] sm:$0xff]  }
  0x1c   : > { %2308 = vmatpush3.bf16.msra.mxu0 %v2469_v23  ;;  %2213 = vmatprep.subr.bf16.mxu1 %v2470_v27  ;;  %v2026_v8 = vld [vmem:[%s2582_s29 + $0xc0] sm:$0xff]  ;;  %v562_v11 = vpack.c.bf16 %v1882_v6, %v1881_v4  ;;  %v2494_v13 = vld [vmem:[%s2841_s1 + $0x90] sm:$0xff]   ;;  %v2497_v16 = vld [vmem:[%s2841_s1 + $0x198] sm:$0xff]  }
  0x1d   : > { %2309 = vmatprep.subr.bf16.mxu0 %v2471_v28  ;;  %v1350_v12 = vpack.c.bf16 %v2026_v8, %v1882_v6  ;;  %v2495_v14 = vld [vmem:[%s2841_s1 + $0x190] sm:$0xff]   ;;  %v2498_v18 = vld [vmem:[%s2841_s1 + $0xa0] sm:$0xff]   ;;  %v2500_v26 = vld [vmem:[%s2841_s1 + $0xa8] sm:$0xff]  }
  0x1e   : > { %v1884_v17 = vld [vmem:[%s2582_s29 + $0xd0] sm:$0xff]  ;;  %v2028_v19 = vld [vmem:[%s2582_s29 + $0xe0] sm:$0xff]  ;;  %v2504_v32 = vld [vmem:[%s2841_s1 + $0xb8] sm:$0xff]  }
  0x1f   : > { %2214 = vmatpush3.bf16.msra.mxu1 %v2470_v27  ;;  %v2499_v20 = vld [vmem:[%s2841_s1 + $0x1a0] sm:$0xff]   ;;  %v563_v21 = vpack.c.bf16 %v1884_v17, %v2026_v8  ;;  %v1899_v22 = vld [vmem:[%s2582_s29 + $0xf0] sm:$0xff]  ;;  %v1351_v24 = vpack.c.bf16 %v2028_v19, %v1884_v17  ;;  %v2501_v27 = vld [vmem:[%s2841_s1 + $0x1a8] sm:$0xff]  }
  0x20   : > { %2310 = vmatpush3.bf16.msra.mxu0 %v2471_v28  ;;  %2215 = vmatprep.subr.bf16.mxu1 %v2472_v29  ;;  %v1900_v23 = vld [vmem:[%s2582_s29 + $0x100] sm:$0xff]  ;;  %v2044_v25 = vld [vmem:[%s2582_s29 + $0x110] sm:$0xff]  ;;  %v2512_v49 = vld [vmem:[%s2841_s1 + $0xd8] sm:$0xff]  }
  0x21   : > { %2311 = vmatprep.subr.bf16.mxu0 %v2473_v30  ;;  %v661_v28 = vpack.c.bf16 %v1900_v23, %v1899_v22  ;;  %v2506_v35 = vld [vmem:[%s2841_s1 + $0xc0] sm:$0xff]   ;;  %v2046_v36 = vld [vmem:[%s2582_s29 + $0x130] sm:$0xff]  ;;  %v2520_v2 = vld [vmem:[%s2841_s1 + $0xf8] sm:$0xff]  }
  0x22   : > { %v2511_v48 = vld [vmem:[%s2841_s1 + $0x1d0] sm:$0xff]   ;;  %v2514_v52 = vld [vmem:[%s2841_s1 + $0xe0] sm:$0xff]   ;;  %v2521_v3 = vld [vmem:[%s2841_s1 + $0x1f8] sm:$0xff]  }
  0x23   : > { %2216 = vmatpush3.bf16.msra.mxu1 %v2472_v29  ;;  %v1449_v29 = vpack.c.bf16 %v2044_v25, %v1900_v23  ;;  %v2064_v53 = vld [vmem:[%s2582_s29 + $0xe1] sm:$0xff] }
  0x24   : > { %2312 = vmatpush3.bf16.msra.mxu0 %v2473_v30  ;;  %2221 = vmatprep.subr.bf16.mxu1 %v2474_v31  ;;  %v2502_v30 = vld [vmem:[%s2841_s1 + $0xb0] sm:$0xff]   ;;  %v1938_v4 = vld [vmem:[%s2582_s29 + $0x121] sm:$0xff] }
  0x25   : > { %2317 = vmatprep.subr.bf16.mxu0 %v2475_v33 }
  0x26   : > { %2218 = vmatmul.mubr.msk.bf16.vlgmr.msra.gmra.mrb[0].mxu1 %vm226_vm0, %v177_v34  ;;  %v1902_v34 = vld [vmem:[%s2582_s29 + $0x120] sm:$0xff] }
  0x27   : > { %2222 = vmatpush3.bf16.msra.mxu1 %v2474_v31  ;;  %2314 = vmatmul.mubr.msk.bf16.vlgmr.msra.gmra.mrb[0].mxu0 %vm226_vm0, %v1056_v37  ;;  %v2503_v31 = vld [vmem:[%s2841_s1 + $0x1b0] sm:$0xff]   ;;  %v2507_v37 = vld [vmem:[%s2841_s1 + $0x1c0] sm:$0xff]   ;;  %v662_v38 = vpack.c.bf16 %v1902_v34, %v2044_v25 }
  0x28   : > { %2318 = vmatpush3.bf16.msra.mxu0 %v2475_v33  ;;  %2223 = vmatprep.subr.bf16.mxu1 %v2476_v39  ;;  %v2505_v33 = vld [vmem:[%s2841_s1 + $0x1b8] sm:$0xff]  }
  0x29   : > { %2319 = vmatprep.subr.bf16.mxu0 %v2477_v40  ;;  %2229 = vmatprep.mubr.msk.bf16.mxu1 %vm226_vm0, %v365_v41  ;;  %v1450_v41 = vpack.c.bf16 %v2046_v36, %v1902_v34 }
  0x2a   : > { %2325 = vmatprep.mubr.msk.bf16.mxu0 %vm226_vm0, %v1153_v42  ;;  %v2062_v42 = vld [vmem:[%s2582_s29 + $0xc1] sm:$0xff] }
  0x2b   : > { %2224 = vmatpush3.bf16.msra.mxu1 %v2476_v39  ;;  %v1917_v39 = vld [vmem:[%s2582_s29 + $0xa1] sm:$0xff] }
  0x2c   : > { %2320 = vmatpush3.bf16.msra.mxu0 %v2477_v40  ;;  %2225 = vmatprep.subr.bf16.mxu1 %v2478_v43  ;;  %v1918_v40 = vld [vmem:[%s2582_s29 + $0xb1] sm:$0xff] }
  0x2d   : > { %2321 = vmatprep.subr.bf16.mxu0 %v2479_v44 }
  0x2f   : > { %2226 = vmatpush3.bf16.msra.mxu1 %v2478_v43  ;;  %v2508_v43 = vld [vmem:[%s2841_s1 + $0xc8] sm:$0xff]  }
  0x30   : > { %2322 = vmatpush3.bf16.msra.mxu0 %v2479_v44  ;;  %2227 = vmatprep.subr.bf16.mxu1 %v2480_v45  ;;  %v2509_v44 = vld [vmem:[%s2841_s1 + $0x1c8] sm:$0xff]  }
  0x31   : > { %2323 = vmatprep.subr.bf16.mxu0 %v2481_v46 }
  0x33   : > { %2228 = vmatpush3.bf16.msra.mxu1 %v2480_v45  ;;  %v759_v45 = vpack.c.bf16 %v1918_v40, %v1917_v39 }
  0x34   : > { %2324 = vmatpush3.bf16.msra.mxu0 %v2481_v46  ;;  %2233 = vmatprep.subr.bf16.mxu1 %v2482_v47  ;;  %v1547_v46 = vpack.c.bf16 %v2062_v42, %v1918_v40 }
  0x35   : > { %2329 = vmatprep.subr.bf16.mxu0 %v2483_v50 }
  0x36   : > { %2230 = vmatmul.mubr.msk.bf16.vlgmr.msra.gmra.mrb[0].mxu1 %vm226_vm0, %v366_v51  ;;  %v1920_v51 = vld [vmem:[%s2582_s29 + $0xd1] sm:$0xff] }
  0x37   : > { %2234 = vmatpush3.bf16.msra.mxu1 %v2482_v47  ;;  %2326 = vmatmul.mubr.msk.bf16.vlgmr.msra.gmra.mrb[0].mxu0 %vm226_vm0, %v1154_v54  ;;  %v2510_v47 = vld [vmem:[%s2841_s1 + $0xd0] sm:$0xff]   ;;  %v2515_v54 = vld [vmem:[%s2841_s1 + $0x1e0] sm:$0xff]   ;;  %v760_v55 = vpack.c.bf16 %v1920_v51, %v2062_v42 }
  0x38   : > { %2330 = vmatpush3.bf16.msra.mxu0 %v2483_v50  ;;  %2235 = vmatprep.subr.bf16.mxu1 %v2484_v56  ;;  %v2513_v50 = vld [vmem:[%s2841_s1 + $0x1d8] sm:$0xff]  }
  0x39   : > { %2331 = vmatprep.subr.bf16.mxu0 %v2485_v57  ;;  %2241 = vmatprep.mubr.msk.bf16.mxu1 %vm226_vm0, %v463_v58  ;;  %v1548_v58 = vpack.c.bf16 %v2064_v53, %v1920_v51 }
  0x3a   : > { %2337 = vmatprep.mubr.msk.bf16.mxu0 %vm226_vm0, %v1251_v59  ;;  %v2080_v59 = vld [vmem:[%s2582_s29 + $0x111] sm:$0xff] }
  0x3b   : > { %2236 = vmatpush3.bf16.msra.mxu1 %v2484_v56  ;;  %v1935_v56 = vld [vmem:[%s2582_s29 + $0xf1] sm:$0xff]  ;;  %v858_v6 = vpack.c.bf16 %v1938_v4, %v2080_v59 }
  0x3c   : > { %2332 = vmatpush3.bf16.msra.mxu0 %v2485_v57  ;;  %2237 = vmatprep.subr.bf16.mxu1 %v2486_v60  ;;  %v1936_v57 = vld [vmem:[%s2582_s29 + $0x101] sm:$0xff] }
  0x3d   : > { %2333 = vmatprep.subr.bf16.mxu0 %v2487_v61 }
  0x3f   : > { %2238 = vmatpush3.bf16.msra.mxu1 %v2486_v60  ;;  %v2516_v60 = vld [vmem:[%s2841_s1 + $0xe8] sm:$0xff]  }
  0x40   : > { %2334 = vmatpush3.bf16.msra.mxu0 %v2487_v61  ;;  %2239 = vmatprep.subr.bf16.mxu1 %v2488_v62  ;;  %v2517_v61 = vld [vmem:[%s2841_s1 + $0x1e8] sm:$0xff]  }
  0x41   : > { %2335 = vmatprep.subr.bf16.mxu0 %v2489_v63 }
  0x43   : > { %2240 = vmatpush3.bf16.msra.mxu1 %v2488_v62  ;;  %v857_v62 = vpack.c.bf16 %v1936_v57, %v1935_v56 }
  0x44   : > { %2336 = vmatpush3.bf16.msra.mxu0 %v2489_v63  ;;  %2245 = vmatprep.subr.bf16.mxu1 %v2490_v0  ;;  %v1645_v63 = vpack.c.bf16 %v2080_v59, %v1936_v57 }
  0x45   : > { %2341 = vmatprep.subr.bf16.mxu0 %v2491_v1 }
  0x46   : > { %2242 = vmatmul.mubr.msk.bf16.vlgmr.msra.gmra.mrb[0].mxu1 %vm226_vm0, %v464_v5  ;;  %v2082_v5 = vld [vmem:[%s2582_s29 + $0x131] sm:$0xff]  ;;  %s2100_s29 = sshll.u32 %s2845_s13, 4 }
  0x47   : > { %2246 = vmatpush3.bf16.msra.mxu1 %v2490_v0  ;;  %2338 = vmatmul.mubr.msk.bf16.vlgmr.msra.gmra.mrb[0].mxu0 %vm226_vm0, %v1252_v7  ;;  %v2518_v0 = vld [vmem:[%s2841_s1 + $0xf0] sm:$0xff]   ;;  %v1646_v7 = vpack.c.bf16 %v2082_v5, %v1938_v4  ;;  %s170_s30 = scalar_lea.vmem %s2843_s3, %s2100_s29 }
  0x48   : > { %2342 = vmatpush3.bf16.msra.mxu0 %v2491_v1  ;;  %2247 = vmatprep.subr.bf16.mxu1 %v2492_v9  ;;  %v2519_v1 = vld [vmem:[%s2841_s1 + $0x1f0] sm:$0xff]  }
  0x49   : > { %2343 = vmatprep.subr.bf16.mxu0 %v2493_v10  ;;  %2253 = vmatprep.mubr.msk.bf16.mxu1 %vm226_vm0, %v562_v11 }
  0x4a   : > { %2349 = vmatprep.mubr.msk.bf16.mxu0 %vm226_vm0, %v1350_v12 }
  0x4b   : > { %2248 = vmatpush3.bf16.msra.mxu1 %v2492_v9 }
  0x4c   : > { %2344 = vmatpush3.bf16.msra.mxu0 %v2493_v10  ;;  %2249 = vmatprep.subr.bf16.mxu1 %v2494_v13  ;;  %v2097_v10 = vld [vmem:[%s2842_s2] ss:$0 sm:$0xff] }
  0x4d   : > { %2345 = vmatprep.subr.bf16.mxu0 %v2495_v14 }
  0x4f   : > { %2250 = vmatpush3.bf16.msra.mxu1 %v2494_v13 }
  0x50   : > { %2346 = vmatpush3.bf16.msra.mxu0 %v2495_v14  ;;  %2251 = vmatprep.subr.bf16.mxu1 %v2496_v15 }
  0x51   : > { %2347 = vmatprep.subr.bf16.mxu0 %v2497_v16 }
  0x53   : > { %2252 = vmatpush3.bf16.msra.mxu1 %v2496_v15 }
  0x54   : > { %2348 = vmatpush3.bf16.msra.mxu0 %v2497_v16  ;;  %2257 = vmatprep.subr.bf16.mxu1 %v2498_v18 }
  0x55   : > { %2353 = vmatprep.subr.bf16.mxu0 %v2499_v20 }
  0x56   : > { %2254 = vmatmul.mubr.msk.bf16.vlgmr.msra.gmra.mrb[0].mxu1 %vm226_vm0, %v563_v21 }
  0x57   : > { %2258 = vmatpush3.bf16.msra.mxu1 %v2498_v18  ;;  %2350 = vmatmul.mubr.msk.bf16.vlgmr.msra.gmra.mrb[0].mxu0 %vm226_vm0, %v1351_v24 }
  0x58   : > { %2354 = vmatpush3.bf16.msra.mxu0 %v2499_v20  ;;  %2259 = vmatprep.subr.bf16.mxu1 %v2500_v26 }
  0x59   : > { %2355 = vmatprep.subr.bf16.mxu0 %v2501_v27  ;;  %2265 = vmatprep.mubr.msk.bf16.mxu1 %vm226_vm0, %v661_v28 }
  0x5a   : > { %2361 = vmatprep.mubr.msk.bf16.mxu0 %vm226_vm0, %v1449_v29 }
  0x5b   : > { %2260 = vmatpush3.bf16.msra.mxu1 %v2500_v26 }
  0x5c   : > { %2356 = vmatpush3.bf16.msra.mxu0 %v2501_v27  ;;  %2261 = vmatprep.subr.bf16.mxu1 %v2502_v30 }
  0x5d   : > { %2357 = vmatprep.subr.bf16.mxu0 %v2503_v31 }
  0x5f   : > { %2262 = vmatpush3.bf16.msra.mxu1 %v2502_v30 }
  0x60   : > { %2358 = vmatpush3.bf16.msra.mxu0 %v2503_v31  ;;  %2263 = vmatprep.subr.bf16.mxu1 %v2504_v32 }
  0x61   : > { %2359 = vmatprep.subr.bf16.mxu0 %v2505_v33 }
  0x63   : > { %2264 = vmatpush3.bf16.msra.mxu1 %v2504_v32 }
  0x64   : > { %2360 = vmatpush3.bf16.msra.mxu0 %v2505_v33  ;;  %2269 = vmatprep.subr.bf16.mxu1 %v2506_v35 }
  0x65   : > { %2365 = vmatprep.subr.bf16.mxu0 %v2507_v37 }
  0x66   : > { %2266 = vmatmul.mubr.msk.bf16.vlgmr.msra.gmra.mrb[0].mxu1 %vm226_vm0, %v662_v38 }
  0x67   : > { %2270 = vmatpush3.bf16.msra.mxu1 %v2506_v35  ;;  %2362 = vmatmul.mubr.msk.bf16.vlgmr.msra.gmra.mrb[0].mxu0 %vm226_vm0, %v1450_v41 }
  0x68   : > { %2366 = vmatpush3.bf16.msra.mxu0 %v2507_v37  ;;  %2271 = vmatprep.subr.bf16.mxu1 %v2508_v43 }
  0x69   : > { %2367 = vmatprep.subr.bf16.mxu0 %v2509_v44  ;;  %2277 = vmatprep.mubr.msk.bf16.mxu1 %vm226_vm0, %v759_v45 }
  0x6a   : > { %2373 = vmatprep.mubr.msk.bf16.mxu0 %vm226_vm0, %v1547_v46 }
  0x6b   : > { %2272 = vmatpush3.bf16.msra.mxu1 %v2508_v43 }
  0x6c   : > { %2368 = vmatpush3.bf16.msra.mxu0 %v2509_v44  ;;  %2273 = vmatprep.subr.bf16.mxu1 %v2510_v47 }
  0x6d   : > { %2369 = vmatprep.subr.bf16.mxu0 %v2511_v48 }
  0x6f   : > { %2274 = vmatpush3.bf16.msra.mxu1 %v2510_v47 }
  0x70   : > { %2370 = vmatpush3.bf16.msra.mxu0 %v2511_v48  ;;  %2275 = vmatprep.subr.bf16.mxu1 %v2512_v49 }
  0x71   : > { %2371 = vmatprep.subr.bf16.mxu0 %v2513_v50 }
  0x73   : > { %2276 = vmatpush3.bf16.msra.mxu1 %v2512_v49 }
  0x74   : > { %2372 = vmatpush3.bf16.msra.mxu0 %v2513_v50  ;;  %2281 = vmatprep.subr.bf16.mxu1 %v2514_v52 }
  0x75   : > { %2377 = vmatprep.subr.bf16.mxu0 %v2515_v54 }
  0x76   : > { %2278 = vmatmul.mubr.msk.bf16.vlgmr.msra.gmra.mrb[0].mxu1 %vm226_vm0, %v760_v55 }
  0x77   : > { %2282 = vmatpush3.bf16.msra.mxu1 %v2514_v52  ;;  %2374 = vmatmul.mubr.msk.bf16.vlgmr.msra.gmra.mrb[0].mxu0 %vm226_vm0, %v1548_v58 }
  0x78   : > { %2378 = vmatpush3.bf16.msra.mxu0 %v2515_v54  ;;  %2283 = vmatprep.subr.bf16.mxu1 %v2516_v60 }
  0x79   : > { %2379 = vmatprep.subr.bf16.mxu0 %v2517_v61  ;;  %2289 = vmatprep.mubr.msk.bf16.mxu1 %vm226_vm0, %v857_v62 }
  0x7a   : > { %2385 = vmatprep.mubr.msk.bf16.mxu0 %vm226_vm0, %v1645_v63 }
  0x7b   : > { %2284 = vmatpush3.bf16.msra.mxu1 %v2516_v60 }
  0x7c   : > { %2380 = vmatpush3.bf16.msra.mxu0 %v2517_v61  ;;  %2285 = vmatprep.subr.bf16.mxu1 %v2518_v0 }
  0x7d   : > { %2381 = vmatprep.subr.bf16.mxu0 %v2519_v1 }
  0x7f   : > { %2286 = vmatpush3.bf16.msra.mxu1 %v2518_v0 }
  0x80   : > { %2382 = vmatpush3.bf16.msra.mxu0 %v2519_v1  ;;  %2287 = vmatprep.subr.bf16.mxu1 %v2520_v2 }
  0x81   : > { %2383 = vmatprep.subr.bf16.mxu0 %v2521_v3 }
  0x83   : > { %2288 = vmatpush3.bf16.msra.mxu1 %v2520_v2 }
  0x84   : > { %2384 = vmatpush3.bf16.msra.mxu0 %v2521_v3 }
  0x86   : > { %2290 = vmatmul.mubr.msk.bf16.vlgmr.msra.gmra.mrb[0].mxu1 %vm226_vm0, %v858_v6 }
  0x87   : > { %2386 = vmatmul.mubr.msk.bf16.vlgmr.msra.gmra.mrb[0].mxu0 %vm226_vm0, %v1646_v7 }
 0x159   : > { %v2291_v8 = vpop.f32.mrb[0].mxu1 }
 0x15a   : > { %v2387_v9 = vpop.f32.mrb[0].mxu0  ;;  %v932_v11 = vpop.f32.mrb[1].mxu1 }
 0x15b   : > { %v2389_v12 = vadd.f32 %v2387_v9, %v2291_v8  ;;  %v1720_v13 = vpop.f32.mrb[1].mxu0  ;;  %v2292_v14 = vpop.f32.mrb[2].mxu1 }
 0x15c   : > { %v2390_v15 = vadd.f32 %v1720_v13, %v932_v11  ;;  %v2388_v16 = vpop.f32.mrb[2].mxu0  ;;  %v935_v17 = vpop.f32.mrb[3].mxu1 }
 0x15d   : > { %v1748_v18 = vadd.f32 %v2389_v12, %v2097_v10  ;;  %v2391_v19 = vadd.f32 %v2388_v16, %v2292_v14  ;;  %v1723_v20 = vpop.f32.mrb[3].mxu0 }
 0x15e   : > { %v1746_v21 = vadd.f32 %v2390_v15, %v2097_v10  ;;  %v2392_v22 = vadd.f32 %v1723_v20, %v935_v17 }
 0x15f   : > { %v1752_v23 = vmul.f32 0.2, %v1748_v18  ;;  %v1749_v24 = vadd.f32 %v2391_v19, %v2097_v10 }
 0x160   : > { %v1750_v25 = vmul.f32 0.2, %v1746_v21  ;;  %v1747_v26 = vadd.f32 %v2392_v22, %v2097_v10 }
 0x161   : > { %v1756_v27 = vmax.f32 %v1748_v18, %v1752_v23  ;;  %v1753_v28 = vmul.f32 0.2, %v1749_v24 }
 0x162   : > { %v1754_v29 = vmax.f32 %v1746_v21, %v1750_v25  ;;  %v1751_v30 = vmul.f32 0.2, %v1747_v26 }
 0x163   : > { %1760 = vst [vmem:[%s170_s30 + $0x8] sm:$0xf] %v1756_v27  ;;  %v1757_v31 = vmax.f32 %v1749_v24, %v1753_v28 }
 0x164   : > { %1758 = vst [vmem:[%s170_s30] sm:$0xf] %v1754_v29  ;;  %v1755_v32 = vmax.f32 %v1747_v26, %v1751_v30 }
 0x165   : > { %1761 = vst [vmem:[%s170_s30 + $0xc] sm:$0xf] %v1757_v31 }
 0x166   : > { %1759 = vst [vmem:[%s170_s30 + $0x4] sm:$0xf] %v1755_v32 }
 0x167 PF: > { %s13_s12 = sadd.s32 1, %s2528_s12  }
 0x168   : > { %p10_p4 = scmp.ge.s32.totalorder %s13_s12, 4  }
 0x16a   :  { %12 = sbr.rel (!%p10_p4) target bundleno = 1 (0x1), region = 84 }

// kernel: discriminator_forward.8
= control target key start
LH: loop header
LB: loop body
LE: loop exit
PB: predicated region body
PF: predicated region fallthrough
CT: control target
= control target key end

     0   :  { %s3834_s12 = smov 0   ;;  %s4835_s0 = inlined_call_operand.vmem [shape: f32[2,1,6,11,128], index: 0, kind: input, shape index: {}]   ;;  %s4836_s1 = inlined_call_operand.vmem [shape: bf16[16,128,256], index: 1, kind: input, shape index: {}]   ;;  %s4837_s2 = inlined_call_operand.vmem [shape: f32[1,256], index: 2, kind: input, shape index: {}]   ;;  %s4838_s3 = inlined_call_operand.vmem [shape: f32[2,3,3,256], index: 3, kind: output, shape index: {}]  }
   0x1 LB: > { %s2806_s13 = sadd.s32 4294967295, %s3811_s12   ;;  %p2810_p0 = scmp.ge.s32.totalorder %s3811_s12, 1  ;;  %s3811_s12 = sphi %s3834_s12, %s13_s12  }
   0x2   : > { %p137_p1 = scmp.lt.s32.totalorder %s3811_s12, 3 }
   0x4   : > { %p138_p2 = pnand %p2810_p0, %p137_p1 }
   0x5   : > { %v3418_v0 = vld [vmem:[%s4836_s1 + $0x84] ss:$8 sps:$4 sm:$0xff] (!%p138_p2)   ;;  %v3813_v2 = vmov (!%p138_p2), 0   ;;  %v3422_v3 = vld [vmem:[%s4836_s1 + $0x80] ss:$8 sps:$4 sm:$0xff] (!%p138_p2)   ;;  %p161_p3 = scmp.lt.s32.totalorder (!%p138_p2), %s2806_s13, 1 }
   0x6   : > { %141 = sbr.rel (%p138_p2) target bundleno = 511 (0x1ff), region = 32  ;;  %v3420_v1 = vld [vmem:[%s4836_s1 + $0x404] ss:$8 sps:$4 sm:$0xff] (!%p138_p2)   ;;  %327 = vmatprep.mubr.bf16.mxu1 (!%p138_p2), %v3813_v2  ;;  %1567 = vmatprep.mubr.bf16.mxu0 (!%p138_p2), %v3813_v2  ;;  %v3423_v4 = vld [vmem:[%s4836_s1 + $0x400] ss:$8 sps:$4 sm:$0xff] (!%p138_p2)  }
   0x7   : > { %295 = vmatprep.subr.bf16.mxu1 (!%p138_p2), %v3418_v0  ;;  %1535 = vmatprep.subr.bf16.mxu0 (!%p138_p2), %v3420_v1  ;;  %v3424_v5 = vld [vmem:[%s4836_s1 + $0x94] ss:$8 sps:$4 sm:$0xff] (!%p138_p2)   ;;  %v3428_v7 = vld [vmem:[%s4836_s1 + $0x90] ss:$8 sps:$4 sm:$0xff] (!%p138_p2)   ;;  %v3430_v9 = vld [vmem:[%s4836_s1 + $0xa4] ss:$8 sps:$4 sm:$0xff] (!%p138_p2)  }
   0x8   : > { %296 = vmatpush1.bf16.msra.mxu1 (!%p138_p2), %v3422_v3  ;;  %1536 = vmatpush1.bf16.msra.mxu0 (!%p138_p2), %v3423_v4  ;;  %v3426_v6 = vld [vmem:[%s4836_s1 + $0x414] ss:$8 sps:$4 sm:$0xff] (!%p138_p2)   ;;  %v3429_v8 = vld [vmem:[%s4836_s1 + $0x410] ss:$8 sps:$4 sm:$0xff] (!%p138_p2)   ;;  %v3432_v10 = vld [vmem:[%s4836_s1 + $0x424] ss:$8 sps:$4 sm:$0xff] (!%p138_p2)  }
   0x9   : > { %297 = vmatprep.subr.bf16.mxu1 (!%p138_p2), %v3424_v5  ;;  %1537 = vmatprep.subr.bf16.mxu0 (!%p138_p2), %v3426_v6  ;;  %v3434_v11 = vld [vmem:[%s4836_s1 + $0xa0] ss:$8 sps:$4 sm:$0xff] (!%p138_p2)   ;;  %v3436_v13 = vld [vmem:[%s4836_s1 + $0xb4] ss:$8 sps:$4 sm:$0xff] (!%p138_p2)   ;;  %v3440_v15 = vld [vmem:[%s4836_s1 + $0xb0] ss:$8 sps:$4 sm:$0xff] (!%p138_p2)  }
   0xa   : > { %v3435_v12 = vld [vmem:[%s4836_s1 + $0x420] ss:$8 sps:$4 sm:$0xff] (!%p138_p2)   ;;  %v3438_v14 = vld [vmem:[%s4836_s1 + $0x434] ss:$8 sps:$4 sm:$0xff] (!%p138_p2)   ;;  %v3441_v16 = vld [vmem:[%s4836_s1 + $0x430] ss:$8 sps:$4 sm:$0xff] (!%p138_p2)  }
   0xb   : > { %v3442_v17 = vld [vmem:[%s4836_s1 + $0xc4] ss:$8 sps:$4 sm:$0xff] (!%p138_p2)   ;;  %v3446_v19 = vld [vmem:[%s4836_s1 + $0xc0] ss:$8 sps:$4 sm:$0xff] (!%p138_p2)   ;;  %v3448_v21 = vld [vmem:[%s4836_s1 + $0xd4] ss:$8 sps:$4 sm:$0xff] (!%p138_p2)  }
   0xc   : > { %298 = vmatpush1.bf16.msra.mxu1 (!%p138_p2), %v3428_v7  ;;  %1538 = vmatpush1.bf16.msra.mxu0 (!%p138_p2), %v3429_v8  ;;  %v3444_v18 = vld [vmem:[%s4836_s1 + $0x444] ss:$8 sps:$4 sm:$0xff] (!%p138_p2)   ;;  %v3447_v20 = vld [vmem:[%s4836_s1 + $0x440] ss:$8 sps:$4 sm:$0xff] (!%p138_p2)   ;;  %v3450_v22 = vld [vmem:[%s4836_s1 + $0x454] ss:$8 sps:$4 sm:$0xff] (!%p138_p2)  }
   0xd   : > { %299 = vmatprep.subr.bf16.mxu1 %v3430_v9  ;;  %1539 = vmatprep.subr.bf16.mxu0 %v3432_v10  ;;  %s4840_s13 = smov (!%p161_p3, %s2806_s13), 1  ;;  %v3452_v23 = vld [vmem:[%s4836_s1 + $0xd0] ss:$8 sps:$4 sm:$0xff]   ;;  %v3454_v25 = vld [vmem:[%s4836_s1 + $0xe4] ss:$8 sps:$4 sm:$0xff]  }
   0xe   : > { %s3407_s8 = smul.u32 96, %s4840_s13  ;;  %v3453_v24 = vld [vmem:[%s4836_s1 + $0x450] ss:$8 sps:$4 sm:$0xff]   ;;  %v3456_v26 = vld [vmem:[%s4836_s1 + $0x464] ss:$8 sps:$4 sm:$0xff]  }
   0xf   : > { %v3458_v27 = vld [vmem:[%s4836_s1 + $0xe0] ss:$8 sps:$4 sm:$0xff]   ;;  %v3460_v29 = vld [vmem:[%s4836_s1 + $0xf4] ss:$8 sps:$4 sm:$0xff]   ;;  %v3464_v31 = vld [vmem:[%s4836_s1 + $0xf0] ss:$8 sps:$4 sm:$0xff]  }
  0x10   : > { %300 = vmatpush1.bf16.msra.mxu1 %v3434_v11  ;;  %1540 = vmatpush1.bf16.msra.mxu0 %v3435_v12  ;;  %s3932_s19 = scalar_lea.vmem %s4835_s0, %s3407_s8  ;;  %v3459_v28 = vld [vmem:[%s4836_s1 + $0x460] ss:$8 sps:$4 sm:$0xff]   ;;  %v3462_v30 = vld [vmem:[%s4836_s1 + $0x474] ss:$8 sps:$4 sm:$0xff]   ;;  %v3465_v32 = vld [vmem:[%s4836_s1 + $0x470] ss:$8 sps:$4 sm:$0xff]  }
  0x11   : > { %301 = vmatprep.subr.bf16.mxu1 %v3436_v13  ;;  %1541 = vmatprep.subr.bf16.mxu0 %v3438_v14  ;;  %v193_v33 = vld [vmem:[%s3932_s19 + $0x1] sm:$0xff]  ;;  %v194_v35 = vld [vmem:[%s3932_s19 + $0x11] sm:$0xff]  ;;  %s3408_s25 = smul.u32 24, %s4840_s13 }
  0x12   : > { %v3468_v34 = vld [vmem:[%s4836_s1 + $0x4] ss:$8 sps:$4 sm:$0xff]   ;;  %v3961_v37 = vld [vmem:[%s3932_s19 + $0x30] sm:$0xff]  ;;  %v3466_v39 = vld [vmem:[%s4836_s1] ss:$8 sps:$4 sm:$0xff]   ;;  %v196_v41 = vpack.c.bf16 %v194_v35, %v193_v33 }
  0x13   : > { %v3958_v36 = vld [vmem:[%s3932_s19 + $0x20] sm:$0xff]  ;;  %v3474_v43 = vld [vmem:[%s4836_s1 + $0x14] ss:$8 sps:$4 sm:$0xff]   ;;  %v3472_v45 = vld [vmem:[%s4836_s1 + $0x10] ss:$8 sps:$4 sm:$0xff]   ;;  %s4813_s28 = scalar_lea.vmem %s4838_s3, %s3408_s25 }
  0x14   : > { %302 = vmatpush1.bf16.msra.mxu1 %v3440_v15  ;;  %1542 = vmatpush1.bf16.msra.mxu0 %v3441_v16  ;;  %v3471_v38 = vld [vmem:[%s4836_s1 + $0x484] ss:$8 sps:$4 sm:$0xff]   ;;  %v3469_v40 = vld [vmem:[%s4836_s1 + $0x480] ss:$8 sps:$4 sm:$0xff]   ;;  %v1436_v42 = vpack.c.bf16 %v3961_v37, %v3958_v36  ;;  %v3477_v44 = vld [vmem:[%s4836_s1 + $0x494] ss:$8 sps:$4 sm:$0xff]  }
  0x15   : > { %303 = vmatprep.subr.bf16.mxu1 %v3442_v17  ;;  %1543 = vmatprep.subr.bf16.mxu0 %v3444_v18  ;;  %v3475_v46 = vld [vmem:[%s4836_s1 + $0x490] ss:$8 sps:$4 sm:$0xff]   ;;  %v3480_v47 = vld [vmem:[%s4836_s1 + $0x24] ss:$8 sps:$4 sm:$0xff]   ;;  %v3478_v50 = vld [vmem:[%s4836_s1 + $0x20] ss:$8 sps:$4 sm:$0xff]  }
  0x16   : > { %v3483_v48 = vld [vmem:[%s4836_s1 + $0x4a4] ss:$8 sps:$4 sm:$0xff]   ;;  %v3481_v52 = vld [vmem:[%s4836_s1 + $0x4a0] ss:$8 sps:$4 sm:$0xff]   ;;  %v3486_v53 = vld [vmem:[%s4836_s1 + $0x34] ss:$8 sps:$4 sm:$0xff]  }
  0x17   : > { %v3994_v49 = vld [vmem:[%s3932_s19 + $0x21] sm:$0xff]  ;;  %v3489_v54 = vld [vmem:[%s4836_s1 + $0x4b4] ss:$8 sps:$4 sm:$0xff]   ;;  %v3484_v58 = vld [vmem:[%s4836_s1 + $0x30] ss:$8 sps:$4 sm:$0xff]  }
  0x18   : > { %304 = vmatpush1.bf16.msra.mxu1 %v3446_v19  ;;  %1544 = vmatpush1.bf16.msra.mxu0 %v3447_v20  ;;  %v197_v51 = vpack.c.bf16 %v3994_v49, %v3994_v49  ;;  %v4012_v55 = vld [vmem:[%s3932_s19 + $0x40] sm:$0xff]  ;;  %v3487_v59 = vld [vmem:[%s4836_s1 + $0x4b0] ss:$8 sps:$4 sm:$0xff]   ;;  %v3498_v3 = vld [vmem:[%s4836_s1 + $0x54] ss:$8 sps:$4 sm:$0xff]  }
  0x19   : > { %305 = vmatprep.subr.bf16.mxu1 %v3448_v21  ;;  %1545 = vmatprep.subr.bf16.mxu0 %v3450_v22  ;;  %v1437_v56 = vpack.c.bf16 %v4012_v55, %v4012_v55  ;;  %v2073_v57 = vpack.c.bf16 %v4012_v55, %v3961_v37  ;;  %v3492_v60 = vld [vmem:[%s4836_s1 + $0x44] ss:$8 sps:$4 sm:$0xff]   ;;  %v4031_v62 = vld [vmem:[%s3932_s19 + $0x10] sm:$0xff]  ;;  %v3490_v0 = vld [vmem:[%s4836_s1 + $0x40] ss:$8 sps:$4 sm:$0xff]  }
  0x1a   : > { %v3495_v61 = vld [vmem:[%s4836_s1 + $0x4c4] ss:$8 sps:$4 sm:$0xff]   ;;  %v799_v63 = vpack.c.bf16 %v3958_v36, %v4031_v62  ;;  %v3493_v1 = vld [vmem:[%s4836_s1 + $0x4c0] ss:$8 sps:$4 sm:$0xff]   ;;  %v3501_v4 = vld [vmem:[%s4836_s1 + $0x4d4] ss:$8 sps:$4 sm:$0xff]  }
  0x1b   : > { %v3496_v5 = vld [vmem:[%s4836_s1 + $0x50] ss:$8 sps:$4 sm:$0xff]   ;;  %v3504_v7 = vld [vmem:[%s4836_s1 + $0x64] ss:$8 sps:$4 sm:$0xff]   ;;  %v3502_v9 = vld [vmem:[%s4836_s1 + $0x60] ss:$8 sps:$4 sm:$0xff]  }
  0x1c   : > { %306 = vmatpush1.bf16.msra.mxu1 %v3452_v23  ;;  %1546 = vmatpush1.bf16.msra.mxu0 %v3453_v24  ;;  %v3499_v6 = vld [vmem:[%s4836_s1 + $0x4d0] ss:$8 sps:$4 sm:$0xff]   ;;  %v3507_v8 = vld [vmem:[%s4836_s1 + $0x4e4] ss:$8 sps:$4 sm:$0xff]   ;;  %v3505_v10 = vld [vmem:[%s4836_s1 + $0x4e0] ss:$8 sps:$4 sm:$0xff]  }
  0x1d   : > { %307 = vmatprep.subr.bf16.mxu1 %v3454_v25  ;;  %1547 = vmatprep.subr.bf16.mxu0 %v3456_v26  ;;  %v3510_v11 = vld [vmem:[%s4836_s1 + $0x74] ss:$8 sps:$4 sm:$0xff]   ;;  %v3508_v13 = vld [vmem:[%s4836_s1 + $0x70] ss:$8 sps:$4 sm:$0xff]   ;;  %v172_v15 = vld [vmem:[%s3932_s19] sm:$0xff] }
  0x1e   : > { %v3513_v12 = vld [vmem:[%s4836_s1 + $0x4f4] ss:$8 sps:$4 sm:$0xff]   ;;  %v3511_v14 = vld [vmem:[%s4836_s1 + $0x4f0] ss:$8 sps:$4 sm:$0xff]   ;;  %v3516_v17 = vld [vmem:[%s4836_s1 + $0x104] ss:$8 sps:$4 sm:$0xff]   ;;  %v175_v19 = vpack.c.bf16 %v4031_v62, %v172_v15 }
  0x1f   : > { %v4081_v16 = vld [vmem:[%s3932_s19 + $0x31] sm:$0xff]  ;;  %v3519_v18 = vld [vmem:[%s4836_s1 + $0x504] ss:$8 sps:$4 sm:$0xff]   ;;  %v3514_v20 = vld [vmem:[%s4836_s1 + $0x100] ss:$8 sps:$4 sm:$0xff]  }
  0x20   : > { %308 = vmatpush1.bf16.msra.mxu1 %v3458_v27  ;;  %1548 = vmatpush1.bf16.msra.mxu0 %v3459_v28  ;;  %v1595_v21 = vpack.c.bf16 %v4081_v16, %v3994_v49  ;;  %v3517_v22 = vld [vmem:[%s4836_s1 + $0x500] ss:$8 sps:$4 sm:$0xff]   ;;  %v3522_v23 = vld [vmem:[%s4836_s1 + $0x114] ss:$8 sps:$4 sm:$0xff]   ;;  %v3520_v27 = vld [vmem:[%s4836_s1 + $0x110] ss:$8 sps:$4 sm:$0xff]  }
  0x21   : > { %309 = vmatprep.subr.bf16.mxu1 %v3460_v29  ;;  %1549 = vmatprep.subr.bf16.mxu0 %v3462_v30  ;;  %v3525_v24 = vld [vmem:[%s4836_s1 + $0x514] ss:$8 sps:$4 sm:$0xff]   ;;  %v4105_v25 = vld [vmem:[%s3932_s19 + $0x41] sm:$0xff]  ;;  %v3523_v28 = vld [vmem:[%s4836_s1 + $0x510] ss:$8 sps:$4 sm:$0xff]  }
  0x22   : > { %v2232_v26 = vpack.c.bf16 %v4105_v25, %v4081_v16  ;;  %v3528_v29 = vld [vmem:[%s4836_s1 + $0x124] ss:$8 sps:$4 sm:$0xff]   ;;  %v3526_v33 = vld [vmem:[%s4836_s1 + $0x120] ss:$8 sps:$4 sm:$0xff]   ;;  %v3534_v35 = vld [vmem:[%s4836_s1 + $0x134] ss:$8 sps:$4 sm:$0xff]  }
  0x23   : > { %v3531_v30 = vld [vmem:[%s4836_s1 + $0x524] ss:$8 sps:$4 sm:$0xff]   ;;  %v3802_v55 = vld [vmem:[%s3932_s19 + $0x30] sm:$0xff]  ;;  %v3670_v62 = vld [vmem:[%s4836_s1 + $0x2a0] ss:$8 sps:$4 sm:$0xff]  }
  0x24   : > { %310 = vmatpush1.bf16.msra.mxu1 %v3464_v31  ;;  %1550 = vmatpush1.bf16.msra.mxu0 %v3465_v32  ;;  %v176_v31 = vpack.c.bf16 %v3958_v36, %v3958_v36  ;;  %v1596_v32 = vpack.c.bf16 %v4105_v25, %v4105_v25  ;;  %v3552_v49 = vld [vmem:[%s4836_s1 + $0x164] ss:$8 sps:$4 sm:$0xff]   ;;  %v3207_v36 = vld [vmem:[%s3932_s19 + $0x50] sm:$0xff] }
  0x25   : > { %426 = vmatprep.subr.bf16.mxu1 %v3468_v34  ;;  %1694 = vmatprep.subr.bf16.mxu0 %v3471_v38  ;;  %v3529_v34 = vld [vmem:[%s4836_s1 + $0x520] ss:$8 sps:$4 sm:$0xff]   ;;  %v3537_v38 = vld [vmem:[%s4836_s1 + $0x534] ss:$8 sps:$4 sm:$0xff]   ;;  %v3576_v15 = vld [vmem:[%s4836_s1 + $0x1a4] ss:$8 sps:$4 sm:$0xff]  }
  0x26   : > { %v3675_v37 = vld [vmem:[%s4836_s1 + $0x6a4] ss:$8 sps:$4 sm:$0xff]   ;;  %v3804_v25 = vld [vmem:[%s3932_s19 + $0x31] sm:$0xff] }
  0x27   : > { %328 = vmatmul.mubr.bf16.vlgmr.msra.gmra.mrb[0].mxu1 %v196_v41  ;;  %1568 = vmatmul.mubr.bf16.vlgmr.msra.gmra.mrb[0].mxu0 %v1436_v42  ;;  %v3540_v41 = vld [vmem:[%s4836_s1 + $0x144] ss:$8 sps:$4 sm:$0xff]  }
  0x28   : > { %427 = vmatpush1.bf16.msra.mxu1 %v3466_v39  ;;  %1695 = vmatpush1.bf16.msra.mxu0 %v3469_v40  ;;  %v3532_v39 = vld [vmem:[%s4836_s1 + $0x130] ss:$8 sps:$4 sm:$0xff]   ;;  %v3543_v42 = vld [vmem:[%s4836_s1 + $0x544] ss:$8 sps:$4 sm:$0xff]  }
  0x29   : > { %428 = vmatprep.subr.bf16.mxu1 %v3474_v43  ;;  %1696 = vmatprep.subr.bf16.mxu0 %v3477_v44  ;;  %v3535_v40 = vld [vmem:[%s4836_s1 + $0x530] ss:$8 sps:$4 sm:$0xff]   ;;  %v3538_v43 = vld [vmem:[%s4836_s1 + $0x140] ss:$8 sps:$4 sm:$0xff]   ;;  %v3723_v16 = vld [vmem:[%s4836_s1 + $0x724] ss:$8 sps:$4 sm:$0xff]  }
  0x2a   : > { %337 = vmatprep.mubr.bf16.mxu1 %v3813_v2  ;;  %1577 = vmatprep.mubr.bf16.mxu0 %v3813_v2  ;;  %v3541_v44 = vld [vmem:[%s4836_s1 + $0x540] ss:$8 sps:$4 sm:$0xff]  }
  0x2c   : > { %429 = vmatpush1.bf16.msra.mxu1 %v3472_v45  ;;  %1697 = vmatpush1.bf16.msra.mxu0 %v3475_v46  ;;  %v3546_v45 = vld [vmem:[%s4836_s1 + $0x154] ss:$8 sps:$4 sm:$0xff]  }
  0x2d   : > { %430 = vmatprep.subr.bf16.mxu1 %v3480_v47  ;;  %1698 = vmatprep.subr.bf16.mxu0 %v3483_v48  ;;  %v3549_v46 = vld [vmem:[%s4836_s1 + $0x554] ss:$8 sps:$4 sm:$0xff]   ;;  %v3544_v47 = vld [vmem:[%s4836_s1 + $0x150] ss:$8 sps:$4 sm:$0xff]  }
  0x2e   : > { %v3547_v48 = vld [vmem:[%s4836_s1 + $0x550] ss:$8 sps:$4 sm:$0xff]  }
  0x2f   : > { %338 = vmatmul.mubr.bf16.gmra.mrb[4].mxu1 %v197_v51  ;;  %1578 = vmatmul.mubr.bf16.gmra.mrb[4].mxu0 %v1437_v56  ;;  %v3550_v51 = vld [vmem:[%s4836_s1 + $0x160] ss:$8 sps:$4 sm:$0xff]   ;;  %v3556_v56 = vld [vmem:[%s4836_s1 + $0x170] ss:$8 sps:$4 sm:$0xff]  }
  0x30   : > { %431 = vmatpush1.bf16.msra.mxu1 %v3478_v50  ;;  %1699 = vmatpush1.bf16.msra.mxu0 %v3481_v52  ;;  %v3555_v50 = vld [vmem:[%s4836_s1 + $0x564] ss:$8 sps:$4 sm:$0xff]   ;;  %v3553_v52 = vld [vmem:[%s4836_s1 + $0x560] ss:$8 sps:$4 sm:$0xff]  }
  0x31   : > { %432 = vmatprep.subr.bf16.mxu1 %v3486_v53  ;;  %1700 = vmatprep.subr.bf16.mxu0 %v3489_v54  ;;  %v3558_v53 = vld [vmem:[%s4836_s1 + $0x174] ss:$8 sps:$4 sm:$0xff]  }
  0x32   : > { %458 = vmatprep.mubr.bf16.mxu1 %v3813_v2  ;;  %1726 = vmatprep.mubr.bf16.mxu0 %v3813_v2  ;;  %v3561_v54 = vld [vmem:[%s4836_s1 + $0x574] ss:$8 sps:$4 sm:$0xff]  }
  0x34   : > { %433 = vmatpush1.bf16.msra.mxu1 %v3484_v58  ;;  %1701 = vmatpush1.bf16.msra.mxu0 %v3487_v59  ;;  %v3559_v58 = vld [vmem:[%s4836_s1 + $0x570] ss:$8 sps:$4 sm:$0xff]   ;;  %v477_v59 = vld [vmem:[%s3932_s19 + $0x2] sm:$0xff] }
  0x35   : > { %434 = vmatprep.subr.bf16.mxu1 %v3492_v60  ;;  %1702 = vmatprep.subr.bf16.mxu0 %v3495_v61  ;;  %v4197_v60 = vld [vmem:[%s3932_s19 + $0x12] sm:$0xff]  ;;  %v4200_v61 = vld [vmem:[%s3932_s19 + $0x22] sm:$0xff] }
  0x38   : > { %435 = vmatpush1.bf16.msra.mxu1 %v3490_v0  ;;  %1703 = vmatpush1.bf16.msra.mxu0 %v3493_v1  ;;  %v4203_v0 = vld [vmem:[%s3932_s19 + $0x32] sm:$0xff]  ;;  %v3564_v1 = vld [vmem:[%s4836_s1 + $0x184] ss:$8 sps:$4 sm:$0xff]  }
  0x39   : > { %436 = vmatprep.subr.bf16.mxu1 %v3498_v3  ;;  %1704 = vmatprep.subr.bf16.mxu0 %v3501_v4  ;;  %v3567_v3 = vld [vmem:[%s4836_s1 + $0x584] ss:$8 sps:$4 sm:$0xff]   ;;  %v480_v4 = vpack.c.bf16 %v4197_v60, %v477_v59 }
  0x3a   : > { %v4348_v59 = vld [vmem:[%s3932_s19 + $0x43] sm:$0xff] }
  0x3c   : > { %437 = vmatpush1.bf16.msra.mxu1 %v3496_v5  ;;  %1705 = vmatpush1.bf16.msra.mxu0 %v3499_v6  ;;  %v3562_v5 = vld [vmem:[%s4836_s1 + $0x180] ss:$8 sps:$4 sm:$0xff]  }
  0x3d   : > { %438 = vmatprep.subr.bf16.mxu1 %v3504_v7  ;;  %1706 = vmatprep.subr.bf16.mxu0 %v3507_v8  ;;  %v3565_v6 = vld [vmem:[%s4836_s1 + $0x580] ss:$8 sps:$4 sm:$0xff]   ;;  %v1754_v7 = vpack.c.bf16 %v4203_v0, %v4200_v61  ;;  %v3570_v8 = vld [vmem:[%s4836_s1 + $0x194] ss:$8 sps:$4 sm:$0xff]  }
  0x40   : > { %439 = vmatpush1.bf16.msra.mxu1 %v3502_v9  ;;  %1707 = vmatpush1.bf16.msra.mxu0 %v3505_v10  ;;  %v3573_v9 = vld [vmem:[%s4836_s1 + $0x594] ss:$8 sps:$4 sm:$0xff]   ;;  %v1117_v10 = vpack.c.bf16 %v4200_v61, %v4197_v60  ;;  %v3768_v60 = vld [vmem:[%s4836_s1 + $0x3a4] ss:$8 sps:$4 sm:$0xff]  }
  0x41   : > { %440 = vmatprep.subr.bf16.mxu1 %v3510_v11  ;;  %1708 = vmatprep.subr.bf16.mxu0 %v3513_v12  ;;  %v4229_v11 = vld [vmem:[%s3932_s19 + $0x42] sm:$0xff] }
  0x42   : > { %v2391_v12 = vpack.c.bf16 %v4229_v11, %v4203_v0 }
  0x44   : > { %441 = vmatpush1.bf16.msra.mxu1 %v3508_v13  ;;  %1709 = vmatpush1.bf16.msra.mxu0 %v3511_v14  ;;  %v3568_v13 = vld [vmem:[%s4836_s1 + $0x190] ss:$8 sps:$4 sm:$0xff]  }
  0x45   : > { %579 = vmatprep.subr.bf16.mxu1 %v3516_v17  ;;  %1853 = vmatprep.subr.bf16.mxu0 %v3519_v18  ;;  %v3571_v14 = vld [vmem:[%s4836_s1 + $0x590] ss:$8 sps:$4 sm:$0xff]   ;;  %v3579_v17 = vld [vmem:[%s4836_s1 + $0x5a4] ss:$8 sps:$4 sm:$0xff]   ;;  %v481_v18 = vpack.c.bf16 %v4200_v61, %v4200_v61 }
  0x46   : > { %v3771_v61 = vld [vmem:[%s4836_s1 + $0x7a4] ss:$8 sps:$4 sm:$0xff]  }
  0x47   : > { %459 = vmatmul.mubr.bf16.vlgmr.msra.gmra.mrb[0].mxu1 %v175_v19  ;;  %1727 = vmatmul.mubr.bf16.vlgmr.msra.gmra.mrb[0].mxu0 %v1595_v21  ;;  %v3574_v19 = vld [vmem:[%s4836_s1 + $0x1a0] ss:$8 sps:$4 sm:$0xff]  }
  0x48   : > { %580 = vmatpush1.bf16.msra.mxu1 %v3514_v20  ;;  %1854 = vmatpush1.bf16.msra.mxu0 %v3517_v22  ;;  %v1755_v20 = vpack.c.bf16 %v4229_v11, %v4229_v11  ;;  %v3577_v21 = vld [vmem:[%s4836_s1 + $0x5a0] ss:$8 sps:$4 sm:$0xff]   ;;  %v3582_v22 = vld [vmem:[%s4836_s1 + $0x1b4] ss:$8 sps:$4 sm:$0xff]  }
  0x49   : > { %581 = vmatprep.subr.bf16.mxu1 %v3522_v23  ;;  %1855 = vmatprep.subr.bf16.mxu0 %v3525_v24  ;;  %v3585_v23 = vld [vmem:[%s4836_s1 + $0x5b4] ss:$8 sps:$4 sm:$0xff]   ;;  %v3580_v24 = vld [vmem:[%s4836_s1 + $0x1b0] ss:$8 sps:$4 sm:$0xff]  }
  0x4a   : > { %468 = vmatprep.mubr.bf16.mxu1 %v3813_v2  ;;  %1736 = vmatprep.mubr.bf16.mxu0 %v3813_v2 }
  0x4c   : > { %582 = vmatpush1.bf16.msra.mxu1 %v3520_v27  ;;  %1856 = vmatpush1.bf16.msra.mxu0 %v3523_v28  ;;  %v3583_v27 = vld [vmem:[%s4836_s1 + $0x5b0] ss:$8 sps:$4 sm:$0xff]   ;;  %v3588_v28 = vld [vmem:[%s4836_s1 + $0x1c4] ss:$8 sps:$4 sm:$0xff]  }
  0x4d   : > { %583 = vmatprep.subr.bf16.mxu1 %v3528_v29  ;;  %1857 = vmatprep.subr.bf16.mxu0 %v3531_v30  ;;  %v3591_v29 = vld [vmem:[%s4836_s1 + $0x5c4] ss:$8 sps:$4 sm:$0xff]   ;;  %v3586_v30 = vld [vmem:[%s4836_s1 + $0x1c0] ss:$8 sps:$4 sm:$0xff]  }
  0x4f   : > { %469 = vmatmul.mubr.bf16.gmra.mrb[8].mxu1 %v176_v31  ;;  %1737 = vmatmul.mubr.bf16.gmra.mrb[8].mxu0 %v1596_v32  ;;  %v3589_v31 = vld [vmem:[%s4836_s1 + $0x5c0] ss:$8 sps:$4 sm:$0xff]   ;;  %v3594_v32 = vld [vmem:[%s4836_s1 + $0x1d4] ss:$8 sps:$4 sm:$0xff]  }
  0x50   : > { %584 = vmatpush1.bf16.msra.mxu1 %v3526_v33  ;;  %1858 = vmatpush1.bf16.msra.mxu0 %v3529_v34  ;;  %v3597_v33 = vld [vmem:[%s4836_s1 + $0x5d4] ss:$8 sps:$4 sm:$0xff]   ;;  %v3592_v34 = vld [vmem:[%s4836_s1 + $0x1d0] ss:$8 sps:$4 sm:$0xff]  }
  0x51   : > { %585 = vmatprep.subr.bf16.mxu1 %v3534_v35  ;;  %1859 = vmatprep.subr.bf16.mxu0 %v3537_v38  ;;  %v3595_v35 = vld [vmem:[%s4836_s1 + $0x5d0] ss:$8 sps:$4 sm:$0xff]   ;;  %v3600_v38 = vld [vmem:[%s4836_s1 + $0x1e4] ss:$8 sps:$4 sm:$0xff]  }
  0x52   : > { %611 = vmatprep.mubr.bf16.mxu1 %v3813_v2  ;;  %1885 = vmatprep.mubr.bf16.mxu0 %v3813_v2 }
  0x54   : > { %586 = vmatpush1.bf16.msra.mxu1 %v3532_v39  ;;  %1860 = vmatpush1.bf16.msra.mxu0 %v3535_v40  ;;  %v3603_v39 = vld [vmem:[%s4836_s1 + $0x5e4] ss:$8 sps:$4 sm:$0xff]   ;;  %v3598_v40 = vld [vmem:[%s4836_s1 + $0x1e0] ss:$8 sps:$4 sm:$0xff]  }
  0x55   : > { %587 = vmatprep.subr.bf16.mxu1 %v3540_v41  ;;  %1861 = vmatprep.subr.bf16.mxu0 %v3543_v42  ;;  %v3601_v41 = vld [vmem:[%s4836_s1 + $0x5e0] ss:$8 sps:$4 sm:$0xff]   ;;  %v3606_v42 = vld [vmem:[%s4836_s1 + $0x1f4] ss:$8 sps:$4 sm:$0xff]  }
  0x58   : > { %588 = vmatpush1.bf16.msra.mxu1 %v3538_v43  ;;  %1862 = vmatpush1.bf16.msra.mxu0 %v3541_v44  ;;  %v3609_v43 = vld [vmem:[%s4836_s1 + $0x5f4] ss:$8 sps:$4 sm:$0xff]   ;;  %v3604_v44 = vld [vmem:[%s4836_s1 + $0x1f0] ss:$8 sps:$4 sm:$0xff]  }
  0x59   : > { %589 = vmatprep.subr.bf16.mxu1 %v3546_v45  ;;  %1863 = vmatprep.subr.bf16.mxu0 %v3549_v46  ;;  %v3607_v45 = vld [vmem:[%s4836_s1 + $0x5f0] ss:$8 sps:$4 sm:$0xff]   ;;  %v636_v46 = vld [vmem:[%s3932_s19 + $0x3] sm:$0xff] }
  0x5c   : > { %590 = vmatpush1.bf16.msra.mxu1 %v3544_v47  ;;  %1864 = vmatpush1.bf16.msra.mxu0 %v3547_v48  ;;  %v4321_v47 = vld [vmem:[%s3932_s19 + $0x13] sm:$0xff]  ;;  %v3612_v48 = vld [vmem:[%s4836_s1 + $0x204] ss:$8 sps:$4 sm:$0xff]  }
  0x5d   : > { %591 = vmatprep.subr.bf16.mxu1 %v3552_v49  ;;  %1865 = vmatprep.subr.bf16.mxu0 %v3555_v50  ;;  %v4327_v49 = vld [vmem:[%s3932_s19 + $0x23] sm:$0xff]  ;;  %v4330_v50 = vld [vmem:[%s3932_s19 + $0x33] sm:$0xff] }
  0x60   : > { %592 = vmatpush1.bf16.msra.mxu1 %v3550_v51  ;;  %1866 = vmatpush1.bf16.msra.mxu0 %v3553_v52  ;;  %v3615_v51 = vld [vmem:[%s4836_s1 + $0x604] ss:$8 sps:$4 sm:$0xff]   ;;  %v3610_v52 = vld [vmem:[%s4836_s1 + $0x200] ss:$8 sps:$4 sm:$0xff]  }
  0x61   : > { %593 = vmatprep.subr.bf16.mxu1 %v3558_v53  ;;  %1867 = vmatprep.subr.bf16.mxu0 %v3561_v54  ;;  %v639_v53 = vpack.c.bf16 %v4321_v47, %v636_v46  ;;  %v3613_v54 = vld [vmem:[%s4836_s1 + $0x600] ss:$8 sps:$4 sm:$0xff]   ;;  %v3669_v46 = vld [vmem:[%s4836_s1 + $0x694] ss:$8 sps:$4 sm:$0xff]  }
  0x64   : > { %594 = vmatpush1.bf16.msra.mxu1 %v3556_v56  ;;  %1868 = vmatpush1.bf16.msra.mxu0 %v3559_v58  ;;  %v1913_v56 = vpack.c.bf16 %v4330_v50, %v4327_v49  ;;  %v3618_v58 = vld [vmem:[%s4836_s1 + $0x214] ss:$8 sps:$4 sm:$0xff]  }
  0x65   : > { %738 = vmatprep.subr.bf16.mxu1 %v3564_v1  ;;  %2012 = vmatprep.subr.bf16.mxu0 %v3567_v3  ;;  %v1276_v1 = vpack.c.bf16 %v4327_v49, %v4321_v47  ;;  %v3621_v3 = vld [vmem:[%s4836_s1 + $0x614] ss:$8 sps:$4 sm:$0xff]  }
  0x67   : > { %612 = vmatmul.mubr.bf16.vlgmr.msra.gmra.mrb[0].mxu1 %v480_v4  ;;  %1886 = vmatmul.mubr.bf16.vlgmr.msra.gmra.mrb[0].mxu0 %v1754_v7  ;;  %v2550_v4 = vpack.c.bf16 %v4348_v59, %v4330_v50  ;;  %v3624_v7 = vld [vmem:[%s4836_s1 + $0x224] ss:$8 sps:$4 sm:$0xff]  }
  0x68   : > { %739 = vmatpush1.bf16.msra.mxu1 %v3562_v5  ;;  %2013 = vmatpush1.bf16.msra.mxu0 %v3565_v6  ;;  %v3616_v5 = vld [vmem:[%s4836_s1 + $0x210] ss:$8 sps:$4 sm:$0xff]  }
  0x69   : > { %740 = vmatprep.subr.bf16.mxu1 %v3570_v8  ;;  %2014 = vmatprep.subr.bf16.mxu0 %v3573_v9  ;;  %v3619_v6 = vld [vmem:[%s4836_s1 + $0x610] ss:$8 sps:$4 sm:$0xff]   ;;  %v3627_v8 = vld [vmem:[%s4836_s1 + $0x624] ss:$8 sps:$4 sm:$0xff]   ;;  %v640_v9 = vpack.c.bf16 %v4327_v49, %v4327_v49 }
  0x6a   : > { %621 = vmatprep.mubr.bf16.mxu1 %v3813_v2  ;;  %1895 = vmatprep.mubr.bf16.mxu0 %v3813_v2 }
  0x6c   : > { %741 = vmatpush1.bf16.msra.mxu1 %v3568_v13  ;;  %2015 = vmatpush1.bf16.msra.mxu0 %v3571_v14  ;;  %v1914_v13 = vpack.c.bf16 %v4348_v59, %v4348_v59  ;;  %v3622_v14 = vld [vmem:[%s4836_s1 + $0x220] ss:$8 sps:$4 sm:$0xff]  }
  0x6d   : > { %742 = vmatprep.subr.bf16.mxu1 %v3576_v15  ;;  %2016 = vmatprep.subr.bf16.mxu0 %v3579_v17  ;;  %v3625_v15 = vld [vmem:[%s4836_s1 + $0x620] ss:$8 sps:$4 sm:$0xff]   ;;  %v3630_v17 = vld [vmem:[%s4836_s1 + $0x234] ss:$8 sps:$4 sm:$0xff]  }
  0x6f   : > { %622 = vmatmul.mubr.bf16.gmra.mrb[12].mxu1 %v481_v18  ;;  %1896 = vmatmul.mubr.bf16.gmra.mrb[12].mxu0 %v1755_v20  ;;  %v3633_v18 = vld [vmem:[%s4836_s1 + $0x634] ss:$8 sps:$4 sm:$0xff]   ;;  %v3631_v20 = vld [vmem:[%s4836_s1 + $0x630] ss:$8 sps:$4 sm:$0xff]  }
  0x70   : > { %743 = vmatpush1.bf16.msra.mxu1 %v3574_v19  ;;  %2017 = vmatpush1.bf16.msra.mxu0 %v3577_v21  ;;  %v3628_v19 = vld [vmem:[%s4836_s1 + $0x230] ss:$8 sps:$4 sm:$0xff]   ;;  %v3636_v21 = vld [vmem:[%s4836_s1 + $0x244] ss:$8 sps:$4 sm:$0xff]  }
  0x71   : > { %744 = vmatprep.subr.bf16.mxu1 %v3582_v22  ;;  %2018 = vmatprep.subr.bf16.mxu0 %v3585_v23  ;;  %v3639_v22 = vld [vmem:[%s4836_s1 + $0x644] ss:$8 sps:$4 sm:$0xff]   ;;  %v3634_v23 = vld [vmem:[%s4836_s1 + $0x240] ss:$8 sps:$4 sm:$0xff]  }
  0x72   : > { %770 = vmatprep.mubr.bf16.mxu1 %v3813_v2  ;;  %2044 = vmatprep.mubr.bf16.mxu0 %v3813_v2 }
  0x74   : > { %745 = vmatpush1.bf16.msra.mxu1 %v3580_v24  ;;  %2019 = vmatpush1.bf16.msra.mxu0 %v3583_v27  ;;  %v3637_v24 = vld [vmem:[%s4836_s1 + $0x640] ss:$8 sps:$4 sm:$0xff]   ;;  %v3642_v27 = vld [vmem:[%s4836_s1 + $0x254] ss:$8 sps:$4 sm:$0xff]  }
  0x75   : > { %746 = vmatprep.subr.bf16.mxu1 %v3588_v28  ;;  %2020 = vmatprep.subr.bf16.mxu0 %v3591_v29  ;;  %v3645_v28 = vld [vmem:[%s4836_s1 + $0x654] ss:$8 sps:$4 sm:$0xff]   ;;  %v3640_v29 = vld [vmem:[%s4836_s1 + $0x250] ss:$8 sps:$4 sm:$0xff]  }
  0x78   : > { %747 = vmatpush1.bf16.msra.mxu1 %v3586_v30  ;;  %2021 = vmatpush1.bf16.msra.mxu0 %v3589_v31  ;;  %v3643_v30 = vld [vmem:[%s4836_s1 + $0x650] ss:$8 sps:$4 sm:$0xff]   ;;  %v3648_v31 = vld [vmem:[%s4836_s1 + $0x264] ss:$8 sps:$4 sm:$0xff]  }
  0x79   : > { %748 = vmatprep.subr.bf16.mxu1 %v3594_v32  ;;  %2022 = vmatprep.subr.bf16.mxu0 %v3597_v33  ;;  %v3651_v32 = vld [vmem:[%s4836_s1 + $0x664] ss:$8 sps:$4 sm:$0xff]   ;;  %v3646_v33 = vld [vmem:[%s4836_s1 + $0x260] ss:$8 sps:$4 sm:$0xff]  }
  0x7c   : > { %749 = vmatpush1.bf16.msra.mxu1 %v3592_v34  ;;  %2023 = vmatpush1.bf16.msra.mxu0 %v3595_v35  ;;  %v3649_v34 = vld [vmem:[%s4836_s1 + $0x660] ss:$8 sps:$4 sm:$0xff]   ;;  %v3654_v35 = vld [vmem:[%s4836_s1 + $0x274] ss:$8 sps:$4 sm:$0xff]  }
  0x7d   : > { %750 = vmatprep.subr.bf16.mxu1 %v3600_v38  ;;  %2024 = vmatprep.subr.bf16.mxu0 %v3603_v39  ;;  %v3657_v38 = vld [vmem:[%s4836_s1 + $0x674] ss:$8 sps:$4 sm:$0xff]   ;;  %v3652_v39 = vld [vmem:[%s4836_s1 + $0x270] ss:$8 sps:$4 sm:$0xff]  }
  0x80   : > { %751 = vmatpush1.bf16.msra.mxu1 %v3598_v40  ;;  %2025 = vmatpush1.bf16.msra.mxu0 %v3601_v41  ;;  %v3655_v40 = vld [vmem:[%s4836_s1 + $0x670] ss:$8 sps:$4 sm:$0xff]   ;;  %v3660_v41 = vld [vmem:[%s4836_s1 + $0x284] ss:$8 sps:$4 sm:$0xff]  }
  0x81   : > { %752 = vmatprep.subr.bf16.mxu1 %v3606_v42  ;;  %2026 = vmatprep.subr.bf16.mxu0 %v3609_v43  ;;  %v3663_v42 = vld [vmem:[%s4836_s1 + $0x684] ss:$8 sps:$4 sm:$0xff]   ;;  %v3658_v43 = vld [vmem:[%s4836_s1 + $0x280] ss:$8 sps:$4 sm:$0xff]  }
  0x84   : > { %753 = vmatpush1.bf16.msra.mxu1 %v3604_v44  ;;  %2027 = vmatpush1.bf16.msra.mxu0 %v3607_v45  ;;  %v3661_v44 = vld [vmem:[%s4836_s1 + $0x680] ss:$8 sps:$4 sm:$0xff]   ;;  %v3666_v45 = vld [vmem:[%s4836_s1 + $0x294] ss:$8 sps:$4 sm:$0xff]  }
  0x85   : > { %898 = vmatprep.subr.bf16.mxu1 %v3612_v48  ;;  %2172 = vmatprep.subr.bf16.mxu0 %v3615_v51  ;;  %v3664_v48 = vld [vmem:[%s4836_s1 + $0x290] ss:$8 sps:$4 sm:$0xff]  }
  0x86   : > { %v3667_v51 = vld [vmem:[%s4836_s1 + $0x690] ss:$8 sps:$4 sm:$0xff]  }
  0x87   : > { %771 = vmatmul.mubr.bf16.vlgmr.msra.gmra.mrb[0].mxu1 %v639_v53  ;;  %2045 = vmatmul.mubr.bf16.vlgmr.msra.gmra.mrb[0].mxu0 %v1913_v56  ;;  %v3673_v53 = vld [vmem:[%s4836_s1 + $0x6a0] ss:$8 sps:$4 sm:$0xff]   ;;  %v3681_v56 = vld [vmem:[%s4836_s1 + $0x6b4] ss:$8 sps:$4 sm:$0xff]  }
  0x88   : > { %899 = vmatpush1.bf16.msra.mxu1 %v3610_v52  ;;  %2173 = vmatpush1.bf16.msra.mxu0 %v3613_v54  ;;  %v3672_v52 = vld [vmem:[%s4836_s1 + $0x2a4] ss:$8 sps:$4 sm:$0xff]   ;;  %v3678_v54 = vld [vmem:[%s4836_s1 + $0x2b4] ss:$8 sps:$4 sm:$0xff]  }
  0x89   : > { %900 = vmatprep.subr.bf16.mxu1 %v3618_v58  ;;  %2174 = vmatprep.subr.bf16.mxu0 %v3621_v3  ;;  %v3676_v58 = vld [vmem:[%s4836_s1 + $0x2b0] ss:$8 sps:$4 sm:$0xff]  }
  0x8a   : > { %780 = vmatprep.mubr.bf16.mxu1 %v3813_v2  ;;  %2054 = vmatprep.mubr.bf16.mxu0 %v3813_v2  ;;  %v3679_v3 = vld [vmem:[%s4836_s1 + $0x6b0] ss:$8 sps:$4 sm:$0xff]  }
  0x8c   : > { %901 = vmatpush1.bf16.msra.mxu1 %v3616_v5  ;;  %2175 = vmatpush1.bf16.msra.mxu0 %v3619_v6  ;;  %v3684_v5 = vld [vmem:[%s4836_s1 + $0x2c4] ss:$8 sps:$4 sm:$0xff]  }
  0x8d   : > { %902 = vmatprep.subr.bf16.mxu1 %v3624_v7  ;;  %2176 = vmatprep.subr.bf16.mxu0 %v3627_v8  ;;  %v3687_v6 = vld [vmem:[%s4836_s1 + $0x6c4] ss:$8 sps:$4 sm:$0xff]   ;;  %v3682_v7 = vld [vmem:[%s4836_s1 + $0x2c0] ss:$8 sps:$4 sm:$0xff]  }
  0x8e   : > { %v3685_v8 = vld [vmem:[%s4836_s1 + $0x6c0] ss:$8 sps:$4 sm:$0xff]  }
  0x8f   : > { %781 = vmatmul.mubr.bf16.gmra.mrb[16].mxu1 %v640_v9  ;;  %2055 = vmatmul.mubr.bf16.gmra.mrb[16].mxu0 %v1914_v13  ;;  %v3690_v9 = vld [vmem:[%s4836_s1 + $0x2d4] ss:$8 sps:$4 sm:$0xff]  }
  0x90   : > { %903 = vmatpush1.bf16.msra.mxu1 %v3622_v14  ;;  %2177 = vmatpush1.bf16.msra.mxu0 %v3625_v15  ;;  %v3693_v13 = vld [vmem:[%s4836_s1 + $0x6d4] ss:$8 sps:$4 sm:$0xff]   ;;  %v3688_v14 = vld [vmem:[%s4836_s1 + $0x2d0] ss:$8 sps:$4 sm:$0xff]  }
  0x91   : > { %904 = vmatprep.subr.bf16.mxu1 %v3630_v17  ;;  %2178 = vmatprep.subr.bf16.mxu0 %v3633_v18  ;;  %v3691_v15 = vld [vmem:[%s4836_s1 + $0x6d0] ss:$8 sps:$4 sm:$0xff]   ;;  %v3696_v17 = vld [vmem:[%s4836_s1 + $0x2e4] ss:$8 sps:$4 sm:$0xff]  }
  0x92   : > { %930 = vmatprep.mubr.bf16.mxu1 %v3813_v2  ;;  %2204 = vmatprep.mubr.bf16.mxu0 %v3813_v2  ;;  %v3699_v18 = vld [vmem:[%s4836_s1 + $0x6e4] ss:$8 sps:$4 sm:$0xff]  }
  0x94   : > { %905 = vmatpush1.bf16.msra.mxu1 %v3628_v19  ;;  %2179 = vmatpush1.bf16.msra.mxu0 %v3631_v20  ;;  %v3694_v19 = vld [vmem:[%s4836_s1 + $0x2e0] ss:$8 sps:$4 sm:$0xff]  }
  0x95   : > { %906 = vmatprep.subr.bf16.mxu1 %v3636_v21  ;;  %2180 = vmatprep.subr.bf16.mxu0 %v3639_v22  ;;  %v3697_v20 = vld [vmem:[%s4836_s1 + $0x6e0] ss:$8 sps:$4 sm:$0xff]   ;;  %v3702_v21 = vld [vmem:[%s4836_s1 + $0x2f4] ss:$8 sps:$4 sm:$0xff]  }
  0x96   : > { %v3705_v22 = vld [vmem:[%s4836_s1 + $0x6f4] ss:$8 sps:$4 sm:$0xff]  }
  0x98   : > { %907 = vmatpush1.bf16.msra.mxu1 %v3634_v23  ;;  %2181 = vmatpush1.bf16.msra.mxu0 %v3637_v24  ;;  %v3700_v23 = vld [vmem:[%s4836_s1 + $0x2f0] ss:$8 sps:$4 sm:$0xff]  }
  0x99   : > { %908 = vmatprep.subr.bf16.mxu1 %v3642_v27  ;;  %2182 = vmatprep.subr.bf16.mxu0 %v3645_v28  ;;  %v3703_v24 = vld [vmem:[%s4836_s1 + $0x6f0] ss:$8 sps:$4 sm:$0xff]   ;;  %v3708_v28 = vld [vmem:[%s4836_s1 + $0x304] ss:$8 sps:$4 sm:$0xff]  }
  0x9a   : > { %v2960_v27 = vld [vmem:[%s3932_s19 + $0x11] sm:$0xff] }
  0x9c   : > { %909 = vmatpush1.bf16.msra.mxu1 %v3640_v29  ;;  %2183 = vmatpush1.bf16.msra.mxu0 %v3643_v30  ;;  %v3711_v29 = vld [vmem:[%s4836_s1 + $0x704] ss:$8 sps:$4 sm:$0xff]  }
  0x9d   : > { %910 = vmatprep.subr.bf16.mxu1 %v3648_v31  ;;  %2184 = vmatprep.subr.bf16.mxu0 %v3651_v32  ;;  %v3803_v30 = vld [vmem:[%s3932_s19 + $0x21] sm:$0xff] }
  0x9e   : > { %v958_v31 = vpack.c.bf16 %v3803_v30, %v2960_v27  ;;  %v3706_v32 = vld [vmem:[%s4836_s1 + $0x300] ss:$8 sps:$4 sm:$0xff]   ;;  %v3775_v27 = vld [vmem:[%s4836_s1 + $0x7b0] ss:$8 sps:$4 sm:$0xff]  }
  0x9f   : > { %v3778_v30 = vld [vmem:[%s4836_s1 + $0x3c0] ss:$8 sps:$4 sm:$0xff]  }
  0xa0   : > { %911 = vmatpush1.bf16.msra.mxu1 %v3646_v33  ;;  %2185 = vmatpush1.bf16.msra.mxu0 %v3649_v34  ;;  %v3709_v33 = vld [vmem:[%s4836_s1 + $0x700] ss:$8 sps:$4 sm:$0xff]   ;;  %v3714_v34 = vld [vmem:[%s4836_s1 + $0x314] ss:$8 sps:$4 sm:$0xff]  }
  0xa1   : > { %912 = vmatprep.subr.bf16.mxu1 %v3654_v35  ;;  %2186 = vmatprep.subr.bf16.mxu0 %v3657_v38  ;;  %v3717_v35 = vld [vmem:[%s4836_s1 + $0x714] ss:$8 sps:$4 sm:$0xff]   ;;  %v3712_v38 = vld [vmem:[%s4836_s1 + $0x310] ss:$8 sps:$4 sm:$0xff]  }
  0xa4   : > { %913 = vmatpush1.bf16.msra.mxu1 %v3652_v39  ;;  %2187 = vmatpush1.bf16.msra.mxu0 %v3655_v40  ;;  %v3715_v39 = vld [vmem:[%s4836_s1 + $0x710] ss:$8 sps:$4 sm:$0xff]  }
  0xa5   : > { %1057 = vmatprep.subr.bf16.mxu1 %v3660_v41  ;;  %2331 = vmatprep.subr.bf16.mxu0 %v3663_v42  ;;  %v3242_v40 = vld [vmem:[%s3932_s19 + $0x51] sm:$0xff]  ;;  %v3720_v41 = vld [vmem:[%s4836_s1 + $0x324] ss:$8 sps:$4 sm:$0xff]  }
  0xa6   : > { %v2233_v42 = vpack.c.bf16 %v3242_v40, %v3242_v40  ;;  %v3790_v40 = vld [vmem:[%s4836_s1 + $0x3e0] ss:$8 sps:$4 sm:$0xff]  }
  0xa7   : > { %931 = vmatmul.mubr.bf16.vlgmr.msra.gmra.mrb[0].mxu1 %v799_v63  ;;  %2205 = vmatmul.mubr.bf16.vlgmr.msra.gmra.mrb[0].mxu0 %v2073_v57  ;;  %v800_v57 = vpack.c.bf16 %v3802_v55, %v3802_v55  ;;  %v2074_v63 = vpack.c.bf16 %v3207_v36, %v3207_v36  ;;  %v3735_v36 = vld [vmem:[%s4836_s1 + $0x744] ss:$8 sps:$4 sm:$0xff]   ;;  %v3733_v55 = vld [vmem:[%s4836_s1 + $0x740] ss:$8 sps:$4 sm:$0xff]  }
  0xa8   : > { %1058 = vmatpush1.bf16.msra.mxu1 %v3658_v43  ;;  %2332 = vmatpush1.bf16.msra.mxu0 %v3661_v44  ;;  %v3718_v43 = vld [vmem:[%s4836_s1 + $0x320] ss:$8 sps:$4 sm:$0xff]  }
  0xa9   : > { %1059 = vmatprep.subr.bf16.mxu1 %v3666_v45  ;;  %2333 = vmatprep.subr.bf16.mxu0 %v3669_v46  ;;  %v3721_v44 = vld [vmem:[%s4836_s1 + $0x720] ss:$8 sps:$4 sm:$0xff]   ;;  %v3726_v45 = vld [vmem:[%s4836_s1 + $0x334] ss:$8 sps:$4 sm:$0xff]  }
  0xaa   : > { %940 = vmatprep.mubr.bf16.mxu1 %v3813_v2  ;;  %2214 = vmatprep.mubr.bf16.mxu0 %v3813_v2  ;;  %v3729_v46 = vld [vmem:[%s4836_s1 + $0x734] ss:$8 sps:$4 sm:$0xff]  }
  0xac   : > { %1060 = vmatpush1.bf16.msra.mxu1 %v3664_v48  ;;  %2334 = vmatpush1.bf16.msra.mxu0 %v3667_v51  ;;  %v3724_v48 = vld [vmem:[%s4836_s1 + $0x330] ss:$8 sps:$4 sm:$0xff]  }
  0xad   : > { %1061 = vmatprep.subr.bf16.mxu1 %v3672_v52  ;;  %2335 = vmatprep.subr.bf16.mxu0 %v3675_v37  ;;  %v3727_v51 = vld [vmem:[%s4836_s1 + $0x730] ss:$8 sps:$4 sm:$0xff]   ;;  %v3732_v52 = vld [vmem:[%s4836_s1 + $0x344] ss:$8 sps:$4 sm:$0xff]   ;;  %v3730_v37 = vld [vmem:[%s4836_s1 + $0x340] ss:$8 sps:$4 sm:$0xff]  }
  0xaf   : > { %941 = vmatmul.mubr.bf16.gmra.mrb[20].mxu1 %v800_v57  ;;  %2215 = vmatmul.mubr.bf16.gmra.mrb[20].mxu0 %v2074_v63  ;;  %v3738_v57 = vld [vmem:[%s4836_s1 + $0x354] ss:$8 sps:$4 sm:$0xff]   ;;  %v3736_v63 = vld [vmem:[%s4836_s1 + $0x350] ss:$8 sps:$4 sm:$0xff]  }
  0xb0   : > { %1062 = vmatpush1.bf16.msra.mxu1 %v3670_v62  ;;  %2336 = vmatpush1.bf16.msra.mxu0 %v3673_v53  ;;  %v3741_v62 = vld [vmem:[%s4836_s1 + $0x754] ss:$8 sps:$4 sm:$0xff]   ;;  %v3739_v53 = vld [vmem:[%s4836_s1 + $0x750] ss:$8 sps:$4 sm:$0xff]  }
  0xb1   : > { %1063 = vmatprep.subr.bf16.mxu1 %v3678_v54  ;;  %2337 = vmatprep.subr.bf16.mxu0 %v3681_v56  ;;  %v3744_v54 = vld [vmem:[%s4836_s1 + $0x364] ss:$8 sps:$4 sm:$0xff]  }
  0xb2   : > { %1089 = vmatprep.mubr.bf16.mxu1 %v3813_v2  ;;  %2363 = vmatprep.mubr.bf16.mxu0 %v3813_v2  ;;  %v3747_v56 = vld [vmem:[%s4836_s1 + $0x764] ss:$8 sps:$4 sm:$0xff]  }
  0xb4   : > { %1064 = vmatpush1.bf16.msra.mxu1 %v3676_v58  ;;  %2338 = vmatpush1.bf16.msra.mxu0 %v3679_v3  ;;  %v3742_v58 = vld [vmem:[%s4836_s1 + $0x360] ss:$8 sps:$4 sm:$0xff]  }
  0xb5   : > { %1065 = vmatprep.subr.bf16.mxu1 %v3684_v5  ;;  %2339 = vmatprep.subr.bf16.mxu0 %v3687_v6  ;;  %v3745_v3 = vld [vmem:[%s4836_s1 + $0x760] ss:$8 sps:$4 sm:$0xff]   ;;  %v3750_v5 = vld [vmem:[%s4836_s1 + $0x374] ss:$8 sps:$4 sm:$0xff]  }
  0xb6   : > { %v3753_v6 = vld [vmem:[%s4836_s1 + $0x774] ss:$8 sps:$4 sm:$0xff]  }
  0xb8   : > { %1066 = vmatpush1.bf16.msra.mxu1 %v3682_v7  ;;  %2340 = vmatpush1.bf16.msra.mxu0 %v3685_v8  ;;  %v3748_v7 = vld [vmem:[%s4836_s1 + $0x370] ss:$8 sps:$4 sm:$0xff]  }
  0xb9   : > { %1067 = vmatprep.subr.bf16.mxu1 %v3690_v9  ;;  %2341 = vmatprep.subr.bf16.mxu0 %v3693_v13  ;;  %v3751_v8 = vld [vmem:[%s4836_s1 + $0x770] ss:$8 sps:$4 sm:$0xff]   ;;  %v3756_v9 = vld [vmem:[%s4836_s1 + $0x384] ss:$8 sps:$4 sm:$0xff]  }
  0xba   : > { %v3759_v13 = vld [vmem:[%s4836_s1 + $0x784] ss:$8 sps:$4 sm:$0xff]  }
  0xbc   : > { %1068 = vmatpush1.bf16.msra.mxu1 %v3688_v14  ;;  %2342 = vmatpush1.bf16.msra.mxu0 %v3691_v15  ;;  %v3754_v14 = vld [vmem:[%s4836_s1 + $0x380] ss:$8 sps:$4 sm:$0xff]  }
  0xbd   : > { %1069 = vmatprep.subr.bf16.mxu1 %v3696_v17  ;;  %2343 = vmatprep.subr.bf16.mxu0 %v3699_v18  ;;  %v3757_v15 = vld [vmem:[%s4836_s1 + $0x780] ss:$8 sps:$4 sm:$0xff]   ;;  %v3762_v17 = vld [vmem:[%s4836_s1 + $0x394] ss:$8 sps:$4 sm:$0xff]  }
  0xbe   : > { %v3765_v18 = vld [vmem:[%s4836_s1 + $0x794] ss:$8 sps:$4 sm:$0xff]  }
  0xc0   : > { %1070 = vmatpush1.bf16.msra.mxu1 %v3694_v19  ;;  %2344 = vmatpush1.bf16.msra.mxu0 %v3697_v20  ;;  %v3760_v19 = vld [vmem:[%s4836_s1 + $0x390] ss:$8 sps:$4 sm:$0xff]  }
  0xc1   : > { %1071 = vmatprep.subr.bf16.mxu1 %v3702_v21  ;;  %2345 = vmatprep.subr.bf16.mxu0 %v3705_v22  ;;  %v3763_v20 = vld [vmem:[%s4836_s1 + $0x790] ss:$8 sps:$4 sm:$0xff]   ;;  %v3769_v22 = vld [vmem:[%s4836_s1 + $0x7a0] ss:$8 sps:$4 sm:$0xff]  }
  0xc2   : > { %v3277_v21 = vld [vmem:[%s3932_s19 + $0x52] sm:$0xff] }
  0xc3   : > { %v2392_v11 = vpack.c.bf16 %v3277_v21, %v3277_v21 }
  0xc4   : > { %1072 = vmatpush1.bf16.msra.mxu1 %v3700_v23  ;;  %2346 = vmatpush1.bf16.msra.mxu0 %v3703_v24  ;;  %v3774_v23 = vld [vmem:[%s4836_s1 + $0x3b4] ss:$8 sps:$4 sm:$0xff]   ;;  %v3772_v24 = vld [vmem:[%s4836_s1 + $0x3b0] ss:$8 sps:$4 sm:$0xff]  }
  0xc5   : > { %1216 = vmatprep.subr.bf16.mxu1 %v3708_v28  ;;  %2490 = vmatprep.subr.bf16.mxu0 %v3711_v29  ;;  %v3780_v28 = vld [vmem:[%s4836_s1 + $0x3c4] ss:$8 sps:$4 sm:$0xff]  }
  0xc6   : > { %v3783_v29 = vld [vmem:[%s4836_s1 + $0x7c4] ss:$8 sps:$4 sm:$0xff]  }
  0xc7   : > { %1090 = vmatmul.mubr.bf16.vlgmr.msra.gmra.mrb[0].mxu1 %v958_v31  ;;  %2364 = vmatmul.mubr.bf16.vlgmr.msra.gmra.mrb[0].mxu0 %v2232_v26  ;;  %v959_v26 = vpack.c.bf16 %v3804_v25, %v3804_v25  ;;  %v3781_v31 = vld [vmem:[%s4836_s1 + $0x7c0] ss:$8 sps:$4 sm:$0xff]   ;;  %v3801_v25 = vld [vmem:[%s4836_s1 + $0x7f4] ss:$8 sps:$4 sm:$0xff]  }
  0xc8   : > { %1217 = vmatpush1.bf16.msra.mxu1 %v3706_v32  ;;  %2491 = vmatpush1.bf16.msra.mxu0 %v3709_v33  ;;  %v3786_v32 = vld [vmem:[%s4836_s1 + $0x3d4] ss:$8 sps:$4 sm:$0xff]  }
  0xc9   : > { %1218 = vmatprep.subr.bf16.mxu1 %v3714_v34  ;;  %2492 = vmatprep.subr.bf16.mxu0 %v3717_v35  ;;  %v3789_v33 = vld [vmem:[%s4836_s1 + $0x7d4] ss:$8 sps:$4 sm:$0xff]   ;;  %v3784_v34 = vld [vmem:[%s4836_s1 + $0x3d0] ss:$8 sps:$4 sm:$0xff]  }
  0xca   : > { %1099 = vmatprep.mubr.bf16.mxu1 %v3813_v2  ;;  %2373 = vmatprep.mubr.bf16.mxu0 %v3813_v2  ;;  %v3787_v35 = vld [vmem:[%s4836_s1 + $0x7d0] ss:$8 sps:$4 sm:$0xff]  }
  0xcc   : > { %1219 = vmatpush1.bf16.msra.mxu1 %v3712_v38  ;;  %2493 = vmatpush1.bf16.msra.mxu0 %v3715_v39  ;;  %v3792_v38 = vld [vmem:[%s4836_s1 + $0x3e4] ss:$8 sps:$4 sm:$0xff]  }
  0xcd   : > { %1220 = vmatprep.subr.bf16.mxu1 %v3720_v41  ;;  %2494 = vmatprep.subr.bf16.mxu0 %v3723_v16  ;;  %v3795_v39 = vld [vmem:[%s4836_s1 + $0x7e4] ss:$8 sps:$4 sm:$0xff]   ;;  %v3793_v41 = vld [vmem:[%s4836_s1 + $0x7e0] ss:$8 sps:$4 sm:$0xff]   ;;  %v3798_v16 = vld [vmem:[%s4836_s1 + $0x3f4] ss:$8 sps:$4 sm:$0xff]  }
  0xcf   : > { %1100 = vmatmul.mubr.bf16.gmra.mrb[24].mxu1 %v959_v26  ;;  %2374 = vmatmul.mubr.bf16.gmra.mrb[24].mxu0 %v2233_v42  ;;  %v3796_v26 = vld [vmem:[%s4836_s1 + $0x3f0] ss:$8 sps:$4 sm:$0xff]  }
  0xd0   : > { %1221 = vmatpush1.bf16.msra.mxu1 %v3718_v43  ;;  %2495 = vmatpush1.bf16.msra.mxu0 %v3721_v44  ;;  %v3799_v42 = vld [vmem:[%s4836_s1 + $0x7f0] ss:$8 sps:$4 sm:$0xff]  }
  0xd1   : > { %1222 = vmatprep.subr.bf16.mxu1 %v3726_v45  ;;  %2496 = vmatprep.subr.bf16.mxu0 %v3729_v46 }
  0xd2   : > { %1248 = vmatprep.mubr.bf16.mxu1 %v3813_v2  ;;  %2522 = vmatprep.mubr.bf16.mxu0 %v3813_v2 }
  0xd4   : > { %1223 = vmatpush1.bf16.msra.mxu1 %v3724_v48  ;;  %2497 = vmatpush1.bf16.msra.mxu0 %v3727_v51 }
  0xd5   : > { %1224 = vmatprep.subr.bf16.mxu1 %v3732_v52  ;;  %2498 = vmatprep.subr.bf16.mxu0 %v3735_v36  ;;  %v3312_v36 = vld [vmem:[%s3932_s19 + $0x53] sm:$0xff] }
  0xd8   : > { %1225 = vmatpush1.bf16.msra.mxu1 %v3730_v37  ;;  %2499 = vmatpush1.bf16.msra.mxu0 %v3733_v55  ;;  %v1277_v55 = vpack.c.bf16 %v4330_v50, %v4330_v50 }
  0xd9   : > { %1226 = vmatprep.subr.bf16.mxu1 %v3738_v57  ;;  %2500 = vmatprep.subr.bf16.mxu0 %v3741_v62  ;;  %v2551_v57 = vpack.c.bf16 %v3312_v36, %v3312_v36 }
  0xdc   : > { %1227 = vmatpush1.bf16.msra.mxu1 %v3736_v63  ;;  %2501 = vmatpush1.bf16.msra.mxu0 %v3739_v53 }
  0xdd   : > { %1228 = vmatprep.subr.bf16.mxu1 %v3744_v54  ;;  %2502 = vmatprep.subr.bf16.mxu0 %v3747_v56 }
  0xe0   : > { %1229 = vmatpush1.bf16.msra.mxu1 %v3742_v58  ;;  %2503 = vmatpush1.bf16.msra.mxu0 %v3745_v3 }
  0xe1   : > { %1230 = vmatprep.subr.bf16.mxu1 %v3750_v5  ;;  %2504 = vmatprep.subr.bf16.mxu0 %v3753_v6 }
  0xe4   : > { %1231 = vmatpush1.bf16.msra.mxu1 %v3748_v7  ;;  %2505 = vmatpush1.bf16.msra.mxu0 %v3751_v8 }
  0xe5   : > { %1375 = vmatprep.subr.bf16.mxu1 %v3756_v9  ;;  %2649 = vmatprep.subr.bf16.mxu0 %v3759_v13 }
  0xe7   : > { %1249 = vmatmul.mubr.bf16.vlgmr.msra.gmra.mrb[0].mxu1 %v1117_v10  ;;  %2523 = vmatmul.mubr.bf16.vlgmr.msra.gmra.mrb[0].mxu0 %v2391_v12  ;;  %v1118_v10 = vpack.c.bf16 %v4203_v0, %v4203_v0  ;;  %v3766_v12 = vld [vmem:[%s4836_s1 + $0x3a0] ss:$8 sps:$4 sm:$0xff]   ;;  %v3777_v0 = vld [vmem:[%s4836_s1 + $0x7b4] ss:$8 sps:$4 sm:$0xff]  }
  0xe8   : > { %1376 = vmatpush1.bf16.msra.mxu1 %v3754_v14  ;;  %2650 = vmatpush1.bf16.msra.mxu0 %v3757_v15 }
  0xe9   : > { %1377 = vmatprep.subr.bf16.mxu1 %v3762_v17  ;;  %2651 = vmatprep.subr.bf16.mxu0 %v3765_v18 }
  0xea   : > { %1258 = vmatprep.mubr.bf16.mxu1 %v3813_v2  ;;  %2532 = vmatprep.mubr.bf16.mxu0 %v3813_v2 }
  0xec   : > { %1378 = vmatpush1.bf16.msra.mxu1 %v3760_v19  ;;  %2652 = vmatpush1.bf16.msra.mxu0 %v3763_v20 }
  0xed   : > { %1379 = vmatprep.subr.bf16.mxu1 %v3768_v60  ;;  %2653 = vmatprep.subr.bf16.mxu0 %v3771_v61 }
  0xef   : > { %1259 = vmatmul.mubr.bf16.gmra.mrb[28].mxu1 %v1118_v10  ;;  %2533 = vmatmul.mubr.bf16.gmra.mrb[28].mxu0 %v2392_v11 }
  0xf0   : > { %1380 = vmatpush1.bf16.msra.mxu1 %v3766_v12  ;;  %2654 = vmatpush1.bf16.msra.mxu0 %v3769_v22 }
  0xf1   : > { %1381 = vmatprep.subr.bf16.mxu1 %v3774_v23  ;;  %2655 = vmatprep.subr.bf16.mxu0 %v3777_v0 }
  0xf2   : > { %1407 = vmatprep.mubr.bf16.mxu1 %v3813_v2  ;;  %2681 = vmatprep.mubr.bf16.mxu0 %v3813_v2 }
  0xf4   : > { %1382 = vmatpush1.bf16.msra.mxu1 %v3772_v24  ;;  %2656 = vmatpush1.bf16.msra.mxu0 %v3775_v27 }
  0xf5   : > { %1383 = vmatprep.subr.bf16.mxu1 %v3780_v28  ;;  %2657 = vmatprep.subr.bf16.mxu0 %v3783_v29 }
  0xf8   : > { %1384 = vmatpush1.bf16.msra.mxu1 %v3778_v30  ;;  %2658 = vmatpush1.bf16.msra.mxu0 %v3781_v31 }
  0xf9   : > { %1385 = vmatprep.subr.bf16.mxu1 %v3786_v32  ;;  %2659 = vmatprep.subr.bf16.mxu0 %v3789_v33 }
  0xfc   : > { %1386 = vmatpush1.bf16.msra.mxu1 %v3784_v34  ;;  %2660 = vmatpush1.bf16.msra.mxu0 %v3787_v35 }
  0xfd   : > { %1387 = vmatprep.subr.bf16.mxu1 %v3792_v38  ;;  %2661 = vmatprep.subr.bf16.mxu0 %v3795_v39 }
 0x100   : > { %1388 = vmatpush1.bf16.msra.mxu1 %v3790_v40  ;;  %2662 = vmatpush1.bf16.msra.mxu0 %v3793_v41 }
 0x101   : > { %1389 = vmatprep.subr.bf16.mxu1 %v3798_v16  ;;  %2663 = vmatprep.subr.bf16.mxu0 %v3801_v25 }
 0x102   : > { %v339_v43 = vpop.f32.mrb[4].mxu1  ;;  %v4767_v48 = vpop.f32.mrb[4].mxu0 }
 0x103   : > { %v341_v44 = vpop.f32.mrb[5].mxu1  ;;  %v4769_v51 = vpop.f32.mrb[5].mxu0 }
 0x104   : > { %1390 = vmatpush1.bf16.msra.mxu1 %v3796_v26  ;;  %2664 = vmatpush1.bf16.msra.mxu0 %v3799_v42  ;;  %v343_v45 = vpop.f32.mrb[6].mxu1  ;;  %v1583_v52 = vpop.f32.mrb[6].mxu0 }
 0x105   : > { %v344_v46 = vpop.f32.mrb[7].mxu1  ;;  %v1584_v37 = vpop.f32.mrb[7].mxu0 }
 0x107   : > { %1408 = vmatmul.mubr.bf16.vlgmr.msra.gmra.mrb[0].mxu1 %v1276_v1  ;;  %2682 = vmatmul.mubr.bf16.vlgmr.msra.gmra.mrb[0].mxu0 %v2550_v4 }
 0x108   : > { %1417 = vmatprep.mubr.bf16.mxu1 %v3813_v2  ;;  %2691 = vmatprep.mubr.bf16.mxu0 %v3813_v2 }
 0x10f   : > { %1418 = vmatmul.mubr.bf16.gmra.mrb[32].mxu1 %v1277_v55  ;;  %2692 = vmatmul.mubr.bf16.gmra.mrb[32].mxu0 %v2551_v57  ;;  %v2708_v55 = vlaneseq }
 0x111   : > { %v2709_v57 = vshrl.u32 %v2708_v55, 7 }
 0x122   : > { %v470_v62 = vpop.f32.mrb[8].mxu1  ;;  %v4782_v47 = vpop.f32.mrb[8].mxu0 }
 0x123   : > { %v471_v49 = vadd.f32 %v470_v62, %v339_v43  ;;  %v472_v1 = vpop.f32.mrb[9].mxu1  ;;  %v4784_v59 = vpop.f32.mrb[9].mxu0  ;;  %v2710_v62 = vsub.s32 0, %v2709_v57 }
 0x124   : > { %v473_v4 = vadd.f32 %v472_v1, %v341_v44  ;;  %v474_v63 = vpop.f32.mrb[10].mxu1  ;;  %v1742_v53 = vpop.f32.mrb[10].mxu0  ;;  %v2714_v1 = vsub.s32 1, %v2709_v57 }
 0x125   : > { %v475_v54 = vpop.f32.mrb[11].mxu1  ;;  %v1743_v2 = vpop.f32.mrb[11].mxu0 }
 0x142   : > { %v623_v56 = vpop.f32.mrb[12].mxu1  ;;  %v4786_v58 = vpop.f32.mrb[12].mxu0 }
 0x143   : > { %v634_v3 = vadd.f32 %v623_v56, %v471_v49  ;;  %v625_v50 = vpop.f32.mrb[13].mxu1  ;;  %v4788_v5 = vpop.f32.mrb[13].mxu0  ;;  %v2706_v49 = vld [vmem:[%s4837_s2] sm:$0x3] }
 0x144   : > { %v635_v6 = vadd.f32 %v625_v50, %v473_v4  ;;  %v627_v7 = vpop.f32.mrb[14].mxu1  ;;  %v1901_v8 = vpop.f32.mrb[14].mxu0  ;;  %v2711_v4 = vrot.slane %v2706_v49, %v2710_v62  ;;  %v2715_v54 = vrot.slane %v2706_v49, %v2714_v1 }
 0x145   : > { %v628_v9 = vpop.f32.mrb[15].mxu1  ;;  %v1902_v13 = vpop.f32.mrb[15].mxu0 }
 0x162   : > { %v782_v14 = vpop.f32.mrb[16].mxu1  ;;  %v4790_v15 = vpop.f32.mrb[16].mxu0 }
 0x163   : > { %v793_v17 = vadd.f32 %v782_v14, %v634_v3  ;;  %v784_v18 = vpop.f32.mrb[17].mxu1  ;;  %v4792_v19 = vpop.f32.mrb[17].mxu0 }
 0x164   : > { %v794_v20 = vadd.f32 %v784_v18, %v635_v6  ;;  %v786_v21 = vpop.f32.mrb[18].mxu1  ;;  %v2060_v60 = vpop.f32.mrb[18].mxu0 }
 0x165   : > { %v787_v61 = vpop.f32.mrb[19].mxu1  ;;  %v2061_v10 = vpop.f32.mrb[19].mxu0 }
 0x182   : > { %v942_v11 = vpop.f32.mrb[20].mxu1  ;;  %v4794_v12 = vpop.f32.mrb[20].mxu0 }
 0x183   : > { %v953_v22 = vadd.f32 %v942_v11, %v793_v17  ;;  %v944_v23 = vpop.f32.mrb[21].mxu1  ;;  %v4796_v0 = vpop.f32.mrb[21].mxu0 }
 0x184   : > { %v954_v24 = vadd.f32 %v944_v23, %v794_v20  ;;  %v946_v27 = vpop.f32.mrb[22].mxu1  ;;  %v2220_v28 = vpop.f32.mrb[22].mxu0 }
 0x185   : > { %v947_v29 = vpop.f32.mrb[23].mxu1  ;;  %v2221_v30 = vpop.f32.mrb[23].mxu0 }
 0x1a2   : > { %v1101_v31 = vpop.f32.mrb[24].mxu1  ;;  %v4798_v32 = vpop.f32.mrb[24].mxu0 }
 0x1a3   : > { %v1112_v33 = vadd.f32 %v1101_v31, %v953_v22  ;;  %v1103_v34 = vpop.f32.mrb[25].mxu1  ;;  %v4800_v35 = vpop.f32.mrb[25].mxu0 }
 0x1a4   : > { %v1113_v38 = vadd.f32 %v1103_v34, %v954_v24  ;;  %v1105_v39 = vpop.f32.mrb[26].mxu1  ;;  %v2379_v40 = vpop.f32.mrb[26].mxu0 }
 0x1a5   : > { %v1106_v41 = vpop.f32.mrb[27].mxu1  ;;  %v2380_v16 = vpop.f32.mrb[27].mxu0 }
 0x1c2   : > { %v1260_v25 = vpop.f32.mrb[28].mxu1  ;;  %v4802_v26 = vpop.f32.mrb[28].mxu0 }
 0x1c3   : > { %v1271_v42 = vadd.f32 %v1260_v25, %v1112_v33  ;;  %v1262_v43 = vpop.f32.mrb[29].mxu1  ;;  %v4804_v44 = vpop.f32.mrb[29].mxu0 }
 0x1c4   : > { %v1272_v45 = vadd.f32 %v1262_v43, %v1113_v38  ;;  %v1264_v46 = vpop.f32.mrb[30].mxu1  ;;  %v2538_v52 = vpop.f32.mrb[30].mxu0 }
 0x1c5   : > { %v1265_v36 = vpop.f32.mrb[31].mxu1  ;;  %v2539_v37 = vpop.f32.mrb[31].mxu0 }
 0x1da   : > { %v1409_v63 = vpop.f32.mrb[0].mxu1  ;;  %v2683_v53 = vpop.f32.mrb[0].mxu0 }
 0x1db   : > { %v3347_v2 = vadd.f32 %v2683_v53, %v1409_v63  ;;  %v1411_v56 = vpop.f32.mrb[1].mxu1  ;;  %v2685_v3 = vpop.f32.mrb[1].mxu0 }
 0x1dc   : > { %v3348_v50 = vadd.f32 %v2685_v3, %v1411_v56  ;;  %v1413_v6 = vpop.f32.mrb[2].mxu1  ;;  %v2687_v7 = vpop.f32.mrb[2].mxu0 }
 0x1dd   : > { %v2718_v8 = vadd.f32 %v3347_v2, %v2711_v4  ;;  %v3349_v9 = vadd.f32 %v2687_v7, %v1413_v6  ;;  %v1415_v13 = vpop.f32.mrb[3].mxu1  ;;  %v2689_v14 = vpop.f32.mrb[3].mxu0 }
 0x1de   : > { %v2719_v17 = vadd.f32 %v3348_v50, %v2715_v54  ;;  %v3350_v18 = vadd.f32 %v2689_v14, %v1415_v13 }
 0x1df   : > { %v2724_v20 = vmul.f32 0.2, %v2718_v8  ;;  %v2720_v21 = vadd.f32 %v3349_v9, %v2711_v4 }
 0x1e0   : > { %v2725_v60 = vmul.f32 0.2, %v2719_v17  ;;  %v2721_v61 = vadd.f32 %v3350_v18, %v2715_v54 }
 0x1e1   : > { %v2730_v10 = vmax.f32 %v2718_v8, %v2724_v20  ;;  %v2726_v11 = vmul.f32 0.2, %v2720_v21 }
 0x1e2   : > { %v2731_v22 = vmax.f32 %v2719_v17, %v2725_v60  ;;  %v2727_v23 = vmul.f32 0.2, %v2721_v61  ;;  %v1419_v24 = vpop.f32.mrb[32].mxu1  ;;  %v2693_v27 = vpop.f32.mrb[32].mxu0 }
 0x1e3   : > { %v2732_v28 = vmax.f32 %v2720_v21, %v2726_v11  ;;  %v1430_v29 = vadd.f32 %v1419_v24, %v1271_v42  ;;  %v1421_v30 = vpop.f32.mrb[33].mxu1  ;;  %v2695_v31 = vpop.f32.mrb[33].mxu0 }
 0x1e4   : > { %v2742_v33 = vcombine.low %v2730_v10, %v2731_v22  ;;  %v2733_v34 = vmax.f32 %v2721_v61, %v2727_v23  ;;  %v1431_v38 = vadd.f32 %v1421_v30, %v1272_v45  ;;  %v1423_v39 = vpop.f32.mrb[34].mxu1  ;;  %v2697_v40 = vpop.f32.mrb[34].mxu0 }
 0x1e5   : > { %v1590_v41 = vadd.f32 %v4767_v48, %v1430_v29  ;;  %v1424_v16 = vpop.f32.mrb[35].mxu1  ;;  %v2698_v25 = vpop.f32.mrb[35].mxu0 }
 0x1e6   : > { %2748 = vst [vmem:[%s4813_s28] sm:$0x77] %v2742_v33  ;;  %v2743_v43 = vcombine.low %v2732_v28, %v2733_v34  ;;  %v1591_v46 = vadd.f32 %v4769_v51, %v1431_v38 }
 0x1e7   : > { %v1749_v52 = vadd.f32 %v4782_v47, %v1590_v41 }
 0x1e8   : > { %2749 = vst [vmem:[%s4813_s28 + $0x8] sm:$0x77] %v2743_v43  ;;  %v1750_v42 = vadd.f32 %v4784_v59, %v1591_v46 }
 0x1e9   : > { %v1908_v36 = vadd.f32 %v4786_v58, %v1749_v52 }
 0x1ea   : > { %v1909_v37 = vadd.f32 %v4788_v5, %v1750_v42 }
 0x1eb   : > { %v2067_v45 = vadd.f32 %v4790_v15, %v1908_v36 }
 0x1ec   : > { %v2068_v55 = vadd.f32 %v4792_v19, %v1909_v37 }
 0x1ed   : > { %v2227_v48 = vadd.f32 %v4794_v12, %v2067_v45 }
 0x1ee   : > { %v2228_v57 = vadd.f32 %v4796_v0, %v2068_v55 }
 0x1ef   : > { %v2386_v51 = vadd.f32 %v4798_v32, %v2227_v48 }
 0x1f0   : > { %v2387_v47 = vadd.f32 %v4800_v35, %v2228_v57 }
 0x1f1   : > { %v2545_v62 = vadd.f32 %v4802_v26, %v2386_v51 }
 0x1f2   : > { %v2546_v59 = vadd.f32 %v4804_v44, %v2387_v47 }
 0x1f3   : > { %v2704_v58 = vadd.f32 %v2693_v27, %v2545_v62 }
 0x1f4   : > { %v2705_v49 = vadd.f32 %v2695_v31, %v2546_v59 }
 0x1f5   : > { %v2722_v5 = vadd.f32 %v2711_v4, %v2704_v58 }
 0x1f6   : > { %v2723_v1 = vadd.f32 %v2715_v54, %v2705_v49 }
 0x1f7   : > { %v2728_v15 = vmul.f32 0.2, %v2722_v5 }
 0x1f8   : > { %v2729_v63 = vmul.f32 0.2, %v2723_v1 }
 0x1f9   : > { %v2734_v19 = vmax.f32 %v2722_v5, %v2728_v15 }
 0x1fa   : > { %v2735_v53 = vmax.f32 %v2723_v1, %v2729_v63 }
 0x1fc   : > { %v2744_v2 = vcombine.low %v2734_v19, %v2735_v53 }
 0x1fe   : > { %2750 = vst [vmem:[%s4813_s28 + $0x10] sm:$0x77] %v2744_v2 }
 0x1ff PF: > { %s13_s12 = sadd.s32 1, %s3811_s12  }
 0x200   : > { %p10_p4 = scmp.ge.s32.totalorder %s13_s12, 4  }
 0x202   :  { %12 = sbr.rel (!%p10_p4) target bundleno = 1 (0x1), region = 80 }

// kernel: discriminator_forward.9
= control target key start
LH: loop header
LB: loop body
LE: loop exit
PB: predicated region body
PF: predicated region fallthrough
CT: control target
= control target key end

     0   :  { %s4906_s14 = smov 0   ;;  %s5885_s0 = inlined_call_operand.vmem [shape: f32[2,1,5,11,256], index: 0, kind: input, shape index: {}]   ;;  %s5886_s1 = inlined_call_operand.vmem [shape: bf16[16,256,1], index: 1, kind: input, shape index: {}]   ;;  %s5887_s2 = inlined_call_operand.<no memory space> [shape: f32[1,1], index: 2, kind: input, shape index: {}]   ;;  %s5888_s3 = inlined_call_operand.vmem [shape: f32[2,2,2,1], index: 3, kind: output, shape index: {}]  }
   0x1   :  { %v8_v0 = vstv %s5887_s2 }
   0x2   :  { %9 = vst [vmem:[#allocation2] sm:$0x1] %v8_v0 }
   0x3 LB: > { %s3426_s15 = sadd.s32 4294967295, %s4881_s14   ;;  %p3430_p0 = scmp.ge.s32.totalorder %s4881_s14, 1  ;;  %s4881_s14 = sphi %s4906_s14, %s15_s14  }
   0x4   : > { %p139_p1 = scmp.lt.s32.totalorder %s4881_s14, 3 }
   0x6   : > { %p140_p2 = pnand %p3430_p0, %p139_p1 }
   0x7   : > { %v4619_v1 = vld [vmem:[%s5886_s1 + $0xc0] sm:$0xff] (!%p140_p2)   ;;  %v4623_v5 = vld [vmem:[%s5886_s1 + $0xc8] sm:$0xff] (!%p140_p2)   ;;  %v4627_v9 = vld [vmem:[%s5886_s1 + $0xd0] sm:$0xff] (!%p140_p2)   ;;  %p163_p3 = scmp.lt.s32.totalorder (!%p140_p2), %s3426_s15, 1  ;;  %vm228_vm0 = vcmask (!%p140_p2), 1046528   ;;  %vm570_vm1 = vcmask (!%p140_p2), 1045504  }
   0x8   : > { %143 = sbr.rel (%p140_p2) target bundleno = 499 (0x1f3), region = 32  ;;  %v4620_v2 = vld [vmem:[%s5886_s1 + $0x40] sm:$0xff] (!%p140_p2)   ;;  %4258 = vmatprep.subr.bf16.mxu0 (!%p140_p2), %v4619_v1  ;;  %v4624_v6 = vld [vmem:[%s5886_s1 + $0x48] sm:$0xff] (!%p140_p2)   ;;  %v4628_v10 = vld [vmem:[%s5886_s1 + $0x50] sm:$0xff] (!%p140_p2)   ;;  %vm777_vm2 = vcmask (!%p140_p2), 1044480   ;;  %vm3368_vm3 = vcmask (!%p140_p2), 1024  }
   0x9   : > { %v4621_v3 = vld [vmem:[%s5886_s1 + $0x80] sm:$0xff] (!%p140_p2)   ;;  %4280 = vmatprep.subr.bf16.mxu1 (!%p140_p2), %v4620_v2  ;;  %v4625_v7 = vld [vmem:[%s5886_s1 + $0x88] sm:$0xff] (!%p140_p2)   ;;  %v4629_v11 = vld [vmem:[%s5886_s1 + $0x90] sm:$0xff] (!%p140_p2)  }
   0xa   : > { %v4622_v4 = vld [vmem:[%s5886_s1] sm:$0xff] (!%p140_p2)   ;;  %4259 = vmatpush3.bf16.msra.mxu0 (!%p140_p2), %v4621_v3  ;;  %v4626_v8 = vld [vmem:[%s5886_s1 + $0x8] sm:$0xff] (!%p140_p2)   ;;  %v4630_v12 = vld [vmem:[%s5886_s1 + $0x10] sm:$0xff] (!%p140_p2)  }
   0xb   : > { %4281 = vmatpush3.bf16.msra.mxu1 (!%p140_p2), %v4622_v4  ;;  %4260 = vmatprep.subr.bf16.mxu0 (!%p140_p2), %v4623_v5  ;;  %v4631_v13 = vld [vmem:[%s5886_s1 + $0xd8] sm:$0xff] (!%p140_p2)   ;;  %v4635_v17 = vld [vmem:[%s5886_s1 + $0xe0] sm:$0xff] (!%p140_p2)   ;;  %v4639_v21 = vld [vmem:[%s5886_s1 + $0xe8] sm:$0xff] (!%p140_p2)  }
   0xc   : > { %4282 = vmatprep.subr.bf16.mxu1 (!%p140_p2), %v4624_v6  ;;  %v4632_v14 = vld [vmem:[%s5886_s1 + $0x58] sm:$0xff] (!%p140_p2)   ;;  %v4636_v18 = vld [vmem:[%s5886_s1 + $0x60] sm:$0xff] (!%p140_p2)   ;;  %v4640_v22 = vld [vmem:[%s5886_s1 + $0x68] sm:$0xff] (!%p140_p2)  }
   0xd   : > { %v4633_v15 = vld [vmem:[%s5886_s1 + $0x98] sm:$0xff] (!%p140_p2)   ;;  %v4637_v19 = vld [vmem:[%s5886_s1 + $0xa0] sm:$0xff] (!%p140_p2)   ;;  %v4641_v23 = vld [vmem:[%s5886_s1 + $0xa8] sm:$0xff] (!%p140_p2)  }
   0xe   : > { %4261 = vmatpush3.bf16.msra.mxu0 (!%p140_p2), %v4625_v7  ;;  %v4634_v16 = vld [vmem:[%s5886_s1 + $0x18] sm:$0xff] (!%p140_p2)   ;;  %v4638_v20 = vld [vmem:[%s5886_s1 + $0x20] sm:$0xff] (!%p140_p2)   ;;  %v4642_v24 = vld [vmem:[%s5886_s1 + $0x28] sm:$0xff] (!%p140_p2)  }
   0xf   : > { %4283 = vmatpush3.bf16.msra.mxu1 %v4626_v8  ;;  %4262 = vmatprep.subr.bf16.mxu0 %v4627_v9  ;;  %s5890_s15 = smov (!%p163_p3, %s3426_s15), 1  ;;  %v4643_v25 = vld [vmem:[%s5886_s1 + $0xf0] sm:$0xff]   ;;  %v4647_v29 = vld [vmem:[%s5886_s1 + $0xf8] sm:$0xff]   ;;  %v4651_v59 = vld [vmem:[%s5886_s1 + $0x140] sm:$0xff]  }
  0x10   : > { %4284 = vmatprep.subr.bf16.mxu1 %v4628_v10  ;;  %v4644_v26 = vld [vmem:[%s5886_s1 + $0x70] sm:$0xff]   ;;  %s4610_s16 = smul.u32 160, %s5890_s15  ;;  %v4648_v30 = vld [vmem:[%s5886_s1 + $0x78] sm:$0xff]   ;;  %v4652_v61 = vld [vmem:[%s5886_s1 + $0x1c0] sm:$0xff]  }
  0x11   : > { %v4645_v27 = vld [vmem:[%s5886_s1 + $0xb0] sm:$0xff]   ;;  %v4649_v31 = vld [vmem:[%s5886_s1 + $0xb8] sm:$0xff]   ;;  %v4653_v63 = vld [vmem:[%s5886_s1 + $0x100] sm:$0xff]  }
  0x12   : > { %4263 = vmatpush3.bf16.msra.mxu0 %v4629_v11  ;;  %v4646_v28 = vld [vmem:[%s5886_s1 + $0x30] sm:$0xff]   ;;  %s5014_s26 = scalar_lea.vmem %s5885_s0, %s4610_s16  ;;  %v4650_v32 = vld [vmem:[%s5886_s1 + $0x38] sm:$0xff]   ;;  %v4654_v0 = vld [vmem:[%s5886_s1 + $0x180] sm:$0xff]  }
  0x13   : > { %4285 = vmatpush3.bf16.msra.mxu1 %v4630_v12  ;;  %4264 = vmatprep.subr.bf16.mxu0 %v4631_v13  ;;  %v213_v33 = vld [vmem:[%s5014_s26 + $0x8] sm:$0xfe]  ;;  %v215_v34 = vld [vmem:[%s5014_s26 + $0x18] sm:$0x1]  ;;  %v212_v43 = vld [vmem:[%s5014_s26] sm:$0xfe] }
  0x14   : > { %4286 = vmatprep.subr.bf16.mxu1 %v4632_v14  ;;  %v217_v35 = vld [vmem:[%s5014_s26 + $0x28] sm:$0xfe]  ;;  %v219_v36 = vld [vmem:[%s5014_s26 + $0x38] sm:$0x1]  ;;  %v232_v37 = vrot.slane %v213_v33, 1  ;;  %v233_v38 = vrot.slane %v215_v34, 1 }
  0x15   : > { %v238_v39 = vrot.slane %v217_v35, 1  ;;  %v175_v40 = vld [vmem:[%s5014_s26 + $0x8] sm:$0xff]  ;;  %v239_v41 = vrot.slane %v219_v36, 1  ;;  %v214_v44 = vld [vmem:[%s5014_s26 + $0x10] sm:$0x1]  ;;  %v229_v49 = vrot.slane %v212_v43, 1 }
  0x16   : > { %4265 = vmatpush3.bf16.msra.mxu0 %v4633_v15  ;;  %v5028_v42 = vld [vmem:[%s5014_s26 + $0x28] sm:$0xff]  ;;  %v234_v45 = vsel %vm228_vm0, %v232_v37, %v233_v38  ;;  %v216_v47 = vld [vmem:[%s5014_s26 + $0x20] sm:$0xfe]  ;;  %v218_v48 = vld [vmem:[%s5014_s26 + $0x30] sm:$0x1]  ;;  %v230_v50 = vrot.slane %v214_v44, 1 }
  0x17   : > { %4287 = vmatpush3.bf16.msra.mxu1 %v4634_v16  ;;  %4266 = vmatprep.subr.bf16.mxu0 %v4635_v17  ;;  %v179_v46 = vpack.c.bf16 %v5028_v42, %v175_v40  ;;  %v240_v51 = vsel %vm228_vm0, %v238_v39, %v239_v41  ;;  %v235_v52 = vrot.slane %v216_v47, 1  ;;  %v236_v53 = vrot.slane %v218_v48, 1  ;;  %v174_v54 = vld [vmem:[%s5014_s26] sm:$0xff]  ;;  %v4655_v1 = vld [vmem:[%s5886_s1 + $0x148] sm:$0xff]   ;;  %v4659_v5 = vld [vmem:[%s5886_s1 + $0x150] sm:$0xff]  }
  0x18   : > { %4288 = vmatprep.subr.bf16.mxu1 %v4636_v18  ;;  %v5039_v55 = vld [vmem:[%s5014_s26 + $0x20] sm:$0xff]  ;;  %v246_v56 = vpack.c.bf16 %v240_v51, %v234_v45  ;;  %v231_v57 = vsel %vm228_vm0, %v229_v49, %v230_v50  ;;  %v4656_v2 = vld [vmem:[%s5886_s1 + $0x1c8] sm:$0xff]   ;;  %v4660_v6 = vld [vmem:[%s5886_s1 + $0x1d0] sm:$0xff]  }
  0x19   : > { %545 = vmatprep.mubr.bf16.mxu1 %v179_v46  ;;  %v178_v58 = vpack.c.bf16 %v5039_v55, %v174_v54  ;;  %v237_v60 = vsel %vm228_vm0, %v235_v52, %v236_v53  ;;  %v4657_v3 = vld [vmem:[%s5886_s1 + $0x108] sm:$0xff]   ;;  %v4661_v7 = vld [vmem:[%s5886_s1 + $0x110] sm:$0xff]   ;;  %v4663_v9 = vld [vmem:[%s5886_s1 + $0x158] sm:$0xff]  }
  0x1a   : > { %4267 = vmatpush3.bf16.msra.mxu0 %v4637_v19  ;;  %408 = vmatprep.mubr.bf16.mxu0 %v246_v56  ;;  %v245_v62 = vpack.c.bf16 %v237_v60, %v231_v57  ;;  %v4658_v4 = vld [vmem:[%s5886_s1 + $0x188] sm:$0xff]   ;;  %v4662_v8 = vld [vmem:[%s5886_s1 + $0x190] sm:$0xff]   ;;  %v4664_v10 = vld [vmem:[%s5886_s1 + $0x1d8] sm:$0xff]  }
  0x1b   : > { %4289 = vmatpush3.bf16.msra.mxu1 %v4638_v20  ;;  %4268 = vmatprep.subr.bf16.mxu0 %v4639_v21  ;;  %v4665_v11 = vld [vmem:[%s5886_s1 + $0x118] sm:$0xff]   ;;  %v4667_v13 = vld [vmem:[%s5886_s1 + $0x160] sm:$0xff]   ;;  %v4671_v17 = vld [vmem:[%s5886_s1 + $0x168] sm:$0xff]  }
  0x1c   : > { %4290 = vmatprep.subr.bf16.mxu1 %v4640_v22  ;;  %v4666_v12 = vld [vmem:[%s5886_s1 + $0x198] sm:$0xff]   ;;  %v4668_v14 = vld [vmem:[%s5886_s1 + $0x1e0] sm:$0xff]   ;;  %v4672_v18 = vld [vmem:[%s5886_s1 + $0x1e8] sm:$0xff]  }
  0x1d   : > { %v4669_v15 = vld [vmem:[%s5886_s1 + $0x120] sm:$0xff]   ;;  %v4673_v19 = vld [vmem:[%s5886_s1 + $0x128] sm:$0xff]   ;;  %v4675_v21 = vld [vmem:[%s5886_s1 + $0x170] sm:$0xff]  }
  0x1e   : > { %4269 = vmatpush3.bf16.msra.mxu0 %v4641_v23  ;;  %v4670_v16 = vld [vmem:[%s5886_s1 + $0x1a0] sm:$0xff]   ;;  %v4674_v20 = vld [vmem:[%s5886_s1 + $0x1a8] sm:$0xff]   ;;  %v4676_v22 = vld [vmem:[%s5886_s1 + $0x1f0] sm:$0xff]  }
  0x1f   : > { %4291 = vmatpush3.bf16.msra.mxu1 %v4642_v24  ;;  %4270 = vmatprep.subr.bf16.mxu0 %v4643_v25  ;;  %v4677_v23 = vld [vmem:[%s5886_s1 + $0x130] sm:$0xff]   ;;  %v4679_v25 = vld [vmem:[%s5886_s1 + $0x178] sm:$0xff]   ;;  %v762_v37 = vld [vmem:[%s5014_s26 + $0x8] sm:$0xf8] }
  0x20   : > { %4292 = vmatprep.subr.bf16.mxu1 %v4644_v26  ;;  %v4678_v24 = vld [vmem:[%s5886_s1 + $0x1b0] sm:$0xff]   ;;  %v4680_v26 = vld [vmem:[%s5886_s1 + $0x1f8] sm:$0xff]   ;;  %v766_v39 = vld [vmem:[%s5014_s26 + $0x28] sm:$0xf8]  ;;  %v781_v44 = vrot.slane %v762_v37, 3 }
  0x21   : > { %v764_v38 = vld [vmem:[%s5014_s26 + $0x18] sm:$0x7]  ;;  %v554_v46 = vld [vmem:[%s5014_s26] sm:$0xfc]  ;;  %v556_v47 = vld [vmem:[%s5014_s26 + $0x10] sm:$0x3] }
  0x22   : > { %4271 = vmatpush3.bf16.msra.mxu0 %v4645_v27  ;;  %v4681_v27 = vld [vmem:[%s5886_s1 + $0x138] sm:$0xff]   ;;  %v782_v45 = vrot.slane %v764_v38, 3  ;;  %v787_v49 = vrot.slane %v766_v39, 3  ;;  %v558_v51 = vld [vmem:[%s5014_s26 + $0x20] sm:$0xfc]  ;;  %v571_v54 = vrot.slane %v554_v46, 2 }
  0x23   : > { %4293 = vmatpush3.bf16.msra.mxu1 %v4646_v28  ;;  %4272 = vmatprep.subr.bf16.mxu0 %v4647_v29  ;;  %v4682_v28 = vld [vmem:[%s5886_s1 + $0x1b8] sm:$0xff]   ;;  %v555_v29 = vld [vmem:[%s5014_s26 + $0x8] sm:$0xfc]  ;;  %v560_v52 = vld [vmem:[%s5014_s26 + $0x30] sm:$0x3]  ;;  %v572_v56 = vrot.slane %v556_v47, 2 }
  0x24   : > { %4294 = vmatprep.subr.bf16.mxu1 %v4648_v30  ;;  %v557_v30 = vld [vmem:[%s5014_s26 + $0x18] sm:$0x3]  ;;  %v574_v33 = vrot.slane %v555_v29, 2  ;;  %v783_v53 = vsel %vm777_vm2, %v781_v44, %v782_v45  ;;  %v577_v57 = vrot.slane %v558_v51, 2  ;;  %v4701_v29 = vld [vmem:[%s5886_s1 + $0x220] sm:$0xff]   ;;  %v4709_v37 = vld [vmem:[%s5886_s1 + $0x230] sm:$0xff]  }
  0x25   : > { %v575_v34 = vrot.slane %v557_v30, 2  ;;  %v768_v40 = vld [vmem:[%s5014_s26 + $0x38] sm:$0x7]  ;;  %v4702_v30 = vld [vmem:[%s5886_s1 + $0x2a0] sm:$0xff]   ;;  %v4710_v38 = vld [vmem:[%s5886_s1 + $0x2b0] sm:$0xff]  }
  0x26   : > { %4273 = vmatpush3.bf16.msra.mxu0 %v4649_v31  ;;  %v559_v31 = vld [vmem:[%s5014_s26 + $0x28] sm:$0xfc]  ;;  %v788_v50 = vrot.slane %v768_v40, 3  ;;  %v4711_v39 = vld [vmem:[%s5886_s1 + $0x278] sm:$0xff]  }
  0x27   : > { %4295 = vmatpush3.bf16.msra.mxu1 %v4650_v32  ;;  %4302 = vmatprep.subr.bf16.mxu0 %v4651_v59  ;;  %v561_v32 = vld [vmem:[%s5014_s26 + $0x38] sm:$0x3]  ;;  %v580_v35 = vrot.slane %v559_v31, 2  ;;  %v576_v41 = vsel %vm570_vm1, %v574_v33, %v575_v34  ;;  %v4683_v59 = vld [vmem:[%s5886_s1 + $0x240] sm:$0xff]   ;;  %v4703_v31 = vld [vmem:[%s5886_s1 + $0x268] sm:$0xff]  }
  0x28   : > { %4324 = vmatprep.subr.bf16.mxu1 %v4652_v61  ;;  %v581_v36 = vrot.slane %v561_v32, 2  ;;  %v789_v60 = vsel %vm777_vm2, %v787_v49, %v788_v50  ;;  %v578_v61 = vrot.slane %v560_v52, 2  ;;  %v4704_v32 = vld [vmem:[%s5886_s1 + $0x2e8] sm:$0xff]   ;;  %v4712_v40 = vld [vmem:[%s5886_s1 + $0x2f8] sm:$0xff]  }
  0x29   : > { %409 = vmatmul.mubr.bf16.vlgmr.msra.gmra.mrb[0].mxu0 %v245_v62  ;;  %v763_v62 = vld [vmem:[%s5014_s26 + $0x10] sm:$0x7]  ;;  %v4705_v33 = vld [vmem:[%s5886_s1 + $0x228] sm:$0xff]   ;;  %v3649_v47 = vld [vmem:[%s5014_s26 + $0x38] sm:$0x1] }
  0x2a   : > { %546 = vmatmul.mubr.bf16.vlgmr.msra.gmra.mrb[0].mxu1 %v178_v58  ;;  %4303 = vmatpush3.bf16.msra.mxu0 %v4653_v63  ;;  %v582_v43 = vsel %vm570_vm1, %v580_v35, %v581_v36  ;;  %v761_v58 = vld [vmem:[%s5014_s26] sm:$0xf8]  ;;  %v4706_v34 = vld [vmem:[%s5886_s1 + $0x2a8] sm:$0xff]   ;;  %v4707_v35 = vld [vmem:[%s5886_s1 + $0x270] sm:$0xff]   ;;  %v1167_v51 = vrot.slane %v3649_v47, 1 }
  0x2b   : > { %4325 = vmatpush3.bf16.msra.mxu1 %v4654_v0  ;;  %4304 = vmatprep.subr.bf16.mxu0 %v4655_v1  ;;  %v588_v48 = vpack.c.bf16 %v582_v43, %v576_v41  ;;  %v765_v63 = vld [vmem:[%s5014_s26 + $0x20] sm:$0xf8]  ;;  %v778_v0 = vrot.slane %v761_v58, 3  ;;  %v795_v1 = vpack.c.bf16 %v789_v60, %v783_v53  ;;  %v4708_v36 = vld [vmem:[%s5886_s1 + $0x2f0] sm:$0xff]   ;;  %v4713_v41 = vld [vmem:[%s5886_s1 + $0x238] sm:$0xff]  }
  0x2c   : > { %4326 = vmatprep.subr.bf16.mxu1 %v4656_v2  ;;  %v573_v2 = vsel %vm570_vm1, %v571_v54, %v572_v56  ;;  %v4714_v43 = vld [vmem:[%s5886_s1 + $0x2b8] sm:$0xff]   ;;  %v5261_v44 = vld [vmem:[%s5014_s26 + $0x48] sm:$0xff]  ;;  %v5270_v54 = vld [vmem:[%s5014_s26 + $0x40] sm:$0xff] }
  0x2d   : > { %750 = vmatprep.mubr.bf16.mxu0 %v588_v48  ;;  %957 = vmatprep.mubr.bf16.mxu1 %v795_v1  ;;  %v3647_v45 = vld [vmem:[%s5014_s26 + $0x28] sm:$0xfe]  ;;  %v974_v46 = vpack.c.bf16 %v5261_v44, %v5028_v42  ;;  %v3653_v49 = vld [vmem:[%s5014_s26 + $0x58] sm:$0x1]  ;;  %v4715_v56 = vld [vmem:[%s5886_s1 + $0x340] sm:$0xff]  }
  0x2e   : > { %4305 = vmatpush3.bf16.msra.mxu0 %v4657_v3  ;;  %v767_v3 = vld [vmem:[%s5014_s26 + $0x30] sm:$0x7]  ;;  %v3651_v48 = vld [vmem:[%s5014_s26 + $0x48] sm:$0xfe]  ;;  %v1166_v50 = vrot.slane %v3647_v45, 1  ;;  %v1173_v53 = vrot.slane %v3653_v49, 1 }
  0x2f   : > { %4327 = vmatpush3.bf16.msra.mxu1 %v4658_v4  ;;  %4306 = vmatprep.subr.bf16.mxu0 %v4659_v5  ;;  %v779_v4 = vrot.slane %v763_v62, 3  ;;  %v784_v5 = vrot.slane %v765_v63, 3  ;;  %v1172_v52 = vrot.slane %v3651_v48, 1  ;;  %v3646_v42 = vld [vmem:[%s5014_s26 + $0x20] sm:$0xfe] }
  0x30   : > { %4328 = vmatprep.subr.bf16.mxu1 %v4660_v6  ;;  %v579_v6 = vsel %vm570_vm1, %v577_v57, %v578_v61  ;;  %v973_v57 = vpack.c.bf16 %v5270_v54, %v5039_v55  ;;  %v3648_v58 = vld [vmem:[%s5014_s26 + $0x30] sm:$0x1]  ;;  %v1168_v60 = vsel %vm228_vm0, %v1166_v50, %v1167_v51  ;;  %v1163_v63 = vrot.slane %v3646_v42, 1  ;;  %v4716_v55 = vld [vmem:[%s5886_s1 + $0x3c0] sm:$0xff]   ;;  %v3759_v47 = vld [vmem:[%s5014_s26 + $0x28] sm:$0xf8] }
  0x31   : > { %v1174_v61 = vsel %vm228_vm0, %v1172_v52, %v1173_v53  ;;  %v3652_v62 = vld [vmem:[%s5014_s26 + $0x50] sm:$0x1]  ;;  %v3761_v48 = vld [vmem:[%s5014_s26 + $0x38] sm:$0x7]  ;;  %v3763_v49 = vld [vmem:[%s5014_s26 + $0x48] sm:$0xf8] }
  0x32   : > { %4307 = vmatpush3.bf16.msra.mxu0 %v4661_v7  ;;  %v785_v7 = vrot.slane %v767_v3, 3  ;;  %v1180_v1 = vpack.c.bf16 %v1174_v61, %v1168_v60  ;;  %v1170_v3 = vrot.slane %v3652_v62, 1  ;;  %v3765_v50 = vld [vmem:[%s5014_s26 + $0x58] sm:$0x7]  ;;  %v1578_v53 = vrot.slane %v3759_v47, 3  ;;  %v4773_v47 = vld [vmem:[%s5886_s1 + $0x430] sm:$0xff]  }
  0x33   : > { %4329 = vmatpush3.bf16.msra.mxu1 %v4662_v8  ;;  %4308 = vmatprep.subr.bf16.mxu0 %v4663_v9  ;;  %v4684_v8 = vld [vmem:[%s5886_s1 + $0x2c0] sm:$0xff]   ;;  %v587_v9 = vpack.c.bf16 %v579_v6, %v573_v2  ;;  %v3704_v42 = vld [vmem:[%s5014_s26 + $0x30] sm:$0x3]  ;;  %v1585_v60 = vrot.slane %v3765_v50, 3  ;;  %v4776_v50 = vld [vmem:[%s5886_s1 + $0x4f8] sm:$0xff]  }
  0x34   : > { %4330 = vmatprep.subr.bf16.mxu1 %v4664_v10  ;;  %v780_v10 = vsel %vm777_vm2, %v778_v0, %v779_v4  ;;  %v1164_v0 = vrot.slane %v3648_v58, 1  ;;  %v4717_v6 = vld [vmem:[%s5886_s1 + $0x300] sm:$0xff]   ;;  %v3708_v62 = vld [vmem:[%s5014_s26 + $0x50] sm:$0x3] }
  0x35   : > { %v3706_v61 = vld [vmem:[%s5014_s26 + $0x40] sm:$0xfc] }
  0x36   : > { %4309 = vmatpush3.bf16.msra.mxu0 %v4665_v11  ;;  %v786_v11 = vsel %vm777_vm2, %v784_v5, %v785_v7  ;;  %v1165_v4 = vsel %vm228_vm0, %v1163_v63, %v1164_v0 }
  0x37   : > { %4331 = vmatpush3.bf16.msra.mxu1 %v4666_v12  ;;  %4310 = vmatprep.subr.bf16.mxu0 %v4667_v13  ;;  %v4685_v12 = vld [vmem:[%s5886_s1 + $0x200] sm:$0xff]   ;;  %v794_v13 = vpack.c.bf16 %v786_v11, %v780_v10  ;;  %v4720_v10 = vld [vmem:[%s5886_s1 + $0x3c8] sm:$0xff]  }
  0x38   : > { %4332 = vmatprep.subr.bf16.mxu1 %v4668_v14  ;;  %v4686_v14 = vld [vmem:[%s5886_s1 + $0x280] sm:$0xff]   ;;  %v4721_v11 = vld [vmem:[%s5886_s1 + $0x308] sm:$0xff]  }
  0x3a   : > { %4311 = vmatpush3.bf16.msra.mxu0 %v4669_v15  ;;  %v4687_v15 = vld [vmem:[%s5886_s1 + $0x248] sm:$0xff]  }
  0x3b   : > { %4333 = vmatpush3.bf16.msra.mxu1 %v4670_v16  ;;  %4312 = vmatprep.subr.bf16.mxu0 %v4671_v17  ;;  %v4688_v16 = vld [vmem:[%s5886_s1 + $0x2c8] sm:$0xff]  }
  0x3c   : > { %4334 = vmatprep.subr.bf16.mxu1 %v4672_v18  ;;  %v4689_v17 = vld [vmem:[%s5886_s1 + $0x208] sm:$0xff]  }
  0x3d   : > { %v4690_v18 = vld [vmem:[%s5886_s1 + $0x288] sm:$0xff]  }
  0x3e   : > { %4313 = vmatpush3.bf16.msra.mxu0 %v4673_v19  ;;  %v4691_v19 = vld [vmem:[%s5886_s1 + $0x250] sm:$0xff]  }
  0x3f   : > { %4335 = vmatpush3.bf16.msra.mxu1 %v4674_v20  ;;  %4314 = vmatprep.subr.bf16.mxu0 %v4675_v21  ;;  %v4692_v20 = vld [vmem:[%s5886_s1 + $0x2d0] sm:$0xff]  }
  0x40   : > { %4336 = vmatprep.subr.bf16.mxu1 %v4676_v22  ;;  %v4693_v21 = vld [vmem:[%s5886_s1 + $0x210] sm:$0xff]  }
  0x41   : > { %v4694_v22 = vld [vmem:[%s5886_s1 + $0x290] sm:$0xff]  }
  0x42   : > { %4315 = vmatpush3.bf16.msra.mxu0 %v4677_v23  ;;  %v4695_v23 = vld [vmem:[%s5886_s1 + $0x258] sm:$0xff]  }
  0x43   : > { %4337 = vmatpush3.bf16.msra.mxu1 %v4678_v24  ;;  %4316 = vmatprep.subr.bf16.mxu0 %v4679_v25  ;;  %v4696_v24 = vld [vmem:[%s5886_s1 + $0x2d8] sm:$0xff]  }
  0x44   : > { %4338 = vmatprep.subr.bf16.mxu1 %v4680_v26  ;;  %v4697_v25 = vld [vmem:[%s5886_s1 + $0x218] sm:$0xff]  }
  0x45   : > { %v4698_v26 = vld [vmem:[%s5886_s1 + $0x298] sm:$0xff]  }
  0x46   : > { %4317 = vmatpush3.bf16.msra.mxu0 %v4681_v27  ;;  %v4699_v27 = vld [vmem:[%s5886_s1 + $0x260] sm:$0xff]  }
  0x47   : > { %4339 = vmatpush3.bf16.msra.mxu1 %v4682_v28  ;;  %4346 = vmatprep.subr.bf16.mxu0 %v4683_v59  ;;  %v4700_v28 = vld [vmem:[%s5886_s1 + $0x2e0] sm:$0xff]  }
  0x48   : > { %4368 = vmatprep.subr.bf16.mxu1 %v4684_v8  ;;  %v3650_v59 = vld [vmem:[%s5014_s26 + $0x40] sm:$0xfe] }
  0x49   : > { %751 = vmatmul.mubr.bf16.vlgmr.msra.gmra.mrb[4].mxu0 %v587_v9  ;;  %v1169_v2 = vrot.slane %v3650_v59, 1  ;;  %v4718_v8 = vld [vmem:[%s5886_s1 + $0x380] sm:$0xff]   ;;  %v4719_v9 = vld [vmem:[%s5886_s1 + $0x348] sm:$0xff]   ;;  %v1584_v59 = vrot.slane %v3763_v49, 3  ;;  %v4775_v49 = vld [vmem:[%s5886_s1 + $0x478] sm:$0xff]  }
  0x4a   : > { %4347 = vmatpush3.bf16.msra.mxu0 %v4685_v12  ;;  %958 = vmatmul.mubr.bf16.vlgmr.msra.gmra.mrb[4].mxu1 %v794_v13  ;;  %v4722_v12 = vld [vmem:[%s5886_s1 + $0x388] sm:$0xff]   ;;  %v4723_v13 = vld [vmem:[%s5886_s1 + $0x350] sm:$0xff]  }
  0x4b   : > { %4369 = vmatpush3.bf16.msra.mxu1 %v4686_v14  ;;  %4348 = vmatprep.subr.bf16.mxu0 %v4687_v15  ;;  %v1171_v5 = vsel %vm228_vm0, %v1169_v2, %v1170_v3  ;;  %v4724_v14 = vld [vmem:[%s5886_s1 + $0x3d0] sm:$0xff]   ;;  %v1375_v2 = vrot.slane %v3706_v61, 2  ;;  %v3758_v3 = vld [vmem:[%s5014_s26 + $0x20] sm:$0xf8] }
  0x4c   : > { %4370 = vmatprep.subr.bf16.mxu1 %v4688_v16  ;;  %1136 = vmatprep.mubr.bf16.mxu0 %v974_v46  ;;  %v1179_v7 = vpack.c.bf16 %v1171_v5, %v1165_v4  ;;  %v4725_v15 = vld [vmem:[%s5886_s1 + $0x310] sm:$0xff]   ;;  %v4747_v4 = vld [vmem:[%s5886_s1 + $0x440] sm:$0xff]   ;;  %v1376_v5 = vrot.slane %v3708_v62, 2 }
  0x4d   : > { %1342 = vmatprep.mubr.bf16.mxu1 %v1180_v1  ;;  %v4726_v16 = vld [vmem:[%s5886_s1 + $0x390] sm:$0xff]   ;;  %v1370_v1 = vrot.slane %v3704_v42, 2  ;;  %v3869_v42 = vld [vmem:[%s5014_s26 + $0x58] sm:$0x1] }
  0x4e   : > { %4349 = vmatpush3.bf16.msra.mxu0 %v4689_v17  ;;  %v4727_v17 = vld [vmem:[%s5886_s1 + $0x358] sm:$0xff]   ;;  %v1964_v61 = vrot.slane %v3869_v42, 1  ;;  %v3979_v42 = vld [vmem:[%s5014_s26 + $0x48] sm:$0xf8] }
  0x4f   : > { %4371 = vmatpush3.bf16.msra.mxu1 %v4690_v18  ;;  %4350 = vmatprep.subr.bf16.mxu0 %v4691_v19  ;;  %v4728_v18 = vld [vmem:[%s5886_s1 + $0x3d8] sm:$0xff]  }
  0x50   : > { %4372 = vmatprep.subr.bf16.mxu1 %v4692_v20  ;;  %v4729_v19 = vld [vmem:[%s5886_s1 + $0x318] sm:$0xff]  }
  0x51   : > { %v4730_v20 = vld [vmem:[%s5886_s1 + $0x398] sm:$0xff]  }
  0x52   : > { %4351 = vmatpush3.bf16.msra.mxu0 %v4693_v21  ;;  %v4731_v21 = vld [vmem:[%s5886_s1 + $0x360] sm:$0xff]  }
  0x53   : > { %4373 = vmatpush3.bf16.msra.mxu1 %v4694_v22  ;;  %4352 = vmatprep.subr.bf16.mxu0 %v4695_v23  ;;  %v4732_v22 = vld [vmem:[%s5886_s1 + $0x3e0] sm:$0xff]  }
  0x54   : > { %4374 = vmatprep.subr.bf16.mxu1 %v4696_v24  ;;  %v4733_v23 = vld [vmem:[%s5886_s1 + $0x320] sm:$0xff]  }
  0x55   : > { %v4734_v24 = vld [vmem:[%s5886_s1 + $0x3a0] sm:$0xff]  }
  0x56   : > { %4353 = vmatpush3.bf16.msra.mxu0 %v4697_v25  ;;  %v4735_v25 = vld [vmem:[%s5886_s1 + $0x368] sm:$0xff]  }
  0x57   : > { %4375 = vmatpush3.bf16.msra.mxu1 %v4698_v26  ;;  %4354 = vmatprep.subr.bf16.mxu0 %v4699_v27  ;;  %v4736_v26 = vld [vmem:[%s5886_s1 + $0x3e8] sm:$0xff]  }
  0x58   : > { %4376 = vmatprep.subr.bf16.mxu1 %v4700_v28  ;;  %v4737_v27 = vld [vmem:[%s5886_s1 + $0x328] sm:$0xff]  }
  0x59   : > { %v4738_v28 = vld [vmem:[%s5886_s1 + $0x3a8] sm:$0xff]  }
  0x5a   : > { %4355 = vmatpush3.bf16.msra.mxu0 %v4701_v29  ;;  %v4739_v29 = vld [vmem:[%s5886_s1 + $0x370] sm:$0xff]  }
  0x5b   : > { %4377 = vmatpush3.bf16.msra.mxu1 %v4702_v30  ;;  %4356 = vmatprep.subr.bf16.mxu0 %v4703_v31  ;;  %v4740_v30 = vld [vmem:[%s5886_s1 + $0x3f0] sm:$0xff]  }
  0x5c   : > { %4378 = vmatprep.subr.bf16.mxu1 %v4704_v32  ;;  %v4741_v31 = vld [vmem:[%s5886_s1 + $0x330] sm:$0xff]  }
  0x5d   : > { %v4742_v32 = vld [vmem:[%s5886_s1 + $0x3b0] sm:$0xff]  }
  0x5e   : > { %4357 = vmatpush3.bf16.msra.mxu0 %v4705_v33  ;;  %v4743_v33 = vld [vmem:[%s5886_s1 + $0x378] sm:$0xff]  }
  0x5f   : > { %4379 = vmatpush3.bf16.msra.mxu1 %v4706_v34  ;;  %4358 = vmatprep.subr.bf16.mxu0 %v4707_v35  ;;  %v4744_v34 = vld [vmem:[%s5886_s1 + $0x3f8] sm:$0xff]  }
  0x60   : > { %4380 = vmatprep.subr.bf16.mxu1 %v4708_v36  ;;  %v4745_v35 = vld [vmem:[%s5886_s1 + $0x338] sm:$0xff]  }
  0x61   : > { %v4746_v36 = vld [vmem:[%s5886_s1 + $0x3b8] sm:$0xff]  }
  0x62   : > { %4359 = vmatpush3.bf16.msra.mxu0 %v4709_v37  ;;  %v3703_v37 = vld [vmem:[%s5014_s26 + $0x28] sm:$0xfc] }
  0x63   : > { %4381 = vmatpush3.bf16.msra.mxu1 %v4710_v38  ;;  %4360 = vmatprep.subr.bf16.mxu0 %v4711_v39  ;;  %v3705_v38 = vld [vmem:[%s5014_s26 + $0x38] sm:$0x3]  ;;  %v3707_v39 = vld [vmem:[%s5014_s26 + $0x48] sm:$0xfc] }
  0x64   : > { %4382 = vmatprep.subr.bf16.mxu1 %v4712_v40  ;;  %v3709_v40 = vld [vmem:[%s5014_s26 + $0x58] sm:$0x3]  ;;  %v1378_v45 = vrot.slane %v3707_v39, 2  ;;  %v4767_v39 = vld [vmem:[%s5886_s1 + $0x468] sm:$0xff]  }
  0x65   : > { %v1379_v46 = vrot.slane %v3709_v40, 2  ;;  %v4768_v40 = vld [vmem:[%s5886_s1 + $0x4e8] sm:$0xff]  }
  0x66   : > { %4361 = vmatpush3.bf16.msra.mxu0 %v4713_v41  ;;  %v1372_v41 = vrot.slane %v3703_v37, 2  ;;  %v4765_v37 = vld [vmem:[%s5886_s1 + $0x420] sm:$0xff]  }
  0x67   : > { %4383 = vmatpush3.bf16.msra.mxu1 %v4714_v43  ;;  %4390 = vmatprep.subr.bf16.mxu0 %v4715_v56  ;;  %v1373_v43 = vrot.slane %v3705_v38, 2  ;;  %v1380_v52 = vsel %vm570_vm1, %v1378_v45, %v1379_v46  ;;  %v1579_v56 = vrot.slane %v3761_v48, 3  ;;  %v4766_v38 = vld [vmem:[%s5886_s1 + $0x4a0] sm:$0xff]   ;;  %v4771_v45 = vld [vmem:[%s5886_s1 + $0x470] sm:$0xff]  }
  0x68   : > { %4412 = vmatprep.subr.bf16.mxu1 %v4716_v55  ;;  %v1586_v55 = vsel %vm777_vm2, %v1584_v59, %v1585_v60  ;;  %v4772_v46 = vld [vmem:[%s5886_s1 + $0x4f0] sm:$0xff]   ;;  %v3873_v59 = vld [vmem:[%s5014_s26 + $0x78] sm:$0x1] }
  0x69   : > { %1137 = vmatmul.mubr.bf16.vlgmr.msra.gmra.mrb[8].mxu0 %v973_v57  ;;  %v1374_v51 = vsel %vm570_vm1, %v1372_v41, %v1373_v43  ;;  %v3702_v57 = vld [vmem:[%s5014_s26 + $0x20] sm:$0xfc]  ;;  %v1580_v63 = vsel %vm777_vm2, %v1578_v53, %v1579_v56  ;;  %v4769_v41 = vld [vmem:[%s5886_s1 + $0x428] sm:$0xff]   ;;  %v4774_v48 = vld [vmem:[%s5886_s1 + $0x4b0] sm:$0xff]  }
  0x6a   : > { %4391 = vmatpush3.bf16.msra.mxu0 %v4717_v6  ;;  %1343 = vmatmul.mubr.bf16.vlgmr.msra.gmra.mrb[8].mxu1 %v1179_v7  ;;  %v1386_v58 = vpack.c.bf16 %v1380_v52, %v1374_v51  ;;  %v1369_v0 = vrot.slane %v3702_v57, 2  ;;  %v3760_v6 = vld [vmem:[%s5014_s26 + $0x30] sm:$0x7]  ;;  %v3762_v7 = vld [vmem:[%s5014_s26 + $0x40] sm:$0xf8]  ;;  %v4770_v43 = vld [vmem:[%s5886_s1 + $0x4a8] sm:$0xff]  }
  0x6b   : > { %4413 = vmatpush3.bf16.msra.mxu1 %v4718_v8  ;;  %4392 = vmatprep.subr.bf16.mxu0 %v4719_v9  ;;  %v1575_v8 = vrot.slane %v3758_v3, 3  ;;  %v1592_v9 = vpack.c.bf16 %v1586_v55, %v1580_v63  ;;  %v4777_v51 = vld [vmem:[%s5886_s1 + $0x438] sm:$0xff]   ;;  %v5499_v53 = vld [vmem:[%s5014_s26 + $0x68] sm:$0xff]  ;;  %v1970_v63 = vrot.slane %v3873_v59, 1  ;;  %v3868_v3 = vld [vmem:[%s5014_s26 + $0x50] sm:$0x1] }
  0x6c   : > { %4414 = vmatprep.subr.bf16.mxu1 %v4720_v10  ;;  %1548 = vmatprep.mubr.bf16.mxu0 %v1386_v58  ;;  %v1371_v10 = vsel %vm570_vm1, %v1369_v0, %v1370_v1  ;;  %v4778_v52 = vld [vmem:[%s5886_s1 + $0x4b8] sm:$0xff]   ;;  %v3867_v56 = vld [vmem:[%s5014_s26 + $0x48] sm:$0xfe]  ;;  %v1771_v57 = vpack.c.bf16 %v5499_v53, %v5261_v44  ;;  %v5508_v0 = vld [vmem:[%s5014_s26 + $0x60] sm:$0xff] }
  0x6d   : > { %1754 = vmatprep.mubr.bf16.mxu1 %v1592_v9  ;;  %v3871_v58 = vld [vmem:[%s5014_s26 + $0x68] sm:$0xfe]  ;;  %v1963_v60 = vrot.slane %v3867_v56, 1  ;;  %v4779_v1 = vld [vmem:[%s5886_s1 + $0x540] sm:$0xff]  }
  0x6e   : > { %4393 = vmatpush3.bf16.msra.mxu0 %v4721_v11  ;;  %v3764_v11 = vld [vmem:[%s5014_s26 + $0x50] sm:$0x7]  ;;  %v1969_v62 = vrot.slane %v3871_v58, 1  ;;  %v3866_v44 = vld [vmem:[%s5014_s26 + $0x40] sm:$0xfe] }
  0x6f   : > { %4415 = vmatpush3.bf16.msra.mxu1 %v4722_v12  ;;  %4394 = vmatprep.subr.bf16.mxu0 %v4723_v13  ;;  %v1576_v12 = vrot.slane %v3760_v6, 3  ;;  %v1581_v13 = vrot.slane %v3762_v7, 3  ;;  %v1965_v55 = vsel %vm228_vm0, %v1963_v60, %v1964_v61  ;;  %v3872_v6 = vld [vmem:[%s5014_s26 + $0x70] sm:$0x1]  ;;  %v1960_v7 = vrot.slane %v3866_v44, 1 }
  0x70   : > { %4416 = vmatprep.subr.bf16.mxu1 %v4724_v14  ;;  %v1377_v14 = vsel %vm570_vm1, %v1375_v2, %v1376_v5  ;;  %v1770_v2 = vpack.c.bf16 %v5508_v0, %v5270_v54  ;;  %v1971_v5 = vsel %vm228_vm0, %v1969_v62, %v1970_v63  ;;  %v4780_v54 = vld [vmem:[%s5886_s1 + $0x5c0] sm:$0xff]   ;;  %v3981_v58 = vld [vmem:[%s5014_s26 + $0x58] sm:$0x7]  ;;  %v3983_v59 = vld [vmem:[%s5014_s26 + $0x68] sm:$0xf8]  ;;  %v2375_v63 = vrot.slane %v3979_v42, 3 }
  0x71   : > { %v1977_v9 = vpack.c.bf16 %v1971_v5, %v1965_v55  ;;  %v3985_v60 = vld [vmem:[%s5014_s26 + $0x78] sm:$0x7]  ;;  %v3924_v44 = vld [vmem:[%s5014_s26 + $0x50] sm:$0x3]  ;;  %v3926_v5 = vld [vmem:[%s5014_s26 + $0x60] sm:$0xfc] }
  0x72   : > { %4395 = vmatpush3.bf16.msra.mxu0 %v4725_v15  ;;  %v1582_v15 = vrot.slane %v3764_v11, 3  ;;  %v1967_v11 = vrot.slane %v3872_v6, 1  ;;  %v2382_v55 = vrot.slane %v3985_v60, 3  ;;  %v3928_v6 = vld [vmem:[%s5014_s26 + $0x70] sm:$0x3] }
  0x73   : > { %4417 = vmatpush3.bf16.msra.mxu1 %v4726_v16  ;;  %4396 = vmatprep.subr.bf16.mxu0 %v4727_v17  ;;  %v4748_v16 = vld [vmem:[%s5886_s1 + $0x4c0] sm:$0xff]   ;;  %v1385_v17 = vpack.c.bf16 %v1377_v14, %v1371_v10 }
  0x74   : > { %4418 = vmatprep.subr.bf16.mxu1 %v4728_v18  ;;  %v1577_v18 = vsel %vm777_vm2, %v1575_v8, %v1576_v12  ;;  %v1961_v8 = vrot.slane %v3868_v3, 1  ;;  %v4781_v14 = vld [vmem:[%s5886_s1 + $0x500] sm:$0xff]  }
  0x76   : > { %4397 = vmatpush3.bf16.msra.mxu0 %v4729_v19  ;;  %v1583_v19 = vsel %vm777_vm2, %v1581_v13, %v1582_v15  ;;  %v1962_v12 = vsel %vm228_vm0, %v1960_v7, %v1961_v8 }
  0x77   : > { %4419 = vmatpush3.bf16.msra.mxu1 %v4730_v20  ;;  %4398 = vmatprep.subr.bf16.mxu0 %v4731_v21  ;;  %v4749_v20 = vld [vmem:[%s5886_s1 + $0x400] sm:$0xff]   ;;  %v1591_v21 = vpack.c.bf16 %v1583_v19, %v1577_v18  ;;  %v4784_v18 = vld [vmem:[%s5886_s1 + $0x5c8] sm:$0xff]  }
  0x78   : > { %4420 = vmatprep.subr.bf16.mxu1 %v4732_v22  ;;  %v4750_v22 = vld [vmem:[%s5886_s1 + $0x480] sm:$0xff]   ;;  %v4785_v19 = vld [vmem:[%s5886_s1 + $0x508] sm:$0xff]  }
  0x7a   : > { %4399 = vmatpush3.bf16.msra.mxu0 %v4733_v23  ;;  %v4751_v23 = vld [vmem:[%s5886_s1 + $0x448] sm:$0xff]  }
  0x7b   : > { %4421 = vmatpush3.bf16.msra.mxu1 %v4734_v24  ;;  %4400 = vmatprep.subr.bf16.mxu0 %v4735_v25  ;;  %v4752_v24 = vld [vmem:[%s5886_s1 + $0x4c8] sm:$0xff]  }
  0x7c   : > { %4422 = vmatprep.subr.bf16.mxu1 %v4736_v26  ;;  %v4753_v25 = vld [vmem:[%s5886_s1 + $0x408] sm:$0xff]  }
  0x7d   : > { %v4754_v26 = vld [vmem:[%s5886_s1 + $0x488] sm:$0xff]  }
  0x7e   : > { %4401 = vmatpush3.bf16.msra.mxu0 %v4737_v27  ;;  %v4755_v27 = vld [vmem:[%s5886_s1 + $0x450] sm:$0xff]  }
  0x7f   : > { %4423 = vmatpush3.bf16.msra.mxu1 %v4738_v28  ;;  %4402 = vmatprep.subr.bf16.mxu0 %v4739_v29  ;;  %v4756_v28 = vld [vmem:[%s5886_s1 + $0x4d0] sm:$0xff]  }
  0x80   : > { %4424 = vmatprep.subr.bf16.mxu1 %v4740_v30  ;;  %v4757_v29 = vld [vmem:[%s5886_s1 + $0x410] sm:$0xff]  }
  0x81   : > { %v4758_v30 = vld [vmem:[%s5886_s1 + $0x490] sm:$0xff]  }
  0x82   : > { %4403 = vmatpush3.bf16.msra.mxu0 %v4741_v31  ;;  %v4759_v31 = vld [vmem:[%s5886_s1 + $0x458] sm:$0xff]  }
  0x83   : > { %4425 = vmatpush3.bf16.msra.mxu1 %v4742_v32  ;;  %4404 = vmatprep.subr.bf16.mxu0 %v4743_v33  ;;  %v4760_v32 = vld [vmem:[%s5886_s1 + $0x4d8] sm:$0xff]  }
  0x84   : > { %4426 = vmatprep.subr.bf16.mxu1 %v4744_v34  ;;  %v4761_v33 = vld [vmem:[%s5886_s1 + $0x418] sm:$0xff]  }
  0x85   : > { %v4762_v34 = vld [vmem:[%s5886_s1 + $0x498] sm:$0xff]  }
  0x86   : > { %4405 = vmatpush3.bf16.msra.mxu0 %v4745_v35  ;;  %v4763_v35 = vld [vmem:[%s5886_s1 + $0x460] sm:$0xff]  }
  0x87   : > { %4427 = vmatpush3.bf16.msra.mxu1 %v4746_v36  ;;  %4434 = vmatprep.subr.bf16.mxu0 %v4747_v4  ;;  %v4764_v36 = vld [vmem:[%s5886_s1 + $0x4e0] sm:$0xff]  }
  0x88   : > { %4456 = vmatprep.subr.bf16.mxu1 %v4748_v16  ;;  %v3870_v4 = vld [vmem:[%s5014_s26 + $0x60] sm:$0xfe] }
  0x89   : > { %1549 = vmatmul.mubr.bf16.vlgmr.msra.gmra.mrb[12].mxu0 %v1385_v17  ;;  %v1966_v10 = vrot.slane %v3870_v4, 1  ;;  %v4782_v16 = vld [vmem:[%s5886_s1 + $0x580] sm:$0xff]   ;;  %v4783_v17 = vld [vmem:[%s5886_s1 + $0x548] sm:$0xff]   ;;  %v2381_v4 = vrot.slane %v3983_v59, 3  ;;  %v4835_v59 = vld [vmem:[%s5886_s1 + $0x670] sm:$0xff]  }
  0x8a   : > { %4435 = vmatpush3.bf16.msra.mxu0 %v4749_v20  ;;  %1755 = vmatmul.mubr.bf16.vlgmr.msra.gmra.mrb[12].mxu1 %v1591_v21  ;;  %v4786_v20 = vld [vmem:[%s5886_s1 + $0x588] sm:$0xff]   ;;  %v4787_v21 = vld [vmem:[%s5886_s1 + $0x550] sm:$0xff]  }
  0x8b   : > { %4457 = vmatpush3.bf16.msra.mxu1 %v4750_v22  ;;  %4436 = vmatprep.subr.bf16.mxu0 %v4751_v23  ;;  %v1968_v13 = vsel %vm228_vm0, %v1966_v10, %v1967_v11  ;;  %v4788_v22 = vld [vmem:[%s5886_s1 + $0x5d0] sm:$0xff]   ;;  %v2172_v10 = vrot.slane %v3926_v5, 2  ;;  %v3978_v11 = vld [vmem:[%s5014_s26 + $0x40] sm:$0xf8] }
  0x8c   : > { %4458 = vmatprep.subr.bf16.mxu1 %v4752_v24  ;;  %1933 = vmatprep.mubr.bf16.mxu0 %v1771_v57  ;;  %v1976_v15 = vpack.c.bf16 %v1968_v13, %v1962_v12  ;;  %v4789_v23 = vld [vmem:[%s5886_s1 + $0x510] sm:$0xff]   ;;  %v4811_v12 = vld [vmem:[%s5886_s1 + $0x640] sm:$0xff]   ;;  %v2173_v13 = vrot.slane %v3928_v6, 2 }
  0x8d   : > { %2139 = vmatprep.mubr.bf16.mxu1 %v1977_v9  ;;  %v4790_v24 = vld [vmem:[%s5886_s1 + $0x590] sm:$0xff]   ;;  %v2167_v9 = vrot.slane %v3924_v44, 2 }
  0x8e   : > { %4437 = vmatpush3.bf16.msra.mxu0 %v4753_v25  ;;  %v4791_v25 = vld [vmem:[%s5886_s1 + $0x558] sm:$0xff]   ;;  %v4838_v44 = vld [vmem:[%s5886_s1 + $0x6b0] sm:$0xff]  }
  0x8f   : > { %4459 = vmatpush3.bf16.msra.mxu1 %v4754_v26  ;;  %4438 = vmatprep.subr.bf16.mxu0 %v4755_v27  ;;  %v4792_v26 = vld [vmem:[%s5886_s1 + $0x5d8] sm:$0xff]  }
  0x90   : > { %4460 = vmatprep.subr.bf16.mxu1 %v4756_v28  ;;  %v4793_v27 = vld [vmem:[%s5886_s1 + $0x518] sm:$0xff]  }
  0x91   : > { %v4794_v28 = vld [vmem:[%s5886_s1 + $0x598] sm:$0xff]  }
  0x92   : > { %4439 = vmatpush3.bf16.msra.mxu0 %v4757_v29  ;;  %v4795_v29 = vld [vmem:[%s5886_s1 + $0x560] sm:$0xff]  }
  0x93   : > { %4461 = vmatpush3.bf16.msra.mxu1 %v4758_v30  ;;  %4440 = vmatprep.subr.bf16.mxu0 %v4759_v31  ;;  %v4796_v30 = vld [vmem:[%s5886_s1 + $0x5e0] sm:$0xff]  }
  0x94   : > { %4462 = vmatprep.subr.bf16.mxu1 %v4760_v32  ;;  %v4797_v31 = vld [vmem:[%s5886_s1 + $0x520] sm:$0xff]  }
  0x95   : > { %v4798_v32 = vld [vmem:[%s5886_s1 + $0x5a0] sm:$0xff]  }
  0x96   : > { %4441 = vmatpush3.bf16.msra.mxu0 %v4761_v33  ;;  %v4799_v33 = vld [vmem:[%s5886_s1 + $0x568] sm:$0xff]  }
  0x97   : > { %4463 = vmatpush3.bf16.msra.mxu1 %v4762_v34  ;;  %4442 = vmatprep.subr.bf16.mxu0 %v4763_v35  ;;  %v4800_v34 = vld [vmem:[%s5886_s1 + $0x5e8] sm:$0xff]  }
  0x98   : > { %4464 = vmatprep.subr.bf16.mxu1 %v4764_v36  ;;  %v4801_v35 = vld [vmem:[%s5886_s1 + $0x528] sm:$0xff]  }
  0x99   : > { %v4802_v36 = vld [vmem:[%s5886_s1 + $0x5a8] sm:$0xff]  }
  0x9a   : > { %4443 = vmatpush3.bf16.msra.mxu0 %v4765_v37  ;;  %v4803_v37 = vld [vmem:[%s5886_s1 + $0x570] sm:$0xff]  }
  0x9b   : > { %4465 = vmatpush3.bf16.msra.mxu1 %v4766_v38  ;;  %4444 = vmatprep.subr.bf16.mxu0 %v4767_v39  ;;  %v4804_v38 = vld [vmem:[%s5886_s1 + $0x5f0] sm:$0xff]  }
  0x9c   : > { %4466 = vmatprep.subr.bf16.mxu1 %v4768_v40  ;;  %v4805_v39 = vld [vmem:[%s5886_s1 + $0x530] sm:$0xff]  }
  0x9d   : > { %v4806_v40 = vld [vmem:[%s5886_s1 + $0x5b0] sm:$0xff]  }
  0x9e   : > { %4445 = vmatpush3.bf16.msra.mxu0 %v4769_v41  ;;  %v4807_v41 = vld [vmem:[%s5886_s1 + $0x578] sm:$0xff]  }
  0x9f   : > { %4467 = vmatpush3.bf16.msra.mxu1 %v4770_v43  ;;  %4446 = vmatprep.subr.bf16.mxu0 %v4771_v45  ;;  %v4808_v43 = vld [vmem:[%s5886_s1 + $0x5f8] sm:$0xff]  }
  0xa0   : > { %4468 = vmatprep.subr.bf16.mxu1 %v4772_v46  ;;  %v4809_v45 = vld [vmem:[%s5886_s1 + $0x538] sm:$0xff]  }
  0xa1   : > { %v4810_v46 = vld [vmem:[%s5886_s1 + $0x5b8] sm:$0xff]  }
  0xa2   : > { %4447 = vmatpush3.bf16.msra.mxu0 %v4773_v47  ;;  %v3923_v47 = vld [vmem:[%s5014_s26 + $0x48] sm:$0xfc] }
  0xa3   : > { %4469 = vmatpush3.bf16.msra.mxu1 %v4774_v48  ;;  %4448 = vmatprep.subr.bf16.mxu0 %v4775_v49  ;;  %v3925_v48 = vld [vmem:[%s5014_s26 + $0x58] sm:$0x3]  ;;  %v3927_v49 = vld [vmem:[%s5014_s26 + $0x68] sm:$0xfc] }
  0xa4   : > { %4470 = vmatprep.subr.bf16.mxu1 %v4776_v50  ;;  %v3929_v50 = vld [vmem:[%s5014_s26 + $0x78] sm:$0x3]  ;;  %v2175_v56 = vrot.slane %v3927_v49, 2  ;;  %v4831_v49 = vld [vmem:[%s5886_s1 + $0x668] sm:$0xff]  }
  0xa5   : > { %v2176_v57 = vrot.slane %v3929_v50, 2  ;;  %v4832_v50 = vld [vmem:[%s5886_s1 + $0x6e8] sm:$0xff]  }
  0xa6   : > { %4449 = vmatpush3.bf16.msra.mxu0 %v4777_v51  ;;  %v2169_v51 = vrot.slane %v3923_v47, 2  ;;  %v4829_v47 = vld [vmem:[%s5886_s1 + $0x620] sm:$0xff]  }
  0xa7   : > { %4471 = vmatpush3.bf16.msra.mxu1 %v4778_v52  ;;  %4478 = vmatprep.subr.bf16.mxu0 %v4779_v1  ;;  %v2170_v52 = vrot.slane %v3925_v48, 2  ;;  %v2177_v62 = vsel %vm570_vm1, %v2175_v56, %v2176_v57  ;;  %v2376_v1 = vrot.slane %v3981_v58, 3  ;;  %v4830_v48 = vld [vmem:[%s5886_s1 + $0x6a0] sm:$0xff]   ;;  %v4834_v57 = vld [vmem:[%s5886_s1 + $0x6a8] sm:$0xff]  }
  0xa8   : > { %4500 = vmatprep.subr.bf16.mxu1 %v4780_v54  ;;  %v2383_v54 = vsel %vm777_vm2, %v2381_v4, %v2382_v55  ;;  %v4839_v55 = vld [vmem:[%s5886_s1 + $0x678] sm:$0xff]  }
  0xa9   : > { %1934 = vmatmul.mubr.bf16.vlgmr.msra.gmra.mrb[16].mxu0 %v1770_v2  ;;  %v2171_v61 = vsel %vm570_vm1, %v2169_v51, %v2170_v52  ;;  %v3922_v2 = vld [vmem:[%s5014_s26 + $0x40] sm:$0xfc]  ;;  %v2377_v7 = vsel %vm777_vm2, %v2375_v63, %v2376_v1  ;;  %v4833_v52 = vld [vmem:[%s5886_s1 + $0x628] sm:$0xff]   ;;  %v4837_v1 = vld [vmem:[%s5886_s1 + $0x630] sm:$0xff]  }
  0xaa   : > { %4479 = vmatpush3.bf16.msra.mxu0 %v4781_v14  ;;  %2140 = vmatmul.mubr.bf16.vlgmr.msra.gmra.mrb[16].mxu1 %v1976_v15  ;;  %v2183_v3 = vpack.c.bf16 %v2177_v62, %v2171_v61  ;;  %v2166_v8 = vrot.slane %v3922_v2, 2  ;;  %v3980_v14 = vld [vmem:[%s5014_s26 + $0x50] sm:$0x7]  ;;  %v3982_v15 = vld [vmem:[%s5014_s26 + $0x60] sm:$0xf8] }
  0xab   : > { %4501 = vmatpush3.bf16.msra.mxu1 %v4782_v16  ;;  %4480 = vmatprep.subr.bf16.mxu0 %v4783_v17  ;;  %v2372_v16 = vrot.slane %v3978_v11, 3  ;;  %v2389_v17 = vpack.c.bf16 %v2383_v54, %v2377_v7  ;;  %v4836_v61 = vld [vmem:[%s5886_s1 + $0x6f0] sm:$0xff]   ;;  %v4840_v7 = vld [vmem:[%s5886_s1 + $0x6f8] sm:$0xff]   ;;  %v4037_v11 = vld [vmem:[%s5014_s26 + $0x88] sm:$0xff] }
  0xac   : > { %4502 = vmatprep.subr.bf16.mxu1 %v4784_v18  ;;  %2345 = vmatprep.mubr.bf16.mxu0 %v2183_v3  ;;  %v2168_v18 = vsel %vm570_vm1, %v2166_v8, %v2167_v9  ;;  %v4841_v9 = vld [vmem:[%s5886_s1 + $0x638] sm:$0xff]  }
  0xad   : > { %2551 = vmatprep.mubr.bf16.mxu1 %v2389_v17 }
  0xae   : > { %4481 = vmatpush3.bf16.msra.mxu0 %v4785_v19  ;;  %v3984_v19 = vld [vmem:[%s5014_s26 + $0x70] sm:$0x7] }
  0xaf   : > { %4503 = vmatpush3.bf16.msra.mxu1 %v4786_v20  ;;  %4482 = vmatprep.subr.bf16.mxu0 %v4787_v21  ;;  %v2373_v20 = vrot.slane %v3980_v14, 3  ;;  %v2378_v21 = vrot.slane %v3982_v15, 3  ;;  %v4089_v14 = vld [vmem:[%s5014_s26 + $0x78] sm:$0x1]  ;;  %v4091_v15 = vld [vmem:[%s5014_s26 + $0x88] sm:$0xfe] }
  0xb0   : > { %4504 = vmatprep.subr.bf16.mxu1 %v4788_v22  ;;  %v2174_v22 = vsel %vm570_vm1, %v2172_v10, %v2173_v13  ;;  %v4842_v10 = vld [vmem:[%s5886_s1 + $0x6b8] sm:$0xff]   ;;  %v2568_v13 = vpack.c.bf16 %v4037_v11, %v5499_v53  ;;  %v4090_v53 = vld [vmem:[%s5014_s26 + $0x80] sm:$0xfe] }
  0xb2   : > { %4483 = vmatpush3.bf16.msra.mxu0 %v4789_v23  ;;  %v2379_v23 = vrot.slane %v3984_v19, 3  ;;  %v2766_v19 = vrot.slane %v4091_v15, 1  ;;  %v4143_v15 = vld [vmem:[%s5014_s26 + $0x68] sm:$0xfc] }
  0xb3   : > { %4505 = vmatpush3.bf16.msra.mxu1 %v4790_v24  ;;  %4484 = vmatprep.subr.bf16.mxu0 %v4791_v25  ;;  %v4812_v24 = vld [vmem:[%s5886_s1 + $0x6c0] sm:$0xff]   ;;  %v2182_v25 = vpack.c.bf16 %v2174_v22, %v2168_v18  ;;  %v2761_v18 = vrot.slane %v4089_v14, 1  ;;  %v4874_v14 = vld [vmem:[%s5886_s1 + $0x7b8] sm:$0xff]  }
  0xb4   : > { %4506 = vmatprep.subr.bf16.mxu1 %v4792_v26  ;;  %v2374_v26 = vsel %vm777_vm2, %v2372_v16, %v2373_v20  ;;  %v4093_v16 = vld [vmem:[%s5014_s26 + $0x98] sm:$0x1]  ;;  %v4843_v22 = vld [vmem:[%s5886_s1 + $0x740] sm:$0xff]  }
  0xb5   : > { %v2767_v20 = vrot.slane %v4093_v16, 1 }
  0xb6   : > { %4485 = vmatpush3.bf16.msra.mxu0 %v4793_v27  ;;  %v2380_v27 = vsel %vm777_vm2, %v2378_v21, %v2379_v23  ;;  %v4036_v21 = vld [vmem:[%s5014_s26 + $0x80] sm:$0xff] }
  0xb7   : > { %4507 = vmatpush3.bf16.msra.mxu1 %v4794_v28  ;;  %4486 = vmatprep.subr.bf16.mxu0 %v4795_v29  ;;  %v4813_v28 = vld [vmem:[%s5886_s1 + $0x600] sm:$0xff]   ;;  %v2388_v29 = vpack.c.bf16 %v2380_v27, %v2374_v26  ;;  %v2567_v23 = vpack.c.bf16 %v4036_v21, %v5508_v0  ;;  %v2768_v27 = vsel %vm228_vm0, %v2766_v19, %v2767_v20  ;;  %v4149_v19 = vld [vmem:[%s5014_s26 + $0x98] sm:$0x3]  ;;  %v2966_v20 = vrot.slane %v4143_v15, 2 }
  0xb8   : > { %4508 = vmatprep.subr.bf16.mxu1 %v4796_v30  ;;  %v4814_v30 = vld [vmem:[%s5886_s1 + $0x680] sm:$0xff]  }
  0xb9   : > { %v4844_v0 = vld [vmem:[%s5886_s1 + $0x7c0] sm:$0xff]  }
  0xba   : > { %4487 = vmatpush3.bf16.msra.mxu0 %v4797_v31  ;;  %v4815_v31 = vld [vmem:[%s5886_s1 + $0x648] sm:$0xff]  }
  0xbb   : > { %4509 = vmatpush3.bf16.msra.mxu1 %v4798_v32  ;;  %4488 = vmatprep.subr.bf16.mxu0 %v4799_v33  ;;  %v4816_v32 = vld [vmem:[%s5886_s1 + $0x6c8] sm:$0xff]  }
  0xbc   : > { %4510 = vmatprep.subr.bf16.mxu1 %v4800_v34  ;;  %v4817_v33 = vld [vmem:[%s5886_s1 + $0x608] sm:$0xff]  }
  0xbd   : > { %v4818_v34 = vld [vmem:[%s5886_s1 + $0x688] sm:$0xff]  }
  0xbe   : > { %4489 = vmatpush3.bf16.msra.mxu0 %v4801_v35  ;;  %v4819_v35 = vld [vmem:[%s5886_s1 + $0x650] sm:$0xff]  }
  0xbf   : > { %4511 = vmatpush3.bf16.msra.mxu1 %v4802_v36  ;;  %4490 = vmatprep.subr.bf16.mxu0 %v4803_v37  ;;  %v4820_v36 = vld [vmem:[%s5886_s1 + $0x6d0] sm:$0xff]  }
  0xc0   : > { %4512 = vmatprep.subr.bf16.mxu1 %v4804_v38  ;;  %v4821_v37 = vld [vmem:[%s5886_s1 + $0x610] sm:$0xff]  }
  0xc1   : > { %v4822_v38 = vld [vmem:[%s5886_s1 + $0x690] sm:$0xff]  }
  0xc2   : > { %4491 = vmatpush3.bf16.msra.mxu0 %v4805_v39  ;;  %v4823_v39 = vld [vmem:[%s5886_s1 + $0x658] sm:$0xff]  }
  0xc3   : > { %4513 = vmatpush3.bf16.msra.mxu1 %v4806_v40  ;;  %4492 = vmatprep.subr.bf16.mxu0 %v4807_v41  ;;  %v4824_v40 = vld [vmem:[%s5886_s1 + $0x6d8] sm:$0xff]  }
  0xc4   : > { %4514 = vmatprep.subr.bf16.mxu1 %v4808_v43  ;;  %v4825_v41 = vld [vmem:[%s5886_s1 + $0x618] sm:$0xff]  }
  0xc5   : > { %v4826_v43 = vld [vmem:[%s5886_s1 + $0x698] sm:$0xff]  }
  0xc6   : > { %4493 = vmatpush3.bf16.msra.mxu0 %v4809_v45  ;;  %v4827_v45 = vld [vmem:[%s5886_s1 + $0x660] sm:$0xff]  }
  0xc7   : > { %4515 = vmatpush3.bf16.msra.mxu1 %v4810_v46  ;;  %4522 = vmatprep.subr.bf16.mxu0 %v4811_v12  ;;  %v4828_v46 = vld [vmem:[%s5886_s1 + $0x6e0] sm:$0xff]   ;;  %v4087_v12 = vld [vmem:[%s5014_s26 + $0x68] sm:$0xfe] }
  0xc8   : > { %4544 = vmatprep.subr.bf16.mxu1 %v4812_v24  ;;  %v2760_v17 = vrot.slane %v4087_v12, 1  ;;  %v4086_v24 = vld [vmem:[%s5014_s26 + $0x60] sm:$0xfe] }
  0xc9   : > { %2346 = vmatmul.mubr.bf16.vlgmr.msra.gmra.mrb[20].mxu0 %v2182_v25  ;;  %v4088_v25 = vld [vmem:[%s5014_s26 + $0x70] sm:$0x1] }
  0xca   : > { %4523 = vmatpush3.bf16.msra.mxu0 %v4813_v28  ;;  %2552 = vmatmul.mubr.bf16.vlgmr.msra.gmra.mrb[20].mxu1 %v2388_v29  ;;  %v2762_v26 = vsel %vm228_vm0, %v2760_v17, %v2761_v18  ;;  %v4092_v28 = vld [vmem:[%s5014_s26 + $0x90] sm:$0x1]  ;;  %v2757_v29 = vrot.slane %v4086_v24, 1  ;;  %v4145_v17 = vld [vmem:[%s5014_s26 + $0x78] sm:$0x3] }
  0xcb   : > { %4545 = vmatpush3.bf16.msra.mxu1 %v4814_v30  ;;  %4524 = vmatprep.subr.bf16.mxu0 %v4815_v31  ;;  %v2758_v30 = vrot.slane %v4088_v25, 1  ;;  %v2774_v31 = vpack.c.bf16 %v2768_v27, %v2762_v26  ;;  %v4147_v18 = vld [vmem:[%s5014_s26 + $0x88] sm:$0xfc]  ;;  %v2967_v21 = vrot.slane %v4145_v17, 2  ;;  %v4201_v25 = vld [vmem:[%s5014_s26 + $0x78] sm:$0x7] }
  0xcc   : > { %4546 = vmatprep.subr.bf16.mxu1 %v4816_v32  ;;  %2730 = vmatprep.mubr.bf16.mxu0 %v2568_v13  ;;  %v2763_v32 = vrot.slane %v4090_v53, 1  ;;  %v4199_v24 = vld [vmem:[%s5014_s26 + $0x68] sm:$0xf8]  ;;  %v4205_v26 = vld [vmem:[%s5014_s26 + $0x98] sm:$0x7] }
  0xcd   : > { %2936 = vmatprep.mubr.bf16.mxu1 %v2774_v31  ;;  %v4203_v53 = vld [vmem:[%s5014_s26 + $0x88] sm:$0xf8]  ;;  %v2968_v27 = vsel %vm570_vm1, %v2966_v20, %v2967_v21  ;;  %v4142_v31 = vld [vmem:[%s5014_s26 + $0x60] sm:$0xfc] }
  0xce   : > { %4525 = vmatpush3.bf16.msra.mxu0 %v4817_v33  ;;  %v2764_v33 = vrot.slane %v4092_v28, 1 }
  0xcf   : > { %4547 = vmatpush3.bf16.msra.mxu1 %v4818_v34  ;;  %4526 = vmatprep.subr.bf16.mxu0 %v4819_v35  ;;  %v2759_v34 = vsel %vm228_vm0, %v2757_v29, %v2758_v30  ;;  %v3172_v29 = vrot.slane %v4199_v24, 3  ;;  %v3173_v30 = vrot.slane %v4201_v25, 3 }
  0xd0   : > { %4548 = vmatprep.subr.bf16.mxu1 %v4820_v36  ;;  %v2765_v35 = vsel %vm228_vm0, %v2763_v32, %v2764_v33  ;;  %v4845_v36 = vld [vmem:[%s5886_s1 + $0x700] sm:$0xff]   ;;  %v4144_v32 = vld [vmem:[%s5014_s26 + $0x70] sm:$0x3] }
  0xd2   : > { %4527 = vmatpush3.bf16.msra.mxu0 %v4821_v37  ;;  %v2773_v37 = vpack.c.bf16 %v2765_v35, %v2759_v34  ;;  %v3178_v34 = vrot.slane %v4203_v53, 3  ;;  %v4146_v35 = vld [vmem:[%s5014_s26 + $0x80] sm:$0xfc] }
  0xd3   : > { %4549 = vmatpush3.bf16.msra.mxu1 %v4822_v38  ;;  %4528 = vmatprep.subr.bf16.mxu0 %v4823_v39  ;;  %v4846_v38 = vld [vmem:[%s5886_s1 + $0x780] sm:$0xff]   ;;  %v4847_v39 = vld [vmem:[%s5886_s1 + $0x748] sm:$0xff]  }
  0xd4   : > { %4550 = vmatprep.subr.bf16.mxu1 %v4824_v40  ;;  %v4848_v40 = vld [vmem:[%s5886_s1 + $0x7c8] sm:$0xff]  }
  0xd6   : > { %4529 = vmatpush3.bf16.msra.mxu0 %v4825_v41  ;;  %v4849_v41 = vld [vmem:[%s5886_s1 + $0x708] sm:$0xff]  }
  0xd7   : > { %4551 = vmatpush3.bf16.msra.mxu1 %v4826_v43  ;;  %4530 = vmatprep.subr.bf16.mxu0 %v4827_v45  ;;  %v4850_v43 = vld [vmem:[%s5886_s1 + $0x788] sm:$0xff]   ;;  %v4851_v45 = vld [vmem:[%s5886_s1 + $0x750] sm:$0xff]  }
  0xd8   : > { %4552 = vmatprep.subr.bf16.mxu1 %v4828_v46  ;;  %v4852_v46 = vld [vmem:[%s5886_s1 + $0x7d0] sm:$0xff]  }
  0xda   : > { %4531 = vmatpush3.bf16.msra.mxu0 %v4829_v47  ;;  %v4853_v47 = vld [vmem:[%s5886_s1 + $0x710] sm:$0xff]  }
  0xdb   : > { %4553 = vmatpush3.bf16.msra.mxu1 %v4830_v48  ;;  %4532 = vmatprep.subr.bf16.mxu0 %v4831_v49  ;;  %v4854_v48 = vld [vmem:[%s5886_s1 + $0x790] sm:$0xff]   ;;  %v4855_v49 = vld [vmem:[%s5886_s1 + $0x758] sm:$0xff]  }
  0xdc   : > { %4554 = vmatprep.subr.bf16.mxu1 %v4832_v50  ;;  %v4856_v50 = vld [vmem:[%s5886_s1 + $0x7d8] sm:$0xff]  }
  0xde   : > { %4533 = vmatpush3.bf16.msra.mxu0 %v4833_v52  ;;  %v4858_v52 = vld [vmem:[%s5886_s1 + $0x798] sm:$0xff]  }
  0xdf   : > { %4555 = vmatpush3.bf16.msra.mxu1 %v4834_v57  ;;  %4534 = vmatprep.subr.bf16.mxu0 %v4835_v59  ;;  %v4860_v57 = vld [vmem:[%s5886_s1 + $0x7e0] sm:$0xff]   ;;  %v4863_v59 = vld [vmem:[%s5886_s1 + $0x768] sm:$0xff]  }
  0xe0   : > { %4556 = vmatprep.subr.bf16.mxu1 %v4836_v61  ;;  %v4865_v61 = vld [vmem:[%s5886_s1 + $0x728] sm:$0xff]  }
  0xe2   : > { %4535 = vmatpush3.bf16.msra.mxu0 %v4837_v1  ;;  %v4868_v1 = vld [vmem:[%s5886_s1 + $0x7f0] sm:$0xff]  }
  0xe3   : > { %4557 = vmatpush3.bf16.msra.mxu1 %v4838_v44  ;;  %4536 = vmatprep.subr.bf16.mxu0 %v4839_v55 }
  0xe4   : > { %4558 = vmatprep.subr.bf16.mxu1 %v4840_v7 }
  0xe6   : > { %4537 = vmatpush3.bf16.msra.mxu0 %v4841_v9 }
  0xe7   : > { %4559 = vmatpush3.bf16.msra.mxu1 %v4842_v10  ;;  %4566 = vmatprep.subr.bf16.mxu0 %v4843_v22  ;;  %v4873_v10 = vld [vmem:[%s5886_s1 + $0x738] sm:$0xff]   ;;  %v2972_v22 = vrot.slane %v4147_v18, 2 }
  0xe8   : > { %4588 = vmatprep.subr.bf16.mxu1 %v4844_v0  ;;  %v3179_v0 = vrot.slane %v4205_v26, 3 }
  0xe9   : > { %2731 = vmatmul.mubr.bf16.vlgmr.msra.gmra.mrb[24].mxu0 %v2567_v23  ;;  %v2973_v23 = vrot.slane %v4149_v19, 2 }
  0xea   : > { %4567 = vmatpush3.bf16.msra.mxu0 %v4845_v36  ;;  %2937 = vmatmul.mubr.bf16.vlgmr.msra.gmra.mrb[24].mxu1 %v2773_v37  ;;  %v4148_v36 = vld [vmem:[%s5014_s26 + $0x90] sm:$0x3]  ;;  %v3174_v37 = vsel %vm777_vm2, %v3172_v29, %v3173_v30 }
  0xeb   : > { %4589 = vmatpush3.bf16.msra.mxu1 %v4846_v38  ;;  %4568 = vmatprep.subr.bf16.mxu0 %v4847_v39  ;;  %v2974_v28 = vsel %vm570_vm1, %v2972_v22, %v2973_v23  ;;  %v2963_v38 = vrot.slane %v4142_v31, 2  ;;  %v2964_v39 = vrot.slane %v4144_v32, 2 }
  0xec   : > { %4590 = vmatprep.subr.bf16.mxu1 %v4848_v40  ;;  %v2980_v33 = vpack.c.bf16 %v2974_v28, %v2968_v27  ;;  %v2969_v40 = vrot.slane %v4146_v35, 2 }
  0xee   : > { %4569 = vmatpush3.bf16.msra.mxu0 %v4849_v41  ;;  %v4198_v41 = vld [vmem:[%s5014_s26 + $0x60] sm:$0xf8]  ;;  %3142 = vmatprep.mubr.bf16.mxu0 %v2980_v33 }
  0xef   : > { %4591 = vmatpush3.bf16.msra.mxu1 %v4850_v43  ;;  %4570 = vmatprep.subr.bf16.mxu0 %v4851_v45  ;;  %v3180_v45 = vsel %vm777_vm2, %v3178_v34, %v3179_v0 }
  0xf0   : > { %4592 = vmatprep.subr.bf16.mxu1 %v4852_v46  ;;  %v2970_v46 = vrot.slane %v4148_v36, 2 }
  0xf2   : > { %4571 = vmatpush3.bf16.msra.mxu0 %v4853_v47  ;;  %v4200_v47 = vld [vmem:[%s5014_s26 + $0x70] sm:$0x7] }
  0xf3   : > { %4593 = vmatpush3.bf16.msra.mxu1 %v4854_v48  ;;  %4572 = vmatprep.subr.bf16.mxu0 %v4855_v49  ;;  %v4202_v48 = vld [vmem:[%s5014_s26 + $0x80] sm:$0xf8]  ;;  %v3169_v49 = vrot.slane %v4198_v41, 3 }
  0xf4   : > { %4594 = vmatprep.subr.bf16.mxu1 %v4856_v50 }
  0xf7   : > { %4595 = vmatpush3.bf16.msra.mxu1 %v4858_v52  ;;  %v2965_v52 = vsel %vm570_vm1, %v2963_v38, %v2964_v39 }
  0xf8   : > { %4596 = vmatprep.subr.bf16.mxu1 %v4860_v57  ;;  %v3170_v57 = vrot.slane %v4200_v47, 3 }
  0xfc   : > { %v4274_v42 = vpop.f32.mrb[0].mxu0 }
  0xfd   : > { %v4296_v51 = vpop.f32.mrb[0].mxu1  ;;  %v4275_v60 = vpop.f32.mrb[1].mxu0 }
  0xfe   : > { %v4297_v56 = vpop.f32.mrb[1].mxu1  ;;  %v4276_v62 = vadd.f32 %v4275_v60, %v4274_v42  ;;  %v4277_v63 = vpop.f32.mrb[2].mxu0  ;;  %v4861_v42 = vld [vmem:[%s5886_s1 + $0x720] sm:$0xff]   ;;  %v4864_v60 = vld [vmem:[%s5886_s1 + $0x7e8] sm:$0xff]  }
  0xff   : > { %v4298_v58 = vadd.f32 %v4297_v56, %v4296_v51  ;;  %v4299_v2 = vpop.f32.mrb[2].mxu1  ;;  %v4278_v4 = vpop.f32.mrb[3].mxu0  ;;  %v4857_v51 = vld [vmem:[%s5886_s1 + $0x718] sm:$0xff]   ;;  %v4859_v56 = vld [vmem:[%s5886_s1 + $0x760] sm:$0xff]  }
 0x100   : > { %v4279_v5 = vadd.f32 %v4278_v4, %v4277_v63  ;;  %v4300_v6 = vpop.f32.mrb[3].mxu1  ;;  %4573 = vmatpush3.bf16.msra.mxu0 %v4857_v51  ;;  %v4867_v63 = vld [vmem:[%s5886_s1 + $0x770] sm:$0xff]   ;;  %v3186_v51 = vpack.c.bf16 %v3180_v45, %v3174_v37 }
 0x101   : > { %v5724_v3 = vadd.f32 %v4298_v58, %v4276_v62  ;;  %v4301_v8 = vadd.f32 %v4300_v6, %v4299_v2  ;;  %4574 = vmatprep.subr.bf16.mxu0 %v4859_v56  ;;  %v4862_v58 = vld [vmem:[%s5886_s1 + $0x7a0] sm:$0xff]   ;;  %v4866_v62 = vld [vmem:[%s5886_s1 + $0x7a8] sm:$0xff]   ;;  %v4869_v2 = vld [vmem:[%s5886_s1 + $0x730] sm:$0xff]  }
 0x102   : > { %4597 = vmatpush3.bf16.msra.mxu1 %v4862_v58  ;;  %v4870_v4 = vld [vmem:[%s5886_s1 + $0x7b0] sm:$0xff]   ;;  %3348 = vmatprep.mubr.bf16.mxu1 %v3186_v51 }
 0x103   : > { %v5740_v54 = vadd.f32 %v4301_v8, %v4279_v5  ;;  %4598 = vmatprep.subr.bf16.mxu1 %v4864_v60  ;;  %v4871_v5 = vld [vmem:[%s5886_s1 + $0x778] sm:$0xff]   ;;  %v4204_v56 = vld [vmem:[%s5014_s26 + $0x90] sm:$0x7]  ;;  %s4257_s26 = sshll.u32 %s5890_s15, 2 }
 0x104   : > { %4575 = vmatpush3.bf16.msra.mxu0 %v4861_v42  ;;  %v4872_v8 = vld [vmem:[%s5886_s1 + $0x7f8] sm:$0xff]   ;;  %v3175_v42 = vrot.slane %v4202_v48, 3  ;;  %v3176_v60 = vrot.slane %v4204_v56, 3  ;;  %s172_s4 = scalar_lea.vmem %s5888_s3, %s4257_s26 }
 0x105   : > { %4576 = vmatprep.subr.bf16.mxu0 %v4863_v59  ;;  %v2971_v59 = vsel %vm570_vm1, %v2969_v40, %v2970_v46 }
 0x106   : > { %4599 = vmatpush3.bf16.msra.mxu1 %v4866_v62 }
 0x107   : > { %4600 = vmatprep.subr.bf16.mxu1 %v4868_v1  ;;  %v3171_v1 = vsel %vm777_vm2, %v3169_v49, %v3170_v57 }
 0x108   : > { %4577 = vmatpush3.bf16.msra.mxu0 %v4865_v61 }
 0x109   : > { %4578 = vmatprep.subr.bf16.mxu0 %v4867_v63  ;;  %v2979_v63 = vpack.c.bf16 %v2971_v59, %v2965_v52 }
 0x10a   : > { %4601 = vmatpush3.bf16.msra.mxu1 %v4870_v4 }
 0x10b   : > { %4602 = vmatprep.subr.bf16.mxu1 %v4872_v8 }
 0x10c   : > { %4579 = vmatpush3.bf16.msra.mxu0 %v4869_v2  ;;  %v3177_v2 = vsel %vm777_vm2, %v3175_v42, %v3176_v60 }
 0x10d   : > { %4580 = vmatprep.subr.bf16.mxu0 %v4871_v5  ;;  %v3185_v4 = vpack.c.bf16 %v3177_v2, %v3171_v1 }
 0x10e   : > { %4603 = vmatpush3.bf16.msra.mxu1 %v4874_v14 }
 0x110   : > { %4581 = vmatpush3.bf16.msra.mxu0 %v4873_v10 }
 0x111   : > { %3349 = vmatmul.mubr.bf16.vlgmr.msra.gmra.mrb[28].mxu1 %v3185_v4 }
 0x113   : > { %3143 = vmatmul.mubr.bf16.vlgmr.msra.gmra.mrb[28].mxu0 %v2979_v63 }
 0x11c   : > { %v4318_v44 = vpop.f32.mrb[4].mxu0 }
 0x11d   : > { %v4319_v55 = vpop.f32.mrb[5].mxu0  ;;  %v4340_v6 = vpop.f32.mrb[4].mxu1 }
 0x11e   : > { %v4320_v7 = vadd.f32 %v4319_v55, %v4318_v44  ;;  %v4341_v9 = vpop.f32.mrb[5].mxu1  ;;  %v4321_v13 = vpop.f32.mrb[6].mxu0 }
 0x11f   : > { %v4342_v12 = vadd.f32 %v4341_v9, %v4340_v6  ;;  %v4343_v16 = vpop.f32.mrb[6].mxu1  ;;  %v4322_v43 = vpop.f32.mrb[7].mxu0 }
 0x120   : > { %v759_v11 = vadd.f32 %v4320_v7, %v5724_v3  ;;  %v4323_v50 = vadd.f32 %v4322_v43, %v4321_v13  ;;  %v4344_v58 = vpop.f32.mrb[7].mxu1 }
 0x121   : > { %v4345_v62 = vadd.f32 %v4344_v58, %v4343_v16 }
 0x122   : > { %v966_v3 = vadd.f32 %v4342_v12, %v759_v11  ;;  %v760_v61 = vadd.f32 %v4323_v50, %v5740_v54 }
 0x124   : > { %v967_v44 = vadd.f32 %v4345_v62, %v760_v61 }
 0x13c   : > { %v4362_v55 = vpop.f32.mrb[8].mxu0 }
 0x13d   : > { %v4363_v5 = vpop.f32.mrb[9].mxu0  ;;  %v4384_v11 = vpop.f32.mrb[8].mxu1 }
 0x13e   : > { %v4364_v6 = vadd.f32 %v4363_v5, %v4362_v55  ;;  %v4365_v7 = vpop.f32.mrb[10].mxu0  ;;  %v4385_v54 = vpop.f32.mrb[9].mxu1 }
 0x13f   : > { %v4366_v8 = vpop.f32.mrb[11].mxu0  ;;  %v4386_v13 = vadd.f32 %v4385_v54, %v4384_v11  ;;  %v4387_v14 = vpop.f32.mrb[10].mxu1 }
 0x140   : > { %v1145_v9 = vadd.f32 %v4364_v6, %v966_v3  ;;  %v4367_v10 = vadd.f32 %v4366_v8, %v4365_v7  ;;  %v4388_v15 = vpop.f32.mrb[11].mxu1 }
 0x141   : > { %v4389_v17 = vadd.f32 %v4388_v15, %v4387_v14 }
 0x142   : > { %v1146_v12 = vadd.f32 %v4367_v10, %v967_v44  ;;  %v1351_v16 = vadd.f32 %v4386_v13, %v1145_v9 }
 0x144   : > { %v1352_v18 = vadd.f32 %v4389_v17, %v1146_v12 }
 0x15c   : > { %v4406_v19 = vpop.f32.mrb[12].mxu0 }
 0x15d   : > { %v4407_v20 = vpop.f32.mrb[13].mxu0  ;;  %v4428_v21 = vpop.f32.mrb[12].mxu1 }
 0x15e   : > { %v4408_v22 = vadd.f32 %v4407_v20, %v4406_v19  ;;  %v4409_v23 = vpop.f32.mrb[14].mxu0  ;;  %v4429_v24 = vpop.f32.mrb[13].mxu1 }
 0x15f   : > { %v4410_v25 = vpop.f32.mrb[15].mxu0  ;;  %v4430_v26 = vadd.f32 %v4429_v24, %v4428_v21  ;;  %v4431_v3 = vpop.f32.mrb[14].mxu1 }
 0x160   : > { %v1557_v53 = vadd.f32 %v4408_v22, %v1351_v16  ;;  %v4411_v27 = vadd.f32 %v4410_v25, %v4409_v23  ;;  %v4432_v28 = vpop.f32.mrb[15].mxu1 }
 0x161   : > { %v4433_v31 = vadd.f32 %v4432_v28, %v4431_v3  ;;  %v4254_v28 = vld [vmem:[#allocation2] ss:$0 sm:$0xff] }
 0x162   : > { %v1763_v29 = vadd.f32 %v4430_v26, %v1557_v53  ;;  %v1558_v30 = vadd.f32 %v4411_v27, %v1352_v18 }
 0x164   : > { %v1764_v32 = vadd.f32 %v4433_v31, %v1558_v30 }
 0x17c   : > { %v4450_v33 = vpop.f32.mrb[16].mxu0 }
 0x17d   : > { %v4451_v34 = vpop.f32.mrb[17].mxu0  ;;  %v4472_v39 = vpop.f32.mrb[16].mxu1 }
 0x17e   : > { %v4452_v0 = vadd.f32 %v4451_v34, %v4450_v33  ;;  %v4453_v35 = vpop.f32.mrb[18].mxu0  ;;  %v4473_v40 = vpop.f32.mrb[17].mxu1 }
 0x17f   : > { %v4454_v36 = vpop.f32.mrb[19].mxu0  ;;  %v4474_v43 = vadd.f32 %v4473_v40, %v4472_v39  ;;  %v4475_v45 = vpop.f32.mrb[18].mxu1 }
 0x180   : > { %v1942_v37 = vadd.f32 %v4452_v0, %v1763_v29  ;;  %v4455_v38 = vadd.f32 %v4454_v36, %v4453_v35  ;;  %v4476_v46 = vpop.f32.mrb[19].mxu1 }
 0x181   : > { %v4477_v48 = vadd.f32 %v4476_v46, %v4475_v45 }
 0x182   : > { %v1943_v41 = vadd.f32 %v4455_v38, %v1764_v32  ;;  %v2148_v47 = vadd.f32 %v4474_v43, %v1942_v37 }
 0x184   : > { %v2149_v49 = vadd.f32 %v4477_v48, %v1943_v41 }
 0x19c   : > { %v4494_v50 = vpop.f32.mrb[20].mxu0 }
 0x19d   : > { %v4495_v51 = vpop.f32.mrb[21].mxu0  ;;  %v4516_v52 = vpop.f32.mrb[20].mxu1 }
 0x19e   : > { %v4496_v56 = vadd.f32 %v4495_v51, %v4494_v50  ;;  %v4497_v57 = vpop.f32.mrb[22].mxu0  ;;  %v4517_v42 = vpop.f32.mrb[21].mxu1 }
 0x19f   : > { %v4498_v58 = vpop.f32.mrb[23].mxu0  ;;  %v4518_v60 = vadd.f32 %v4517_v42, %v4516_v52  ;;  %v4519_v61 = vpop.f32.mrb[22].mxu1 }
 0x1a0   : > { %v2354_v59 = vadd.f32 %v4496_v56, %v2148_v47  ;;  %v4499_v62 = vadd.f32 %v4498_v58, %v4497_v57  ;;  %v4520_v63 = vpop.f32.mrb[23].mxu1 }
 0x1a1   : > { %v4521_v44 = vadd.f32 %v4520_v63, %v4519_v61 }
 0x1a2   : > { %v2560_v1 = vadd.f32 %v4518_v60, %v2354_v59  ;;  %v2355_v2 = vadd.f32 %v4499_v62, %v2149_v49 }
 0x1a4   : > { %v2561_v4 = vadd.f32 %v4521_v44, %v2355_v2 }
 0x1bc   : > { %v4538_v55 = vpop.f32.mrb[24].mxu0 }
 0x1bd   : > { %v4539_v5 = vpop.f32.mrb[25].mxu0  ;;  %v4560_v11 = vpop.f32.mrb[24].mxu1 }
 0x1be   : > { %v4540_v6 = vadd.f32 %v4539_v5, %v4538_v55  ;;  %v4541_v7 = vpop.f32.mrb[26].mxu0  ;;  %v4561_v54 = vpop.f32.mrb[25].mxu1 }
 0x1bf   : > { %v4542_v8 = vpop.f32.mrb[27].mxu0  ;;  %v4562_v13 = vadd.f32 %v4561_v54, %v4560_v11  ;;  %v4563_v14 = vpop.f32.mrb[26].mxu1 }
 0x1c0   : > { %v2739_v9 = vadd.f32 %v4540_v6, %v2560_v1  ;;  %v4543_v10 = vadd.f32 %v4542_v8, %v4541_v7  ;;  %v4564_v15 = vpop.f32.mrb[27].mxu1 }
 0x1c1   : > { %v4565_v17 = vadd.f32 %v4564_v15, %v4563_v14 }
 0x1c2   : > { %v2740_v12 = vadd.f32 %v4543_v10, %v2561_v4  ;;  %v2945_v16 = vadd.f32 %v4562_v13, %v2739_v9 }
 0x1c4   : > { %v2946_v18 = vadd.f32 %v4565_v17, %v2740_v12 }
 0x1e4   : > { %v4604_v21 = vpop.f32.mrb[28].mxu1 }
 0x1e5   : > { %v4605_v24 = vpop.f32.mrb[29].mxu1 }
 0x1e6   : > { %v4582_v19 = vpop.f32.mrb[28].mxu0  ;;  %v4606_v26 = vadd.f32 %v4605_v24, %v4604_v21  ;;  %v4607_v3 = vpop.f32.mrb[30].mxu1 }
 0x1e7   : > { %v4583_v20 = vpop.f32.mrb[29].mxu0  ;;  %v4608_v29 = vpop.f32.mrb[31].mxu1 }
 0x1e8   : > { %v4584_v22 = vadd.f32 %v4583_v20, %v4582_v19  ;;  %v4585_v23 = vpop.f32.mrb[30].mxu0  ;;  %v4609_v32 = vadd.f32 %v4608_v29, %v4607_v3 }
 0x1e9   : > { %v4586_v25 = vpop.f32.mrb[31].mxu0 }
 0x1ea   : > { %v3151_v53 = vadd.f32 %v4584_v22, %v2945_v16  ;;  %v4587_v27 = vadd.f32 %v4586_v25, %v4585_v23 }
 0x1ec   : > { %v3357_v30 = vadd.f32 %v4606_v26, %v3151_v53  ;;  %v3152_v31 = vadd.f32 %v4587_v27, %v2946_v18 }
 0x1ee   : > { %v3366_v33 = vadd.f32 %v4254_v28, %v3357_v30  ;;  %v3358_v34 = vadd.f32 %v4609_v32, %v3152_v31 }
 0x1f0   : > { %3369 = vst.msk [vmem:[%s172_s4] sm:$0x3] %vm3368_vm3, %v3366_v33  ;;  %v3367_v0 = vadd.f32 %v4254_v28, %v3358_v34 }
 0x1f2   : > { %3370 = vst.msk [vmem:[%s172_s4 + $0x2] sm:$0x3] %vm3368_vm3, %v3367_v0 }
 0x1f3 PF: > { %s15_s14 = sadd.s32 1, %s4881_s14  }
 0x1f4   : > { %p12_p4 = scmp.ge.s32.totalorder %s15_s14, 4  }
 0x1f6   :  { %14 = sbr.rel (!%p12_p4) target bundleno = 3 (0x3), region = 80 }

</bundles_post_ra>
